<compile_context>
chip_gen: v6e
topology: v6e:2x2x1
jax: 0.10.0
libtpu: 0.0.40
codegen_flags: <defaults>
</compile_context>

<pallas_src>
import functools

import jax
import jax.numpy as jnp
from jax.experimental import pallas as pl
from jax.experimental.pallas import tpu as pltpu

BN_EPS = 1e-5


def _fused_decoder_kernel(has_skip, *refs):
    """Fused: upsample(x) ++ skip -> conv1+BN+ReLU -> conv2+BN+ReLU.

    refs (has_skip=True):
      x_ref     (1, h, w, Cx)      low-res input tile (f32)
      skip_ref  (1, H, W, Cs)      skip tile (f32), H=2h, W=2w
      w1_ref    (9*(Cx+Cs), Cout)  conv1 weights, im2col layout (bf16)
      w2_ref    (9*Cout, Cout)     conv2 weights, im2col layout (bf16)
      s1,b1,s2,b2  (1, Cout)       folded BN scale/bias (f32)
      o_ref     (1, H*W, Cout)     output tile (f32)
      scratches: x_pad (H+2,W+2,Cx), skip_pad (H+2,W+2,Cs),
                 mid_pad (H+2,W+2,Cout), slab1 (H*W,9*Cin1), slab2 (H*W,9*Cout)
    """
    if has_skip:
        (x_ref, skip_ref, w1_ref, w2_ref, s1_ref, b1_ref, s2_ref, b2_ref,
         o_ref, x_pad, skip_pad, mid_pad, slab1, slab2) = refs
    else:
        (x_ref, w1_ref, w2_ref, s1_ref, b1_ref, s2_ref, b2_ref,
         o_ref, x_pad, mid_pad, slab1, slab2) = refs
        skip_ref = None
        skip_pad = None

    Hp2, Wp2, Cx = x_pad.shape
    H, W = Hp2 - 2, Wp2 - 2
    w = W // 2
    Cout = o_ref.shape[-1]
    Cs = skip_pad.shape[-1] if has_skip else 0
    Cin1 = Cx + Cs

    # ---- fused 2x nearest-neighbour upsample of x into a zero-padded scratch ----
    x_pad[...] = jnp.zeros(x_pad.shape, x_pad.dtype)
    xl = x_ref[0]                                               # (h, w, Cx)
    # double the rows: (h, w, Cx) -> (h, 2, w, Cx) -> (H, w, Cx)
    # (concat on a non-minor dim + leading-dim-only merge reshape: layout-safe)
    x2r = jnp.concatenate([xl[:, None], xl[:, None]], axis=1).reshape(H, w, Cx)
    # double the columns with paired static-slice stores into the padded scratch.
    # TODO(synk): for large W replace the per-column loop with a vectorized
    # sublane interleave / strided store.
    for j in range(w):
        col = x2r[:, j:j + 1, :]                                # (H, 1, Cx)
        col2 = jnp.concatenate([col, col], axis=1)              # (H, 2, Cx)
        x_pad[1:H + 1, 1 + 2 * j:3 + 2 * j, :] = col2

    if has_skip:
        skip_pad[...] = jnp.zeros(skip_pad.shape, skip_pad.dtype)
        skip_pad[1:H + 1, 1:W + 1, :] = skip_ref[0]

    # ---- conv1: build im2col slab (H*W, 9*Cin1) once, single bf16 MXU matmul ----
    for dy in range(3):
        for dx in range(3):
            t = dy * 3 + dx
            piece = x_pad[dy:dy + H, dx:dx + W, :].reshape(H * W, Cx)
            if has_skip:
                spiece = skip_pad[dy:dy + H, dx:dx + W, :].reshape(H * W, Cs)
                piece = jnp.concatenate([piece, spiece], axis=-1)
            slab1[:, t * Cin1:(t + 1) * Cin1] = piece

    y1 = jnp.dot(slab1[...].astype(jnp.bfloat16), w1_ref[...],
                 preferred_element_type=jnp.float32)            # (H*W, Cout) f32
    y1 = jnp.maximum(y1 * s1_ref[0] + b1_ref[0], 0.0)

    # layer-1 activation never leaves VMEM: store zero-padded for the next conv
    mid_pad[...] = jnp.zeros(mid_pad.shape, mid_pad.dtype)
    mid_pad[1:H + 1, 1:W + 1, :] = y1.reshape(H, W, Cout)

    # ---- conv2: im2col slab (H*W, 9*Cout), single bf16 MXU matmul ----
    for dy in range(3):
        for dx in range(3):
            t = dy * 3 + dx
            slab2[:, t * Cout:(t + 1) * Cout] = (
                mid_pad[dy:dy + H, dx:dx + W, :].reshape(H * W, Cout))

    y2 = jnp.dot(slab2[...].astype(jnp.bfloat16), w2_ref[...],
                 preferred_element_type=jnp.float32)            # (H*W, Cout) f32
    y2 = jnp.maximum(y2 * s2_ref[0] + b2_ref[0], 0.0)
    o_ref[0] = y2.astype(o_ref.dtype)


def fused_decoder_block(x_low, skip, w1_mat, w2_mat, s1, b1, s2, b2):
    """x_low: (N,h,w,Cx) NHWC low-res input, skip: (N,2h,2w,Cs) NHWC or None.
    w1_mat: (9*(Cx+Cs), Cout) bf16, w2_mat: (9*Cout, Cout) bf16.
    Returns the DecoderBlock output as (N, 2h, 2w, Cout) f32 (NHWC)."""
    N, h, w, Cx = x_low.shape
    H, W = 2 * h, 2 * w
    Cout = w2_mat.shape[-1]
    has_skip = skip is not None
    Cs = skip.shape[-1] if has_skip else 0
    Cin1 = Cx + Cs
    assert w1_mat.shape == (9 * Cin1, Cout), w1_mat.shape
    assert w2_mat.shape == (9 * Cout, Cout), w2_mat.shape
    if has_skip:
        assert skip.shape == (N, H, W, Cs), skip.shape

    s1 = s1.reshape(1, Cout).astype(jnp.float32)
    b1 = b1.reshape(1, Cout).astype(jnp.float32)
    s2 = s2.reshape(1, Cout).astype(jnp.float32)
    b2 = b2.reshape(1, Cout).astype(jnp.float32)

    in_arrays = [x_low.astype(jnp.float32)]
    in_specs = [pl.BlockSpec((1, h, w, Cx), lambda b: (b, 0, 0, 0))]
    if has_skip:
        in_arrays.append(skip.astype(jnp.float32))
        in_specs.append(pl.BlockSpec((1, H, W, Cs), lambda b: (b, 0, 0, 0)))
    in_arrays += [w1_mat, w2_mat, s1, b1, s2, b2]
    in_specs += [
        pl.BlockSpec((9 * Cin1, Cout), lambda b: (0, 0)),
        pl.BlockSpec((9 * Cout, Cout), lambda b: (0, 0)),
        pl.BlockSpec((1, Cout), lambda b: (0, 0)),
        pl.BlockSpec((1, Cout), lambda b: (0, 0)),
        pl.BlockSpec((1, Cout), lambda b: (0, 0)),
        pl.BlockSpec((1, Cout), lambda b: (0, 0)),
    ]

    scratch = [pltpu.VMEM((H + 2, W + 2, Cx), jnp.float32)]
    if has_skip:
        scratch.append(pltpu.VMEM((H + 2, W + 2, Cs), jnp.float32))
    scratch += [
        pltpu.VMEM((H + 2, W + 2, Cout), jnp.float32),   # layer-1 activation (padded)
        pltpu.VMEM((H * W, 9 * Cin1), jnp.float32),      # im2col slab, conv1
        pltpu.VMEM((H * W, 9 * Cout), jnp.float32),      # im2col slab, conv2
    ]

    out = pl.pallas_call(
        functools.partial(_fused_decoder_kernel, has_skip),
        out_shape=jax.ShapeDtypeStruct((N, H * W, Cout), jnp.float32),
        grid_spec=pltpu.PrefetchScalarGridSpec(
            num_scalar_prefetch=0,
            grid=(N,),
            in_specs=in_specs,
            out_specs=pl.BlockSpec((1, H * W, Cout), lambda b: (b, 0, 0)),
            scratch_shapes=scratch),
        compiler_params=pltpu.CompilerParams(
            dimension_semantics=("parallel",)),
    )(*in_arrays)
    # (N, H*W, Cout) -> NHWC; contiguous reshape, free at the XLA level.
    return out.reshape(N, H, W, Cout)


def _fold_bn(gamma, beta, running_mean, running_var):
    scale = gamma * jax.lax.rsqrt(running_var + BN_EPS)
    bias = beta - running_mean * scale
    return scale, bias


def _init_conv_bn(key, c_in, c_out):
    """Deterministic synthetic init of Conv2d(3x3, bias=False) + BatchNorm2d (eval)."""
    k_w, k_g, k_b, k_m, k_v = jax.random.split(key, 5)
    # torch layout (Cout, Cin, 3, 3) -> HWIO (3, 3, Cin, Cout); bf16 for the MXU.
    w_torch = jax.random.normal(k_w, (c_out, c_in, 3, 3), jnp.float32) * 0.1
    w_hwio = jnp.transpose(w_torch, (2, 3, 1, 0)).astype(jnp.bfloat16)
    gamma = 1.0 + 0.1 * jax.random.normal(k_g, (c_out,), jnp.float32)
    beta = 0.1 * jax.random.normal(k_b, (c_out,), jnp.float32)
    mean = 0.1 * jax.random.normal(k_m, (c_out,), jnp.float32)
    var = jax.random.uniform(k_v, (c_out,), jnp.float32, 0.5, 1.5)
    scale, bias = _fold_bn(gamma, beta, mean, var)
    return w_hwio, scale, bias


class DecoderBlockPallas:
    """JAX/Pallas port of DecoderBlock (use_batchnorm=True, eval-mode BN)."""

    def __init__(self, in_channels, skip_channels, out_channels, key):
        k1, k2 = jax.random.split(key)
        self.in_channels = in_channels
        self.skip_channels = skip_channels
        self.out_channels = out_channels
        self.w1, self.s1, self.b1 = _init_conv_bn(
            k1, in_channels + skip_channels, out_channels)
        self.w2, self.s2, self.b2 = _init_conv_bn(k2, out_channels, out_channels)

    def __call__(self, x_nchw, skip_nchw=None):
        x = jnp.transpose(x_nchw, (0, 2, 3, 1))                     # NCHW -> NHWC
        skip = (None if skip_nchw is None
                else jnp.transpose(skip_nchw, (0, 2, 3, 1)))
        w1_mat = self.w1.reshape(-1, self.out_channels)             # (9*Cin1, Cout)
        w2_mat = self.w2.reshape(-1, self.out_channels)             # (9*Cout, Cout)
        out = fused_decoder_block(x, skip, w1_mat, w2_mat,
                                  self.s1, self.b1, self.s2, self.b2)
        return jnp.transpose(out, (0, 3, 1, 2))                     # NHWC -> NCHW


def _reference_conv_bn_relu(x_nhwc, w_hwio_bf16, scale, bias):
    y = jax.lax.conv_general_dilated(
        x_nhwc.astype(jnp.bfloat16), w_hwio_bf16,
        window_strides=(1, 1), padding="SAME",
        dimension_numbers=("NHWC", "HWIO", "NHWC"),
        preferred_element_type=jnp.float32)
    return jnp.maximum(y * scale + bias, 0.0)


if __name__ == "__main__":
    key = jax.random.PRNGKey(0)
    k_params, k_x, k_skip = jax.random.split(key, 3)

    in_channels, skip_channels, out_channels = 4, 4, 8
    N, H, W = 2, 8, 8  # low-res spatial; after 2x upsample -> 16x16

    block = DecoderBlockPallas(in_channels, skip_channels, out_channels, k_params)

    x = jax.random.normal(k_x, (N, in_channels, H, W), jnp.float32)
    skip = jax.random.normal(k_skip, (N, skip_channels, 2 * H, 2 * W), jnp.float32)

    out = jax.block_until_ready(block(x, skip))
    assert out.shape == (N, out_channels, 2 * H, 2 * W), out.shape

    # cross-check the fused Pallas path against an lax.conv reference (same
    # bf16 weights / bf16 matmul operands, f32 accumulation).
    x_nhwc = jnp.transpose(x, (0, 2, 3, 1))
    x_up = jnp.repeat(jnp.repeat(x_nhwc, 2, axis=1), 2, axis=2)
    x_cat = jnp.concatenate([x_up, jnp.transpose(skip, (0, 2, 3, 1))], axis=-1)
    ref = _reference_conv_bn_relu(x_cat, block.w1, block.s1, block.b1)
    ref = _reference_conv_bn_relu(ref, block.w2, block.s2, block.b2)
    ref = jnp.transpose(ref, (0, 3, 1, 2))

    max_err = float(jnp.max(jnp.abs(out - ref)))
    assert jnp.allclose(out, ref, atol=1e-2, rtol=1e-2), f"max_err={max_err}"

    print("KERNEL_OK")
</pallas_src>

<mosaic_0001>
module attributes {stable_mosaic.version = 11 : i64} {
  func.func @_fused_decoder_kernel(%arg0: i32, %arg1: memref<1x8x8x4xf32, #tpu.memory_space<vmem>>, %arg2: memref<1x16x16x4xf32, #tpu.memory_space<vmem>>, %arg3: memref<72x8xbf16, #tpu.memory_space<vmem>>, %arg4: memref<72x8xbf16, #tpu.memory_space<vmem>>, %arg5: memref<1x8xf32, #tpu.memory_space<vmem>>, %arg6: memref<1x8xf32, #tpu.memory_space<vmem>>, %arg7: memref<1x8xf32, #tpu.memory_space<vmem>>, %arg8: memref<1x8xf32, #tpu.memory_space<vmem>>, %arg9: memref<1x256x8xf32, #tpu.memory_space<vmem>>, %arg10: memref<18x18x4xf32, #tpu.memory_space<vmem>>, %arg11: memref<18x18x4xf32, #tpu.memory_space<vmem>>, %arg12: memref<18x18x8xf32, #tpu.memory_space<vmem>>, %arg13: memref<256x72xf32, #tpu.memory_space<vmem>>, %arg14: memref<256x72xf32, #tpu.memory_space<vmem>>) attributes {dimension_semantics = [#tpu.dimension_semantics<parallel>], iteration_bounds = array<i64: 2>, scalar_prefetch = 0 : i64, scratch_operands = 5 : i64, tpu.core_type = #tpu.core_type<tc>, window_params = [{transform_indices = @transform_0, window_bounds = array<i64: 1, 8, 8, 4>}, {transform_indices = @transform_1, window_bounds = array<i64: 1, 16, 16, 4>}, {pipeline_mode = #tpu.pipeline_mode<synchronous>, transform_indices = @transform_2, window_bounds = array<i64: 72, 8>}, {pipeline_mode = #tpu.pipeline_mode<synchronous>, transform_indices = @transform_3, window_bounds = array<i64: 72, 8>}, {pipeline_mode = #tpu.pipeline_mode<synchronous>, transform_indices = @transform_4, window_bounds = array<i64: 1, 8>}, {pipeline_mode = #tpu.pipeline_mode<synchronous>, transform_indices = @transform_5, window_bounds = array<i64: 1, 8>}, {pipeline_mode = #tpu.pipeline_mode<synchronous>, transform_indices = @transform_6, window_bounds = array<i64: 1, 8>}, {pipeline_mode = #tpu.pipeline_mode<synchronous>, transform_indices = @transform_7, window_bounds = array<i64: 1, 8>}, {transform_indices = @transform_8, window_bounds = array<i64: 1, 256, 8>}]} {
    %cst = arith.constant 0.000000e+00 : f32
    %0 = vector.broadcast %cst : f32 to vector<18x18x4xf32>
    %c0 = arith.constant 0 : index
    %c0_0 = arith.constant 0 : index
    %c0_1 = arith.constant 0 : index
    %1 = vector.load %arg10[%c0, %c0_0, %c0_1] : memref<18x18x4xf32, #tpu.memory_space<vmem>>, vector<18x18x4xf32>
    tpu.vector_store %arg10[%c0, %c0_0, %c0_1], %0 {strides = array<i32>} : memref<18x18x4xf32, #tpu.memory_space<vmem>>, vector<18x18x4xf32>,
    %c0_2 = arith.constant 0 : index
    %c0_3 = arith.constant 0 : index
    %c0_4 = arith.constant 0 : index
    %c0_5 = arith.constant 0 : index
    %2 = vector.load %arg1[%c0_2, %c0_3, %c0_4, %c0_5] : memref<1x8x8x4xf32, #tpu.memory_space<vmem>>, vector<1x8x8x4xf32>
    %3 = vector.shape_cast %2 : vector<1x8x8x4xf32> to vector<8x8x4xf32>
    %4 = vector.shape_cast %3 : vector<8x8x4xf32> to vector<8x1x8x4xf32>
    %5 = vector.shape_cast %3 : vector<8x8x4xf32> to vector<8x1x8x4xf32>
    %6 = tpu.concatenate %4, %5 in 1 : vector<8x1x8x4xf32>, vector<8x1x8x4xf32> -> vector<8x2x8x4xf32>
    %7 = vector.shape_cast %6 : vector<8x2x8x4xf32> to vector<16x8x4xf32>
    %8 = vector.extract_strided_slice %7 {offsets = [0, 0, 0], sizes = [16, 1, 4], strides = [1, 1, 1]} : vector<16x8x4xf32> to vector<16x1x4xf32>
    %9 = tpu.concatenate %8, %8 in 1 : vector<16x1x4xf32>, vector<16x1x4xf32> -> vector<16x2x4xf32>
    %c1 = arith.constant 1 : index
    %c1_6 = arith.constant 1 : index
    %c0_7 = arith.constant 0 : index
    %10 = vector.load %arg10[%c1, %c1_6, %c0_7] : memref<18x18x4xf32, #tpu.memory_space<vmem>>, vector<16x2x4xf32>
    tpu.vector_store %arg10[%c1, %c1_6, %c0_7], %9 {strides = array<i32>} : memref<18x18x4xf32, #tpu.memory_space<vmem>>, vector<16x2x4xf32>,
    %11 = vector.extract_strided_slice %7 {offsets = [0, 1, 0], sizes = [16, 1, 4], strides = [1, 1, 1]} : vector<16x8x4xf32> to vector<16x1x4xf32>
    %12 = tpu.concatenate %11, %11 in 1 : vector<16x1x4xf32>, vector<16x1x4xf32> -> vector<16x2x4xf32>
    %c1_8 = arith.constant 1 : index
    %c3 = arith.constant 3 : index
    %c0_9 = arith.constant 0 : index
    %13 = vector.load %arg10[%c1_8, %c3, %c0_9] : memref<18x18x4xf32, #tpu.memory_space<vmem>>, vector<16x2x4xf32>
    tpu.vector_store %arg10[%c1_8, %c3, %c0_9], %12 {strides = array<i32>} : memref<18x18x4xf32, #tpu.memory_space<vmem>>, vector<16x2x4xf32>,
    %14 = vector.extract_strided_slice %7 {offsets = [0, 2, 0], sizes = [16, 1, 4], strides = [1, 1, 1]} : vector<16x8x4xf32> to vector<16x1x4xf32>
    %15 = tpu.concatenate %14, %14 in 1 : vector<16x1x4xf32>, vector<16x1x4xf32> -> vector<16x2x4xf32>
    %c1_10 = arith.constant 1 : index
    %c5 = arith.constant 5 : index
    %c0_11 = arith.constant 0 : index
    %16 = vector.load %arg10[%c1_10, %c5, %c0_11] : memref<18x18x4xf32, #tpu.memory_space<vmem>>, vector<16x2x4xf32>
    tpu.vector_store %arg10[%c1_10, %c5, %c0_11], %15 {strides = array<i32>} : memref<18x18x4xf32, #tpu.memory_space<vmem>>, vector<16x2x4xf32>,
    %17 = vector.extract_strided_slice %7 {offsets = [0, 3, 0], sizes = [16, 1, 4], strides = [1, 1, 1]} : vector<16x8x4xf32> to vector<16x1x4xf32>
    %18 = tpu.concatenate %17, %17 in 1 : vector<16x1x4xf32>, vector<16x1x4xf32> -> vector<16x2x4xf32>
    %c1_12 = arith.constant 1 : index
    %c7 = arith.constant 7 : index
    %c0_13 = arith.constant 0 : index
    %19 = vector.load %arg10[%c1_12, %c7, %c0_13] : memref<18x18x4xf32, #tpu.memory_space<vmem>>, vector<16x2x4xf32>
    tpu.vector_store %arg10[%c1_12, %c7, %c0_13], %18 {strides = array<i32>} : memref<18x18x4xf32, #tpu.memory_space<vmem>>, vector<16x2x4xf32>,
    %20 = vector.extract_strided_slice %7 {offsets = [0, 4, 0], sizes = [16, 1, 4], strides = [1, 1, 1]} : vector<16x8x4xf32> to vector<16x1x4xf32>
    %21 = tpu.concatenate %20, %20 in 1 : vector<16x1x4xf32>, vector<16x1x4xf32> -> vector<16x2x4xf32>
    %c1_14 = arith.constant 1 : index
    %c9 = arith.constant 9 : index
    %c0_15 = arith.constant 0 : index
    %22 = vector.load %arg10[%c1_14, %c9, %c0_15] : memref<18x18x4xf32, #tpu.memory_space<vmem>>, vector<16x2x4xf32>
    tpu.vector_store %arg10[%c1_14, %c9, %c0_15], %21 {strides = array<i32>} : memref<18x18x4xf32, #tpu.memory_space<vmem>>, vector<16x2x4xf32>,
    %23 = vector.extract_strided_slice %7 {offsets = [0, 5, 0], sizes = [16, 1, 4], strides = [1, 1, 1]} : vector<16x8x4xf32> to vector<16x1x4xf32>
    %24 = tpu.concatenate %23, %23 in 1 : vector<16x1x4xf32>, vector<16x1x4xf32> -> vector<16x2x4xf32>
    %c1_16 = arith.constant 1 : index
    %c11 = arith.constant 11 : index
    %c0_17 = arith.constant 0 : index
    %25 = vector.load %arg10[%c1_16, %c11, %c0_17] : memref<18x18x4xf32, #tpu.memory_space<vmem>>, vector<16x2x4xf32>
    tpu.vector_store %arg10[%c1_16, %c11, %c0_17], %24 {strides = array<i32>} : memref<18x18x4xf32, #tpu.memory_space<vmem>>, vector<16x2x4xf32>,
    %26 = vector.extract_strided_slice %7 {offsets = [0, 6, 0], sizes = [16, 1, 4], strides = [1, 1, 1]} : vector<16x8x4xf32> to vector<16x1x4xf32>
    %27 = tpu.concatenate %26, %26 in 1 : vector<16x1x4xf32>, vector<16x1x4xf32> -> vector<16x2x4xf32>
    %c1_18 = arith.constant 1 : index
    %c13 = arith.constant 13 : index
    %c0_19 = arith.constant 0 : index
    %28 = vector.load %arg10[%c1_18, %c13, %c0_19] : memref<18x18x4xf32, #tpu.memory_space<vmem>>, vector<16x2x4xf32>
    tpu.vector_store %arg10[%c1_18, %c13, %c0_19], %27 {strides = array<i32>} : memref<18x18x4xf32, #tpu.memory_space<vmem>>, vector<16x2x4xf32>,
    %29 = vector.extract_strided_slice %7 {offsets = [0, 7, 0], sizes = [16, 1, 4], strides = [1, 1, 1]} : vector<16x8x4xf32> to vector<16x1x4xf32>
    %30 = tpu.concatenate %29, %29 in 1 : vector<16x1x4xf32>, vector<16x1x4xf32> -> vector<16x2x4xf32>
    %c1_20 = arith.constant 1 : index
    %c15 = arith.constant 15 : index
    %c0_21 = arith.constant 0 : index
    %31 = vector.load %arg10[%c1_20, %c15, %c0_21] : memref<18x18x4xf32, #tpu.memory_space<vmem>>, vector<16x2x4xf32>
    tpu.vector_store %arg10[%c1_20, %c15, %c0_21], %30 {strides = array<i32>} : memref<18x18x4xf32, #tpu.memory_space<vmem>>, vector<16x2x4xf32>,
    %cst_22 = arith.constant 0.000000e+00 : f32
    %32 = vector.broadcast %cst_22 : f32 to vector<18x18x4xf32>
    %c0_23 = arith.constant 0 : index
    %c0_24 = arith.constant 0 : index
    %c0_25 = arith.constant 0 : index
    %33 = vector.load %arg11[%c0_23, %c0_24, %c0_25] : memref<18x18x4xf32, #tpu.memory_space<vmem>>, vector<18x18x4xf32>
    tpu.vector_store %arg11[%c0_23, %c0_24, %c0_25], %32 {strides = array<i32>} : memref<18x18x4xf32, #tpu.memory_space<vmem>>, vector<18x18x4xf32>,
    %c0_26 = arith.constant 0 : index
    %c0_27 = arith.constant 0 : index
    %c0_28 = arith.constant 0 : index
    %c0_29 = arith.constant 0 : index
    %34 = vector.load %arg2[%c0_26, %c0_27, %c0_28, %c0_29] : memref<1x16x16x4xf32, #tpu.memory_space<vmem>>, vector<1x16x16x4xf32>
    %35 = vector.shape_cast %34 : vector<1x16x16x4xf32> to vector<16x16x4xf32>
    %c1_30 = arith.constant 1 : index
    %c1_31 = arith.constant 1 : index
    %c0_32 = arith.constant 0 : index
    %36 = vector.load %arg11[%c1_30, %c1_31, %c0_32] : memref<18x18x4xf32, #tpu.memory_space<vmem>>, vector<16x16x4xf32>
    tpu.vector_store %arg11[%c1_30, %c1_31, %c0_32], %35 {strides = array<i32>} : memref<18x18x4xf32, #tpu.memory_space<vmem>>, vector<16x16x4xf32>,
    %c0_33 = arith.constant 0 : index
    %c0_34 = arith.constant 0 : index
    %c0_35 = arith.constant 0 : index
    %37 = vector.load %arg10[%c0_33, %c0_34, %c0_35] : memref<18x18x4xf32, #tpu.memory_space<vmem>>, vector<16x16x4xf32>
    %38 = vector.shape_cast %37 : vector<16x16x4xf32> to vector<256x4xf32>
    %c0_36 = arith.constant 0 : index
    %c0_37 = arith.constant 0 : index
    %c0_38 = arith.constant 0 : index
    %39 = vector.load %arg11[%c0_36, %c0_37, %c0_38] : memref<18x18x4xf32, #tpu.memory_space<vmem>>, vector<16x16x4xf32>
    %40 = vector.shape_cast %39 : vector<16x16x4xf32> to vector<256x4xf32>
    %41 = tpu.concatenate %38, %40 in 1 : vector<256x4xf32>, vector<256x4xf32> -> vector<256x8xf32>
    %c0_39 = arith.constant 0 : index
    %c0_40 = arith.constant 0 : index
    %42 = vector.load %arg13[%c0_39, %c0_40] : memref<256x72xf32, #tpu.memory_space<vmem>>, vector<256x8xf32>
    tpu.vector_store %arg13[%c0_39, %c0_40], %41 {strides = array<i32>} : memref<256x72xf32, #tpu.memory_space<vmem>>, vector<256x8xf32>,
    %c0_41 = arith.constant 0 : index
    %c1_42 = arith.constant 1 : index
    %c0_43 = arith.constant 0 : index
    %43 = vector.load %arg10[%c0_41, %c1_42, %c0_43] : memref<18x18x4xf32, #tpu.memory_space<vmem>>, vector<16x16x4xf32>
    %44 = vector.shape_cast %43 : vector<16x16x4xf32> to vector<256x4xf32>
    %c0_44 = arith.constant 0 : index
    %c1_45 = arith.constant 1 : index
    %c0_46 = arith.constant 0 : index
    %45 = vector.load %arg11[%c0_44, %c1_45, %c0_46] : memref<18x18x4xf32, #tpu.memory_space<vmem>>, vector<16x16x4xf32>
    %46 = vector.shape_cast %45 : vector<16x16x4xf32> to vector<256x4xf32>
    %47 = tpu.concatenate %44, %46 in 1 : vector<256x4xf32>, vector<256x4xf32> -> vector<256x8xf32>
    %c0_47 = arith.constant 0 : index
    %c8 = arith.constant 8 : index
    %48 = vector.load %arg13[%c0_47, %c8] : memref<256x72xf32, #tpu.memory_space<vmem>>, vector<256x8xf32>
    tpu.vector_store %arg13[%c0_47, %c8], %47 {strides = array<i32>} : memref<256x72xf32, #tpu.memory_space<vmem>>, vector<256x8xf32>,
    %c0_48 = arith.constant 0 : index
    %c2 = arith.constant 2 : index
    %c0_49 = arith.constant 0 : index
    %49 = vector.load %arg10[%c0_48, %c2, %c0_49] : memref<18x18x4xf32, #tpu.memory_space<vmem>>, vector<16x16x4xf32>
    %50 = vector.shape_cast %49 : vector<16x16x4xf32> to vector<256x4xf32>
    %c0_50 = arith.constant 0 : index
    %c2_51 = arith.constant 2 : index
    %c0_52 = arith.constant 0 : index
    %51 = vector.load %arg11[%c0_50, %c2_51, %c0_52] : memref<18x18x4xf32, #tpu.memory_space<vmem>>, vector<16x16x4xf32>
    %52 = vector.shape_cast %51 : vector<16x16x4xf32> to vector<256x4xf32>
    %53 = tpu.concatenate %50, %52 in 1 : vector<256x4xf32>, vector<256x4xf32> -> vector<256x8xf32>
    %c0_53 = arith.constant 0 : index
    %c16 = arith.constant 16 : index
    %54 = vector.load %arg13[%c0_53, %c16] : memref<256x72xf32, #tpu.memory_space<vmem>>, vector<256x8xf32>
    tpu.vector_store %arg13[%c0_53, %c16], %53 {strides = array<i32>} : memref<256x72xf32, #tpu.memory_space<vmem>>, vector<256x8xf32>,
    %c1_54 = arith.constant 1 : index
    %c0_55 = arith.constant 0 : index
    %c0_56 = arith.constant 0 : index
    %55 = vector.load %arg10[%c1_54, %c0_55, %c0_56] : memref<18x18x4xf32, #tpu.memory_space<vmem>>, vector<16x16x4xf32>
    %56 = vector.shape_cast %55 : vector<16x16x4xf32> to vector<256x4xf32>
    %c1_57 = arith.constant 1 : index
    %c0_58 = arith.constant 0 : index
    %c0_59 = arith.constant 0 : index
    %57 = vector.load %arg11[%c1_57, %c0_58, %c0_59] : memref<18x18x4xf32, #tpu.memory_space<vmem>>, vector<16x16x4xf32>
    %58 = vector.shape_cast %57 : vector<16x16x4xf32> to vector<256x4xf32>
    %59 = tpu.concatenate %56, %58 in 1 : vector<256x4xf32>, vector<256x4xf32> -> vector<256x8xf32>
    %c0_60 = arith.constant 0 : index
    %c24 = arith.constant 24 : index
    %60 = vector.load %arg13[%c0_60, %c24] : memref<256x72xf32, #tpu.memory_space<vmem>>, vector<256x8xf32>
    tpu.vector_store %arg13[%c0_60, %c24], %59 {strides = array<i32>} : memref<256x72xf32, #tpu.memory_space<vmem>>, vector<256x8xf32>,
    %c1_61 = arith.constant 1 : index
    %c1_62 = arith.constant 1 : index
    %c0_63 = arith.constant 0 : index
    %61 = vector.load %arg10[%c1_61, %c1_62, %c0_63] : memref<18x18x4xf32, #tpu.memory_space<vmem>>, vector<16x16x4xf32>
    %62 = vector.shape_cast %61 : vector<16x16x4xf32> to vector<256x4xf32>
    %c1_64 = arith.constant 1 : index
    %c1_65 = arith.constant 1 : index
    %c0_66 = arith.constant 0 : index
    %63 = vector.load %arg11[%c1_64, %c1_65, %c0_66] : memref<18x18x4xf32, #tpu.memory_space<vmem>>, vector<16x16x4xf32>
    %64 = vector.shape_cast %63 : vector<16x16x4xf32> to vector<256x4xf32>
    %65 = tpu.concatenate %62, %64 in 1 : vector<256x4xf32>, vector<256x4xf32> -> vector<256x8xf32>
    %c0_67 = arith.constant 0 : index
    %c32 = arith.constant 32 : index
    %66 = vector.load %arg13[%c0_67, %c32] : memref<256x72xf32, #tpu.memory_space<vmem>>, vector<256x8xf32>
    tpu.vector_store %arg13[%c0_67, %c32], %65 {strides = array<i32>} : memref<256x72xf32, #tpu.memory_space<vmem>>, vector<256x8xf32>,
    %c1_68 = arith.constant 1 : index
    %c2_69 = arith.constant 2 : index
    %c0_70 = arith.constant 0 : index
    %67 = vector.load %arg10[%c1_68, %c2_69, %c0_70] : memref<18x18x4xf32, #tpu.memory_space<vmem>>, vector<16x16x4xf32>
    %68 = vector.shape_cast %67 : vector<16x16x4xf32> to vector<256x4xf32>
    %c1_71 = arith.constant 1 : index
    %c2_72 = arith.constant 2 : index
    %c0_73 = arith.constant 0 : index
    %69 = vector.load %arg11[%c1_71, %c2_72, %c0_73] : memref<18x18x4xf32, #tpu.memory_space<vmem>>, vector<16x16x4xf32>
    %70 = vector.shape_cast %69 : vector<16x16x4xf32> to vector<256x4xf32>
    %71 = tpu.concatenate %68, %70 in 1 : vector<256x4xf32>, vector<256x4xf32> -> vector<256x8xf32>
    %c0_74 = arith.constant 0 : index
    %c40 = arith.constant 40 : index
    %72 = vector.load %arg13[%c0_74, %c40] : memref<256x72xf32, #tpu.memory_space<vmem>>, vector<256x8xf32>
    tpu.vector_store %arg13[%c0_74, %c40], %71 {strides = array<i32>} : memref<256x72xf32, #tpu.memory_space<vmem>>, vector<256x8xf32>,
    %c2_75 = arith.constant 2 : index
    %c0_76 = arith.constant 0 : index
    %c0_77 = arith.constant 0 : index
    %73 = vector.load %arg10[%c2_75, %c0_76, %c0_77] : memref<18x18x4xf32, #tpu.memory_space<vmem>>, vector<16x16x4xf32>
    %74 = vector.shape_cast %73 : vector<16x16x4xf32> to vector<256x4xf32>
    %c2_78 = arith.constant 2 : index
    %c0_79 = arith.constant 0 : index
    %c0_80 = arith.constant 0 : index
    %75 = vector.load %arg11[%c2_78, %c0_79, %c0_80] : memref<18x18x4xf32, #tpu.memory_space<vmem>>, vector<16x16x4xf32>
    %76 = vector.shape_cast %75 : vector<16x16x4xf32> to vector<256x4xf32>
    %77 = tpu.concatenate %74, %76 in 1 : vector<256x4xf32>, vector<256x4xf32> -> vector<256x8xf32>
    %c0_81 = arith.constant 0 : index
    %c48 = arith.constant 48 : index
    %78 = vector.load %arg13[%c0_81, %c48] : memref<256x72xf32, #tpu.memory_space<vmem>>, vector<256x8xf32>
    tpu.vector_store %arg13[%c0_81, %c48], %77 {strides = array<i32>} : memref<256x72xf32, #tpu.memory_space<vmem>>, vector<256x8xf32>,
    %c2_82 = arith.constant 2 : index
    %c1_83 = arith.constant 1 : index
    %c0_84 = arith.constant 0 : index
    %79 = vector.load %arg10[%c2_82, %c1_83, %c0_84] : memref<18x18x4xf32, #tpu.memory_space<vmem>>, vector<16x16x4xf32>
    %80 = vector.shape_cast %79 : vector<16x16x4xf32> to vector<256x4xf32>
    %c2_85 = arith.constant 2 : index
    %c1_86 = arith.constant 1 : index
    %c0_87 = arith.constant 0 : index
    %81 = vector.load %arg11[%c2_85, %c1_86, %c0_87] : memref<18x18x4xf32, #tpu.memory_space<vmem>>, vector<16x16x4xf32>
    %82 = vector.shape_cast %81 : vector<16x16x4xf32> to vector<256x4xf32>
    %83 = tpu.concatenate %80, %82 in 1 : vector<256x4xf32>, vector<256x4xf32> -> vector<256x8xf32>
    %c0_88 = arith.constant 0 : index
    %c56 = arith.constant 56 : index
    %84 = vector.load %arg13[%c0_88, %c56] : memref<256x72xf32, #tpu.memory_space<vmem>>, vector<256x8xf32>
    tpu.vector_store %arg13[%c0_88, %c56], %83 {strides = array<i32>} : memref<256x72xf32, #tpu.memory_space<vmem>>, vector<256x8xf32>,
    %c2_89 = arith.constant 2 : index
    %c2_90 = arith.constant 2 : index
    %c0_91 = arith.constant 0 : index
    %85 = vector.load %arg10[%c2_89, %c2_90, %c0_91] : memref<18x18x4xf32, #tpu.memory_space<vmem>>, vector<16x16x4xf32>
    %86 = vector.shape_cast %85 : vector<16x16x4xf32> to vector<256x4xf32>
    %c2_92 = arith.constant 2 : index
    %c2_93 = arith.constant 2 : index
    %c0_94 = arith.constant 0 : index
    %87 = vector.load %arg11[%c2_92, %c2_93, %c0_94] : memref<18x18x4xf32, #tpu.memory_space<vmem>>, vector<16x16x4xf32>
    %88 = vector.shape_cast %87 : vector<16x16x4xf32> to vector<256x4xf32>
    %89 = tpu.concatenate %86, %88 in 1 : vector<256x4xf32>, vector<256x4xf32> -> vector<256x8xf32>
    %c0_95 = arith.constant 0 : index
    %c64 = arith.constant 64 : index
    %90 = vector.load %arg13[%c0_95, %c64] : memref<256x72xf32, #tpu.memory_space<vmem>>, vector<256x8xf32>
    tpu.vector_store %arg13[%c0_95, %c64], %89 {strides = array<i32>} : memref<256x72xf32, #tpu.memory_space<vmem>>, vector<256x8xf32>,
    %c0_96 = arith.constant 0 : index
    %c0_97 = arith.constant 0 : index
    %91 = vector.load %arg13[%c0_96, %c0_97] : memref<256x72xf32, #tpu.memory_space<vmem>>, vector<256x72xf32>
    %92 = arith.truncf %91 : vector<256x72xf32> to vector<256x72xbf16>
    %c0_98 = arith.constant 0 : index
    %c0_99 = arith.constant 0 : index
    %93 = vector.load %arg3[%c0_98, %c0_99] : memref<72x8xbf16, #tpu.memory_space<vmem>>, vector<72x8xbf16>
    %cst_100 = arith.constant dense<0.000000e+00> : vector<256x8xf32>
    %94 = tpu.matmul %92, %93, %cst_100 {dimension_numbers = #tpu.dot_dimension_numbers<[1], [0], [0], [1], [0, 0, 1, 1], [], []>} : vector<256x72xbf16>, vector<72x8xbf16>, vector<256x8xf32> -> vector<256x8xf32>
    %c0_101 = arith.constant 0 : index
    %c0_102 = arith.constant 0 : index
    %95 = vector.load %arg5[%c0_101, %c0_102] : memref<1x8xf32, #tpu.memory_space<vmem>>, vector<1x8xf32>
    %96 = vector.shape_cast %95 : vector<1x8xf32> to vector<8xf32>
    %97 = vector.shape_cast %96 : vector<8xf32> to vector<1x8xf32>
    %98 = vector.broadcast %97 : vector<1x8xf32> to vector<256x8xf32>
    %99 = arith.mulf %94, %98 : vector<256x8xf32>
    %c0_103 = arith.constant 0 : index
    %c0_104 = arith.constant 0 : index
    %100 = vector.load %arg6[%c0_103, %c0_104] : memref<1x8xf32, #tpu.memory_space<vmem>>, vector<1x8xf32>
    %101 = vector.shape_cast %100 : vector<1x8xf32> to vector<8xf32>
    %102 = vector.shape_cast %101 : vector<8xf32> to vector<1x8xf32>
    %103 = vector.broadcast %102 : vector<1x8xf32> to vector<256x8xf32>
    %104 = arith.addf %99, %103 : vector<256x8xf32>
    %cst_105 = arith.constant 0.000000e+00 : f32
    %105 = vector.broadcast %cst_105 : f32 to vector<256x8xf32>
    %106 = arith.maximumf %104, %105 : vector<256x8xf32>
    %cst_106 = arith.constant 0.000000e+00 : f32
    %107 = vector.broadcast %cst_106 : f32 to vector<18x18x8xf32>
    %c0_107 = arith.constant 0 : index
    %c0_108 = arith.constant 0 : index
    %c0_109 = arith.constant 0 : index
    %108 = vector.load %arg12[%c0_107, %c0_108, %c0_109] : memref<18x18x8xf32, #tpu.memory_space<vmem>>, vector<18x18x8xf32>
    tpu.vector_store %arg12[%c0_107, %c0_108, %c0_109], %107 {strides = array<i32>} : memref<18x18x8xf32, #tpu.memory_space<vmem>>, vector<18x18x8xf32>,
    %109 = vector.shape_cast %106 : vector<256x8xf32> to vector<16x16x8xf32>
    %c1_110 = arith.constant 1 : index
    %c1_111 = arith.constant 1 : index
    %c0_112 = arith.constant 0 : index
    %110 = vector.load %arg12[%c1_110, %c1_111, %c0_112] : memref<18x18x8xf32, #tpu.memory_space<vmem>>, vector<16x16x8xf32>
    tpu.vector_store %arg12[%c1_110, %c1_111, %c0_112], %109 {strides = array<i32>} : memref<18x18x8xf32, #tpu.memory_space<vmem>>, vector<16x16x8xf32>,
    %c0_113 = arith.constant 0 : index
    %c0_114 = arith.constant 0 : index
    %c0_115 = arith.constant 0 : index
    %111 = vector.load %arg12[%c0_113, %c0_114, %c0_115] : memref<18x18x8xf32, #tpu.memory_space<vmem>>, vector<16x16x8xf32>
    %112 = vector.shape_cast %111 : vector<16x16x8xf32> to vector<256x8xf32>
    %c0_116 = arith.constant 0 : index
    %c0_117 = arith.constant 0 : index
    %113 = vector.load %arg14[%c0_116, %c0_117] : memref<256x72xf32, #tpu.memory_space<vmem>>, vector<256x8xf32>
    tpu.vector_store %arg14[%c0_116, %c0_117], %112 {strides = array<i32>} : memref<256x72xf32, #tpu.memory_space<vmem>>, vector<256x8xf32>,
    %c0_118 = arith.constant 0 : index
    %c1_119 = arith.constant 1 : index
    %c0_120 = arith.constant 0 : index
    %114 = vector.load %arg12[%c0_118, %c1_119, %c0_120] : memref<18x18x8xf32, #tpu.memory_space<vmem>>, vector<16x16x8xf32>
    %115 = vector.shape_cast %114 : vector<16x16x8xf32> to vector<256x8xf32>
    %c0_121 = arith.constant 0 : index
    %c8_122 = arith.constant 8 : index
    %116 = vector.load %arg14[%c0_121, %c8_122] : memref<256x72xf32, #tpu.memory_space<vmem>>, vector<256x8xf32>
    tpu.vector_store %arg14[%c0_121, %c8_122], %115 {strides = array<i32>} : memref<256x72xf32, #tpu.memory_space<vmem>>, vector<256x8xf32>,
    %c0_123 = arith.constant 0 : index
    %c2_124 = arith.constant 2 : index
    %c0_125 = arith.constant 0 : index
    %117 = vector.load %arg12[%c0_123, %c2_124, %c0_125] : memref<18x18x8xf32, #tpu.memory_space<vmem>>, vector<16x16x8xf32>
    %118 = vector.shape_cast %117 : vector<16x16x8xf32> to vector<256x8xf32>
    %c0_126 = arith.constant 0 : index
    %c16_127 = arith.constant 16 : index
    %119 = vector.load %arg14[%c0_126, %c16_127] : memref<256x72xf32, #tpu.memory_space<vmem>>, vector<256x8xf32>
    tpu.vector_store %arg14[%c0_126, %c16_127], %118 {strides = array<i32>} : memref<256x72xf32, #tpu.memory_space<vmem>>, vector<256x8xf32>,
    %c1_128 = arith.constant 1 : index
    %c0_129 = arith.constant 0 : index
    %c0_130 = arith.constant 0 : index
    %120 = vector.load %arg12[%c1_128, %c0_129, %c0_130] : memref<18x18x8xf32, #tpu.memory_space<vmem>>, vector<16x16x8xf32>
    %121 = vector.shape_cast %120 : vector<16x16x8xf32> to vector<256x8xf32>
    %c0_131 = arith.constant 0 : index
    %c24_132 = arith.constant 24 : index
    %122 = vector.load %arg14[%c0_131, %c24_132] : memref<256x72xf32, #tpu.memory_space<vmem>>, vector<256x8xf32>
    tpu.vector_store %arg14[%c0_131, %c24_132], %121 {strides = array<i32>} : memref<256x72xf32, #tpu.memory_space<vmem>>, vector<256x8xf32>,
    %c1_133 = arith.constant 1 : index
    %c1_134 = arith.constant 1 : index
    %c0_135 = arith.constant 0 : index
    %123 = vector.load %arg12[%c1_133, %c1_134, %c0_135] : memref<18x18x8xf32, #tpu.memory_space<vmem>>, vector<16x16x8xf32>
    %124 = vector.shape_cast %123 : vector<16x16x8xf32> to vector<256x8xf32>
    %c0_136 = arith.constant 0 : index
    %c32_137 = arith.constant 32 : index
    %125 = vector.load %arg14[%c0_136, %c32_137] : memref<256x72xf32, #tpu.memory_space<vmem>>, vector<256x8xf32>
    tpu.vector_store %arg14[%c0_136, %c32_137], %124 {strides = array<i32>} : memref<256x72xf32, #tpu.memory_space<vmem>>, vector<256x8xf32>,
    %c1_138 = arith.constant 1 : index
    %c2_139 = arith.constant 2 : index
    %c0_140 = arith.constant 0 : index
    %126 = vector.load %arg12[%c1_138, %c2_139, %c0_140] : memref<18x18x8xf32, #tpu.memory_space<vmem>>, vector<16x16x8xf32>
    %127 = vector.shape_cast %126 : vector<16x16x8xf32> to vector<256x8xf32>
    %c0_141 = arith.constant 0 : index
    %c40_142 = arith.constant 40 : index
    %128 = vector.load %arg14[%c0_141, %c40_142] : memref<256x72xf32, #tpu.memory_space<vmem>>, vector<256x8xf32>
    tpu.vector_store %arg14[%c0_141, %c40_142], %127 {strides = array<i32>} : memref<256x72xf32, #tpu.memory_space<vmem>>, vector<256x8xf32>,
    %c2_143 = arith.constant 2 : index
    %c0_144 = arith.constant 0 : index
    %c0_145 = arith.constant 0 : index
    %129 = vector.load %arg12[%c2_143, %c0_144, %c0_145] : memref<18x18x8xf32, #tpu.memory_space<vmem>>, vector<16x16x8xf32>
    %130 = vector.shape_cast %129 : vector<16x16x8xf32> to vector<256x8xf32>
    %c0_146 = arith.constant 0 : index
    %c48_147 = arith.constant 48 : index
    %131 = vector.load %arg14[%c0_146, %c48_147] : memref<256x72xf32, #tpu.memory_space<vmem>>, vector<256x8xf32>
    tpu.vector_store %arg14[%c0_146, %c48_147], %130 {strides = array<i32>} : memref<256x72xf32, #tpu.memory_space<vmem>>, vector<256x8xf32>,
    %c2_148 = arith.constant 2 : index
    %c1_149 = arith.constant 1 : index
    %c0_150 = arith.constant 0 : index
    %132 = vector.load %arg12[%c2_148, %c1_149, %c0_150] : memref<18x18x8xf32, #tpu.memory_space<vmem>>, vector<16x16x8xf32>
    %133 = vector.shape_cast %132 : vector<16x16x8xf32> to vector<256x8xf32>
    %c0_151 = arith.constant 0 : index
    %c56_152 = arith.constant 56 : index
    %134 = vector.load %arg14[%c0_151, %c56_152] : memref<256x72xf32, #tpu.memory_space<vmem>>, vector<256x8xf32>
    tpu.vector_store %arg14[%c0_151, %c56_152], %133 {strides = array<i32>} : memref<256x72xf32, #tpu.memory_space<vmem>>, vector<256x8xf32>,
    %c2_153 = arith.constant 2 : index
    %c2_154 = arith.constant 2 : index
    %c0_155 = arith.constant 0 : index
    %135 = vector.load %arg12[%c2_153, %c2_154, %c0_155] : memref<18x18x8xf32, #tpu.memory_space<vmem>>, vector<16x16x8xf32>
    %136 = vector.shape_cast %135 : vector<16x16x8xf32> to vector<256x8xf32>
    %c0_156 = arith.constant 0 : index
    %c64_157 = arith.constant 64 : index
    %137 = vector.load %arg14[%c0_156, %c64_157] : memref<256x72xf32, #tpu.memory_space<vmem>>, vector<256x8xf32>
    tpu.vector_store %arg14[%c0_156, %c64_157], %136 {strides = array<i32>} : memref<256x72xf32, #tpu.memory_space<vmem>>, vector<256x8xf32>,
    %c0_158 = arith.constant 0 : index
    %c0_159 = arith.constant 0 : index
    %138 = vector.load %arg14[%c0_158, %c0_159] : memref<256x72xf32, #tpu.memory_space<vmem>>, vector<256x72xf32>
    %139 = arith.truncf %138 : vector<256x72xf32> to vector<256x72xbf16>
    %c0_160 = arith.constant 0 : index
    %c0_161 = arith.constant 0 : index
    %140 = vector.load %arg4[%c0_160, %c0_161] : memref<72x8xbf16, #tpu.memory_space<vmem>>, vector<72x8xbf16>
    %cst_162 = arith.constant dense<0.000000e+00> : vector<256x8xf32>
    %141 = tpu.matmul %139, %140, %cst_162 {dimension_numbers = #tpu.dot_dimension_numbers<[1], [0], [0], [1], [0, 0, 1, 1], [], []>} : vector<256x72xbf16>, vector<72x8xbf16>, vector<256x8xf32> -> vector<256x8xf32>
    %c0_163 = arith.constant 0 : index
    %c0_164 = arith.constant 0 : index
    %142 = vector.load %arg7[%c0_163, %c0_164] : memref<1x8xf32, #tpu.memory_space<vmem>>, vector<1x8xf32>
    %143 = vector.shape_cast %142 : vector<1x8xf32> to vector<8xf32>
    %144 = vector.shape_cast %143 : vector<8xf32> to vector<1x8xf32>
    %145 = vector.broadcast %144 : vector<1x8xf32> to vector<256x8xf32>
    %146 = arith.mulf %141, %145 : vector<256x8xf32>
    %c0_165 = arith.constant 0 : index
    %c0_166 = arith.constant 0 : index
    %147 = vector.load %arg8[%c0_165, %c0_166] : memref<1x8xf32, #tpu.memory_space<vmem>>, vector<1x8xf32>
    %148 = vector.shape_cast %147 : vector<1x8xf32> to vector<8xf32>
    %149 = vector.shape_cast %148 : vector<8xf32> to vector<1x8xf32>
    %150 = vector.broadcast %149 : vector<1x8xf32> to vector<256x8xf32>
    %151 = arith.addf %146, %150 : vector<256x8xf32>
    %cst_167 = arith.constant 0.000000e+00 : f32
    %152 = vector.broadcast %cst_167 : f32 to vector<256x8xf32>
    %153 = arith.maximumf %151, %152 : vector<256x8xf32>
    %c0_168 = arith.constant 0 : index
    %c0_169 = arith.constant 0 : index
    %c0_170 = arith.constant 0 : index
    %154 = vector.load %arg9[%c0_168, %c0_169, %c0_170] : memref<1x256x8xf32, #tpu.memory_space<vmem>>, vector<1x256x8xf32>
    %155 = vector.shape_cast %154 : vector<1x256x8xf32> to vector<256x8xf32>
    %156 = vector.shape_cast %153 : vector<256x8xf32> to vector<1x256x8xf32>
    tpu.vector_store %arg9[%c0_168, %c0_169, %c0_170], %156 {strides = array<i32>} : memref<1x256x8xf32, #tpu.memory_space<vmem>>, vector<1x256x8xf32>,
    return
  }
  func.func @transform_0(%arg0: i32) -> (i32, i32, i32, i32) {
    %c0_i32 = arith.constant 0 : i32
    %c0_i32_0 = arith.constant 0 : i32
    %c0_i32_1 = arith.constant 0 : i32
    %c0_i32_2 = arith.constant 0 : i32
    return %arg0, %c0_i32, %c0_i32_0, %c0_i32_1 : i32, i32, i32, i32
  }
  func.func @transform_1(%arg0: i32) -> (i32, i32, i32, i32) {
    %c0_i32 = arith.constant 0 : i32
    %c0_i32_0 = arith.constant 0 : i32
    %c0_i32_1 = arith.constant 0 : i32
    %c0_i32_2 = arith.constant 0 : i32
    return %arg0, %c0_i32, %c0_i32_0, %c0_i32_1 : i32, i32, i32, i32
  }
  func.func @transform_2(%arg0: i32) -> (i32, i32) {
    %c0_i32 = arith.constant 0 : i32
    %c0_i32_0 = arith.constant 0 : i32
    %c0_i32_1 = arith.constant 0 : i32
    return %c0_i32, %c0_i32_0 : i32, i32
  }
  func.func @transform_3(%arg0: i32) -> (i32, i32) {
    %c0_i32 = arith.constant 0 : i32
    %c0_i32_0 = arith.constant 0 : i32
    %c0_i32_1 = arith.constant 0 : i32
    return %c0_i32, %c0_i32_0 : i32, i32
  }
  func.func @transform_4(%arg0: i32) -> (i32, i32) {
    %c0_i32 = arith.constant 0 : i32
    %c0_i32_0 = arith.constant 0 : i32
    %c0_i32_1 = arith.constant 0 : i32
    return %c0_i32, %c0_i32_0 : i32, i32
  }
  func.func @transform_5(%arg0: i32) -> (i32, i32) {
    %c0_i32 = arith.constant 0 : i32
    %c0_i32_0 = arith.constant 0 : i32
    %c0_i32_1 = arith.constant 0 : i32
    return %c0_i32, %c0_i32_0 : i32, i32
  }
  func.func @transform_6(%arg0: i32) -> (i32, i32) {
    %c0_i32 = arith.constant 0 : i32
    %c0_i32_0 = arith.constant 0 : i32
    %c0_i32_1 = arith.constant 0 : i32
    return %c0_i32, %c0_i32_0 : i32, i32
  }
  func.func @transform_7(%arg0: i32) -> (i32, i32) {
    %c0_i32 = arith.constant 0 : i32
    %c0_i32_0 = arith.constant 0 : i32
    %c0_i32_1 = arith.constant 0 : i32
    return %c0_i32, %c0_i32_0 : i32, i32
  }
  func.func @transform_8(%arg0: i32) -> (i32, i32, i32) {
    %c0_i32 = arith.constant 0 : i32
    %c0_i32_0 = arith.constant 0 : i32
    %c0_i32_1 = arith.constant 0 : i32
    return %arg0, %c0_i32, %c0_i32_0 : i32, i32, i32
  }
}

</mosaic_0001>

<bundles_post_ra>
// kernel: tpu_custom_call.1
= control target key start
LH: loop header
LB: loop body
LE: loop exit
PB: predicated region body
PF: predicated region fallthrough
CT: control target
= control target key end

     0   :  { %s7046_s27 = smov 0   ;;  %s10024_s0 = inlined_call_operand.vmem [shape: f32[2,8,8,4], index: 0, kind: input, shape index: {}]   ;;  %s10025_s1 = inlined_call_operand.vmem [shape: f32[2,16,16,4], index: 1, kind: input, shape index: {}]   ;;  %s10026_s2 = inlined_call_operand.vmem [shape: bf16[72,8], index: 2, kind: input, shape index: {}]   ;;  %s10027_s3 = inlined_call_operand.vmem [shape: bf16[72,8], index: 3, kind: input, shape index: {}]   ;;  %s10028_s4 = inlined_call_operand.vmem [shape: f32[1,8], index: 4, kind: input, shape index: {}]   ;;  %s10029_s5 = inlined_call_operand.vmem [shape: f32[1,8], index: 5, kind: input, shape index: {}]   ;;  %s10030_s6 = inlined_call_operand.vmem [shape: f32[1,8], index: 6, kind: input, shape index: {}]   ;;  %s10031_s7 = inlined_call_operand.vmem [shape: f32[1,8], index: 7, kind: input, shape index: {}]   ;;  %s10032_s8 = inlined_call_operand.vmem [shape: f32[2,256,8], index: 8, kind: output, shape index: {}]  }
   0x1 LB: > { %s6765_s28 = sadd.s32 4294967295, %s6989_s27   ;;  %p6769_p0 = scmp.ge.s32.totalorder %s6989_s27, 1  ;;  %s6989_s27 = sphi %s7046_s27, %s18_s27  }
   0x2   : > { %p272_p1 = scmp.lt.s32.totalorder %s6989_s27, 3 }
   0x4   : > { %p273_p2 = pnand %p6769_p0, %p272_p1 }
   0x5   : > { %p7056_p3 = scmp.lt.s32.totalorder (!%p273_p2), %s6765_s28, 1  ;;  %s6992_s12 = smov (!%p273_p2), 4  }
   0x6   : > { %276 = sbr.rel (%p273_p2) target bundleno = 2709 (0xa95), region = 52  ;;  %s6993_s17 = smov (!%p273_p2), 8  }
   0x7   : > { %s6994_s18 = smov (!%p273_p2), 16   ;;  %s6995_s19 = smov (!%p273_p2), 24  }
   0x8   : > { %s6996_s20 = smov (!%p273_p2), 32   ;;  %s6997_s21 = smov (!%p273_p2), 40  }
   0x9   : > { %s6998_s22 = smov (!%p273_p2), 48   ;;  %s6999_s23 = smov (!%p273_p2), 56  }
   0xb   : > { %vm327_vm0 = vcmask 31744   ;;  %vm330_vm1 = vcmask 25600   ;;  %vm1048_vm2 = vcmask 64512   ;;  %v6991_v0 = vmov 0.0   ;;  %s10035_s28 = smov (!%p7056_p3, %s6765_s28), 1 }
   0xc   : > { %705 = vst.msk [vmem:[#allocation3] sm:$0xff] %vm327_vm0, %v6991_v0  ;;  %328 = vst.msk [vmem:[#allocation2] sm:$0xff] %vm327_vm0, %v6991_v0  ;;  %s6825_s30 = sshll.u32 %s10035_s28, 8  ;;  %s6824_s13 = sshll.u32 %s10035_s28, 6  ;;  %vm415_vm3 = vcmask 1040384   ;;  %vm1433_vm4 = vcmask 130112  }
   0xd   : > { %329 = vst.msk [vmem:[#allocation2 + $0x8] sm:$0xff] %vm327_vm0, %v6991_v0  ;;  %332 = vst.msk [vmem:[#allocation2 + $0x18] sm:$0xff] %vm327_vm0, %v6991_v0  ;;  %s7360_s11 = scalar_lea.vmem %s10025_s1, %s6825_s30  ;;  %s7438_s16 = scalar_lea.vmem %s10024_s0, %s6824_s13  ;;  %vm1818_vm5 = vcmask 195712   ;;  %vm2203_vm6 = vcmask 261312   ;;  %vm2588_vm7 = vcmask 326912   ;;  %vm2973_vm8 = vcmask 392512  }
   0xe   : > { %333 = vst.msk [vmem:[#allocation2 + $0x20] sm:$0xff] %vm327_vm0, %v6991_v0  ;;  %335 = vst.msk [vmem:[#allocation2 + $0x30] sm:$0xff] %vm327_vm0, %v6991_v0  ;;  %v759_v1 = vld [vmem:[%s7360_s11] sm:$0xff]  ;;  %v761_v2 = vld [vmem:[%s7360_s11 + $0x10] sm:$0xff]  ;;  %vm3360_vm9 = vcmask 458112   ;;  %vm3745_vm10 = vcmask 523712   ;;  %s9843_s24 = scalar_lea.vmem %s10032_s8, %s6825_s30 }
   0xf   : > { %336 = vst.msk [vmem:[#allocation2 + $0x38] sm:$0xff] %vm327_vm0, %v6991_v0  ;;  %338 = vst.msk [vmem:[#allocation2 + $0x48] sm:$0xff] %vm327_vm0, %v6991_v0  ;;  %v760_v3 = vld [vmem:[%s7360_s11 + $0x8] sm:$0xff]  ;;  %v763_v4 = vld [vmem:[%s7360_s11 + $0x20] sm:$0xff]  ;;  %vm4296_vm11 = vcmask 1043456   ;;  %s7000_s13 = smov 64  }
  0x10   : > { %339 = vst.msk [vmem:[#allocation2 + $0x50] sm:$0xff] %vm327_vm0, %v6991_v0  ;;  %341 = vst.msk [vmem:[#allocation2 + $0x60] sm:$0xff] %vm327_vm0, %v6991_v0  ;;  %v762_v5 = vld [vmem:[%s7360_s11 + $0x18] sm:$0xff]  ;;  %v765_v6 = vld [vmem:[%s7360_s11 + $0x30] sm:$0xff]  ;;  %vm4130_vm12 = vcmask 589312   ;;  %vm4247_vm13 = vcmask 588800  }
  0x11   : > { %342 = vst.msk [vmem:[#allocation2 + $0x68] sm:$0xff] %vm327_vm0, %v6991_v0  ;;  %344 = vst.msk [vmem:[#allocation2 + $0x78] sm:$0xff] %vm327_vm0, %v6991_v0  ;;  %v764_v9 = vld [vmem:[%s7360_s11 + $0x28] sm:$0xff]  ;;  %v767_v10 = vld [vmem:[%s7360_s11 + $0x40] sm:$0xff]  ;;  %vm4573_vm14 = vcmask 58368  }
  0x12   : > { %345 = vst.msk [vmem:[#allocation2 + $0x80] sm:$0xff] %vm327_vm0, %v6991_v0  ;;  %347 = vst.msk [vmem:[#allocation2 + $0x90] sm:$0xff] %vm327_vm0, %v6991_v0  ;;  %v766_v11 = vld [vmem:[%s7360_s11 + $0x38] sm:$0xff]  ;;  %v769_v12 = vld [vmem:[%s7360_s11 + $0x50] sm:$0xff] }
  0x13   : > { %348 = vst.msk [vmem:[#allocation2 + $0x98] sm:$0xff] %vm327_vm0, %v6991_v0  ;;  %350 = vst.msk [vmem:[#allocation2 + $0xa8] sm:$0xff] %vm327_vm0, %v6991_v0  ;;  %v856_v7 = vld [vmem:[#allocation3] sm:$0xff]  ;;  %v768_v13 = vld [vmem:[%s7360_s11 + $0x48] sm:$0xff] }
  0x14   : > { %351 = vst.msk [vmem:[#allocation2 + $0xb0] sm:$0xff] %vm327_vm0, %v6991_v0  ;;  %353 = vst.msk [vmem:[#allocation2 + $0xc0] sm:$0xff] %vm327_vm0, %v6991_v0  ;;  %920 = vrot.lane.b32.xlu0 %v856_v7, %s6992_s12  ;;  %v771_v14 = vld [vmem:[%s7360_s11 + $0x60] sm:$0xff]  ;;  %v770_v15 = vld [vmem:[%s7360_s11 + $0x58] sm:$0xff] }
  0x15   : > { %354 = vst.msk [vmem:[#allocation2 + $0xc8] sm:$0xff] %vm327_vm0, %v6991_v0  ;;  %356 = vst.msk [vmem:[#allocation2 + $0xd8] sm:$0xff] %vm327_vm0, %v6991_v0  ;;  %v773_v16 = vld [vmem:[%s7360_s11 + $0x70] sm:$0xff]  ;;  %v772_v17 = vld [vmem:[%s7360_s11 + $0x68] sm:$0xff] }
  0x16   : > { %357 = vst.msk [vmem:[#allocation2 + $0xe0] sm:$0xff] %vm327_vm0, %v6991_v0  ;;  %359 = vst.msk [vmem:[#allocation2 + $0xf0] sm:$0xff] %vm327_vm0, %v6991_v0  ;;  %v775_v18 = vld [vmem:[%s7360_s11 + $0x80] sm:$0xff]  ;;  %v774_v19 = vld [vmem:[%s7360_s11 + $0x78] sm:$0xff] }
  0x17   : > { %360 = vst.msk [vmem:[#allocation2 + $0xf8] sm:$0xff] %vm327_vm0, %v6991_v0  ;;  %362 = vst.msk [vmem:[#allocation2 + $0x108] sm:$0xff] %vm327_vm0, %v6991_v0  ;;  %v777_v20 = vld [vmem:[%s7360_s11 + $0x90] sm:$0xff]  ;;  %v776_v21 = vld [vmem:[%s7360_s11 + $0x88] sm:$0xff] }
  0x18   : > { %363 = vst.msk [vmem:[#allocation2 + $0x110] sm:$0xff] %vm327_vm0, %v6991_v0  ;;  %365 = vst.msk [vmem:[#allocation2 + $0x120] sm:$0xff] %vm327_vm0, %v6991_v0  ;;  %v779_v22 = vld [vmem:[%s7360_s11 + $0xa0] sm:$0xff]  ;;  %v778_v23 = vld [vmem:[%s7360_s11 + $0x98] sm:$0xff] }
  0x19   : > { %366 = vst.msk [vmem:[#allocation2 + $0x128] sm:$0xff] %vm327_vm0, %v6991_v0  ;;  %368 = vst.msk [vmem:[#allocation2 + $0x138] sm:$0xff] %vm327_vm0, %v6991_v0  ;;  %v781_v24 = vld [vmem:[%s7360_s11 + $0xb0] sm:$0xff]  ;;  %v780_v28 = vld [vmem:[%s7360_s11 + $0xa8] sm:$0xff] }
  0x1a   : > { %369 = vst.msk [vmem:[#allocation2 + $0x140] sm:$0xff] %vm327_vm0, %v6991_v0  ;;  %371 = vst.msk [vmem:[#allocation2 + $0x150] sm:$0xff] %vm327_vm0, %v6991_v0  ;;  %v783_v29 = vld [vmem:[%s7360_s11 + $0xc0] sm:$0xff]  ;;  %v782_v33 = vld [vmem:[%s7360_s11 + $0xb8] sm:$0xff] }
  0x1b   : > { %372 = vst.msk [vmem:[#allocation2 + $0x158] sm:$0xff] %vm327_vm0, %v6991_v0  ;;  %374 = vst.msk [vmem:[#allocation2 + $0x168] sm:$0xff] %vm327_vm0, %v6991_v0  ;;  %v785_v34 = vld [vmem:[%s7360_s11 + $0xd0] sm:$0xff]  ;;  %v784_v35 = vld [vmem:[%s7360_s11 + $0xc8] sm:$0xff] }
  0x1c   : > { %375 = vst.msk [vmem:[#allocation2 + $0x170] sm:$0xff] %vm327_vm0, %v6991_v0  ;;  %377 = vst.msk [vmem:[#allocation2 + $0x180] sm:$0xff] %vm327_vm0, %v6991_v0  ;;  %v787_v36 = vld [vmem:[%s7360_s11 + $0xe0] sm:$0xff]  ;;  %v786_v37 = vld [vmem:[%s7360_s11 + $0xd8] sm:$0xff] }
  0x1d   : > { %378 = vst.msk [vmem:[#allocation2 + $0x188] sm:$0xff] %vm327_vm0, %v6991_v0  ;;  %380 = vst.msk [vmem:[#allocation2 + $0x198] sm:$0xff] %vm327_vm0, %v6991_v0  ;;  %v788_v39 = vld [vmem:[%s7360_s11 + $0xe8] sm:$0xff]  ;;  %v383_v46 = vld [vmem:[%s7438_s16] sm:$0xff] }
  0x1e   : > { %381 = vst.msk [vmem:[#allocation2 + $0x1a0] sm:$0xff] %vm327_vm0, %v6991_v0  ;;  %706 = vst.msk [vmem:[#allocation3 + $0x8] sm:$0xff] %vm327_vm0, %v6991_v0  ;;  %v399_v47 = vrot.slane %v383_v46, 7  ;;  %v441_v48 = vrot.slane %v383_v46, 1  ;;  %v481_v49 = vrot.slane %v383_v46, 2  ;;  %v521_v50 = vrot.slane %v383_v46, 3 }
  0x1f   : > { %708 = vst.msk [vmem:[#allocation3 + $0x18] sm:$0xff] %vm327_vm0, %v6991_v0  ;;  %709 = vst.msk [vmem:[#allocation3 + $0x20] sm:$0xff] %vm327_vm0, %v6991_v0  ;;  %v561_v52 = vrot.slane %v383_v46, 4  ;;  %v601_v53 = vrot.slane %v383_v46, 5  ;;  %v641_v54 = vrot.slane %v383_v46, 6  ;;  %v384_v55 = vld [vmem:[%s7438_s16 + $0x8] sm:$0xff] }
  0x20   : > { %711 = vst.msk [vmem:[#allocation3 + $0x30] sm:$0xff] %vm327_vm0, %v6991_v0  ;;  %712 = vst.msk [vmem:[#allocation3 + $0x38] sm:$0xff] %vm327_vm0, %v6991_v0  ;;  %v416_v56 = vsel %vm415_vm3, %v383_v46, %v399_v47  ;;  %v457_v57 = vsel %vm415_vm3, %v441_v48, %v383_v46  ;;  %v497_v58 = vsel %vm415_vm3, %v481_v49, %v441_v48  ;;  %v7450_v60 = vld [vmem:[%s7438_s16 + $0x10] sm:$0xff] }
  0x21   : > { %714 = vst.msk [vmem:[#allocation3 + $0x48] sm:$0xff] %vm327_vm0, %v6991_v0  ;;  %715 = vst.msk [vmem:[#allocation3 + $0x50] sm:$0xff] %vm327_vm0, %v6991_v0  ;;  %v537_v59 = vsel %vm415_vm3, %v521_v50, %v481_v49  ;;  %v577_v62 = vsel %vm415_vm3, %v561_v52, %v521_v50  ;;  %v617_v63 = vsel %vm415_vm3, %v601_v53, %v561_v52 }
  0x22   : > { %717 = vst.msk [vmem:[#allocation3 + $0x60] sm:$0xff] %vm327_vm0, %v6991_v0  ;;  %718 = vst.msk [vmem:[#allocation3 + $0x68] sm:$0xff] %vm327_vm0, %v6991_v0 }
  0x23   : > { %720 = vst.msk [vmem:[#allocation3 + $0x78] sm:$0xff] %vm327_vm0, %v6991_v0  ;;  %721 = vst.msk [vmem:[#allocation3 + $0x80] sm:$0xff] %vm327_vm0, %v6991_v0 }
  0x24   : > { %723 = vst.msk [vmem:[#allocation3 + $0x90] sm:$0xff] %vm327_vm0, %v6991_v0  ;;  %724 = vst.msk [vmem:[#allocation3 + $0x98] sm:$0xff] %vm327_vm0, %v6991_v0 }
  0x25   : > { %726 = vst.msk [vmem:[#allocation3 + $0xa8] sm:$0xff] %vm327_vm0, %v6991_v0  ;;  %727 = vst.msk [vmem:[#allocation3 + $0xb0] sm:$0xff] %vm327_vm0, %v6991_v0  ;;  %v857_v8 = vld [vmem:[#allocation3 + $0x8] sm:$0xff] }
  0x26   : > { %729 = vst.msk [vmem:[#allocation3 + $0xc0] sm:$0xff] %vm327_vm0, %v6991_v0  ;;  %730 = vst.msk [vmem:[#allocation3 + $0xc8] sm:$0xff] %vm327_vm0, %v6991_v0  ;;  %922 = vrot.lane.b32.xlu0 %v857_v8, %s6992_s12  ;;  %v562_v8 = vrot.slane %v384_v55, 4 }
  0x27   : > { %732 = vst.msk [vmem:[#allocation3 + $0xd8] sm:$0xff] %vm327_vm0, %v6991_v0  ;;  %733 = vst.msk [vmem:[#allocation3 + $0xe0] sm:$0xff] %vm327_vm0, %v6991_v0 }
  0x28   : > { %735 = vst.msk [vmem:[#allocation3 + $0xf0] sm:$0xff] %vm327_vm0, %v6991_v0  ;;  %736 = vst.msk [vmem:[#allocation3 + $0xf8] sm:$0xff] %vm327_vm0, %v6991_v0 }
  0x29   : > { %738 = vst.msk [vmem:[#allocation3 + $0x108] sm:$0xff] %vm327_vm0, %v6991_v0  ;;  %739 = vst.msk [vmem:[#allocation3 + $0x110] sm:$0xff] %vm327_vm0, %v6991_v0 }
  0x2a   : > { %741 = vst.msk [vmem:[#allocation3 + $0x120] sm:$0xff] %vm327_vm0, %v6991_v0  ;;  %742 = vst.msk [vmem:[#allocation3 + $0x128] sm:$0xff] %vm327_vm0, %v6991_v0 }
  0x2b   : > { %744 = vst.msk [vmem:[#allocation3 + $0x138] sm:$0xff] %vm327_vm0, %v6991_v0  ;;  %745 = vst.msk [vmem:[#allocation3 + $0x140] sm:$0xff] %vm327_vm0, %v6991_v0 }
  0x2c   : > { %747 = vst.msk [vmem:[#allocation3 + $0x150] sm:$0xff] %vm327_vm0, %v6991_v0  ;;  %748 = vst.msk [vmem:[#allocation3 + $0x158] sm:$0xff] %vm327_vm0, %v6991_v0 }
  0x2d   : > { %750 = vst.msk [vmem:[#allocation3 + $0x168] sm:$0xff] %vm327_vm0, %v6991_v0  ;;  %751 = vst.msk [vmem:[#allocation3 + $0x170] sm:$0xff] %vm327_vm0, %v6991_v0 }
  0x2e   : > { %753 = vst.msk [vmem:[#allocation3 + $0x180] sm:$0xff] %vm327_vm0, %v6991_v0  ;;  %754 = vst.msk [vmem:[#allocation3 + $0x188] sm:$0xff] %vm327_vm0, %v6991_v0 }
  0x2f   : > { %756 = vst.msk [vmem:[#allocation3 + $0x198] sm:$0xff] %vm327_vm0, %v6991_v0  ;;  %757 = vst.msk [vmem:[#allocation3 + $0x1a0] sm:$0xff] %vm327_vm0, %v6991_v0 }
  0x30   : > { %710 = vst.msk [vmem:[#allocation3 + $0x28] sm:$0x3] %vm330_vm1, %v6991_v0  ;;  %331 = vst.msk [vmem:[#allocation2 + $0x10] sm:$0x3] %vm330_vm1, %v6991_v0 }
  0x31   : > { %334 = vst.msk [vmem:[#allocation2 + $0x28] sm:$0x3] %vm330_vm1, %v6991_v0  ;;  %337 = vst.msk [vmem:[#allocation2 + $0x40] sm:$0x3] %vm330_vm1, %v6991_v0 }
  0x32   : > { %340 = vst.msk [vmem:[#allocation2 + $0x58] sm:$0x3] %vm330_vm1, %v6991_v0  ;;  %343 = vst.msk [vmem:[#allocation2 + $0x70] sm:$0x3] %vm330_vm1, %v6991_v0 }
  0x33   : > { %346 = vst.msk [vmem:[#allocation2 + $0x88] sm:$0x3] %vm330_vm1, %v6991_v0  ;;  %349 = vst.msk [vmem:[#allocation2 + $0xa0] sm:$0x3] %vm330_vm1, %v6991_v0 }
  0x34   : > { %352 = vst.msk [vmem:[#allocation2 + $0xb8] sm:$0x3] %vm330_vm1, %v6991_v0  ;;  %355 = vst.msk [vmem:[#allocation2 + $0xd0] sm:$0x3] %vm330_vm1, %v6991_v0 }
  0x35   : > { %358 = vst.msk [vmem:[#allocation2 + $0xe8] sm:$0x3] %vm330_vm1, %v6991_v0  ;;  %361 = vst.msk [vmem:[#allocation2 + $0x100] sm:$0x3] %vm330_vm1, %v6991_v0 }
  0x36   : > { %364 = vst.msk [vmem:[#allocation2 + $0x118] sm:$0x3] %vm330_vm1, %v6991_v0  ;;  %367 = vst.msk [vmem:[#allocation2 + $0x130] sm:$0x3] %vm330_vm1, %v6991_v0 }
  0x37   : > { %370 = vst.msk [vmem:[#allocation2 + $0x148] sm:$0x3] %vm330_vm1, %v6991_v0  ;;  %373 = vst.msk [vmem:[#allocation2 + $0x160] sm:$0x3] %vm330_vm1, %v6991_v0 }
  0x38   : > { %376 = vst.msk [vmem:[#allocation2 + $0x178] sm:$0x3] %vm330_vm1, %v6991_v0  ;;  %379 = vst.msk [vmem:[#allocation2 + $0x190] sm:$0x3] %vm330_vm1, %v6991_v0 }
  0x39   : > { %382 = vst.msk [vmem:[#allocation2 + $0x1a8] sm:$0x3] %vm330_vm1, %v6991_v0  ;;  %707 = vst.msk [vmem:[#allocation3 + $0x10] sm:$0x3] %vm330_vm1, %v6991_v0 }
  0x3a   : > { %713 = vst.msk [vmem:[#allocation3 + $0x40] sm:$0x3] %vm330_vm1, %v6991_v0  ;;  %716 = vst.msk [vmem:[#allocation3 + $0x58] sm:$0x3] %vm330_vm1, %v6991_v0 }
  0x3b   : > { %719 = vst.msk [vmem:[#allocation3 + $0x70] sm:$0x3] %vm330_vm1, %v6991_v0  ;;  %722 = vst.msk [vmem:[#allocation3 + $0x88] sm:$0x3] %vm330_vm1, %v6991_v0 }
  0x3c   : > { %725 = vst.msk [vmem:[#allocation3 + $0xa0] sm:$0x3] %vm330_vm1, %v6991_v0  ;;  %728 = vst.msk [vmem:[#allocation3 + $0xb8] sm:$0x3] %vm330_vm1, %v6991_v0 }
  0x3d   : > { %731 = vst.msk [vmem:[#allocation3 + $0xd0] sm:$0x3] %vm330_vm1, %v6991_v0  ;;  %734 = vst.msk [vmem:[#allocation3 + $0xe8] sm:$0x3] %vm330_vm1, %v6991_v0 }
  0x3e   : > { %737 = vst.msk [vmem:[#allocation3 + $0x100] sm:$0x3] %vm330_vm1, %v6991_v0  ;;  %740 = vst.msk [vmem:[#allocation3 + $0x118] sm:$0x3] %vm330_vm1, %v6991_v0 }
  0x3f   : > { %743 = vst.msk [vmem:[#allocation3 + $0x130] sm:$0x3] %vm330_vm1, %v6991_v0  ;;  %746 = vst.msk [vmem:[#allocation3 + $0x148] sm:$0x3] %vm330_vm1, %v6991_v0 }
  0x40   : > { %749 = vst.msk [vmem:[#allocation3 + $0x160] sm:$0x3] %vm330_vm1, %v6991_v0  ;;  %752 = vst.msk [vmem:[#allocation3 + $0x178] sm:$0x3] %vm330_vm1, %v6991_v0 }
  0x41   : > { %755 = vst.msk [vmem:[#allocation3 + $0x190] sm:$0x3] %vm330_vm1, %v6991_v0  ;;  %758 = vst.msk [vmem:[#allocation3 + $0x1a8] sm:$0x3] %vm330_vm1, %v6991_v0 }
  0x42   : > { %4571 = vst.msk [vmem:[#allocation4] sm:$0xff] %vm1048_vm2, %v6991_v0  ;;  %4572 = vst.msk [vmem:[#allocation4 + $0x8] sm:$0xff] %vm1048_vm2, %v6991_v0 }
  0x43   : > { %4575 = vst.msk [vmem:[#allocation4 + $0x18] sm:$0xff] %vm1048_vm2, %v6991_v0  ;;  %4576 = vst.msk [vmem:[#allocation4 + $0x20] sm:$0xff] %vm1048_vm2, %v6991_v0 }
  0x44   : > { %4578 = vst.msk [vmem:[#allocation4 + $0x30] sm:$0xff] %vm1048_vm2, %v6991_v0  ;;  %4579 = vst.msk [vmem:[#allocation4 + $0x38] sm:$0xff] %vm1048_vm2, %v6991_v0 }
  0x45   : > { %4581 = vst.msk [vmem:[#allocation4 + $0x48] sm:$0xff] %vm1048_vm2, %v6991_v0  ;;  %4582 = vst.msk [vmem:[#allocation4 + $0x50] sm:$0xff] %vm1048_vm2, %v6991_v0 }
  0x46   : > { %4584 = vst.msk [vmem:[#allocation4 + $0x60] sm:$0xff] %vm1048_vm2, %v6991_v0  ;;  %4585 = vst.msk [vmem:[#allocation4 + $0x68] sm:$0xff] %vm1048_vm2, %v6991_v0 }
  0x47   : > { %4587 = vst.msk [vmem:[#allocation4 + $0x78] sm:$0xff] %vm1048_vm2, %v6991_v0  ;;  %4588 = vst.msk [vmem:[#allocation4 + $0x80] sm:$0xff] %vm1048_vm2, %v6991_v0 }
  0x48   : > { %4590 = vst.msk [vmem:[#allocation4 + $0x90] sm:$0xff] %vm1048_vm2, %v6991_v0  ;;  %4591 = vst.msk [vmem:[#allocation4 + $0x98] sm:$0xff] %vm1048_vm2, %v6991_v0 }
  0x49   : > { %4593 = vst.msk [vmem:[#allocation4 + $0xa8] sm:$0xff] %vm1048_vm2, %v6991_v0  ;;  %4594 = vst.msk [vmem:[#allocation4 + $0xb0] sm:$0xff] %vm1048_vm2, %v6991_v0 }
  0x4a   : > { %4596 = vst.msk [vmem:[#allocation4 + $0xc0] sm:$0xff] %vm1048_vm2, %v6991_v0  ;;  %4597 = vst.msk [vmem:[#allocation4 + $0xc8] sm:$0xff] %vm1048_vm2, %v6991_v0 }
  0x4b   : > { %4599 = vst.msk [vmem:[#allocation4 + $0xd8] sm:$0xff] %vm1048_vm2, %v6991_v0  ;;  %4600 = vst.msk [vmem:[#allocation4 + $0xe0] sm:$0xff] %vm1048_vm2, %v6991_v0 }
  0x4c   : > { %4602 = vst.msk [vmem:[#allocation4 + $0xf0] sm:$0xff] %vm1048_vm2, %v6991_v0  ;;  %4603 = vst.msk [vmem:[#allocation4 + $0xf8] sm:$0xff] %vm1048_vm2, %v6991_v0 }
  0x4d   : > { %4605 = vst.msk [vmem:[#allocation4 + $0x108] sm:$0xff] %vm1048_vm2, %v6991_v0  ;;  %4606 = vst.msk [vmem:[#allocation4 + $0x110] sm:$0xff] %vm1048_vm2, %v6991_v0 }
  0x4e   : > { %4608 = vst.msk [vmem:[#allocation4 + $0x120] sm:$0xff] %vm1048_vm2, %v6991_v0  ;;  %4609 = vst.msk [vmem:[#allocation4 + $0x128] sm:$0xff] %vm1048_vm2, %v6991_v0 }
  0x4f   : > { %4611 = vst.msk [vmem:[#allocation4 + $0x138] sm:$0xff] %vm1048_vm2, %v6991_v0  ;;  %4612 = vst.msk [vmem:[#allocation4 + $0x140] sm:$0xff] %vm1048_vm2, %v6991_v0 }
  0x50   : > { %4614 = vst.msk [vmem:[#allocation4 + $0x150] sm:$0xff] %vm1048_vm2, %v6991_v0  ;;  %4615 = vst.msk [vmem:[#allocation4 + $0x158] sm:$0xff] %vm1048_vm2, %v6991_v0 }
  0x51   : > { %4617 = vst.msk [vmem:[#allocation4 + $0x168] sm:$0xff] %vm1048_vm2, %v6991_v0  ;;  %4618 = vst.msk [vmem:[#allocation4 + $0x170] sm:$0xff] %vm1048_vm2, %v6991_v0 }
  0x52   : > { %4620 = vst.msk [vmem:[#allocation4 + $0x180] sm:$0xff] %vm1048_vm2, %v6991_v0  ;;  %4621 = vst.msk [vmem:[#allocation4 + $0x188] sm:$0xff] %vm1048_vm2, %v6991_v0 }
  0x53   : > { %4623 = vst.msk [vmem:[#allocation4 + $0x198] sm:$0xff] %vm1048_vm2, %v6991_v0  ;;  %4624 = vst.msk [vmem:[#allocation4 + $0x1a0] sm:$0xff] %vm1048_vm2, %v6991_v0 }
  0x54   : > { %792 = vst.msk [vmem:[#allocation3 + $0x19] sm:$0xff] %vm327_vm0, %v759_v1  ;;  %794 = vst.msk [vmem:[#allocation3 + $0x31] sm:$0xff] %vm327_vm0, %v761_v2  ;;  %v657_v1 = vsel %vm415_vm3, %v641_v54, %v601_v53  ;;  %v681_v2 = vsel %vm415_vm3, %v399_v47, %v641_v54  ;;  %v7562_v54 = vld [vmem:[%s7438_s16 + $0x28] sm:$0xff] }
  0x55   : > { %793 = vst.msk [vmem:[#allocation3 + $0x21] sm:$0xff] %vm327_vm0, %v760_v3  ;;  %796 = vst.msk [vmem:[#allocation3 + $0x49] sm:$0xff] %vm327_vm0, %v763_v4  ;;  %v400_v3 = vrot.slane %v384_v55, 7  ;;  %v442_v4 = vrot.slane %v384_v55, 1 }
  0x56   : > { %795 = vst.msk [vmem:[#allocation3 + $0x39] sm:$0xff] %vm327_vm0, %v762_v5  ;;  %798 = vst.msk [vmem:[#allocation3 + $0x61] sm:$0xff] %vm327_vm0, %v765_v6  ;;  %v482_v5 = vrot.slane %v384_v55, 2  ;;  %v522_v6 = vrot.slane %v384_v55, 3 }
  0x57   : > { %797 = vst.msk [vmem:[#allocation3 + $0x51] sm:$0xff] %vm327_vm0, %v764_v9  ;;  %800 = vst.msk [vmem:[#allocation3 + $0x79] sm:$0xff] %vm327_vm0, %v767_v10  ;;  %v602_v9 = vrot.slane %v384_v55, 5  ;;  %v642_v10 = vrot.slane %v384_v55, 6 }
  0x58   : > { %799 = vst.msk [vmem:[#allocation3 + $0x69] sm:$0xff] %vm327_vm0, %v766_v11  ;;  %802 = vst.msk [vmem:[#allocation3 + $0x91] sm:$0xff] %vm327_vm0, %v769_v12  ;;  %v401_v11 = vrot.slane %v7450_v60, 7  ;;  %v7475_v12 = vld [vmem:[%s7438_s16 + $0x18] sm:$0xff] }
  0x59   : > { %801 = vst.msk [vmem:[#allocation3 + $0x81] sm:$0xff] %vm327_vm0, %v768_v13  ;;  %804 = vst.msk [vmem:[#allocation3 + $0xa9] sm:$0xff] %vm327_vm0, %v771_v14  ;;  %v417_v13 = vsel %vm415_vm3, %v384_v55, %v400_v3  ;;  %v458_v14 = vsel %vm415_vm3, %v442_v4, %v384_v55  ;;  %v564_v46 = vrot.slane %v7475_v12, 4  ;;  %v604_v47 = vrot.slane %v7475_v12, 5 }
  0x5a   : > { %803 = vst.msk [vmem:[#allocation3 + $0x99] sm:$0xff] %vm327_vm0, %v770_v15  ;;  %806 = vst.msk [vmem:[#allocation3 + $0xc1] sm:$0xff] %vm327_vm0, %v773_v16  ;;  %v498_v15 = vsel %vm415_vm3, %v482_v5, %v442_v4  ;;  %v538_v16 = vsel %vm415_vm3, %v522_v6, %v482_v5  ;;  %v644_v48 = vrot.slane %v7475_v12, 6  ;;  %v404_v5 = vrot.slane %v7562_v54, 7 }
  0x5b   : > { %805 = vst.msk [vmem:[#allocation3 + $0xb1] sm:$0xff] %vm327_vm0, %v772_v17  ;;  %808 = vst.msk [vmem:[#allocation3 + $0xd9] sm:$0xff] %vm327_vm0, %v775_v18  ;;  %v858_v25 = vld [vmem:[#allocation3 + $0x18] sm:$0xff]  ;;  %v860_v26 = vld [vmem:[#allocation3 + $0x30] sm:$0xff]  ;;  %v578_v18 = vsel %vm415_vm3, %v562_v8, %v522_v6 }
  0x5c   : > { %807 = vst.msk [vmem:[#allocation3 + $0xc9] sm:$0xff] %vm327_vm0, %v774_v19  ;;  %810 = vst.msk [vmem:[#allocation3 + $0xf1] sm:$0xff] %vm327_vm0, %v777_v20  ;;  %924 = vrot.lane.b32.xlu1 %v858_v25, %s6992_s12  ;;  %v859_v27 = vld [vmem:[#allocation3 + $0x20] sm:$0xff]  ;;  %928 = vrot.lane.b32.xlu0 %v860_v26, %s6992_s12  ;;  %v862_v30 = vld [vmem:[#allocation3 + $0x48] sm:$0xff]  ;;  %v618_v19 = vsel %vm415_vm3, %v602_v9, %v562_v8  ;;  %v658_v20 = vsel %vm415_vm3, %v642_v10, %v602_v9  ;;  %v523_v25 = vrot.slane %v7450_v60, 3 }
  0x5d   : > { %809 = vst.msk [vmem:[#allocation3 + $0xe1] sm:$0xff] %vm327_vm0, %v776_v21  ;;  %812 = vst.msk [vmem:[#allocation3 + $0x109] sm:$0xff] %vm327_vm0, %v779_v22  ;;  %v861_v31 = vld [vmem:[#allocation3 + $0x38] sm:$0xff]  ;;  %v864_v32 = vld [vmem:[#allocation3 + $0x60] sm:$0xff]  ;;  %v682_v21 = vsel %vm415_vm3, %v400_v3, %v642_v10  ;;  %v418_v22 = vsel %vm415_vm3, %v7450_v60, %v401_v11  ;;  %v486_v8 = vrot.slane %v7562_v54, 2  ;;  %v526_v9 = vrot.slane %v7562_v54, 3 }
  0x5e   : > { %811 = vst.msk [vmem:[#allocation3 + $0xf9] sm:$0xff] %vm327_vm0, %v778_v23  ;;  %814 = vst.msk [vmem:[#allocation3 + $0x121] sm:$0xff] %vm327_vm0, %v781_v24  ;;  %v863_v38 = vld [vmem:[#allocation3 + $0x50] sm:$0xff]  ;;  %v866_v40 = vld [vmem:[#allocation3 + $0x78] sm:$0xff]  ;;  %v443_v23 = vrot.slane %v7450_v60, 1  ;;  %v483_v24 = vrot.slane %v7450_v60, 2 }
  0x5f   : > { %813 = vst.msk [vmem:[#allocation3 + $0x111] sm:$0xff] %vm327_vm0, %v780_v28  ;;  %816 = vst.msk [vmem:[#allocation3 + $0x139] sm:$0xff] %vm327_vm0, %v783_v29  ;;  %v865_v41 = vld [vmem:[#allocation3 + $0x68] sm:$0xff]  ;;  %v868_v42 = vld [vmem:[#allocation3 + $0x90] sm:$0xff]  ;;  %v603_v28 = vrot.slane %v7450_v60, 5  ;;  %v643_v29 = vrot.slane %v7450_v60, 6 }
  0x60   : > { %926 = vrot.lane.b32.xlu1 %v859_v27, %s6992_s12  ;;  %932 = vrot.lane.b32.xlu0 %v862_v30, %s6992_s12  ;;  %815 = vst.msk [vmem:[#allocation3 + $0x129] sm:$0xff] %vm327_vm0, %v782_v33  ;;  %818 = vst.msk [vmem:[#allocation3 + $0x151] sm:$0xff] %vm327_vm0, %v785_v34  ;;  %v867_v43 = vld [vmem:[#allocation3 + $0x80] sm:$0xff]  ;;  %v870_v44 = vld [vmem:[#allocation3 + $0xa8] sm:$0xff]  ;;  %v563_v27 = vrot.slane %v7450_v60, 4  ;;  %v402_v30 = vrot.slane %v7475_v12, 7  ;;  %v539_v33 = vsel %vm415_vm3, %v523_v25, %v483_v24 }
  0x61   : > { %817 = vst.msk [vmem:[#allocation3 + $0x141] sm:$0xff] %vm327_vm0, %v784_v35  ;;  %820 = vst.msk [vmem:[#allocation3 + $0x169] sm:$0xff] %vm327_vm0, %v787_v36  ;;  %v869_v45 = vld [vmem:[#allocation3 + $0x98] sm:$0xff]  ;;  %v872_v51 = vld [vmem:[#allocation3 + $0xc0] sm:$0xff]  ;;  %v444_v34 = vrot.slane %v7475_v12, 1 }
  0x62   : > { %819 = vst.msk [vmem:[#allocation3 + $0x159] sm:$0xff] %vm327_vm0, %v786_v37  ;;  %821 = vst.msk [vmem:[#allocation3 + $0x171] sm:$0xff] %vm327_vm0, %v788_v39  ;;  %v871_v61 = vld [vmem:[#allocation3 + $0xb0] sm:$0xff]  ;;  %v874_v7 = vld [vmem:[#allocation3 + $0xd8] sm:$0xff]  ;;  %v579_v37 = vsel %vm415_vm3, %v563_v27, %v523_v25  ;;  %v659_v39 = vsel %vm415_vm3, %v643_v29, %v603_v28 }
  0x63   : > { %425 = vst.msk [vmem:[#allocation2 + $0x19] sm:$0x3] %vm330_vm1, %v416_v56  ;;  %465 = vst.msk [vmem:[#allocation2 + $0x1b] sm:$0x3] %vm330_vm1, %v457_v57  ;;  %v873_v17 = vld [vmem:[#allocation3 + $0xc8] sm:$0xff]  ;;  %v876_v26 = vld [vmem:[#allocation3 + $0xf0] sm:$0xff] }
  0x64   : > { %930 = vrot.lane.b32.xlu1 %v861_v31, %s6992_s12  ;;  %936 = vrot.lane.b32.xlu0 %v864_v32, %s6992_s12  ;;  %505 = vst.msk [vmem:[#allocation2 + $0x1d] sm:$0x3] %vm330_vm1, %v497_v58  ;;  %545 = vst.msk [vmem:[#allocation2 + $0x1f] sm:$0x3] %vm330_vm1, %v537_v59  ;;  %v459_v31 = vsel %vm415_vm3, %v443_v23, %v7450_v60  ;;  %v499_v32 = vsel %vm415_vm3, %v483_v24, %v443_v23  ;;  %v7521_v35 = vld [vmem:[%s7438_s16 + $0x20] sm:$0xff]  ;;  %v875_v36 = vld [vmem:[#allocation3 + $0xe0] sm:$0xff] }
  0x65   : > { %426 = vst.msk [vmem:[#allocation2 + $0x31] sm:$0x3] %vm330_vm1, %v416_v56  ;;  %466 = vst.msk [vmem:[#allocation2 + $0x33] sm:$0x3] %vm330_vm1, %v457_v57  ;;  %v403_v49 = vrot.slane %v7521_v35, 7  ;;  %v445_v52 = vrot.slane %v7521_v35, 1  ;;  %v620_v57 = vsel %vm415_vm3, %v604_v47, %v564_v46 }
  0x66   : > { %506 = vst.msk [vmem:[#allocation2 + $0x35] sm:$0x3] %vm330_vm1, %v497_v58  ;;  %546 = vst.msk [vmem:[#allocation2 + $0x37] sm:$0x3] %vm330_vm1, %v537_v59  ;;  %v485_v53 = vrot.slane %v7521_v35, 2  ;;  %v877_v55 = vld [vmem:[#allocation3 + $0xf8] sm:$0xff]  ;;  %v660_v58 = vsel %vm415_vm3, %v644_v48, %v604_v47  ;;  %v684_v59 = vsel %vm415_vm3, %v402_v30, %v644_v48 }
  0x67   : > { %585 = vst.msk [vmem:[#allocation2 + $0x21] sm:$0x3] %vm330_vm1, %v577_v62  ;;  %625 = vst.msk [vmem:[#allocation2 + $0x23] sm:$0x3] %vm330_vm1, %v617_v63  ;;  %v420_v60 = vsel %vm415_vm3, %v7521_v35, %v403_v49  ;;  %v605_v3 = vrot.slane %v7521_v35, 5  ;;  %v645_v4 = vrot.slane %v7521_v35, 6 }
  0x68   : > { %934 = vrot.lane.b32.xlu1 %v863_v38, %s6992_s12  ;;  %940 = vrot.lane.b32.xlu0 %v866_v40, %s6992_s12  ;;  %665 = vst.msk [vmem:[#allocation2 + $0x25] sm:$0x3] %vm330_vm1, %v657_v1  ;;  %689 = vst.msk [vmem:[#allocation2 + $0x27] sm:$0x3] %vm330_vm1, %v681_v2  ;;  %v619_v38 = vsel %vm415_vm3, %v603_v28, %v563_v27  ;;  %v683_v40 = vsel %vm415_vm3, %v401_v11, %v643_v29  ;;  %v7603_v10 = vld [vmem:[%s7438_s16 + $0x30] sm:$0xff]  ;;  %v879_v11 = vld [vmem:[#allocation3 + $0x110] sm:$0xff] }
  0x69   : > { %586 = vst.msk [vmem:[#allocation2 + $0x39] sm:$0x3] %vm330_vm1, %v577_v62  ;;  %626 = vst.msk [vmem:[#allocation2 + $0x3b] sm:$0x3] %vm330_vm1, %v617_v63  ;;  %v501_v62 = vsel %vm415_vm3, %v485_v53, %v445_v52  ;;  %v525_v63 = vrot.slane %v7521_v35, 3  ;;  %v646_v23 = vrot.slane %v7562_v54, 6 }
  0x6a   : > { %666 = vst.msk [vmem:[#allocation2 + $0x3d] sm:$0x3] %vm330_vm1, %v657_v1  ;;  %690 = vst.msk [vmem:[#allocation2 + $0x3f] sm:$0x3] %vm330_vm1, %v681_v2  ;;  %v880_v1 = vld [vmem:[#allocation3 + $0x120] sm:$0xff]  ;;  %v565_v2 = vrot.slane %v7521_v35, 4 }
  0x6b   : > { %427 = vst.msk [vmem:[#allocation2 + $0x49] sm:$0x3] %vm330_vm1, %v417_v13  ;;  %467 = vst.msk [vmem:[#allocation2 + $0x4b] sm:$0x3] %vm330_vm1, %v458_v14  ;;  %v541_v6 = vsel %vm415_vm3, %v525_v63, %v485_v53  ;;  %v405_v24 = vrot.slane %v7603_v10, 7  ;;  %v447_v25 = vrot.slane %v7603_v10, 1 }
  0x6c   : > { %938 = vrot.lane.b32.xlu1 %v865_v41, %s6992_s12  ;;  %944 = vrot.lane.b32.xlu0 %v868_v42, %s6992_s12  ;;  %507 = vst.msk [vmem:[#allocation2 + $0x4d] sm:$0x3] %vm330_vm1, %v498_v15  ;;  %547 = vst.msk [vmem:[#allocation2 + $0x4f] sm:$0x3] %vm330_vm1, %v538_v16  ;;  %v419_v41 = vsel %vm415_vm3, %v7475_v12, %v402_v30  ;;  %v460_v42 = vsel %vm415_vm3, %v444_v34, %v7475_v12  ;;  %v527_v27 = vrot.slane %v7603_v10, 3  ;;  %v7644_v29 = vld [vmem:[%s7438_s16 + $0x38] sm:$0xff] }
  0x6d   : > { %428 = vst.msk [vmem:[#allocation2 + $0x61] sm:$0x3] %vm330_vm1, %v417_v13  ;;  %468 = vst.msk [vmem:[#allocation2 + $0x63] sm:$0x3] %vm330_vm1, %v458_v14  ;;  %v621_v13 = vsel %vm415_vm3, %v605_v3, %v565_v2  ;;  %v661_v14 = vsel %vm415_vm3, %v645_v4, %v605_v3  ;;  %v567_v28 = vrot.slane %v7603_v10, 4  ;;  %v881_v30 = vld [vmem:[#allocation3 + $0x128] sm:$0xff] }
  0x6e   : > { %508 = vst.msk [vmem:[#allocation2 + $0x65] sm:$0x3] %vm330_vm1, %v498_v15  ;;  %548 = vst.msk [vmem:[#allocation2 + $0x67] sm:$0x3] %vm330_vm1, %v538_v16  ;;  %v685_v15 = vsel %vm415_vm3, %v403_v49, %v645_v4  ;;  %v421_v16 = vsel %vm415_vm3, %v7562_v54, %v404_v5  ;;  %v568_v47 = vrot.slane %v7644_v29, 4  ;;  %v883_v48 = vld [vmem:[#allocation3 + $0x140] sm:$0xff] }
  0x6f   : > { %587 = vst.msk [vmem:[#allocation2 + $0x51] sm:$0x3] %vm330_vm1, %v578_v18  ;;  %627 = vst.msk [vmem:[#allocation2 + $0x53] sm:$0x3] %vm330_vm1, %v618_v19  ;;  %v1115_v3 = vld [vmem:[#allocation3 + $0x19] sm:$0xff]  ;;  %v1114_v4 = vld [vmem:[#allocation3 + $0x9] sm:$0xff] }
  0x70   : > { %942 = vrot.lane.b32.xlu1 %v867_v43, %s6992_s12  ;;  %948 = vrot.lane.b32.xlu0 %v870_v44, %s6992_s12  ;;  %667 = vst.msk [vmem:[#allocation2 + $0x55] sm:$0x3] %vm330_vm1, %v658_v20  ;;  %691 = vst.msk [vmem:[#allocation2 + $0x57] sm:$0x3] %vm330_vm1, %v682_v21  ;;  %v484_v43 = vrot.slane %v7475_v12, 2  ;;  %v524_v44 = vrot.slane %v7475_v12, 3  ;;  %v581_v12 = vsel %vm415_vm3, %v565_v2, %v525_v63 }
  0x71   : > { %588 = vst.msk [vmem:[#allocation2 + $0x69] sm:$0x3] %vm330_vm1, %v578_v18  ;;  %628 = vst.msk [vmem:[#allocation2 + $0x6b] sm:$0x3] %vm330_vm1, %v618_v19  ;;  %v542_v19 = vsel %vm415_vm3, %v526_v9, %v486_v8  ;;  %v887_v2 = vld [vmem:[#allocation3 + $0x170] sm:$0xff] }
  0x72   : > { %668 = vst.msk [vmem:[#allocation2 + $0x6d] sm:$0x3] %vm330_vm1, %v658_v20  ;;  %692 = vst.msk [vmem:[#allocation2 + $0x6f] sm:$0x3] %vm330_vm1, %v682_v21  ;;  %v500_v50 = vsel %vm415_vm3, %v484_v43, %v444_v34  ;;  %v580_v56 = vsel %vm415_vm3, %v564_v46, %v524_v44  ;;  %v882_v20 = vld [vmem:[#allocation3 + $0x138] sm:$0xff]  ;;  %v566_v21 = vrot.slane %v7562_v54, 4  ;;  %v686_v34 = vsel %vm415_vm3, %v404_v5, %v646_v23 }
  0x73   : > { %429 = vst.msk [vmem:[#allocation2 + $0x79] sm:$0x3] %vm330_vm1, %v418_v22  ;;  %430 = vst.msk [vmem:[#allocation2 + $0x91] sm:$0x3] %vm330_vm1, %v418_v22  ;;  %v606_v22 = vrot.slane %v7562_v54, 5  ;;  %v528_v46 = vrot.slane %v7644_v29, 3 }
  0x74   : > { %946 = vrot.lane.b32.xlu1 %v869_v45, %s6992_s12  ;;  %952 = vrot.lane.b32.xlu0 %v872_v51, %s6992_s12  ;;  %469 = vst.msk [vmem:[#allocation2 + $0x7b] sm:$0x3] %vm330_vm1, %v459_v31  ;;  %509 = vst.msk [vmem:[#allocation2 + $0x7d] sm:$0x3] %vm330_vm1, %v499_v32  ;;  %v878_v45 = vld [vmem:[#allocation3 + $0x108] sm:$0xff]  ;;  %v540_v51 = vsel %vm415_vm3, %v524_v44, %v484_v43  ;;  %v406_v43 = vrot.slane %v7644_v29, 7 }
  0x75   : > { %549 = vst.msk [vmem:[#allocation2 + $0x7f] sm:$0x3] %vm330_vm1, %v539_v33  ;;  %470 = vst.msk [vmem:[#allocation2 + $0x93] sm:$0x3] %vm330_vm1, %v459_v31  ;;  %v582_v31 = vsel %vm415_vm3, %v566_v21, %v526_v9  ;;  %v448_v44 = vrot.slane %v7644_v29, 1  ;;  %v1117_v5 = vld [vmem:[#allocation3 + $0x31] sm:$0xff] }
  0x76   : > { %510 = vst.msk [vmem:[#allocation2 + $0x95] sm:$0x3] %vm330_vm1, %v499_v32  ;;  %550 = vst.msk [vmem:[#allocation2 + $0x97] sm:$0x3] %vm330_vm1, %v539_v33  ;;  %v622_v32 = vsel %vm415_vm3, %v606_v22, %v566_v21  ;;  %v662_v33 = vsel %vm415_vm3, %v646_v23, %v606_v22  ;;  %v1121_v9 = vld [vmem:[#allocation3 + $0x61] sm:$0xff]  ;;  %v1133_v21 = vld [vmem:[#allocation3 + $0xf1] sm:$0xff] }
  0x77   : > { %589 = vst.msk [vmem:[#allocation2 + $0x81] sm:$0x3] %vm330_vm1, %v579_v37  ;;  %629 = vst.msk [vmem:[#allocation2 + $0x83] sm:$0x3] %vm330_vm1, %v619_v38  ;;  %v464_v53 = vsel %vm415_vm3, %v448_v44, %v7644_v29  ;;  %v1132_v22 = vld [vmem:[#allocation3 + $0xe1] sm:$0xff]  ;;  %v1135_v23 = vld [vmem:[#allocation3 + $0x109] sm:$0xff] }
  0x78   : > { %950 = vrot.lane.b32.xlu1 %v871_v61, %s6992_s12  ;;  %956 = vrot.lane.b32.xlu0 %v874_v7, %s6992_s12  ;;  %669 = vst.msk [vmem:[#allocation2 + $0x85] sm:$0x3] %vm330_vm1, %v659_v39  ;;  %693 = vst.msk [vmem:[#allocation2 + $0x87] sm:$0x3] %vm330_vm1, %v683_v40  ;;  %v461_v61 = vsel %vm415_vm3, %v445_v52, %v7521_v35  ;;  %v446_v7 = vrot.slane %v7562_v54, 1  ;;  %v422_v35 = vsel %vm415_vm3, %v7603_v10, %v405_v24 }
  0x79   : > { %590 = vst.msk [vmem:[#allocation2 + $0x99] sm:$0x3] %vm330_vm1, %v579_v37  ;;  %630 = vst.msk [vmem:[#allocation2 + $0x9b] sm:$0x3] %vm330_vm1, %v619_v38  ;;  %v423_v52 = vsel %vm415_vm3, %v7644_v29, %v406_v43 }
  0x7a   : > { %670 = vst.msk [vmem:[#allocation2 + $0x9d] sm:$0x3] %vm330_vm1, %v659_v39  ;;  %694 = vst.msk [vmem:[#allocation2 + $0x9f] sm:$0x3] %vm330_vm1, %v683_v40  ;;  %v502_v18 = vsel %vm415_vm3, %v486_v8, %v446_v7  ;;  %v884_v39 = vld [vmem:[#allocation3 + $0x150] sm:$0xff]  ;;  %v583_v40 = vsel %vm415_vm3, %v567_v28, %v527_v27  ;;  %v1118_v8 = vld [vmem:[#allocation3 + $0x39] sm:$0xff] }
  0x7b   : > { %431 = vst.msk [vmem:[#allocation2 + $0xa9] sm:$0x3] %vm330_vm1, %v419_v41  ;;  %471 = vst.msk [vmem:[#allocation2 + $0xab] sm:$0x3] %vm330_vm1, %v460_v42 }
  0x7c   : > { %954 = vrot.lane.b32.xlu1 %v873_v17, %s6992_s12  ;;  %960 = vrot.lane.b32.xlu0 %v876_v26, %s6992_s12  ;;  %432 = vst.msk [vmem:[#allocation2 + $0xc1] sm:$0x3] %vm330_vm1, %v419_v41  ;;  %472 = vst.msk [vmem:[#allocation2 + $0xc3] sm:$0x3] %vm330_vm1, %v460_v42  ;;  %v462_v17 = vsel %vm415_vm3, %v446_v7, %v7562_v54  ;;  %v487_v26 = vrot.slane %v7603_v10, 2  ;;  %v607_v41 = vrot.slane %v7603_v10, 5 }
  0x7d   : > { %511 = vst.msk [vmem:[#allocation2 + $0xad] sm:$0x3] %vm330_vm1, %v500_v50  ;;  %551 = vst.msk [vmem:[#allocation2 + $0xaf] sm:$0x3] %vm330_vm1, %v540_v51  ;;  %v647_v42 = vrot.slane %v7603_v10, 6  ;;  %v1119_v7 = vld [vmem:[#allocation3 + $0x49] sm:$0xff] }
  0x7e   : > { %512 = vst.msk [vmem:[#allocation2 + $0xc5] sm:$0x3] %vm330_vm1, %v500_v50  ;;  %552 = vst.msk [vmem:[#allocation2 + $0xc7] sm:$0x3] %vm330_vm1, %v540_v51  ;;  %v503_v37 = vsel %vm415_vm3, %v487_v26, %v447_v25  ;;  %v543_v38 = vsel %vm415_vm3, %v527_v27, %v487_v26  ;;  %v623_v49 = vsel %vm415_vm3, %v607_v41, %v567_v28  ;;  %v1136_v26 = vld [vmem:[#allocation3 + $0x111] sm:$0xff]  ;;  %v1139_v28 = vld [vmem:[#allocation3 + $0x139] sm:$0xff] }
  0x7f   : > { %591 = vst.msk [vmem:[#allocation2 + $0xb1] sm:$0x3] %vm330_vm1, %v580_v56  ;;  %631 = vst.msk [vmem:[#allocation2 + $0xb3] sm:$0x3] %vm330_vm1, %v620_v57  ;;  %v663_v50 = vsel %vm415_vm3, %v647_v42, %v607_v41  ;;  %v687_v51 = vsel %vm415_vm3, %v405_v24, %v647_v42  ;;  %v1134_v24 = vld [vmem:[#allocation3 + $0xf9] sm:$0xff]  ;;  %v824_v27 = vld [vmem:[#allocation2] sm:$0xff] }
  0x80   : > { %958 = vrot.lane.b32.xlu1 %v875_v36, %s6992_s12  ;;  %964 = vrot.lane.b32.xlu0 %v878_v45, %s6992_s12  ;;  %671 = vst.msk [vmem:[#allocation2 + $0xb5] sm:$0x3] %vm330_vm1, %v660_v58  ;;  %695 = vst.msk [vmem:[#allocation2 + $0xb7] sm:$0x3] %vm330_vm1, %v684_v59  ;;  %v463_v36 = vsel %vm415_vm3, %v447_v25, %v7603_v10  ;;  %v488_v45 = vrot.slane %v7644_v29, 2  ;;  %v1120_v10 = vld [vmem:[#allocation3 + $0x51] sm:$0xff] }
  0x81   : > { %592 = vst.msk [vmem:[#allocation2 + $0xc9] sm:$0x3] %vm330_vm1, %v580_v56  ;;  %632 = vst.msk [vmem:[#allocation2 + $0xcb] sm:$0x3] %vm330_vm1, %v620_v57  ;;  %v584_v56 = vsel %vm415_vm3, %v568_v47, %v528_v46  ;;  %v886_v57 = vld [vmem:[#allocation3 + $0x168] sm:$0xff] }
  0x82   : > { %672 = vst.msk [vmem:[#allocation2 + $0xcd] sm:$0x3] %vm330_vm1, %v660_v58  ;;  %696 = vst.msk [vmem:[#allocation2 + $0xcf] sm:$0x3] %vm330_vm1, %v684_v59  ;;  %v504_v54 = vsel %vm415_vm3, %v488_v45, %v448_v44  ;;  %v608_v58 = vrot.slane %v7644_v29, 5  ;;  %v648_v59 = vrot.slane %v7644_v29, 6 }
  0x83   : > { %433 = vst.msk [vmem:[#allocation2 + $0xd9] sm:$0x3] %vm330_vm1, %v420_v60  ;;  %473 = vst.msk [vmem:[#allocation2 + $0xdb] sm:$0x3] %vm330_vm1, %v461_v61  ;;  %v1137_v25 = vld [vmem:[#allocation3 + $0x121] sm:$0xff]  ;;  %v1143_v41 = vld [vmem:[#allocation3 + $0x169] sm:$0xff] }
  0x84   : > { %513 = vst.msk [vmem:[#allocation2 + $0xdd] sm:$0x3] %vm330_vm1, %v501_v62  ;;  %434 = vst.msk [vmem:[#allocation2 + $0xf1] sm:$0x3] %vm330_vm1, %v420_v60  ;;  %962 = vrot.lane.b32.xlu1 %v877_v55, %s6992_s12  ;;  %968 = vrot.lane.b32.xlu0 %v880_v1, %s6992_s12  ;;  %v544_v55 = vsel %vm415_vm3, %v528_v46, %v488_v45  ;;  %v885_v60 = vld [vmem:[#allocation3 + $0x158] sm:$0xff]  ;;  %v688_v63 = vsel %vm415_vm3, %v406_v43, %v648_v59  ;;  %v1113_v1 = vld [vmem:[#allocation3 + $0x1] sm:$0xff] }
  0x85   : > { %474 = vst.msk [vmem:[#allocation2 + $0xf3] sm:$0x3] %vm330_vm1, %v461_v61  ;;  %514 = vst.msk [vmem:[#allocation2 + $0xf5] sm:$0x3] %vm330_vm1, %v501_v62  ;;  %v624_v61 = vsel %vm415_vm3, %v608_v58, %v568_v47  ;;  %v664_v62 = vsel %vm415_vm3, %v648_v59, %v608_v58  ;;  %v827_v43 = vld [vmem:[#allocation2 + $0x20] sm:$0xff]  ;;  %v1142_v45 = vld [vmem:[#allocation3 + $0x159] sm:$0xff] }
  0x86   : > { %553 = vst.msk [vmem:[#allocation2 + $0xdf] sm:$0x3] %vm330_vm1, %v541_v6  ;;  %554 = vst.msk [vmem:[#allocation2 + $0xf7] sm:$0x3] %vm330_vm1, %v541_v6  ;;  %v1116_v6 = vld [vmem:[#allocation3 + $0x21] sm:$0xff]  ;;  %v921_v29 = vpop.permute.xlu0 %920  ;;  %v830_v47 = vld [vmem:[#allocation2 + $0x48] sm:$0xff] }
  0x87   : > { %593 = vst.msk [vmem:[#allocation2 + $0xe1] sm:$0x3] %vm330_vm1, %v581_v12  ;;  %633 = vst.msk [vmem:[#allocation2 + $0xe3] sm:$0x3] %vm330_vm1, %v621_v13 }
  0x88   : > { %673 = vst.msk [vmem:[#allocation2 + $0xe5] sm:$0x3] %vm330_vm1, %v661_v14  ;;  %697 = vst.msk [vmem:[#allocation2 + $0xe7] sm:$0x3] %vm330_vm1, %v685_v15  ;;  %966 = vrot.lane.b32.xlu1 %v879_v11, %s6992_s12  ;;  %972 = vrot.lane.b32.xlu0 %v882_v20, %s6992_s12  ;;  %v1123_v11 = vld [vmem:[#allocation3 + $0x79] sm:$0xff]  ;;  %v1130_v20 = vld [vmem:[#allocation3 + $0xc9] sm:$0xff] }
  0x89   : > { %594 = vst.msk [vmem:[#allocation2 + $0xf9] sm:$0x3] %vm330_vm1, %v581_v12  ;;  %634 = vst.msk [vmem:[#allocation2 + $0xfb] sm:$0x3] %vm330_vm1, %v621_v13  ;;  %v1122_v12 = vld [vmem:[#allocation3 + $0x69] sm:$0xff]  ;;  %v1125_v13 = vld [vmem:[#allocation3 + $0x91] sm:$0xff] }
  0x8a   : > { %674 = vst.msk [vmem:[#allocation2 + $0xfd] sm:$0x3] %vm330_vm1, %v661_v14  ;;  %698 = vst.msk [vmem:[#allocation2 + $0xff] sm:$0x3] %vm330_vm1, %v685_v15  ;;  %v1124_v14 = vld [vmem:[#allocation3 + $0x81] sm:$0xff]  ;;  %v1127_v15 = vld [vmem:[#allocation3 + $0xa9] sm:$0xff] }
  0x8b   : > { %435 = vst.msk [vmem:[#allocation2 + $0x109] sm:$0x3] %vm330_vm1, %v421_v16  ;;  %475 = vst.msk [vmem:[#allocation2 + $0x10b] sm:$0x3] %vm330_vm1, %v462_v17 }
  0x8c   : > { %515 = vst.msk [vmem:[#allocation2 + $0x10d] sm:$0x3] %vm330_vm1, %v502_v18  ;;  %555 = vst.msk [vmem:[#allocation2 + $0x10f] sm:$0x3] %vm330_vm1, %v542_v19  ;;  %970 = vrot.lane.b32.xlu1 %v881_v30, %s6992_s12  ;;  %976 = vrot.lane.b32.xlu0 %v884_v39, %s6992_s12  ;;  %v1016_v30 = vsel %vm327_vm0, %v824_v27, %v921_v29  ;;  %v828_v39 = vld [vmem:[#allocation2 + $0x30] sm:$0xff] }
  0x8d   : > { %436 = vst.msk [vmem:[#allocation2 + $0x121] sm:$0x3] %vm330_vm1, %v421_v16  ;;  %476 = vst.msk [vmem:[#allocation2 + $0x123] sm:$0x3] %vm330_vm1, %v462_v17  ;;  %v1126_v16 = vld [vmem:[#allocation3 + $0x99] sm:$0xff]  ;;  %v1129_v17 = vld [vmem:[#allocation3 + $0xc1] sm:$0xff] }
  0x8e   : > { %516 = vst.msk [vmem:[#allocation2 + $0x125] sm:$0x3] %vm330_vm1, %v502_v18  ;;  %556 = vst.msk [vmem:[#allocation2 + $0x127] sm:$0x3] %vm330_vm1, %v542_v19  ;;  %v1128_v18 = vld [vmem:[#allocation3 + $0xb1] sm:$0xff]  ;;  %v1131_v19 = vld [vmem:[#allocation3 + $0xd9] sm:$0xff] }
  0x8f   : > { %595 = vst.msk [vmem:[#allocation2 + $0x111] sm:$0x3] %vm330_vm1, %v582_v31  ;;  %635 = vst.msk [vmem:[#allocation2 + $0x113] sm:$0x3] %vm330_vm1, %v622_v32  ;;  %v844_v27 = vld [vmem:[#allocation2 + $0xf0] sm:$0xff] }
  0x90   : > { %675 = vst.msk [vmem:[#allocation2 + $0x115] sm:$0x3] %vm330_vm1, %v662_v33  ;;  %699 = vst.msk [vmem:[#allocation2 + $0x117] sm:$0x3] %vm330_vm1, %v686_v34  ;;  %974 = vrot.lane.b32.xlu1 %v883_v48, %s6992_s12  ;;  %980 = vrot.lane.b32.xlu0 %v886_v57, %s6992_s12  ;;  %v831_v57 = vld [vmem:[#allocation2 + $0x50] sm:$0xff] }
  0x91   : > { %596 = vst.msk [vmem:[#allocation2 + $0x129] sm:$0x3] %vm330_vm1, %v582_v31  ;;  %636 = vst.msk [vmem:[#allocation2 + $0x12b] sm:$0x3] %vm330_vm1, %v622_v32  ;;  %v1138_v31 = vld [vmem:[#allocation3 + $0x129] sm:$0xff]  ;;  %v825_v32 = vld [vmem:[#allocation2 + $0x8] sm:$0xff] }
  0x92   : > { %676 = vst.msk [vmem:[#allocation2 + $0x12d] sm:$0x3] %vm330_vm1, %v662_v33  ;;  %700 = vst.msk [vmem:[#allocation2 + $0x12f] sm:$0x3] %vm330_vm1, %v686_v34  ;;  %v1141_v33 = vld [vmem:[#allocation3 + $0x151] sm:$0xff] }
  0x93   : > { %437 = vst.msk [vmem:[#allocation2 + $0x139] sm:$0x3] %vm330_vm1, %v422_v35  ;;  %477 = vst.msk [vmem:[#allocation2 + $0x13b] sm:$0x3] %vm330_vm1, %v463_v36 }
  0x94   : > { %517 = vst.msk [vmem:[#allocation2 + $0x13d] sm:$0x3] %vm330_vm1, %v503_v37  ;;  %557 = vst.msk [vmem:[#allocation2 + $0x13f] sm:$0x3] %vm330_vm1, %v543_v38  ;;  %978 = vrot.lane.b32.xlu1 %v885_v60, %s6992_s12  ;;  %1177 = vrot.lane.b32.xlu0 %v1113_v1, %s6992_s12  ;;  %v834_v60 = vld [vmem:[#allocation2 + $0x78] sm:$0xff] }
  0x95   : > { %438 = vst.msk [vmem:[#allocation2 + $0x151] sm:$0x3] %vm330_vm1, %v422_v35  ;;  %478 = vst.msk [vmem:[#allocation2 + $0x153] sm:$0x3] %vm330_vm1, %v463_v36  ;;  %v826_v35 = vld [vmem:[#allocation2 + $0x18] sm:$0xff] }
  0x96   : > { %518 = vst.msk [vmem:[#allocation2 + $0x155] sm:$0x3] %vm330_vm1, %v503_v37  ;;  %558 = vst.msk [vmem:[#allocation2 + $0x157] sm:$0x3] %vm330_vm1, %v543_v38  ;;  %v1140_v37 = vld [vmem:[#allocation3 + $0x141] sm:$0xff] }
  0x97   : > { %597 = vst.msk [vmem:[#allocation2 + $0x141] sm:$0x3] %vm330_vm1, %v583_v40  ;;  %598 = vst.msk [vmem:[#allocation2 + $0x159] sm:$0x3] %vm330_vm1, %v583_v40 }
  0x98   : > { %637 = vst.msk [vmem:[#allocation2 + $0x143] sm:$0x3] %vm330_vm1, %v623_v49  ;;  %677 = vst.msk [vmem:[#allocation2 + $0x145] sm:$0x3] %vm330_vm1, %v663_v50  ;;  %982 = vrot.lane.b32.xlu1 %v887_v2, %s6992_s12  ;;  %1181 = vrot.lane.b32.xlu0 %v1115_v3, %s6992_s12  ;;  %v923_v34 = vpop.permute.xlu0 %922  ;;  %v836_v3 = vld [vmem:[#allocation2 + $0x90] sm:$0xff] }
  0x99   : > { %701 = vst.msk [vmem:[#allocation2 + $0x147] sm:$0x3] %vm330_vm1, %v687_v51  ;;  %638 = vst.msk [vmem:[#allocation2 + $0x15b] sm:$0x3] %vm330_vm1, %v623_v49  ;;  %v1017_v36 = vsel %vm327_vm0, %v825_v32, %v923_v34 }
  0x9a   : > { %678 = vst.msk [vmem:[#allocation2 + $0x15d] sm:$0x3] %vm330_vm1, %v663_v50  ;;  %702 = vst.msk [vmem:[#allocation2 + $0x15f] sm:$0x3] %vm330_vm1, %v687_v51  ;;  %v829_v50 = vld [vmem:[#allocation2 + $0x38] sm:$0xff] }
  0x9b   : > { %439 = vst.msk [vmem:[#allocation2 + $0x169] sm:$0x3] %vm330_vm1, %v423_v52  ;;  %440 = vst.msk [vmem:[#allocation2 + $0x181] sm:$0x3] %vm330_vm1, %v423_v52  ;;  %v1144_v52 = vld [vmem:[#allocation3 + $0x171] sm:$0xff] }
  0x9c   : > { %479 = vst.msk [vmem:[#allocation2 + $0x16b] sm:$0x3] %vm330_vm1, %v464_v53  ;;  %519 = vst.msk [vmem:[#allocation2 + $0x16d] sm:$0x3] %vm330_vm1, %v504_v54  ;;  %1179 = vrot.lane.b32.xlu1 %v1114_v4, %s6992_s12  ;;  %1185 = vrot.lane.b32.xlu0 %v1117_v5, %s6992_s12 }
  0x9d   : > { %559 = vst.msk [vmem:[#allocation2 + $0x16f] sm:$0x3] %vm330_vm1, %v544_v55  ;;  %480 = vst.msk [vmem:[#allocation2 + $0x183] sm:$0x3] %vm330_vm1, %v464_v53 }
  0x9e   : > { %520 = vst.msk [vmem:[#allocation2 + $0x185] sm:$0x3] %vm330_vm1, %v504_v54  ;;  %560 = vst.msk [vmem:[#allocation2 + $0x187] sm:$0x3] %vm330_vm1, %v544_v55  ;;  %v832_v54 = vld [vmem:[#allocation2 + $0x60] sm:$0xff] }
  0x9f   : > { %599 = vst.msk [vmem:[#allocation2 + $0x171] sm:$0x3] %vm330_vm1, %v584_v56  ;;  %600 = vst.msk [vmem:[#allocation2 + $0x189] sm:$0x3] %vm330_vm1, %v584_v56 }
  0xa0   : > { %639 = vst.msk [vmem:[#allocation2 + $0x173] sm:$0x3] %vm330_vm1, %v624_v61  ;;  %679 = vst.msk [vmem:[#allocation2 + $0x175] sm:$0x3] %vm330_vm1, %v664_v62  ;;  %1183 = vrot.lane.b32.xlu1 %v1116_v6, %s6992_s12  ;;  %1189 = vrot.lane.b32.xlu0 %v1119_v7, %s6992_s12  ;;  %v835_v6 = vld [vmem:[#allocation2 + $0x80] sm:$0xff] }
  0xa1   : > { %703 = vst.msk [vmem:[#allocation2 + $0x177] sm:$0x3] %vm330_vm1, %v688_v63  ;;  %640 = vst.msk [vmem:[#allocation2 + $0x18b] sm:$0x3] %vm330_vm1, %v624_v61 }
  0xa2   : > { %680 = vst.msk [vmem:[#allocation2 + $0x18d] sm:$0x3] %vm330_vm1, %v664_v62  ;;  %704 = vst.msk [vmem:[#allocation2 + $0x18f] sm:$0x3] %vm330_vm1, %v688_v63  ;;  %v833_v63 = vld [vmem:[#allocation2 + $0x68] sm:$0xff] }
  0xa3   : > { %1049 = vst.msk [vmem:[#allocation5] sm:$0xff] %vm1048_vm2, %v1016_v30  ;;  %1050 = vst.msk [vmem:[#allocation5 + $0x8] sm:$0xff] %vm1048_vm2, %v1017_v36  ;;  %v843_v30 = vld [vmem:[#allocation2 + $0xe0] sm:$0xff]  ;;  %v845_v36 = vld [vmem:[#allocation2 + $0xf8] sm:$0xff] }
  0xa4   : > { %1187 = vrot.lane.b32.xlu1 %v1118_v8, %s6992_s12  ;;  %1193 = vrot.lane.b32.xlu0 %v1121_v9, %s6992_s12  ;;  %v838_v9 = vld [vmem:[#allocation2 + $0xa8] sm:$0xff]  ;;  %4580 = vst.msk [vmem:[#allocation4 + $0x40] sm:$0x3] %vm4573_vm14, %v6991_v0  ;;  %4574 = vst.msk [vmem:[#allocation4 + $0x10] sm:$0x3] %vm4573_vm14, %v6991_v0 }
  0xa5   : > { %4577 = vst.msk [vmem:[#allocation4 + $0x28] sm:$0x3] %vm4573_vm14, %v6991_v0  ;;  %4583 = vst.msk [vmem:[#allocation4 + $0x58] sm:$0x3] %vm4573_vm14, %v6991_v0 }
  0xa6   : > { %4586 = vst.msk [vmem:[#allocation4 + $0x70] sm:$0x3] %vm4573_vm14, %v6991_v0  ;;  %4589 = vst.msk [vmem:[#allocation4 + $0x88] sm:$0x3] %vm4573_vm14, %v6991_v0 }
  0xa7   : > { %4592 = vst.msk [vmem:[#allocation4 + $0xa0] sm:$0x3] %vm4573_vm14, %v6991_v0  ;;  %4595 = vst.msk [vmem:[#allocation4 + $0xb8] sm:$0x3] %vm4573_vm14, %v6991_v0 }
  0xa8   : > { %1191 = vrot.lane.b32.xlu1 %v1120_v10, %s6992_s12  ;;  %1197 = vrot.lane.b32.xlu0 %v1123_v11, %s6992_s12  ;;  %4598 = vst.msk [vmem:[#allocation4 + $0xd0] sm:$0x3] %vm4573_vm14, %v6991_v0  ;;  %4601 = vst.msk [vmem:[#allocation4 + $0xe8] sm:$0x3] %vm4573_vm14, %v6991_v0 }
  0xa9   : > { %4604 = vst.msk [vmem:[#allocation4 + $0x100] sm:$0x3] %vm4573_vm14, %v6991_v0  ;;  %4607 = vst.msk [vmem:[#allocation4 + $0x118] sm:$0x3] %vm4573_vm14, %v6991_v0 }
  0xaa   : > { %4610 = vst.msk [vmem:[#allocation4 + $0x130] sm:$0x3] %vm4573_vm14, %v6991_v0  ;;  %4613 = vst.msk [vmem:[#allocation4 + $0x148] sm:$0x3] %vm4573_vm14, %v6991_v0 }
  0xab   : > { %4616 = vst.msk [vmem:[#allocation4 + $0x160] sm:$0x3] %vm4573_vm14, %v6991_v0  ;;  %4619 = vst.msk [vmem:[#allocation4 + $0x178] sm:$0x3] %vm4573_vm14, %v6991_v0 }
  0xac   : > { %1195 = vrot.lane.b32.xlu1 %v1122_v12, %s6992_s12  ;;  %1201 = vrot.lane.b32.xlu0 %v1125_v13, %s6992_s12  ;;  %v837_v12 = vld [vmem:[#allocation2 + $0x98] sm:$0xff]  ;;  %4622 = vst.msk [vmem:[#allocation4 + $0x190] sm:$0x3] %vm4573_vm14, %v6991_v0  ;;  %4625 = vst.msk [vmem:[#allocation4 + $0x1a8] sm:$0x3] %vm4573_vm14, %v6991_v0  ;;  %v4724_v0 = vld [vmem:[#allocation4 + $0x9] sm:$0xff] }
  0xb0   : > { %1199 = vrot.lane.b32.xlu1 %v1124_v14, %s6992_s12  ;;  %1205 = vrot.lane.b32.xlu0 %v1127_v15, %s6992_s12  ;;  %v840_v15 = vld [vmem:[#allocation2 + $0xc0] sm:$0xff] }
  0xb4   : > { %1203 = vrot.lane.b32.xlu1 %v1126_v16, %s6992_s12  ;;  %1209 = vrot.lane.b32.xlu0 %v1129_v17, %s6992_s12 }
  0xb8   : > { %1207 = vrot.lane.b32.xlu1 %v1128_v18, %s6992_s12  ;;  %1213 = vrot.lane.b32.xlu0 %v1131_v19, %s6992_s12  ;;  %v839_v18 = vld [vmem:[#allocation2 + $0xb0] sm:$0xff] }
  0xbc   : > { %1211 = vrot.lane.b32.xlu1 %v1130_v20, %s6992_s12  ;;  %1217 = vrot.lane.b32.xlu0 %v1133_v21, %s6992_s12  ;;  %v842_v21 = vld [vmem:[#allocation2 + $0xd8] sm:$0xff] }
  0xc0   : > { %1215 = vrot.lane.b32.xlu1 %v1132_v22, %s6992_s12  ;;  %1221 = vrot.lane.b32.xlu0 %v1135_v23, %s6992_s12 }
  0xc4   : > { %1219 = vrot.lane.b32.xlu1 %v1134_v24, %s6992_s12  ;;  %1225 = vrot.lane.b32.xlu0 %v1137_v25, %s6992_s12  ;;  %v841_v24 = vld [vmem:[#allocation2 + $0xc8] sm:$0xff] }
  0xc8   : > { %1223 = vrot.lane.b32.xlu1 %v1136_v26, %s6992_s12  ;;  %1229 = vrot.lane.b32.xlu0 %v1139_v28, %s6992_s12 }
  0xcc   : > { %1227 = vrot.lane.b32.xlu1 %v1138_v31, %s6992_s12  ;;  %1233 = vrot.lane.b32.xlu0 %v1141_v33, %s6992_s12  ;;  %v846_v33 = vld [vmem:[#allocation2 + $0x108] sm:$0xff] }
  0xce   : > { %v925_v38 = vpop.permute.xlu1 %924  ;;  %v929_v42 = vpop.permute.xlu0 %928 }
  0xcf   : > { %v1018_v40 = vsel %vm327_vm0, %v826_v35, %v925_v38  ;;  %v1020_v44 = vsel %vm327_vm0, %v828_v39, %v929_v42  ;;  %v848_v39 = vld [vmem:[#allocation2 + $0x120] sm:$0xff]  ;;  %v847_v42 = vld [vmem:[#allocation2 + $0x110] sm:$0xff] }
  0xd0   : > { %1051 = vst.msk [vmem:[#allocation5 + $0x10] sm:$0xff] %vm1048_vm2, %v1018_v40  ;;  %1231 = vrot.lane.b32.xlu1 %v1140_v37, %s6992_s12  ;;  %1053 = vst.msk [vmem:[#allocation5 + $0x20] sm:$0xff] %vm1048_vm2, %v1020_v44  ;;  %1237 = vrot.lane.b32.xlu0 %v1143_v41, %s6992_s12 }
  0xd2   : > { %v927_v46 = vpop.permute.xlu1 %926  ;;  %v933_v49 = vpop.permute.xlu0 %932 }
  0xd3   : > { %v1019_v48 = vsel %vm327_vm0, %v827_v43, %v927_v46  ;;  %v1022_v51 = vsel %vm327_vm0, %v830_v47, %v933_v49 }
  0xd4   : > { %1052 = vst.msk [vmem:[#allocation5 + $0x18] sm:$0xff] %vm1048_vm2, %v1019_v48  ;;  %1235 = vrot.lane.b32.xlu1 %v1142_v45, %s6992_s12  ;;  %1055 = vst.msk [vmem:[#allocation5 + $0x30] sm:$0xff] %vm1048_vm2, %v1022_v51  ;;  %v850_v45 = vld [vmem:[#allocation2 + $0x138] sm:$0xff]  ;;  %v849_v48 = vld [vmem:[#allocation2 + $0x128] sm:$0xff] }
  0xd5   : > { %v852_v51 = vld [vmem:[#allocation2 + $0x150] sm:$0xff] }
  0xd6   : > { %v931_v53 = vpop.permute.xlu1 %930  ;;  %v937_v56 = vpop.permute.xlu0 %936 }
  0xd7   : > { %v1021_v55 = vsel %vm327_vm0, %v829_v50, %v931_v53  ;;  %v1024_v58 = vsel %vm327_vm0, %v832_v54, %v937_v56  ;;  %v851_v54 = vld [vmem:[#allocation2 + $0x140] sm:$0xff] }
  0xd8   : > { %1054 = vst.msk [vmem:[#allocation5 + $0x28] sm:$0xff] %vm1048_vm2, %v1021_v55  ;;  %1239 = vrot.lane.b32.xlu1 %v1144_v52, %s6992_s12  ;;  %1057 = vst.msk [vmem:[#allocation5 + $0x40] sm:$0xff] %vm1048_vm2, %v1024_v58 }
  0xda   : > { %v935_v59 = vpop.permute.xlu1 %934  ;;  %v941_v62 = vpop.permute.xlu0 %940 }
  0xdb   : > { %v1023_v61 = vsel %vm327_vm0, %v831_v57, %v935_v59  ;;  %v1026_v1 = vsel %vm327_vm0, %v834_v60, %v941_v62  ;;  %v854_v57 = vld [vmem:[#allocation2 + $0x168] sm:$0xff]  ;;  %v853_v60 = vld [vmem:[#allocation2 + $0x158] sm:$0xff] }
  0xdc   : > { %1056 = vst.msk [vmem:[#allocation5 + $0x38] sm:$0xff] %vm1048_vm2, %v1023_v61  ;;  %1059 = vst.msk [vmem:[#allocation5 + $0x50] sm:$0xff] %vm1048_vm2, %v1026_v1 }
  0xde   : > { %v939_v2 = vpop.permute.xlu1 %938  ;;  %v945_v5 = vpop.permute.xlu0 %944 }
  0xdf   : > { %v1025_v4 = vsel %vm327_vm0, %v833_v63, %v939_v2  ;;  %v1028_v7 = vsel %vm327_vm0, %v836_v3, %v945_v5  ;;  %v1081_v63 = vld [vmem:[#allocation2 + $0x1] sm:$0xff]  ;;  %v855_v3 = vld [vmem:[#allocation2 + $0x170] sm:$0xff] }
  0xe0   : > { %1058 = vst.msk [vmem:[#allocation5 + $0x48] sm:$0xff] %vm1048_vm2, %v1025_v4  ;;  %1061 = vst.msk [vmem:[#allocation5 + $0x60] sm:$0xff] %vm1048_vm2, %v1028_v7 }
  0xe2   : > { %v943_v8 = vpop.permute.xlu1 %942  ;;  %v949_v11 = vpop.permute.xlu0 %948 }
  0xe3   : > { %v1027_v10 = vsel %vm327_vm0, %v835_v6, %v943_v8  ;;  %v1030_v13 = vsel %vm327_vm0, %v838_v9, %v949_v11  ;;  %v1083_v6 = vld [vmem:[#allocation2 + $0x19] sm:$0xff]  ;;  %v1082_v9 = vld [vmem:[#allocation2 + $0x9] sm:$0xff] }
  0xe4   : > { %1060 = vst.msk [vmem:[#allocation5 + $0x58] sm:$0xff] %vm1048_vm2, %v1027_v10  ;;  %1063 = vst.msk [vmem:[#allocation5 + $0x70] sm:$0xff] %vm1048_vm2, %v1030_v13 }
  0xe6   : > { %v947_v14 = vpop.permute.xlu1 %946  ;;  %v953_v17 = vpop.permute.xlu0 %952 }
  0xe7   : > { %v1029_v16 = vsel %vm327_vm0, %v837_v12, %v947_v14  ;;  %v1032_v19 = vsel %vm327_vm0, %v840_v15, %v953_v17  ;;  %v1085_v12 = vld [vmem:[#allocation2 + $0x31] sm:$0xff]  ;;  %v1084_v15 = vld [vmem:[#allocation2 + $0x21] sm:$0xff] }
  0xe8   : > { %1062 = vst.msk [vmem:[#allocation5 + $0x68] sm:$0xff] %vm1048_vm2, %v1029_v16  ;;  %1065 = vst.msk [vmem:[#allocation5 + $0x80] sm:$0xff] %vm1048_vm2, %v1032_v19 }
  0xea   : > { %v951_v20 = vpop.permute.xlu1 %950  ;;  %v957_v23 = vpop.permute.xlu0 %956 }
  0xeb   : > { %v1031_v22 = vsel %vm327_vm0, %v839_v18, %v951_v20  ;;  %v1034_v25 = vsel %vm327_vm0, %v842_v21, %v957_v23  ;;  %v1087_v18 = vld [vmem:[#allocation2 + $0x49] sm:$0xff]  ;;  %v1086_v21 = vld [vmem:[#allocation2 + $0x39] sm:$0xff] }
  0xec   : > { %1064 = vst.msk [vmem:[#allocation5 + $0x78] sm:$0xff] %vm1048_vm2, %v1031_v22  ;;  %1067 = vst.msk [vmem:[#allocation5 + $0x90] sm:$0xff] %vm1048_vm2, %v1034_v25 }
  0xee   : > { %v955_v26 = vpop.permute.xlu1 %954  ;;  %v961_v29 = vpop.permute.xlu0 %960 }
  0xef   : > { %v1033_v28 = vsel %vm327_vm0, %v841_v24, %v955_v26  ;;  %v1036_v31 = vsel %vm327_vm0, %v844_v27, %v961_v29  ;;  %v1089_v24 = vld [vmem:[#allocation2 + $0x61] sm:$0xff]  ;;  %v1088_v27 = vld [vmem:[#allocation2 + $0x51] sm:$0xff] }
  0xf0   : > { %1066 = vst.msk [vmem:[#allocation5 + $0x88] sm:$0xff] %vm1048_vm2, %v1033_v28  ;;  %1069 = vst.msk [vmem:[#allocation5 + $0xa0] sm:$0xff] %vm1048_vm2, %v1036_v31 }
  0xf2   : > { %v959_v32 = vpop.permute.xlu1 %958  ;;  %v965_v35 = vpop.permute.xlu0 %964 }
  0xf3   : > { %v1035_v34 = vsel %vm327_vm0, %v843_v30, %v959_v32  ;;  %v1038_v37 = vsel %vm327_vm0, %v846_v33, %v965_v35  ;;  %v1091_v30 = vld [vmem:[#allocation2 + $0x79] sm:$0xff]  ;;  %v1090_v33 = vld [vmem:[#allocation2 + $0x69] sm:$0xff] }
  0xf4   : > { %1068 = vst.msk [vmem:[#allocation5 + $0x98] sm:$0xff] %vm1048_vm2, %v1035_v34  ;;  %1071 = vst.msk [vmem:[#allocation5 + $0xb0] sm:$0xff] %vm1048_vm2, %v1038_v37 }
  0xf6   : > { %v963_v38 = vpop.permute.xlu1 %962  ;;  %v969_v41 = vpop.permute.xlu0 %968 }
  0xf7   : > { %v1037_v40 = vsel %vm327_vm0, %v845_v36, %v963_v38  ;;  %v1040_v43 = vsel %vm327_vm0, %v848_v39, %v969_v41  ;;  %v1093_v36 = vld [vmem:[#allocation2 + $0x91] sm:$0xff]  ;;  %v1092_v39 = vld [vmem:[#allocation2 + $0x81] sm:$0xff] }
  0xf8   : > { %1070 = vst.msk [vmem:[#allocation5 + $0xa8] sm:$0xff] %vm1048_vm2, %v1037_v40  ;;  %1073 = vst.msk [vmem:[#allocation5 + $0xc0] sm:$0xff] %vm1048_vm2, %v1040_v43 }
  0xfa   : > { %v967_v44 = vpop.permute.xlu1 %966  ;;  %v973_v47 = vpop.permute.xlu0 %972 }
  0xfb   : > { %v1039_v46 = vsel %vm327_vm0, %v847_v42, %v967_v44  ;;  %v1042_v49 = vsel %vm327_vm0, %v850_v45, %v973_v47  ;;  %v1095_v42 = vld [vmem:[#allocation2 + $0xa9] sm:$0xff]  ;;  %v1094_v45 = vld [vmem:[#allocation2 + $0x99] sm:$0xff] }
  0xfc   : > { %1072 = vst.msk [vmem:[#allocation5 + $0xb8] sm:$0xff] %vm1048_vm2, %v1039_v46  ;;  %1075 = vst.msk [vmem:[#allocation5 + $0xd0] sm:$0xff] %vm1048_vm2, %v1042_v49 }
  0xfe   : > { %v971_v50 = vpop.permute.xlu1 %970  ;;  %v977_v53 = vpop.permute.xlu0 %976 }
  0xff   : > { %v1041_v52 = vsel %vm327_vm0, %v849_v48, %v971_v50  ;;  %v1044_v55 = vsel %vm327_vm0, %v852_v51, %v977_v53  ;;  %v1097_v48 = vld [vmem:[#allocation2 + $0xc1] sm:$0xff]  ;;  %v1096_v51 = vld [vmem:[#allocation2 + $0xb1] sm:$0xff] }
 0x100   : > { %1074 = vst.msk [vmem:[#allocation5 + $0xc8] sm:$0xff] %vm1048_vm2, %v1041_v52  ;;  %1077 = vst.msk [vmem:[#allocation5 + $0xe0] sm:$0xff] %vm1048_vm2, %v1044_v55 }
 0x102   : > { %v975_v56 = vpop.permute.xlu1 %974  ;;  %v981_v59 = vpop.permute.xlu0 %980 }
 0x103   : > { %v1043_v58 = vsel %vm327_vm0, %v851_v54, %v975_v56  ;;  %v1046_v61 = vsel %vm327_vm0, %v854_v57, %v981_v59  ;;  %v1099_v54 = vld [vmem:[#allocation2 + $0xd9] sm:$0xff]  ;;  %v1098_v57 = vld [vmem:[#allocation2 + $0xc9] sm:$0xff] }
 0x104   : > { %1076 = vst.msk [vmem:[#allocation5 + $0xd8] sm:$0xff] %vm1048_vm2, %v1043_v58  ;;  %1079 = vst.msk [vmem:[#allocation5 + $0xf0] sm:$0xff] %vm1048_vm2, %v1046_v61 }
 0x106   : > { %v979_v62 = vpop.permute.xlu1 %978  ;;  %v1178_v2 = vpop.permute.xlu0 %1177 }
 0x107   : > { %v1045_v1 = vsel %vm327_vm0, %v853_v60, %v979_v62  ;;  %v1273_v4 = vsel %vm327_vm0, %v1081_v63, %v1178_v2  ;;  %v1101_v60 = vld [vmem:[#allocation2 + $0xf1] sm:$0xff]  ;;  %v1100_v63 = vld [vmem:[#allocation2 + $0xe1] sm:$0xff] }
 0x108   : > { %1078 = vst.msk [vmem:[#allocation5 + $0xe8] sm:$0xff] %vm1048_vm2, %v1045_v1  ;;  %1337 = vrot.lane.b32.xlu0 %v1273_v4, %s6993_s17 }
 0x10a   : > { %v983_v5 = vpop.permute.xlu1 %982  ;;  %v1182_v8 = vpop.permute.xlu0 %1181 }
 0x10b   : > { %v1047_v7 = vsel %vm327_vm0, %v855_v3, %v983_v5  ;;  %v1275_v10 = vsel %vm327_vm0, %v1083_v6, %v1182_v8  ;;  %v1103_v3 = vld [vmem:[#allocation2 + $0x109] sm:$0xff]  ;;  %v1102_v6 = vld [vmem:[#allocation2 + $0xf9] sm:$0xff] }
 0x10c   : > { %1080 = vst.msk [vmem:[#allocation5 + $0xf8] sm:$0xff] %vm1048_vm2, %v1047_v7  ;;  %1341 = vrot.lane.b32.xlu0 %v1275_v10, %s6993_s17 }
 0x10e   : > { %v1180_v11 = vpop.permute.xlu1 %1179  ;;  %v1186_v14 = vpop.permute.xlu0 %1185 }
 0x10f   : > { %v1274_v13 = vsel %vm327_vm0, %v1082_v9, %v1180_v11  ;;  %v1277_v16 = vsel %vm327_vm0, %v1085_v12, %v1186_v14  ;;  %v1105_v9 = vld [vmem:[#allocation2 + $0x121] sm:$0xff]  ;;  %v1104_v12 = vld [vmem:[#allocation2 + $0x111] sm:$0xff] }
 0x110   : > { %1339 = vrot.lane.b32.xlu1 %v1274_v13, %s6993_s17  ;;  %1345 = vrot.lane.b32.xlu0 %v1277_v16, %s6993_s17 }
 0x112   : > { %v1184_v17 = vpop.permute.xlu1 %1183  ;;  %v1190_v20 = vpop.permute.xlu0 %1189 }
 0x113   : > { %v1276_v19 = vsel %vm327_vm0, %v1084_v15, %v1184_v17  ;;  %v1279_v22 = vsel %vm327_vm0, %v1087_v18, %v1190_v20  ;;  %v1107_v15 = vld [vmem:[#allocation2 + $0x139] sm:$0xff]  ;;  %v1106_v18 = vld [vmem:[#allocation2 + $0x129] sm:$0xff] }
 0x114   : > { %1343 = vrot.lane.b32.xlu1 %v1276_v19, %s6993_s17  ;;  %1349 = vrot.lane.b32.xlu0 %v1279_v22, %s6993_s17 }
 0x116   : > { %v1188_v23 = vpop.permute.xlu1 %1187  ;;  %v1194_v26 = vpop.permute.xlu0 %1193 }
 0x117   : > { %v1278_v25 = vsel %vm327_vm0, %v1086_v21, %v1188_v23  ;;  %v1281_v28 = vsel %vm327_vm0, %v1089_v24, %v1194_v26  ;;  %v1109_v21 = vld [vmem:[#allocation2 + $0x151] sm:$0xff]  ;;  %v1108_v24 = vld [vmem:[#allocation2 + $0x141] sm:$0xff] }
 0x118   : > { %1347 = vrot.lane.b32.xlu1 %v1278_v25, %s6993_s17  ;;  %1353 = vrot.lane.b32.xlu0 %v1281_v28, %s6993_s17 }
 0x11a   : > { %v1192_v29 = vpop.permute.xlu1 %1191  ;;  %v1198_v32 = vpop.permute.xlu0 %1197 }
 0x11b   : > { %v1280_v31 = vsel %vm327_vm0, %v1088_v27, %v1192_v29  ;;  %v1283_v34 = vsel %vm327_vm0, %v1091_v30, %v1198_v32  ;;  %v1111_v27 = vld [vmem:[#allocation2 + $0x169] sm:$0xff]  ;;  %v1110_v30 = vld [vmem:[#allocation2 + $0x159] sm:$0xff] }
 0x11c   : > { %1351 = vrot.lane.b32.xlu1 %v1280_v31, %s6993_s17  ;;  %1357 = vrot.lane.b32.xlu0 %v1283_v34, %s6993_s17  ;;  %v1498_v34 = vld [vmem:[#allocation3 + $0x2] sm:$0xff] }
 0x11e   : > { %v1196_v35 = vpop.permute.xlu1 %1195  ;;  %v1202_v38 = vpop.permute.xlu0 %1201 }
 0x11f   : > { %v1282_v37 = vsel %vm327_vm0, %v1090_v33, %v1196_v35  ;;  %v1285_v40 = vsel %vm327_vm0, %v1093_v36, %v1202_v38  ;;  %v1112_v35 = vld [vmem:[#allocation2 + $0x171] sm:$0xff] }
 0x120   : > { %1355 = vrot.lane.b32.xlu1 %v1282_v37, %s6993_s17  ;;  %1361 = vrot.lane.b32.xlu0 %v1285_v40, %s6993_s17  ;;  %v1500_v38 = vld [vmem:[#allocation3 + $0x1a] sm:$0xff]  ;;  %v1502_v40 = vld [vmem:[#allocation3 + $0x32] sm:$0xff] }
 0x122   : > { %v1200_v41 = vpop.permute.xlu1 %1199  ;;  %v1206_v44 = vpop.permute.xlu0 %1205 }
 0x123   : > { %v1284_v43 = vsel %vm327_vm0, %v1092_v39, %v1200_v41  ;;  %v1287_v46 = vsel %vm327_vm0, %v1095_v42, %v1206_v44  ;;  %v1499_v39 = vld [vmem:[#allocation3 + $0xa] sm:$0xff]  ;;  %v1501_v41 = vld [vmem:[#allocation3 + $0x22] sm:$0xff] }
 0x124   : > { %1359 = vrot.lane.b32.xlu1 %v1284_v43, %s6993_s17  ;;  %1365 = vrot.lane.b32.xlu0 %v1287_v46, %s6993_s17  ;;  %v1504_v42 = vld [vmem:[#allocation3 + $0x4a] sm:$0xff]  ;;  %v1503_v43 = vld [vmem:[#allocation3 + $0x3a] sm:$0xff]  ;;  %v1506_v44 = vld [vmem:[#allocation3 + $0x62] sm:$0xff] }
 0x125   : > { %v1508_v46 = vld [vmem:[#allocation3 + $0x7a] sm:$0xff] }
 0x126   : > { %v1204_v47 = vpop.permute.xlu1 %1203  ;;  %v1210_v50 = vpop.permute.xlu0 %1209 }
 0x127   : > { %v1286_v49 = vsel %vm327_vm0, %v1094_v45, %v1204_v47  ;;  %v1289_v52 = vsel %vm327_vm0, %v1097_v48, %v1210_v50  ;;  %v1505_v45 = vld [vmem:[#allocation3 + $0x52] sm:$0xff]  ;;  %v1507_v47 = vld [vmem:[#allocation3 + $0x6a] sm:$0xff] }
 0x128   : > { %1363 = vrot.lane.b32.xlu1 %v1286_v49, %s6993_s17  ;;  %1369 = vrot.lane.b32.xlu0 %v1289_v52, %s6993_s17  ;;  %v1510_v48 = vld [vmem:[#allocation3 + $0x92] sm:$0xff]  ;;  %v1509_v49 = vld [vmem:[#allocation3 + $0x82] sm:$0xff]  ;;  %v1512_v50 = vld [vmem:[#allocation3 + $0xaa] sm:$0xff] }
 0x129   : > { %v1514_v52 = vld [vmem:[#allocation3 + $0xc2] sm:$0xff] }
 0x12a   : > { %v1208_v53 = vpop.permute.xlu1 %1207  ;;  %v1214_v56 = vpop.permute.xlu0 %1213 }
 0x12b   : > { %v1288_v55 = vsel %vm327_vm0, %v1096_v51, %v1208_v53  ;;  %v1291_v58 = vsel %vm327_vm0, %v1099_v54, %v1214_v56  ;;  %v1511_v51 = vld [vmem:[#allocation3 + $0x9a] sm:$0xff]  ;;  %v1513_v53 = vld [vmem:[#allocation3 + $0xb2] sm:$0xff] }
 0x12c   : > { %1367 = vrot.lane.b32.xlu1 %v1288_v55, %s6993_s17  ;;  %1373 = vrot.lane.b32.xlu0 %v1291_v58, %s6993_s17  ;;  %v1516_v54 = vld [vmem:[#allocation3 + $0xda] sm:$0xff]  ;;  %v1515_v55 = vld [vmem:[#allocation3 + $0xca] sm:$0xff]  ;;  %v1518_v56 = vld [vmem:[#allocation3 + $0xf2] sm:$0xff] }
 0x12d   : > { %v1520_v58 = vld [vmem:[#allocation3 + $0x10a] sm:$0xff] }
 0x12e   : > { %v1212_v59 = vpop.permute.xlu1 %1211  ;;  %v1218_v62 = vpop.permute.xlu0 %1217 }
 0x12f   : > { %v1290_v61 = vsel %vm327_vm0, %v1098_v57, %v1212_v59  ;;  %v1293_v1 = vsel %vm327_vm0, %v1101_v60, %v1218_v62  ;;  %v1517_v57 = vld [vmem:[#allocation3 + $0xe2] sm:$0xff]  ;;  %v1519_v59 = vld [vmem:[#allocation3 + $0xfa] sm:$0xff] }
 0x130   : > { %1371 = vrot.lane.b32.xlu1 %v1290_v61, %s6993_s17  ;;  %1377 = vrot.lane.b32.xlu0 %v1293_v1, %s6993_s17  ;;  %v1522_v60 = vld [vmem:[#allocation3 + $0x122] sm:$0xff]  ;;  %v1521_v61 = vld [vmem:[#allocation3 + $0x112] sm:$0xff]  ;;  %v1524_v62 = vld [vmem:[#allocation3 + $0x13a] sm:$0xff] }
 0x131   : > { %v1523_v1 = vld [vmem:[#allocation3 + $0x12a] sm:$0xff] }
 0x132   : > { %v1216_v2 = vpop.permute.xlu1 %1215  ;;  %v1222_v5 = vpop.permute.xlu0 %1221 }
 0x133   : > { %v1292_v4 = vsel %vm327_vm0, %v1100_v63, %v1216_v2  ;;  %v1295_v7 = vsel %vm327_vm0, %v1103_v3, %v1222_v5  ;;  %v1526_v2 = vld [vmem:[#allocation3 + $0x152] sm:$0xff] }
 0x134   : > { %1375 = vrot.lane.b32.xlu1 %v1292_v4, %s6993_s17  ;;  %1381 = vrot.lane.b32.xlu0 %v1295_v7, %s6993_s17  ;;  %v1525_v4 = vld [vmem:[#allocation3 + $0x142] sm:$0xff] }
 0x136   : > { %v1220_v8 = vpop.permute.xlu1 %1219  ;;  %v1226_v11 = vpop.permute.xlu0 %1225 }
 0x137   : > { %v1294_v10 = vsel %vm327_vm0, %v1102_v6, %v1220_v8  ;;  %v1297_v13 = vsel %vm327_vm0, %v1105_v9, %v1226_v11  ;;  %v1528_v6 = vld [vmem:[#allocation3 + $0x16a] sm:$0xff]  ;;  %v1527_v8 = vld [vmem:[#allocation3 + $0x15a] sm:$0xff]  ;;  %v1529_v11 = vld [vmem:[#allocation3 + $0x172] sm:$0xff] }
 0x138   : > { %1379 = vrot.lane.b32.xlu1 %v1294_v10, %s6993_s17  ;;  %1385 = vrot.lane.b32.xlu0 %v1297_v13, %s6993_s17 }
 0x13a   : > { %v1224_v14 = vpop.permute.xlu1 %1223  ;;  %v1230_v17 = vpop.permute.xlu0 %1229 }
 0x13b   : > { %v1296_v16 = vsel %vm327_vm0, %v1104_v12, %v1224_v14  ;;  %v1299_v19 = vsel %vm327_vm0, %v1107_v15, %v1230_v17 }
 0x13c   : > { %1383 = vrot.lane.b32.xlu1 %v1296_v16, %s6993_s17  ;;  %1389 = vrot.lane.b32.xlu0 %v1299_v19, %s6993_s17 }
 0x13e   : > { %v1228_v20 = vpop.permute.xlu1 %1227  ;;  %v1234_v23 = vpop.permute.xlu0 %1233 }
 0x13f   : > { %v1298_v22 = vsel %vm327_vm0, %v1106_v18, %v1228_v20  ;;  %v1301_v25 = vsel %vm327_vm0, %v1109_v21, %v1234_v23 }
 0x140   : > { %1387 = vrot.lane.b32.xlu1 %v1298_v22, %s6993_s17  ;;  %1393 = vrot.lane.b32.xlu0 %v1301_v25, %s6993_s17 }
 0x142   : > { %v1232_v26 = vpop.permute.xlu1 %1231  ;;  %v1238_v29 = vpop.permute.xlu0 %1237 }
 0x143   : > { %v1300_v28 = vsel %vm327_vm0, %v1108_v24, %v1232_v26  ;;  %v1303_v31 = vsel %vm327_vm0, %v1111_v27, %v1238_v29 }
 0x144   : > { %1391 = vrot.lane.b32.xlu1 %v1300_v28, %s6993_s17  ;;  %1397 = vrot.lane.b32.xlu0 %v1303_v31, %s6993_s17 }
 0x146   : > { %v1236_v32 = vpop.permute.xlu1 %1235 }
 0x147   : > { %v1302_v33 = vsel %vm327_vm0, %v1110_v30, %v1236_v32  ;;  %v789_v32 = vld [vmem:[%s7360_s11 + $0xf0] sm:$0xff] }
 0x148   : > { %1395 = vrot.lane.b32.xlu1 %v1302_v33, %s6993_s17  ;;  %1562 = vrot.lane.b32.xlu0 %v1498_v34, %s6992_s12  ;;  %822 = vst.msk [vmem:[#allocation3 + $0x181] sm:$0xff] %vm327_vm0, %v789_v32 }
 0x14a   : > { %v1240_v36 = vpop.permute.xlu1 %1239 }
 0x14b   : > { %v1304_v37 = vsel %vm327_vm0, %v1112_v35, %v1240_v36  ;;  %v790_v36 = vld [vmem:[%s7360_s11 + $0xf8] sm:$0xff] }
 0x14c   : > { %1399 = vrot.lane.b32.xlu1 %v1304_v37, %s6993_s17  ;;  %1566 = vrot.lane.b32.xlu0 %v1500_v38, %s6992_s12  ;;  %823 = vst.msk [vmem:[#allocation3 + $0x189] sm:$0xff] %vm327_vm0, %v790_v36  ;;  %v1485_v36 = vld [vmem:[#allocation2 + $0xe2] sm:$0xff] }
 0x150   : > { %1564 = vrot.lane.b32.xlu1 %v1499_v39, %s6992_s12  ;;  %1570 = vrot.lane.b32.xlu0 %v1502_v40, %s6992_s12  ;;  %v1466_v39 = vld [vmem:[#allocation2 + $0x2] sm:$0xff] }
 0x154   : > { %1568 = vrot.lane.b32.xlu1 %v1501_v41, %s6992_s12  ;;  %1574 = vrot.lane.b32.xlu0 %v1504_v42, %s6992_s12 }
 0x158   : > { %1572 = vrot.lane.b32.xlu1 %v1503_v43, %s6992_s12  ;;  %1578 = vrot.lane.b32.xlu0 %v1506_v44, %s6992_s12  ;;  %v1468_v43 = vld [vmem:[#allocation2 + $0x1a] sm:$0xff] }
 0x15c   : > { %1576 = vrot.lane.b32.xlu1 %v1505_v45, %s6992_s12  ;;  %1582 = vrot.lane.b32.xlu0 %v1508_v46, %s6992_s12  ;;  %v1467_v45 = vld [vmem:[#allocation2 + $0xa] sm:$0xff] }
 0x160   : > { %1580 = vrot.lane.b32.xlu1 %v1507_v47, %s6992_s12  ;;  %1586 = vrot.lane.b32.xlu0 %v1510_v48, %s6992_s12  ;;  %v1470_v48 = vld [vmem:[#allocation2 + $0x32] sm:$0xff] }
 0x164   : > { %1584 = vrot.lane.b32.xlu1 %v1509_v49, %s6992_s12  ;;  %1590 = vrot.lane.b32.xlu0 %v1512_v50, %s6992_s12 }
 0x168   : > { %1588 = vrot.lane.b32.xlu1 %v1511_v51, %s6992_s12  ;;  %1594 = vrot.lane.b32.xlu0 %v1514_v52, %s6992_s12  ;;  %v1469_v51 = vld [vmem:[#allocation2 + $0x22] sm:$0xff] }
 0x16c   : > { %1592 = vrot.lane.b32.xlu1 %v1513_v53, %s6992_s12  ;;  %1598 = vrot.lane.b32.xlu0 %v1516_v54, %s6992_s12  ;;  %v1472_v54 = vld [vmem:[#allocation2 + $0x4a] sm:$0xff] }
 0x170   : > { %1596 = vrot.lane.b32.xlu1 %v1515_v55, %s6992_s12  ;;  %1602 = vrot.lane.b32.xlu0 %v1518_v56, %s6992_s12 }
 0x174   : > { %1600 = vrot.lane.b32.xlu1 %v1517_v57, %s6992_s12  ;;  %1606 = vrot.lane.b32.xlu0 %v1520_v58, %s6992_s12  ;;  %v1471_v57 = vld [vmem:[#allocation2 + $0x3a] sm:$0xff] }
 0x178   : > { %1604 = vrot.lane.b32.xlu1 %v1519_v59, %s6992_s12  ;;  %1610 = vrot.lane.b32.xlu0 %v1522_v60, %s6992_s12  ;;  %v1474_v60 = vld [vmem:[#allocation2 + $0x62] sm:$0xff] }
 0x17a   : > { %v1338_v63 = vpop.permute.xlu0 %1337 }
 0x17b   : > { %1434 = vst.msk [vmem:[#allocation5] sm:$0xff] %vm1433_vm4, %v1338_v63  ;;  %v1473_v63 = vld [vmem:[#allocation2 + $0x52] sm:$0xff] }
 0x17c   : > { %1608 = vrot.lane.b32.xlu1 %v1521_v61, %s6992_s12  ;;  %1614 = vrot.lane.b32.xlu0 %v1524_v62, %s6992_s12 }
 0x17e   : > { %v1342_v3 = vpop.permute.xlu0 %1341 }
 0x17f   : > { %1436 = vst.msk [vmem:[#allocation5 + $0x10] sm:$0xff] %vm1433_vm4, %v1342_v3  ;;  %v1476_v3 = vld [vmem:[#allocation2 + $0x7a] sm:$0xff] }
 0x180   : > { %1612 = vrot.lane.b32.xlu1 %v1523_v1, %s6992_s12  ;;  %1618 = vrot.lane.b32.xlu0 %v1526_v2, %s6992_s12 }
 0x182   : > { %v1340_v5 = vpop.permute.xlu1 %1339  ;;  %v1346_v7 = vpop.permute.xlu0 %1345 }
 0x183   : > { %1435 = vst.msk [vmem:[#allocation5 + $0x8] sm:$0xff] %vm1433_vm4, %v1340_v5  ;;  %1438 = vst.msk [vmem:[#allocation5 + $0x20] sm:$0xff] %vm1433_vm4, %v1346_v7 }
 0x184   : > { %1616 = vrot.lane.b32.xlu1 %v1525_v4, %s6992_s12  ;;  %1622 = vrot.lane.b32.xlu0 %v1528_v6, %s6992_s12  ;;  %v1475_v6 = vld [vmem:[#allocation2 + $0x6a] sm:$0xff] }
 0x186   : > { %v1344_v9 = vpop.permute.xlu1 %1343  ;;  %v1350_v10 = vpop.permute.xlu0 %1349 }
 0x187   : > { %1437 = vst.msk [vmem:[#allocation5 + $0x18] sm:$0xff] %vm1433_vm4, %v1344_v9  ;;  %1440 = vst.msk [vmem:[#allocation5 + $0x30] sm:$0xff] %vm1433_vm4, %v1350_v10  ;;  %v1478_v9 = vld [vmem:[#allocation2 + $0x92] sm:$0xff] }
 0x188   : > { %1620 = vrot.lane.b32.xlu1 %v1527_v8, %s6992_s12 }
 0x18a   : > { %v1348_v12 = vpop.permute.xlu1 %1347  ;;  %v1354_v13 = vpop.permute.xlu0 %1353 }
 0x18b   : > { %1439 = vst.msk [vmem:[#allocation5 + $0x28] sm:$0xff] %vm1433_vm4, %v1348_v12  ;;  %1442 = vst.msk [vmem:[#allocation5 + $0x40] sm:$0xff] %vm1433_vm4, %v1354_v13  ;;  %v1477_v12 = vld [vmem:[#allocation2 + $0x82] sm:$0xff] }
 0x18c   : > { %1624 = vrot.lane.b32.xlu1 %v1529_v11, %s6992_s12 }
 0x18e   : > { %v1352_v14 = vpop.permute.xlu1 %1351  ;;  %v1358_v15 = vpop.permute.xlu0 %1357 }
 0x18f   : > { %1441 = vst.msk [vmem:[#allocation5 + $0x38] sm:$0xff] %vm1433_vm4, %v1352_v14  ;;  %1444 = vst.msk [vmem:[#allocation5 + $0x50] sm:$0xff] %vm1433_vm4, %v1358_v15  ;;  %v1480_v15 = vld [vmem:[#allocation2 + $0xaa] sm:$0xff] }
 0x192   : > { %v1356_v16 = vpop.permute.xlu1 %1355  ;;  %v1362_v17 = vpop.permute.xlu0 %1361 }
 0x193   : > { %1443 = vst.msk [vmem:[#allocation5 + $0x48] sm:$0xff] %vm1433_vm4, %v1356_v16  ;;  %1446 = vst.msk [vmem:[#allocation5 + $0x60] sm:$0xff] %vm1433_vm4, %v1362_v17 }
 0x196   : > { %v1360_v18 = vpop.permute.xlu1 %1359  ;;  %v1366_v19 = vpop.permute.xlu0 %1365 }
 0x197   : > { %1445 = vst.msk [vmem:[#allocation5 + $0x58] sm:$0xff] %vm1433_vm4, %v1360_v18  ;;  %1448 = vst.msk [vmem:[#allocation5 + $0x70] sm:$0xff] %vm1433_vm4, %v1366_v19  ;;  %v1479_v18 = vld [vmem:[#allocation2 + $0x9a] sm:$0xff] }
 0x19a   : > { %v1364_v20 = vpop.permute.xlu1 %1363  ;;  %v1370_v21 = vpop.permute.xlu0 %1369 }
 0x19b   : > { %1447 = vst.msk [vmem:[#allocation5 + $0x68] sm:$0xff] %vm1433_vm4, %v1364_v20  ;;  %1450 = vst.msk [vmem:[#allocation5 + $0x80] sm:$0xff] %vm1433_vm4, %v1370_v21  ;;  %v1482_v21 = vld [vmem:[#allocation2 + $0xc2] sm:$0xff] }
 0x19e   : > { %v1368_v22 = vpop.permute.xlu1 %1367  ;;  %v1374_v23 = vpop.permute.xlu0 %1373 }
 0x19f   : > { %1449 = vst.msk [vmem:[#allocation5 + $0x78] sm:$0xff] %vm1433_vm4, %v1368_v22  ;;  %1452 = vst.msk [vmem:[#allocation5 + $0x90] sm:$0xff] %vm1433_vm4, %v1374_v23 }
 0x1a2   : > { %v1372_v24 = vpop.permute.xlu1 %1371  ;;  %v1378_v25 = vpop.permute.xlu0 %1377 }
 0x1a3   : > { %1451 = vst.msk [vmem:[#allocation5 + $0x88] sm:$0xff] %vm1433_vm4, %v1372_v24  ;;  %1454 = vst.msk [vmem:[#allocation5 + $0xa0] sm:$0xff] %vm1433_vm4, %v1378_v25  ;;  %v1481_v24 = vld [vmem:[#allocation2 + $0xb2] sm:$0xff] }
 0x1a6   : > { %v1376_v26 = vpop.permute.xlu1 %1375  ;;  %v1382_v27 = vpop.permute.xlu0 %1381 }
 0x1a7   : > { %1453 = vst.msk [vmem:[#allocation5 + $0x98] sm:$0xff] %vm1433_vm4, %v1376_v26  ;;  %1456 = vst.msk [vmem:[#allocation5 + $0xb0] sm:$0xff] %vm1433_vm4, %v1382_v27  ;;  %v1484_v27 = vld [vmem:[#allocation2 + $0xda] sm:$0xff] }
 0x1aa   : > { %v1380_v28 = vpop.permute.xlu1 %1379  ;;  %v1386_v29 = vpop.permute.xlu0 %1385 }
 0x1ab   : > { %1455 = vst.msk [vmem:[#allocation5 + $0xa8] sm:$0xff] %vm1433_vm4, %v1380_v28  ;;  %1458 = vst.msk [vmem:[#allocation5 + $0xc0] sm:$0xff] %vm1433_vm4, %v1386_v29 }
 0x1ae   : > { %v1384_v30 = vpop.permute.xlu1 %1383  ;;  %v1390_v31 = vpop.permute.xlu0 %1389 }
 0x1af   : > { %1457 = vst.msk [vmem:[#allocation5 + $0xb8] sm:$0xff] %vm1433_vm4, %v1384_v30  ;;  %1460 = vst.msk [vmem:[#allocation5 + $0xd0] sm:$0xff] %vm1433_vm4, %v1390_v31  ;;  %v1483_v30 = vld [vmem:[#allocation2 + $0xca] sm:$0xff] }
 0x1b2   : > { %v1388_v33 = vpop.permute.xlu1 %1387  ;;  %v1394_v34 = vpop.permute.xlu0 %1393 }
 0x1b3   : > { %1459 = vst.msk [vmem:[#allocation5 + $0xc8] sm:$0xff] %vm1433_vm4, %v1388_v33  ;;  %1462 = vst.msk [vmem:[#allocation5 + $0xe0] sm:$0xff] %vm1433_vm4, %v1394_v34  ;;  %v1486_v33 = vld [vmem:[#allocation2 + $0xf2] sm:$0xff] }
 0x1b6   : > { %v1392_v35 = vpop.permute.xlu1 %1391  ;;  %v1398_v37 = vpop.permute.xlu0 %1397 }
 0x1b7   : > { %1461 = vst.msk [vmem:[#allocation5 + $0xd8] sm:$0xff] %vm1433_vm4, %v1392_v35  ;;  %1464 = vst.msk [vmem:[#allocation5 + $0xf0] sm:$0xff] %vm1433_vm4, %v1398_v37 }
 0x1ba   : > { %v1396_v38 = vpop.permute.xlu1 %1395  ;;  %v1563_v40 = vpop.permute.xlu0 %1562 }
 0x1bb   : > { %1463 = vst.msk [vmem:[#allocation5 + $0xe8] sm:$0xff] %vm1433_vm4, %v1396_v38  ;;  %v1658_v41 = vsel %vm327_vm0, %v1466_v39, %v1563_v40  ;;  %v1488_v39 = vld [vmem:[#allocation2 + $0x10a] sm:$0xff] }
 0x1bc   : > { %1722 = vrot.lane.b32.xlu0 %v1658_v41, %s6994_s18 }
 0x1be   : > { %v1400_v42 = vpop.permute.xlu1 %1399  ;;  %v1567_v44 = vpop.permute.xlu0 %1566 }
 0x1bf   : > { %1465 = vst.msk [vmem:[#allocation5 + $0xf8] sm:$0xff] %vm1433_vm4, %v1400_v42  ;;  %v1660_v46 = vsel %vm327_vm0, %v1468_v43, %v1567_v44  ;;  %v1487_v42 = vld [vmem:[#allocation2 + $0xfa] sm:$0xff] }
 0x1c0   : > { %1726 = vrot.lane.b32.xlu0 %v1660_v46, %s6994_s18 }
 0x1c2   : > { %v1565_v47 = vpop.permute.xlu1 %1564  ;;  %v1571_v50 = vpop.permute.xlu0 %1570 }
 0x1c3   : > { %v1659_v49 = vsel %vm327_vm0, %v1467_v45, %v1565_v47  ;;  %v1662_v52 = vsel %vm327_vm0, %v1470_v48, %v1571_v50  ;;  %v1490_v45 = vld [vmem:[#allocation2 + $0x122] sm:$0xff]  ;;  %v1489_v48 = vld [vmem:[#allocation2 + $0x112] sm:$0xff] }
 0x1c4   : > { %1724 = vrot.lane.b32.xlu1 %v1659_v49, %s6994_s18  ;;  %1730 = vrot.lane.b32.xlu0 %v1662_v52, %s6994_s18 }
 0x1c6   : > { %v1569_v53 = vpop.permute.xlu1 %1568  ;;  %v1575_v56 = vpop.permute.xlu0 %1574 }
 0x1c7   : > { %v1661_v55 = vsel %vm327_vm0, %v1469_v51, %v1569_v53  ;;  %v1664_v58 = vsel %vm327_vm0, %v1472_v54, %v1575_v56  ;;  %v1492_v51 = vld [vmem:[#allocation2 + $0x13a] sm:$0xff]  ;;  %v1491_v54 = vld [vmem:[#allocation2 + $0x12a] sm:$0xff] }
 0x1c8   : > { %1728 = vrot.lane.b32.xlu1 %v1661_v55, %s6994_s18  ;;  %1734 = vrot.lane.b32.xlu0 %v1664_v58, %s6994_s18 }
 0x1ca   : > { %v1573_v59 = vpop.permute.xlu1 %1572  ;;  %v1579_v62 = vpop.permute.xlu0 %1578 }
 0x1cb   : > { %v1663_v61 = vsel %vm327_vm0, %v1471_v57, %v1573_v59  ;;  %v1666_v1 = vsel %vm327_vm0, %v1474_v60, %v1579_v62  ;;  %v1494_v57 = vld [vmem:[#allocation2 + $0x152] sm:$0xff]  ;;  %v1493_v60 = vld [vmem:[#allocation2 + $0x142] sm:$0xff] }
 0x1cc   : > { %1732 = vrot.lane.b32.xlu1 %v1663_v61, %s6994_s18  ;;  %1738 = vrot.lane.b32.xlu0 %v1666_v1, %s6994_s18 }
 0x1ce   : > { %v1577_v2 = vpop.permute.xlu1 %1576  ;;  %v1583_v5 = vpop.permute.xlu0 %1582 }
 0x1cf   : > { %v1665_v4 = vsel %vm327_vm0, %v1473_v63, %v1577_v2  ;;  %v1668_v7 = vsel %vm327_vm0, %v1476_v3, %v1583_v5  ;;  %v1496_v63 = vld [vmem:[#allocation2 + $0x16a] sm:$0xff]  ;;  %v1495_v3 = vld [vmem:[#allocation2 + $0x15a] sm:$0xff] }
 0x1d0   : > { %1736 = vrot.lane.b32.xlu1 %v1665_v4, %s6994_s18  ;;  %1742 = vrot.lane.b32.xlu0 %v1668_v7, %s6994_s18  ;;  %v1883_v7 = vld [vmem:[#allocation3 + $0x18] sm:$0xff] }
 0x1d2   : > { %v1581_v8 = vpop.permute.xlu1 %1580  ;;  %v1587_v11 = vpop.permute.xlu0 %1586 }
 0x1d3   : > { %v1667_v10 = vsel %vm327_vm0, %v1475_v6, %v1581_v8  ;;  %v1670_v13 = vsel %vm327_vm0, %v1478_v9, %v1587_v11  ;;  %v1497_v8 = vld [vmem:[#allocation2 + $0x172] sm:$0xff]  ;;  %v1885_v11 = vld [vmem:[#allocation3 + $0x30] sm:$0xff] }
 0x1d4   : > { %1740 = vrot.lane.b32.xlu1 %v1667_v10, %s6994_s18  ;;  %1746 = vrot.lane.b32.xlu0 %v1670_v13, %s6994_s18  ;;  %v1887_v13 = vld [vmem:[#allocation3 + $0x48] sm:$0xff] }
 0x1d6   : > { %v1585_v14 = vpop.permute.xlu1 %1584  ;;  %v1591_v17 = vpop.permute.xlu0 %1590 }
 0x1d7   : > { %v1669_v16 = vsel %vm327_vm0, %v1477_v12, %v1585_v14  ;;  %v1672_v19 = vsel %vm327_vm0, %v1480_v15, %v1591_v17  ;;  %v1884_v12 = vld [vmem:[#allocation3 + $0x20] sm:$0xff]  ;;  %v1886_v14 = vld [vmem:[#allocation3 + $0x38] sm:$0xff] }
 0x1d8   : > { %1744 = vrot.lane.b32.xlu1 %v1669_v16, %s6994_s18  ;;  %1750 = vrot.lane.b32.xlu0 %v1672_v19, %s6994_s18  ;;  %v1889_v15 = vld [vmem:[#allocation3 + $0x60] sm:$0xff]  ;;  %v1888_v16 = vld [vmem:[#allocation3 + $0x50] sm:$0xff]  ;;  %v1891_v17 = vld [vmem:[#allocation3 + $0x78] sm:$0xff] }
 0x1d9   : > { %v1893_v19 = vld [vmem:[#allocation3 + $0x90] sm:$0xff] }
 0x1da   : > { %v1589_v20 = vpop.permute.xlu1 %1588  ;;  %v1595_v23 = vpop.permute.xlu0 %1594 }
 0x1db   : > { %v1671_v22 = vsel %vm327_vm0, %v1479_v18, %v1589_v20  ;;  %v1674_v25 = vsel %vm327_vm0, %v1482_v21, %v1595_v23  ;;  %v1890_v18 = vld [vmem:[#allocation3 + $0x68] sm:$0xff]  ;;  %v1892_v20 = vld [vmem:[#allocation3 + $0x80] sm:$0xff] }
 0x1dc   : > { %1748 = vrot.lane.b32.xlu1 %v1671_v22, %s6994_s18  ;;  %1754 = vrot.lane.b32.xlu0 %v1674_v25, %s6994_s18  ;;  %v1895_v21 = vld [vmem:[#allocation3 + $0xa8] sm:$0xff]  ;;  %v1894_v22 = vld [vmem:[#allocation3 + $0x98] sm:$0xff]  ;;  %v1897_v23 = vld [vmem:[#allocation3 + $0xc0] sm:$0xff] }
 0x1dd   : > { %v1899_v25 = vld [vmem:[#allocation3 + $0xd8] sm:$0xff] }
 0x1de   : > { %v1593_v26 = vpop.permute.xlu1 %1592  ;;  %v1599_v29 = vpop.permute.xlu0 %1598 }
 0x1df   : > { %v1673_v28 = vsel %vm327_vm0, %v1481_v24, %v1593_v26  ;;  %v1676_v31 = vsel %vm327_vm0, %v1484_v27, %v1599_v29  ;;  %v1896_v24 = vld [vmem:[#allocation3 + $0xb0] sm:$0xff]  ;;  %v1898_v26 = vld [vmem:[#allocation3 + $0xc8] sm:$0xff] }
 0x1e0   : > { %1752 = vrot.lane.b32.xlu1 %v1673_v28, %s6994_s18  ;;  %1758 = vrot.lane.b32.xlu0 %v1676_v31, %s6994_s18  ;;  %v1901_v27 = vld [vmem:[#allocation3 + $0xf0] sm:$0xff]  ;;  %v1900_v28 = vld [vmem:[#allocation3 + $0xe0] sm:$0xff]  ;;  %v1903_v29 = vld [vmem:[#allocation3 + $0x108] sm:$0xff] }
 0x1e1   : > { %v1905_v31 = vld [vmem:[#allocation3 + $0x120] sm:$0xff] }
 0x1e2   : > { %v1597_v32 = vpop.permute.xlu1 %1596  ;;  %v1603_v35 = vpop.permute.xlu0 %1602 }
 0x1e3   : > { %v1675_v34 = vsel %vm327_vm0, %v1483_v30, %v1597_v32  ;;  %v1678_v37 = vsel %vm327_vm0, %v1486_v33, %v1603_v35  ;;  %v1902_v30 = vld [vmem:[#allocation3 + $0xf8] sm:$0xff]  ;;  %v1904_v32 = vld [vmem:[#allocation3 + $0x110] sm:$0xff] }
 0x1e4   : > { %1756 = vrot.lane.b32.xlu1 %v1675_v34, %s6994_s18  ;;  %1762 = vrot.lane.b32.xlu0 %v1678_v37, %s6994_s18  ;;  %v1907_v33 = vld [vmem:[#allocation3 + $0x138] sm:$0xff]  ;;  %v1906_v34 = vld [vmem:[#allocation3 + $0x128] sm:$0xff]  ;;  %v1909_v35 = vld [vmem:[#allocation3 + $0x150] sm:$0xff] }
 0x1e5   : > { %v1908_v37 = vld [vmem:[#allocation3 + $0x140] sm:$0xff] }
 0x1e6   : > { %v1601_v38 = vpop.permute.xlu1 %1600  ;;  %v1607_v41 = vpop.permute.xlu0 %1606 }
 0x1e7   : > { %v1677_v40 = vsel %vm327_vm0, %v1485_v36, %v1601_v38  ;;  %v1680_v43 = vsel %vm327_vm0, %v1488_v39, %v1607_v41  ;;  %v1911_v38 = vld [vmem:[#allocation3 + $0x168] sm:$0xff] }
 0x1e8   : > { %1760 = vrot.lane.b32.xlu1 %v1677_v40, %s6994_s18  ;;  %1766 = vrot.lane.b32.xlu0 %v1680_v43, %s6994_s18  ;;  %v1910_v40 = vld [vmem:[#allocation3 + $0x158] sm:$0xff] }
 0x1ea   : > { %v1605_v44 = vpop.permute.xlu1 %1604  ;;  %v1611_v47 = vpop.permute.xlu0 %1610 }
 0x1eb   : > { %v1679_v46 = vsel %vm327_vm0, %v1487_v42, %v1605_v44  ;;  %v1682_v49 = vsel %vm327_vm0, %v1490_v45, %v1611_v47  ;;  %v1913_v42 = vld [vmem:[#allocation3 + $0x180] sm:$0xff]  ;;  %v1912_v44 = vld [vmem:[#allocation3 + $0x170] sm:$0xff]  ;;  %v1914_v47 = vld [vmem:[#allocation3 + $0x188] sm:$0xff] }
 0x1ec   : > { %1764 = vrot.lane.b32.xlu1 %v1679_v46, %s6994_s18  ;;  %1770 = vrot.lane.b32.xlu0 %v1682_v49, %s6994_s18 }
 0x1ee   : > { %v1609_v50 = vpop.permute.xlu1 %1608  ;;  %v1615_v53 = vpop.permute.xlu0 %1614 }
 0x1ef   : > { %v1681_v52 = vsel %vm327_vm0, %v1489_v48, %v1609_v50  ;;  %v1684_v55 = vsel %vm327_vm0, %v1492_v51, %v1615_v53 }
 0x1f0   : > { %1768 = vrot.lane.b32.xlu1 %v1681_v52, %s6994_s18  ;;  %1774 = vrot.lane.b32.xlu0 %v1684_v55, %s6994_s18 }
 0x1f2   : > { %v1613_v56 = vpop.permute.xlu1 %1612  ;;  %v1619_v59 = vpop.permute.xlu0 %1618 }
 0x1f3   : > { %v1683_v58 = vsel %vm327_vm0, %v1491_v54, %v1613_v56  ;;  %v1686_v61 = vsel %vm327_vm0, %v1494_v57, %v1619_v59 }
 0x1f4   : > { %1772 = vrot.lane.b32.xlu1 %v1683_v58, %s6994_s18  ;;  %1778 = vrot.lane.b32.xlu0 %v1686_v61, %s6994_s18 }
 0x1f6   : > { %v1617_v62 = vpop.permute.xlu1 %1616  ;;  %v1623_v2 = vpop.permute.xlu0 %1622 }
 0x1f7   : > { %v1685_v1 = vsel %vm327_vm0, %v1493_v60, %v1617_v62  ;;  %v1688_v4 = vsel %vm327_vm0, %v1496_v63, %v1623_v2 }
 0x1f8   : > { %1776 = vrot.lane.b32.xlu1 %v1685_v1, %s6994_s18  ;;  %1782 = vrot.lane.b32.xlu0 %v1688_v4, %s6994_s18 }
 0x1fa   : > { %v1621_v5 = vpop.permute.xlu1 %1620 }
 0x1fb   : > { %v1687_v6 = vsel %vm327_vm0, %v1495_v3, %v1621_v5 }
 0x1fc   : > { %1780 = vrot.lane.b32.xlu1 %v1687_v6, %s6994_s18  ;;  %1947 = vrot.lane.b32.xlu0 %v1883_v7, %s6992_s12 }
 0x1fe   : > { %v1625_v9 = vpop.permute.xlu1 %1624 }
 0x1ff   : > { %v1689_v10 = vsel %vm327_vm0, %v1497_v8, %v1625_v9 }
 0x200   : > { %1784 = vrot.lane.b32.xlu1 %v1689_v10, %s6994_s18  ;;  %1951 = vrot.lane.b32.xlu0 %v1885_v11, %s6992_s12  ;;  %v1851_v10 = vld [vmem:[#allocation2 + $0x18] sm:$0xff] }
 0x204   : > { %1949 = vrot.lane.b32.xlu1 %v1884_v12, %s6992_s12  ;;  %1955 = vrot.lane.b32.xlu0 %v1887_v13, %s6992_s12 }
 0x208   : > { %1953 = vrot.lane.b32.xlu1 %v1886_v14, %s6992_s12  ;;  %1959 = vrot.lane.b32.xlu0 %v1889_v15, %s6992_s12  ;;  %v1853_v14 = vld [vmem:[#allocation2 + $0x30] sm:$0xff] }
 0x20c   : > { %1957 = vrot.lane.b32.xlu1 %v1888_v16, %s6992_s12  ;;  %1963 = vrot.lane.b32.xlu0 %v1891_v17, %s6992_s12  ;;  %v1852_v16 = vld [vmem:[#allocation2 + $0x20] sm:$0xff] }
 0x210   : > { %1961 = vrot.lane.b32.xlu1 %v1890_v18, %s6992_s12  ;;  %1967 = vrot.lane.b32.xlu0 %v1893_v19, %s6992_s12  ;;  %v1855_v19 = vld [vmem:[#allocation2 + $0x48] sm:$0xff] }
 0x214   : > { %1965 = vrot.lane.b32.xlu1 %v1892_v20, %s6992_s12  ;;  %1971 = vrot.lane.b32.xlu0 %v1895_v21, %s6992_s12 }
 0x218   : > { %1969 = vrot.lane.b32.xlu1 %v1894_v22, %s6992_s12  ;;  %1975 = vrot.lane.b32.xlu0 %v1897_v23, %s6992_s12  ;;  %v1854_v22 = vld [vmem:[#allocation2 + $0x38] sm:$0xff] }
 0x21c   : > { %1973 = vrot.lane.b32.xlu1 %v1896_v24, %s6992_s12  ;;  %1979 = vrot.lane.b32.xlu0 %v1899_v25, %s6992_s12  ;;  %v1857_v25 = vld [vmem:[#allocation2 + $0x60] sm:$0xff] }
 0x220   : > { %1977 = vrot.lane.b32.xlu1 %v1898_v26, %s6992_s12  ;;  %1983 = vrot.lane.b32.xlu0 %v1901_v27, %s6992_s12 }
 0x224   : > { %1981 = vrot.lane.b32.xlu1 %v1900_v28, %s6992_s12  ;;  %1987 = vrot.lane.b32.xlu0 %v1903_v29, %s6992_s12  ;;  %v1856_v28 = vld [vmem:[#allocation2 + $0x50] sm:$0xff] }
 0x228   : > { %1985 = vrot.lane.b32.xlu1 %v1902_v30, %s6992_s12  ;;  %1991 = vrot.lane.b32.xlu0 %v1905_v31, %s6992_s12  ;;  %v1859_v31 = vld [vmem:[#allocation2 + $0x78] sm:$0xff] }
 0x22c   : > { %1989 = vrot.lane.b32.xlu1 %v1904_v32, %s6992_s12  ;;  %1995 = vrot.lane.b32.xlu0 %v1907_v33, %s6992_s12 }
 0x22e   : > { %v1723_v36 = vpop.permute.xlu0 %1722 }
 0x22f   : > { %1819 = vst.msk [vmem:[#allocation5] sm:$0xff] %vm1818_vm5, %v1723_v36 }
 0x230   : > { %1993 = vrot.lane.b32.xlu1 %v1906_v34, %s6992_s12  ;;  %1999 = vrot.lane.b32.xlu0 %v1909_v35, %s6992_s12  ;;  %v1858_v34 = vld [vmem:[#allocation2 + $0x68] sm:$0xff] }
 0x232   : > { %v1727_v39 = vpop.permute.xlu0 %1726 }
 0x233   : > { %1821 = vst.msk [vmem:[#allocation5 + $0x10] sm:$0xff] %vm1818_vm5, %v1727_v39 }
 0x234   : > { %1997 = vrot.lane.b32.xlu1 %v1908_v37, %s6992_s12  ;;  %2003 = vrot.lane.b32.xlu0 %v1911_v38, %s6992_s12  ;;  %v1861_v37 = vld [vmem:[#allocation2 + $0x90] sm:$0xff] }
 0x236   : > { %v1725_v41 = vpop.permute.xlu1 %1724  ;;  %v1731_v43 = vpop.permute.xlu0 %1730 }
 0x237   : > { %1820 = vst.msk [vmem:[#allocation5 + $0x8] sm:$0xff] %vm1818_vm5, %v1725_v41  ;;  %1823 = vst.msk [vmem:[#allocation5 + $0x20] sm:$0xff] %vm1818_vm5, %v1731_v43  ;;  %v1863_v43 = vld [vmem:[#allocation2 + $0xa8] sm:$0xff] }
 0x238   : > { %2001 = vrot.lane.b32.xlu1 %v1910_v40, %s6992_s12  ;;  %2007 = vrot.lane.b32.xlu0 %v1913_v42, %s6992_s12  ;;  %v1860_v40 = vld [vmem:[#allocation2 + $0x80] sm:$0xff] }
 0x23a   : > { %v1729_v45 = vpop.permute.xlu1 %1728  ;;  %v1735_v46 = vpop.permute.xlu0 %1734 }
 0x23b   : > { %1822 = vst.msk [vmem:[#allocation5 + $0x18] sm:$0xff] %vm1818_vm5, %v1729_v45  ;;  %1825 = vst.msk [vmem:[#allocation5 + $0x30] sm:$0xff] %vm1818_vm5, %v1735_v46  ;;  %v1862_v46 = vld [vmem:[#allocation2 + $0x98] sm:$0xff] }
 0x23c   : > { %2005 = vrot.lane.b32.xlu1 %v1912_v44, %s6992_s12 }
 0x23e   : > { %v1733_v48 = vpop.permute.xlu1 %1732  ;;  %v1739_v49 = vpop.permute.xlu0 %1738 }
 0x23f   : > { %1824 = vst.msk [vmem:[#allocation5 + $0x28] sm:$0xff] %vm1818_vm5, %v1733_v48  ;;  %1827 = vst.msk [vmem:[#allocation5 + $0x40] sm:$0xff] %vm1818_vm5, %v1739_v49  ;;  %v1865_v49 = vld [vmem:[#allocation2 + $0xc0] sm:$0xff] }
 0x240   : > { %2009 = vrot.lane.b32.xlu1 %v1914_v47, %s6992_s12 }
 0x242   : > { %v1737_v50 = vpop.permute.xlu1 %1736  ;;  %v1743_v51 = vpop.permute.xlu0 %1742 }
 0x243   : > { %1826 = vst.msk [vmem:[#allocation5 + $0x38] sm:$0xff] %vm1818_vm5, %v1737_v50  ;;  %1829 = vst.msk [vmem:[#allocation5 + $0x50] sm:$0xff] %vm1818_vm5, %v1743_v51 }
 0x246   : > { %v1741_v52 = vpop.permute.xlu1 %1740  ;;  %v1747_v53 = vpop.permute.xlu0 %1746 }
 0x247   : > { %1828 = vst.msk [vmem:[#allocation5 + $0x48] sm:$0xff] %vm1818_vm5, %v1741_v52  ;;  %1831 = vst.msk [vmem:[#allocation5 + $0x60] sm:$0xff] %vm1818_vm5, %v1747_v53  ;;  %v1864_v52 = vld [vmem:[#allocation2 + $0xb0] sm:$0xff] }
 0x24a   : > { %v1745_v54 = vpop.permute.xlu1 %1744  ;;  %v1751_v55 = vpop.permute.xlu0 %1750 }
 0x24b   : > { %1830 = vst.msk [vmem:[#allocation5 + $0x58] sm:$0xff] %vm1818_vm5, %v1745_v54  ;;  %1833 = vst.msk [vmem:[#allocation5 + $0x70] sm:$0xff] %vm1818_vm5, %v1751_v55  ;;  %v1867_v55 = vld [vmem:[#allocation2 + $0xd8] sm:$0xff] }
 0x24e   : > { %v1749_v56 = vpop.permute.xlu1 %1748  ;;  %v1755_v57 = vpop.permute.xlu0 %1754 }
 0x24f   : > { %1832 = vst.msk [vmem:[#allocation5 + $0x68] sm:$0xff] %vm1818_vm5, %v1749_v56  ;;  %1835 = vst.msk [vmem:[#allocation5 + $0x80] sm:$0xff] %vm1818_vm5, %v1755_v57 }
 0x252   : > { %v1753_v58 = vpop.permute.xlu1 %1752  ;;  %v1759_v59 = vpop.permute.xlu0 %1758 }
 0x253   : > { %1834 = vst.msk [vmem:[#allocation5 + $0x78] sm:$0xff] %vm1818_vm5, %v1753_v58  ;;  %1837 = vst.msk [vmem:[#allocation5 + $0x90] sm:$0xff] %vm1818_vm5, %v1759_v59  ;;  %v1866_v58 = vld [vmem:[#allocation2 + $0xc8] sm:$0xff] }
 0x256   : > { %v1757_v60 = vpop.permute.xlu1 %1756  ;;  %v1763_v61 = vpop.permute.xlu0 %1762 }
 0x257   : > { %1836 = vst.msk [vmem:[#allocation5 + $0x88] sm:$0xff] %vm1818_vm5, %v1757_v60  ;;  %1839 = vst.msk [vmem:[#allocation5 + $0xa0] sm:$0xff] %vm1818_vm5, %v1763_v61  ;;  %v1869_v61 = vld [vmem:[#allocation2 + $0xf0] sm:$0xff] }
 0x25a   : > { %v1761_v62 = vpop.permute.xlu1 %1760  ;;  %v1767_v63 = vpop.permute.xlu0 %1766 }
 0x25b   : > { %1838 = vst.msk [vmem:[#allocation5 + $0x98] sm:$0xff] %vm1818_vm5, %v1761_v62  ;;  %1841 = vst.msk [vmem:[#allocation5 + $0xb0] sm:$0xff] %vm1818_vm5, %v1767_v63 }
 0x25e   : > { %v1765_v1 = vpop.permute.xlu1 %1764  ;;  %v1771_v2 = vpop.permute.xlu0 %1770 }
 0x25f   : > { %1840 = vst.msk [vmem:[#allocation5 + $0xa8] sm:$0xff] %vm1818_vm5, %v1765_v1  ;;  %1843 = vst.msk [vmem:[#allocation5 + $0xc0] sm:$0xff] %vm1818_vm5, %v1771_v2  ;;  %v1868_v1 = vld [vmem:[#allocation2 + $0xe0] sm:$0xff] }
 0x262   : > { %v1769_v3 = vpop.permute.xlu1 %1768  ;;  %v1775_v4 = vpop.permute.xlu0 %1774 }
 0x263   : > { %1842 = vst.msk [vmem:[#allocation5 + $0xb8] sm:$0xff] %vm1818_vm5, %v1769_v3  ;;  %1845 = vst.msk [vmem:[#allocation5 + $0xd0] sm:$0xff] %vm1818_vm5, %v1775_v4  ;;  %v1871_v4 = vld [vmem:[#allocation2 + $0x108] sm:$0xff] }
 0x266   : > { %v1773_v5 = vpop.permute.xlu1 %1772  ;;  %v1779_v6 = vpop.permute.xlu0 %1778 }
 0x267   : > { %1844 = vst.msk [vmem:[#allocation5 + $0xc8] sm:$0xff] %vm1818_vm5, %v1773_v5  ;;  %1847 = vst.msk [vmem:[#allocation5 + $0xe0] sm:$0xff] %vm1818_vm5, %v1779_v6 }
 0x26a   : > { %v1777_v7 = vpop.permute.xlu1 %1776  ;;  %v1783_v8 = vpop.permute.xlu0 %1782 }
 0x26b   : > { %1846 = vst.msk [vmem:[#allocation5 + $0xd8] sm:$0xff] %vm1818_vm5, %v1777_v7  ;;  %1849 = vst.msk [vmem:[#allocation5 + $0xf0] sm:$0xff] %vm1818_vm5, %v1783_v8  ;;  %v1870_v7 = vld [vmem:[#allocation2 + $0xf8] sm:$0xff] }
 0x26e   : > { %v1781_v9 = vpop.permute.xlu1 %1780  ;;  %v1948_v11 = vpop.permute.xlu0 %1947 }
 0x26f   : > { %1848 = vst.msk [vmem:[#allocation5 + $0xe8] sm:$0xff] %vm1818_vm5, %v1781_v9  ;;  %v2043_v12 = vsel %vm327_vm0, %v1851_v10, %v1948_v11  ;;  %v1873_v10 = vld [vmem:[#allocation2 + $0x120] sm:$0xff] }
 0x270   : > { %2107 = vrot.lane.b32.xlu0 %v2043_v12, %s6995_s19 }
 0x272   : > { %v1785_v13 = vpop.permute.xlu1 %1784  ;;  %v1952_v15 = vpop.permute.xlu0 %1951 }
 0x273   : > { %1850 = vst.msk [vmem:[#allocation5 + $0xf8] sm:$0xff] %vm1818_vm5, %v1785_v13  ;;  %v2045_v17 = vsel %vm327_vm0, %v1853_v14, %v1952_v15  ;;  %v1872_v13 = vld [vmem:[#allocation2 + $0x110] sm:$0xff] }
 0x274   : > { %2111 = vrot.lane.b32.xlu0 %v2045_v17, %s6995_s19 }
 0x276   : > { %v1950_v18 = vpop.permute.xlu1 %1949  ;;  %v1956_v21 = vpop.permute.xlu0 %1955 }
 0x277   : > { %v2044_v20 = vsel %vm327_vm0, %v1852_v16, %v1950_v18  ;;  %v2047_v23 = vsel %vm327_vm0, %v1855_v19, %v1956_v21  ;;  %v1875_v16 = vld [vmem:[#allocation2 + $0x138] sm:$0xff]  ;;  %v1874_v19 = vld [vmem:[#allocation2 + $0x128] sm:$0xff] }
 0x278   : > { %2109 = vrot.lane.b32.xlu1 %v2044_v20, %s6995_s19  ;;  %2115 = vrot.lane.b32.xlu0 %v2047_v23, %s6995_s19 }
 0x27a   : > { %v1954_v24 = vpop.permute.xlu1 %1953  ;;  %v1960_v27 = vpop.permute.xlu0 %1959 }
 0x27b   : > { %v2046_v26 = vsel %vm327_vm0, %v1854_v22, %v1954_v24  ;;  %v2049_v29 = vsel %vm327_vm0, %v1857_v25, %v1960_v27  ;;  %v1877_v22 = vld [vmem:[#allocation2 + $0x150] sm:$0xff]  ;;  %v1876_v25 = vld [vmem:[#allocation2 + $0x140] sm:$0xff] }
 0x27c   : > { %2113 = vrot.lane.b32.xlu1 %v2046_v26, %s6995_s19  ;;  %2119 = vrot.lane.b32.xlu0 %v2049_v29, %s6995_s19 }
 0x27e   : > { %v1958_v30 = vpop.permute.xlu1 %1957  ;;  %v1964_v33 = vpop.permute.xlu0 %1963 }
 0x27f   : > { %v2048_v32 = vsel %vm327_vm0, %v1856_v28, %v1958_v30  ;;  %v2051_v35 = vsel %vm327_vm0, %v1859_v31, %v1964_v33  ;;  %v1879_v28 = vld [vmem:[#allocation2 + $0x168] sm:$0xff]  ;;  %v1878_v31 = vld [vmem:[#allocation2 + $0x158] sm:$0xff] }
 0x280   : > { %2117 = vrot.lane.b32.xlu1 %v2048_v32, %s6995_s19  ;;  %2123 = vrot.lane.b32.xlu0 %v2051_v35, %s6995_s19 }
 0x282   : > { %v1962_v36 = vpop.permute.xlu1 %1961  ;;  %v1968_v39 = vpop.permute.xlu0 %1967 }
 0x283   : > { %v2050_v38 = vsel %vm327_vm0, %v1858_v34, %v1962_v36  ;;  %v2053_v41 = vsel %vm327_vm0, %v1861_v37, %v1968_v39  ;;  %v1881_v34 = vld [vmem:[#allocation2 + $0x180] sm:$0xff]  ;;  %v1880_v37 = vld [vmem:[#allocation2 + $0x170] sm:$0xff] }
 0x284   : > { %2121 = vrot.lane.b32.xlu1 %v2050_v38, %s6995_s19  ;;  %2127 = vrot.lane.b32.xlu0 %v2053_v41, %s6995_s19  ;;  %v2268_v41 = vld [vmem:[#allocation3 + $0x19] sm:$0xff] }
 0x286   : > { %v1966_v42 = vpop.permute.xlu1 %1965  ;;  %v1972_v45 = vpop.permute.xlu0 %1971 }
 0x287   : > { %v2052_v44 = vsel %vm327_vm0, %v1860_v40, %v1966_v42  ;;  %v2055_v47 = vsel %vm327_vm0, %v1863_v43, %v1972_v45  ;;  %v1882_v42 = vld [vmem:[#allocation2 + $0x188] sm:$0xff] }
 0x288   : > { %2125 = vrot.lane.b32.xlu1 %v2052_v44, %s6995_s19  ;;  %2131 = vrot.lane.b32.xlu0 %v2055_v47, %s6995_s19  ;;  %v2270_v45 = vld [vmem:[#allocation3 + $0x31] sm:$0xff]  ;;  %v2272_v47 = vld [vmem:[#allocation3 + $0x49] sm:$0xff] }
 0x28a   : > { %v1970_v48 = vpop.permute.xlu1 %1969  ;;  %v1976_v51 = vpop.permute.xlu0 %1975 }
 0x28b   : > { %v2054_v50 = vsel %vm327_vm0, %v1862_v46, %v1970_v48  ;;  %v2057_v53 = vsel %vm327_vm0, %v1865_v49, %v1976_v51  ;;  %v2269_v46 = vld [vmem:[#allocation3 + $0x21] sm:$0xff]  ;;  %v2271_v48 = vld [vmem:[#allocation3 + $0x39] sm:$0xff] }
 0x28c   : > { %2129 = vrot.lane.b32.xlu1 %v2054_v50, %s6995_s19  ;;  %2135 = vrot.lane.b32.xlu0 %v2057_v53, %s6995_s19  ;;  %v2274_v49 = vld [vmem:[#allocation3 + $0x61] sm:$0xff]  ;;  %v2273_v50 = vld [vmem:[#allocation3 + $0x51] sm:$0xff]  ;;  %v2276_v51 = vld [vmem:[#allocation3 + $0x79] sm:$0xff] }
 0x28d   : > { %v2278_v53 = vld [vmem:[#allocation3 + $0x91] sm:$0xff] }
 0x28e   : > { %v1974_v54 = vpop.permute.xlu1 %1973  ;;  %v1980_v57 = vpop.permute.xlu0 %1979 }
 0x28f   : > { %v2056_v56 = vsel %vm327_vm0, %v1864_v52, %v1974_v54  ;;  %v2059_v59 = vsel %vm327_vm0, %v1867_v55, %v1980_v57  ;;  %v2275_v52 = vld [vmem:[#allocation3 + $0x69] sm:$0xff]  ;;  %v2277_v54 = vld [vmem:[#allocation3 + $0x81] sm:$0xff] }
 0x290   : > { %2133 = vrot.lane.b32.xlu1 %v2056_v56, %s6995_s19  ;;  %2139 = vrot.lane.b32.xlu0 %v2059_v59, %s6995_s19  ;;  %v2280_v55 = vld [vmem:[#allocation3 + $0xa9] sm:$0xff]  ;;  %v2279_v56 = vld [vmem:[#allocation3 + $0x99] sm:$0xff]  ;;  %v2282_v57 = vld [vmem:[#allocation3 + $0xc1] sm:$0xff] }
 0x291   : > { %v2284_v59 = vld [vmem:[#allocation3 + $0xd9] sm:$0xff] }
 0x292   : > { %v1978_v60 = vpop.permute.xlu1 %1977  ;;  %v1984_v63 = vpop.permute.xlu0 %1983 }
 0x293   : > { %v2058_v62 = vsel %vm327_vm0, %v1866_v58, %v1978_v60  ;;  %v2061_v2 = vsel %vm327_vm0, %v1869_v61, %v1984_v63  ;;  %v2281_v58 = vld [vmem:[#allocation3 + $0xb1] sm:$0xff]  ;;  %v2283_v60 = vld [vmem:[#allocation3 + $0xc9] sm:$0xff] }
 0x294   : > { %2137 = vrot.lane.b32.xlu1 %v2058_v62, %s6995_s19  ;;  %2143 = vrot.lane.b32.xlu0 %v2061_v2, %s6995_s19  ;;  %v2286_v61 = vld [vmem:[#allocation3 + $0xf1] sm:$0xff]  ;;  %v2285_v62 = vld [vmem:[#allocation3 + $0xe1] sm:$0xff]  ;;  %v2288_v63 = vld [vmem:[#allocation3 + $0x109] sm:$0xff] }
 0x295   : > { %v2290_v2 = vld [vmem:[#allocation3 + $0x121] sm:$0xff] }
 0x296   : > { %v1982_v3 = vpop.permute.xlu1 %1981  ;;  %v1988_v6 = vpop.permute.xlu0 %1987 }
 0x297   : > { %v2060_v5 = vsel %vm327_vm0, %v1868_v1, %v1982_v3  ;;  %v2063_v8 = vsel %vm327_vm0, %v1871_v4, %v1988_v6  ;;  %v2287_v1 = vld [vmem:[#allocation3 + $0xf9] sm:$0xff]  ;;  %v2289_v3 = vld [vmem:[#allocation3 + $0x111] sm:$0xff] }
 0x298   : > { %2141 = vrot.lane.b32.xlu1 %v2060_v5, %s6995_s19  ;;  %2147 = vrot.lane.b32.xlu0 %v2063_v8, %s6995_s19  ;;  %v2292_v4 = vld [vmem:[#allocation3 + $0x139] sm:$0xff]  ;;  %v2291_v5 = vld [vmem:[#allocation3 + $0x129] sm:$0xff]  ;;  %v2294_v6 = vld [vmem:[#allocation3 + $0x151] sm:$0xff] }
 0x299   : > { %v2293_v8 = vld [vmem:[#allocation3 + $0x141] sm:$0xff] }
 0x29a   : > { %v1986_v9 = vpop.permute.xlu1 %1985  ;;  %v1992_v12 = vpop.permute.xlu0 %1991 }
 0x29b   : > { %v2062_v11 = vsel %vm327_vm0, %v1870_v7, %v1986_v9  ;;  %v2065_v14 = vsel %vm327_vm0, %v1873_v10, %v1992_v12  ;;  %v2296_v9 = vld [vmem:[#allocation3 + $0x169] sm:$0xff] }
 0x29c   : > { %2145 = vrot.lane.b32.xlu1 %v2062_v11, %s6995_s19  ;;  %2151 = vrot.lane.b32.xlu0 %v2065_v14, %s6995_s19  ;;  %v2295_v11 = vld [vmem:[#allocation3 + $0x159] sm:$0xff] }
 0x29e   : > { %v1990_v15 = vpop.permute.xlu1 %1989  ;;  %v1996_v18 = vpop.permute.xlu0 %1995 }
 0x29f   : > { %v2064_v17 = vsel %vm327_vm0, %v1872_v13, %v1990_v15  ;;  %v2067_v20 = vsel %vm327_vm0, %v1875_v16, %v1996_v18  ;;  %v2298_v13 = vld [vmem:[#allocation3 + $0x181] sm:$0xff]  ;;  %v2297_v15 = vld [vmem:[#allocation3 + $0x171] sm:$0xff]  ;;  %v2299_v18 = vld [vmem:[#allocation3 + $0x189] sm:$0xff] }
 0x2a0   : > { %2149 = vrot.lane.b32.xlu1 %v2064_v17, %s6995_s19  ;;  %2155 = vrot.lane.b32.xlu0 %v2067_v20, %s6995_s19 }
 0x2a2   : > { %v1994_v21 = vpop.permute.xlu1 %1993  ;;  %v2000_v24 = vpop.permute.xlu0 %1999 }
 0x2a3   : > { %v2066_v23 = vsel %vm327_vm0, %v1874_v19, %v1994_v21  ;;  %v2069_v26 = vsel %vm327_vm0, %v1877_v22, %v2000_v24 }
 0x2a4   : > { %2153 = vrot.lane.b32.xlu1 %v2066_v23, %s6995_s19  ;;  %2159 = vrot.lane.b32.xlu0 %v2069_v26, %s6995_s19 }
 0x2a6   : > { %v1998_v27 = vpop.permute.xlu1 %1997  ;;  %v2004_v30 = vpop.permute.xlu0 %2003 }
 0x2a7   : > { %v2068_v29 = vsel %vm327_vm0, %v1876_v25, %v1998_v27  ;;  %v2071_v32 = vsel %vm327_vm0, %v1879_v28, %v2004_v30 }
 0x2a8   : > { %2157 = vrot.lane.b32.xlu1 %v2068_v29, %s6995_s19  ;;  %2163 = vrot.lane.b32.xlu0 %v2071_v32, %s6995_s19 }
 0x2aa   : > { %v2002_v33 = vpop.permute.xlu1 %2001  ;;  %v2008_v36 = vpop.permute.xlu0 %2007 }
 0x2ab   : > { %v2070_v35 = vsel %vm327_vm0, %v1878_v31, %v2002_v33  ;;  %v2073_v38 = vsel %vm327_vm0, %v1881_v34, %v2008_v36 }
 0x2ac   : > { %2161 = vrot.lane.b32.xlu1 %v2070_v35, %s6995_s19  ;;  %2167 = vrot.lane.b32.xlu0 %v2073_v38, %s6995_s19 }
 0x2ae   : > { %v2006_v39 = vpop.permute.xlu1 %2005 }
 0x2af   : > { %v2072_v40 = vsel %vm327_vm0, %v1880_v37, %v2006_v39 }
 0x2b0   : > { %2165 = vrot.lane.b32.xlu1 %v2072_v40, %s6995_s19  ;;  %2332 = vrot.lane.b32.xlu0 %v2268_v41, %s6992_s12 }
 0x2b2   : > { %v2010_v43 = vpop.permute.xlu1 %2009 }
 0x2b3   : > { %v2074_v44 = vsel %vm327_vm0, %v1882_v42, %v2010_v43 }
 0x2b4   : > { %2169 = vrot.lane.b32.xlu1 %v2074_v44, %s6995_s19  ;;  %2336 = vrot.lane.b32.xlu0 %v2270_v45, %s6992_s12  ;;  %v2236_v44 = vld [vmem:[#allocation2 + $0x19] sm:$0xff] }
 0x2b8   : > { %2334 = vrot.lane.b32.xlu1 %v2269_v46, %s6992_s12  ;;  %2340 = vrot.lane.b32.xlu0 %v2272_v47, %s6992_s12 }
 0x2bc   : > { %2338 = vrot.lane.b32.xlu1 %v2271_v48, %s6992_s12  ;;  %2344 = vrot.lane.b32.xlu0 %v2274_v49, %s6992_s12  ;;  %v2238_v48 = vld [vmem:[#allocation2 + $0x31] sm:$0xff] }
 0x2c0   : > { %2342 = vrot.lane.b32.xlu1 %v2273_v50, %s6992_s12  ;;  %2348 = vrot.lane.b32.xlu0 %v2276_v51, %s6992_s12  ;;  %v2237_v50 = vld [vmem:[#allocation2 + $0x21] sm:$0xff] }
 0x2c4   : > { %2346 = vrot.lane.b32.xlu1 %v2275_v52, %s6992_s12  ;;  %2352 = vrot.lane.b32.xlu0 %v2278_v53, %s6992_s12  ;;  %v2240_v53 = vld [vmem:[#allocation2 + $0x49] sm:$0xff] }
 0x2c8   : > { %2350 = vrot.lane.b32.xlu1 %v2277_v54, %s6992_s12  ;;  %2356 = vrot.lane.b32.xlu0 %v2280_v55, %s6992_s12 }
 0x2cc   : > { %2354 = vrot.lane.b32.xlu1 %v2279_v56, %s6992_s12  ;;  %2360 = vrot.lane.b32.xlu0 %v2282_v57, %s6992_s12  ;;  %v2239_v56 = vld [vmem:[#allocation2 + $0x39] sm:$0xff] }
 0x2d0   : > { %2358 = vrot.lane.b32.xlu1 %v2281_v58, %s6992_s12  ;;  %2364 = vrot.lane.b32.xlu0 %v2284_v59, %s6992_s12  ;;  %v2242_v59 = vld [vmem:[#allocation2 + $0x61] sm:$0xff] }
 0x2d4   : > { %2362 = vrot.lane.b32.xlu1 %v2283_v60, %s6992_s12  ;;  %2368 = vrot.lane.b32.xlu0 %v2286_v61, %s6992_s12 }
 0x2d8   : > { %2366 = vrot.lane.b32.xlu1 %v2285_v62, %s6992_s12  ;;  %2372 = vrot.lane.b32.xlu0 %v2288_v63, %s6992_s12  ;;  %v2241_v62 = vld [vmem:[#allocation2 + $0x51] sm:$0xff] }
 0x2dc   : > { %2370 = vrot.lane.b32.xlu1 %v2287_v1, %s6992_s12  ;;  %2376 = vrot.lane.b32.xlu0 %v2290_v2, %s6992_s12  ;;  %v2244_v2 = vld [vmem:[#allocation2 + $0x79] sm:$0xff] }
 0x2e0   : > { %2374 = vrot.lane.b32.xlu1 %v2289_v3, %s6992_s12  ;;  %2380 = vrot.lane.b32.xlu0 %v2292_v4, %s6992_s12 }
 0x2e2   : > { %v2108_v7 = vpop.permute.xlu0 %2107 }
 0x2e3   : > { %2204 = vst.msk [vmem:[#allocation5] sm:$0xff] %vm2203_vm6, %v2108_v7 }
 0x2e4   : > { %2378 = vrot.lane.b32.xlu1 %v2291_v5, %s6992_s12  ;;  %2384 = vrot.lane.b32.xlu0 %v2294_v6, %s6992_s12  ;;  %v2243_v5 = vld [vmem:[#allocation2 + $0x69] sm:$0xff] }
 0x2e6   : > { %v2112_v10 = vpop.permute.xlu0 %2111 }
 0x2e7   : > { %2206 = vst.msk [vmem:[#allocation5 + $0x10] sm:$0xff] %vm2203_vm6, %v2112_v10 }
 0x2e8   : > { %2382 = vrot.lane.b32.xlu1 %v2293_v8, %s6992_s12  ;;  %2388 = vrot.lane.b32.xlu0 %v2296_v9, %s6992_s12  ;;  %v2246_v8 = vld [vmem:[#allocation2 + $0x91] sm:$0xff] }
 0x2ea   : > { %v2110_v12 = vpop.permute.xlu1 %2109  ;;  %v2116_v14 = vpop.permute.xlu0 %2115 }
 0x2eb   : > { %2205 = vst.msk [vmem:[#allocation5 + $0x8] sm:$0xff] %vm2203_vm6, %v2110_v12  ;;  %2208 = vst.msk [vmem:[#allocation5 + $0x20] sm:$0xff] %vm2203_vm6, %v2116_v14  ;;  %v2248_v14 = vld [vmem:[#allocation2 + $0xa9] sm:$0xff] }
 0x2ec   : > { %2386 = vrot.lane.b32.xlu1 %v2295_v11, %s6992_s12  ;;  %2392 = vrot.lane.b32.xlu0 %v2298_v13, %s6992_s12  ;;  %v2245_v11 = vld [vmem:[#allocation2 + $0x81] sm:$0xff] }
 0x2ee   : > { %v2114_v16 = vpop.permute.xlu1 %2113  ;;  %v2120_v17 = vpop.permute.xlu0 %2119 }
 0x2ef   : > { %2207 = vst.msk [vmem:[#allocation5 + $0x18] sm:$0xff] %vm2203_vm6, %v2114_v16  ;;  %2210 = vst.msk [vmem:[#allocation5 + $0x30] sm:$0xff] %vm2203_vm6, %v2120_v17  ;;  %v2247_v17 = vld [vmem:[#allocation2 + $0x99] sm:$0xff] }
 0x2f0   : > { %2390 = vrot.lane.b32.xlu1 %v2297_v15, %s6992_s12 }
 0x2f2   : > { %v2118_v19 = vpop.permute.xlu1 %2117  ;;  %v2124_v20 = vpop.permute.xlu0 %2123 }
 0x2f3   : > { %2209 = vst.msk [vmem:[#allocation5 + $0x28] sm:$0xff] %vm2203_vm6, %v2118_v19  ;;  %2212 = vst.msk [vmem:[#allocation5 + $0x40] sm:$0xff] %vm2203_vm6, %v2124_v20  ;;  %v2250_v20 = vld [vmem:[#allocation2 + $0xc1] sm:$0xff] }
 0x2f4   : > { %2394 = vrot.lane.b32.xlu1 %v2299_v18, %s6992_s12 }
 0x2f6   : > { %v2122_v21 = vpop.permute.xlu1 %2121  ;;  %v2128_v22 = vpop.permute.xlu0 %2127 }
 0x2f7   : > { %2211 = vst.msk [vmem:[#allocation5 + $0x38] sm:$0xff] %vm2203_vm6, %v2122_v21  ;;  %2214 = vst.msk [vmem:[#allocation5 + $0x50] sm:$0xff] %vm2203_vm6, %v2128_v22 }
 0x2fa   : > { %v2126_v23 = vpop.permute.xlu1 %2125  ;;  %v2132_v24 = vpop.permute.xlu0 %2131 }
 0x2fb   : > { %2213 = vst.msk [vmem:[#allocation5 + $0x48] sm:$0xff] %vm2203_vm6, %v2126_v23  ;;  %2216 = vst.msk [vmem:[#allocation5 + $0x60] sm:$0xff] %vm2203_vm6, %v2132_v24  ;;  %v2249_v23 = vld [vmem:[#allocation2 + $0xb1] sm:$0xff] }
 0x2fe   : > { %v2130_v25 = vpop.permute.xlu1 %2129  ;;  %v2136_v26 = vpop.permute.xlu0 %2135 }
 0x2ff   : > { %2215 = vst.msk [vmem:[#allocation5 + $0x58] sm:$0xff] %vm2203_vm6, %v2130_v25  ;;  %2218 = vst.msk [vmem:[#allocation5 + $0x70] sm:$0xff] %vm2203_vm6, %v2136_v26  ;;  %v2252_v26 = vld [vmem:[#allocation2 + $0xd9] sm:$0xff] }
 0x302   : > { %v2134_v27 = vpop.permute.xlu1 %2133  ;;  %v2140_v28 = vpop.permute.xlu0 %2139 }
 0x303   : > { %2217 = vst.msk [vmem:[#allocation5 + $0x68] sm:$0xff] %vm2203_vm6, %v2134_v27  ;;  %2220 = vst.msk [vmem:[#allocation5 + $0x80] sm:$0xff] %vm2203_vm6, %v2140_v28 }
 0x306   : > { %v2138_v29 = vpop.permute.xlu1 %2137  ;;  %v2144_v30 = vpop.permute.xlu0 %2143 }
 0x307   : > { %2219 = vst.msk [vmem:[#allocation5 + $0x78] sm:$0xff] %vm2203_vm6, %v2138_v29  ;;  %2222 = vst.msk [vmem:[#allocation5 + $0x90] sm:$0xff] %vm2203_vm6, %v2144_v30  ;;  %v2251_v29 = vld [vmem:[#allocation2 + $0xc9] sm:$0xff] }
 0x30a   : > { %v2142_v31 = vpop.permute.xlu1 %2141  ;;  %v2148_v32 = vpop.permute.xlu0 %2147 }
 0x30b   : > { %2221 = vst.msk [vmem:[#allocation5 + $0x88] sm:$0xff] %vm2203_vm6, %v2142_v31  ;;  %2224 = vst.msk [vmem:[#allocation5 + $0xa0] sm:$0xff] %vm2203_vm6, %v2148_v32  ;;  %v2254_v32 = vld [vmem:[#allocation2 + $0xf1] sm:$0xff] }
 0x30e   : > { %v2146_v33 = vpop.permute.xlu1 %2145  ;;  %v2152_v34 = vpop.permute.xlu0 %2151 }
 0x30f   : > { %2223 = vst.msk [vmem:[#allocation5 + $0x98] sm:$0xff] %vm2203_vm6, %v2146_v33  ;;  %2226 = vst.msk [vmem:[#allocation5 + $0xb0] sm:$0xff] %vm2203_vm6, %v2152_v34 }
 0x312   : > { %v2150_v35 = vpop.permute.xlu1 %2149  ;;  %v2156_v36 = vpop.permute.xlu0 %2155 }
 0x313   : > { %2225 = vst.msk [vmem:[#allocation5 + $0xa8] sm:$0xff] %vm2203_vm6, %v2150_v35  ;;  %2228 = vst.msk [vmem:[#allocation5 + $0xc0] sm:$0xff] %vm2203_vm6, %v2156_v36  ;;  %v2253_v35 = vld [vmem:[#allocation2 + $0xe1] sm:$0xff] }
 0x316   : > { %v2154_v37 = vpop.permute.xlu1 %2153  ;;  %v2160_v38 = vpop.permute.xlu0 %2159 }
 0x317   : > { %2227 = vst.msk [vmem:[#allocation5 + $0xb8] sm:$0xff] %vm2203_vm6, %v2154_v37  ;;  %2230 = vst.msk [vmem:[#allocation5 + $0xd0] sm:$0xff] %vm2203_vm6, %v2160_v38  ;;  %v2256_v38 = vld [vmem:[#allocation2 + $0x109] sm:$0xff] }
 0x31a   : > { %v2158_v39 = vpop.permute.xlu1 %2157  ;;  %v2164_v40 = vpop.permute.xlu0 %2163 }
 0x31b   : > { %2229 = vst.msk [vmem:[#allocation5 + $0xc8] sm:$0xff] %vm2203_vm6, %v2158_v39  ;;  %2232 = vst.msk [vmem:[#allocation5 + $0xe0] sm:$0xff] %vm2203_vm6, %v2164_v40 }
 0x31e   : > { %v2162_v41 = vpop.permute.xlu1 %2161  ;;  %v2168_v42 = vpop.permute.xlu0 %2167 }
 0x31f   : > { %2231 = vst.msk [vmem:[#allocation5 + $0xd8] sm:$0xff] %vm2203_vm6, %v2162_v41  ;;  %2234 = vst.msk [vmem:[#allocation5 + $0xf0] sm:$0xff] %vm2203_vm6, %v2168_v42  ;;  %v2255_v41 = vld [vmem:[#allocation2 + $0xf9] sm:$0xff] }
 0x322   : > { %v2166_v43 = vpop.permute.xlu1 %2165  ;;  %v2333_v45 = vpop.permute.xlu0 %2332 }
 0x323   : > { %2233 = vst.msk [vmem:[#allocation5 + $0xe8] sm:$0xff] %vm2203_vm6, %v2166_v43  ;;  %v2428_v46 = vsel %vm327_vm0, %v2236_v44, %v2333_v45  ;;  %v2258_v44 = vld [vmem:[#allocation2 + $0x121] sm:$0xff] }
 0x324   : > { %2492 = vrot.lane.b32.xlu0 %v2428_v46, %s6996_s20 }
 0x326   : > { %v2170_v47 = vpop.permute.xlu1 %2169  ;;  %v2337_v49 = vpop.permute.xlu0 %2336 }
 0x327   : > { %2235 = vst.msk [vmem:[#allocation5 + $0xf8] sm:$0xff] %vm2203_vm6, %v2170_v47  ;;  %v2430_v51 = vsel %vm327_vm0, %v2238_v48, %v2337_v49  ;;  %v2257_v47 = vld [vmem:[#allocation2 + $0x111] sm:$0xff] }
 0x328   : > { %2496 = vrot.lane.b32.xlu0 %v2430_v51, %s6996_s20 }
 0x32a   : > { %v2335_v52 = vpop.permute.xlu1 %2334  ;;  %v2341_v55 = vpop.permute.xlu0 %2340 }
 0x32b   : > { %v2429_v54 = vsel %vm327_vm0, %v2237_v50, %v2335_v52  ;;  %v2432_v57 = vsel %vm327_vm0, %v2240_v53, %v2341_v55  ;;  %v2260_v50 = vld [vmem:[#allocation2 + $0x139] sm:$0xff]  ;;  %v2259_v53 = vld [vmem:[#allocation2 + $0x129] sm:$0xff] }
 0x32c   : > { %2494 = vrot.lane.b32.xlu1 %v2429_v54, %s6996_s20  ;;  %2500 = vrot.lane.b32.xlu0 %v2432_v57, %s6996_s20 }
 0x32e   : > { %v2339_v58 = vpop.permute.xlu1 %2338  ;;  %v2345_v61 = vpop.permute.xlu0 %2344 }
 0x32f   : > { %v2431_v60 = vsel %vm327_vm0, %v2239_v56, %v2339_v58  ;;  %v2434_v63 = vsel %vm327_vm0, %v2242_v59, %v2345_v61  ;;  %v2262_v56 = vld [vmem:[#allocation2 + $0x151] sm:$0xff]  ;;  %v2261_v59 = vld [vmem:[#allocation2 + $0x141] sm:$0xff] }
 0x330   : > { %2498 = vrot.lane.b32.xlu1 %v2431_v60, %s6996_s20  ;;  %2504 = vrot.lane.b32.xlu0 %v2434_v63, %s6996_s20 }
 0x332   : > { %v2343_v1 = vpop.permute.xlu1 %2342  ;;  %v2349_v4 = vpop.permute.xlu0 %2348 }
 0x333   : > { %v2433_v3 = vsel %vm327_vm0, %v2241_v62, %v2343_v1  ;;  %v2436_v6 = vsel %vm327_vm0, %v2244_v2, %v2349_v4  ;;  %v2264_v62 = vld [vmem:[#allocation2 + $0x169] sm:$0xff]  ;;  %v2263_v2 = vld [vmem:[#allocation2 + $0x159] sm:$0xff] }
 0x334   : > { %2502 = vrot.lane.b32.xlu1 %v2433_v3, %s6996_s20  ;;  %2508 = vrot.lane.b32.xlu0 %v2436_v6, %s6996_s20 }
 0x336   : > { %v2347_v7 = vpop.permute.xlu1 %2346  ;;  %v2353_v10 = vpop.permute.xlu0 %2352 }
 0x337   : > { %v2435_v9 = vsel %vm327_vm0, %v2243_v5, %v2347_v7  ;;  %v2438_v12 = vsel %vm327_vm0, %v2246_v8, %v2353_v10  ;;  %v2266_v5 = vld [vmem:[#allocation2 + $0x181] sm:$0xff]  ;;  %v2265_v8 = vld [vmem:[#allocation2 + $0x171] sm:$0xff] }
 0x338   : > { %2506 = vrot.lane.b32.xlu1 %v2435_v9, %s6996_s20  ;;  %2512 = vrot.lane.b32.xlu0 %v2438_v12, %s6996_s20  ;;  %v2653_v12 = vld [vmem:[#allocation3 + $0x1a] sm:$0xff] }
 0x33a   : > { %v2351_v13 = vpop.permute.xlu1 %2350  ;;  %v2357_v16 = vpop.permute.xlu0 %2356 }
 0x33b   : > { %v2437_v15 = vsel %vm327_vm0, %v2245_v11, %v2351_v13  ;;  %v2440_v18 = vsel %vm327_vm0, %v2248_v14, %v2357_v16  ;;  %v2267_v13 = vld [vmem:[#allocation2 + $0x189] sm:$0xff] }
 0x33c   : > { %2510 = vrot.lane.b32.xlu1 %v2437_v15, %s6996_s20  ;;  %2516 = vrot.lane.b32.xlu0 %v2440_v18, %s6996_s20  ;;  %v2655_v16 = vld [vmem:[#allocation3 + $0x32] sm:$0xff]  ;;  %v2657_v18 = vld [vmem:[#allocation3 + $0x4a] sm:$0xff] }
 0x33e   : > { %v2355_v19 = vpop.permute.xlu1 %2354  ;;  %v2361_v22 = vpop.permute.xlu0 %2360 }
 0x33f   : > { %v2439_v21 = vsel %vm327_vm0, %v2247_v17, %v2355_v19  ;;  %v2442_v24 = vsel %vm327_vm0, %v2250_v20, %v2361_v22  ;;  %v2654_v17 = vld [vmem:[#allocation3 + $0x22] sm:$0xff]  ;;  %v2656_v19 = vld [vmem:[#allocation3 + $0x3a] sm:$0xff] }
 0x340   : > { %2514 = vrot.lane.b32.xlu1 %v2439_v21, %s6996_s20  ;;  %2520 = vrot.lane.b32.xlu0 %v2442_v24, %s6996_s20  ;;  %v2659_v20 = vld [vmem:[#allocation3 + $0x62] sm:$0xff]  ;;  %v2658_v21 = vld [vmem:[#allocation3 + $0x52] sm:$0xff]  ;;  %v2661_v22 = vld [vmem:[#allocation3 + $0x7a] sm:$0xff] }
 0x341   : > { %v2663_v24 = vld [vmem:[#allocation3 + $0x92] sm:$0xff] }
 0x342   : > { %v2359_v25 = vpop.permute.xlu1 %2358  ;;  %v2365_v28 = vpop.permute.xlu0 %2364 }
 0x343   : > { %v2441_v27 = vsel %vm327_vm0, %v2249_v23, %v2359_v25  ;;  %v2444_v30 = vsel %vm327_vm0, %v2252_v26, %v2365_v28  ;;  %v2660_v23 = vld [vmem:[#allocation3 + $0x6a] sm:$0xff]  ;;  %v2662_v25 = vld [vmem:[#allocation3 + $0x82] sm:$0xff] }
 0x344   : > { %2518 = vrot.lane.b32.xlu1 %v2441_v27, %s6996_s20  ;;  %2524 = vrot.lane.b32.xlu0 %v2444_v30, %s6996_s20  ;;  %v2665_v26 = vld [vmem:[#allocation3 + $0xaa] sm:$0xff]  ;;  %v2664_v27 = vld [vmem:[#allocation3 + $0x9a] sm:$0xff]  ;;  %v2667_v28 = vld [vmem:[#allocation3 + $0xc2] sm:$0xff] }
 0x345   : > { %v2669_v30 = vld [vmem:[#allocation3 + $0xda] sm:$0xff] }
 0x346   : > { %v2363_v31 = vpop.permute.xlu1 %2362  ;;  %v2369_v34 = vpop.permute.xlu0 %2368 }
 0x347   : > { %v2443_v33 = vsel %vm327_vm0, %v2251_v29, %v2363_v31  ;;  %v2446_v36 = vsel %vm327_vm0, %v2254_v32, %v2369_v34  ;;  %v2666_v29 = vld [vmem:[#allocation3 + $0xb2] sm:$0xff]  ;;  %v2668_v31 = vld [vmem:[#allocation3 + $0xca] sm:$0xff] }
 0x348   : > { %2522 = vrot.lane.b32.xlu1 %v2443_v33, %s6996_s20  ;;  %2528 = vrot.lane.b32.xlu0 %v2446_v36, %s6996_s20  ;;  %v2671_v32 = vld [vmem:[#allocation3 + $0xf2] sm:$0xff]  ;;  %v2670_v33 = vld [vmem:[#allocation3 + $0xe2] sm:$0xff]  ;;  %v2673_v34 = vld [vmem:[#allocation3 + $0x10a] sm:$0xff] }
 0x349   : > { %v2675_v36 = vld [vmem:[#allocation3 + $0x122] sm:$0xff] }
 0x34a   : > { %v2367_v37 = vpop.permute.xlu1 %2366  ;;  %v2373_v40 = vpop.permute.xlu0 %2372 }
 0x34b   : > { %v2445_v39 = vsel %vm327_vm0, %v2253_v35, %v2367_v37  ;;  %v2448_v42 = vsel %vm327_vm0, %v2256_v38, %v2373_v40  ;;  %v2672_v35 = vld [vmem:[#allocation3 + $0xfa] sm:$0xff]  ;;  %v2674_v37 = vld [vmem:[#allocation3 + $0x112] sm:$0xff] }
 0x34c   : > { %2526 = vrot.lane.b32.xlu1 %v2445_v39, %s6996_s20  ;;  %2532 = vrot.lane.b32.xlu0 %v2448_v42, %s6996_s20  ;;  %v2677_v38 = vld [vmem:[#allocation3 + $0x13a] sm:$0xff]  ;;  %v2676_v39 = vld [vmem:[#allocation3 + $0x12a] sm:$0xff]  ;;  %v2679_v40 = vld [vmem:[#allocation3 + $0x152] sm:$0xff] }
 0x34d   : > { %v2678_v42 = vld [vmem:[#allocation3 + $0x142] sm:$0xff] }
 0x34e   : > { %v2371_v43 = vpop.permute.xlu1 %2370  ;;  %v2377_v46 = vpop.permute.xlu0 %2376 }
 0x34f   : > { %v2447_v45 = vsel %vm327_vm0, %v2255_v41, %v2371_v43  ;;  %v2450_v48 = vsel %vm327_vm0, %v2258_v44, %v2377_v46  ;;  %v2681_v43 = vld [vmem:[#allocation3 + $0x16a] sm:$0xff] }
 0x350   : > { %2530 = vrot.lane.b32.xlu1 %v2447_v45, %s6996_s20  ;;  %2536 = vrot.lane.b32.xlu0 %v2450_v48, %s6996_s20  ;;  %v2680_v45 = vld [vmem:[#allocation3 + $0x15a] sm:$0xff] }
 0x352   : > { %v2375_v49 = vpop.permute.xlu1 %2374  ;;  %v2381_v52 = vpop.permute.xlu0 %2380 }
 0x353   : > { %v2449_v51 = vsel %vm327_vm0, %v2257_v47, %v2375_v49  ;;  %v2452_v54 = vsel %vm327_vm0, %v2260_v50, %v2381_v52  ;;  %v2683_v47 = vld [vmem:[#allocation3 + $0x182] sm:$0xff]  ;;  %v2682_v49 = vld [vmem:[#allocation3 + $0x172] sm:$0xff]  ;;  %v2684_v52 = vld [vmem:[#allocation3 + $0x18a] sm:$0xff] }
 0x354   : > { %2534 = vrot.lane.b32.xlu1 %v2449_v51, %s6996_s20  ;;  %2540 = vrot.lane.b32.xlu0 %v2452_v54, %s6996_s20 }
 0x356   : > { %v2379_v55 = vpop.permute.xlu1 %2378  ;;  %v2385_v58 = vpop.permute.xlu0 %2384 }
 0x357   : > { %v2451_v57 = vsel %vm327_vm0, %v2259_v53, %v2379_v55  ;;  %v2454_v60 = vsel %vm327_vm0, %v2262_v56, %v2385_v58 }
 0x358   : > { %2538 = vrot.lane.b32.xlu1 %v2451_v57, %s6996_s20  ;;  %2544 = vrot.lane.b32.xlu0 %v2454_v60, %s6996_s20 }
 0x35a   : > { %v2383_v61 = vpop.permute.xlu1 %2382  ;;  %v2389_v1 = vpop.permute.xlu0 %2388 }
 0x35b   : > { %v2453_v63 = vsel %vm327_vm0, %v2261_v59, %v2383_v61  ;;  %v2456_v3 = vsel %vm327_vm0, %v2264_v62, %v2389_v1 }
 0x35c   : > { %2542 = vrot.lane.b32.xlu1 %v2453_v63, %s6996_s20  ;;  %2548 = vrot.lane.b32.xlu0 %v2456_v3, %s6996_s20 }
 0x35e   : > { %v2387_v4 = vpop.permute.xlu1 %2386  ;;  %v2393_v7 = vpop.permute.xlu0 %2392 }
 0x35f   : > { %v2455_v6 = vsel %vm327_vm0, %v2263_v2, %v2387_v4  ;;  %v2458_v9 = vsel %vm327_vm0, %v2266_v5, %v2393_v7 }
 0x360   : > { %2546 = vrot.lane.b32.xlu1 %v2455_v6, %s6996_s20  ;;  %2552 = vrot.lane.b32.xlu0 %v2458_v9, %s6996_s20 }
 0x362   : > { %v2391_v10 = vpop.permute.xlu1 %2390 }
 0x363   : > { %v2457_v11 = vsel %vm327_vm0, %v2265_v8, %v2391_v10 }
 0x364   : > { %2550 = vrot.lane.b32.xlu1 %v2457_v11, %s6996_s20  ;;  %2717 = vrot.lane.b32.xlu0 %v2653_v12, %s6992_s12 }
 0x366   : > { %v2395_v14 = vpop.permute.xlu1 %2394 }
 0x367   : > { %v2459_v15 = vsel %vm327_vm0, %v2267_v13, %v2395_v14 }
 0x368   : > { %2554 = vrot.lane.b32.xlu1 %v2459_v15, %s6996_s20  ;;  %2721 = vrot.lane.b32.xlu0 %v2655_v16, %s6992_s12  ;;  %v2621_v15 = vld [vmem:[#allocation2 + $0x1a] sm:$0xff] }
 0x36c   : > { %2719 = vrot.lane.b32.xlu1 %v2654_v17, %s6992_s12  ;;  %2725 = vrot.lane.b32.xlu0 %v2657_v18, %s6992_s12 }
 0x370   : > { %2723 = vrot.lane.b32.xlu1 %v2656_v19, %s6992_s12  ;;  %2729 = vrot.lane.b32.xlu0 %v2659_v20, %s6992_s12  ;;  %v2623_v19 = vld [vmem:[#allocation2 + $0x32] sm:$0xff] }
 0x374   : > { %2727 = vrot.lane.b32.xlu1 %v2658_v21, %s6992_s12  ;;  %2733 = vrot.lane.b32.xlu0 %v2661_v22, %s6992_s12  ;;  %v2622_v21 = vld [vmem:[#allocation2 + $0x22] sm:$0xff] }
 0x378   : > { %2731 = vrot.lane.b32.xlu1 %v2660_v23, %s6992_s12  ;;  %2737 = vrot.lane.b32.xlu0 %v2663_v24, %s6992_s12  ;;  %v2625_v24 = vld [vmem:[#allocation2 + $0x4a] sm:$0xff] }
 0x37c   : > { %2735 = vrot.lane.b32.xlu1 %v2662_v25, %s6992_s12  ;;  %2741 = vrot.lane.b32.xlu0 %v2665_v26, %s6992_s12 }
 0x380   : > { %2739 = vrot.lane.b32.xlu1 %v2664_v27, %s6992_s12  ;;  %2745 = vrot.lane.b32.xlu0 %v2667_v28, %s6992_s12  ;;  %v2624_v27 = vld [vmem:[#allocation2 + $0x3a] sm:$0xff] }
 0x384   : > { %2743 = vrot.lane.b32.xlu1 %v2666_v29, %s6992_s12  ;;  %2749 = vrot.lane.b32.xlu0 %v2669_v30, %s6992_s12  ;;  %v2627_v30 = vld [vmem:[#allocation2 + $0x62] sm:$0xff] }
 0x388   : > { %2747 = vrot.lane.b32.xlu1 %v2668_v31, %s6992_s12  ;;  %2753 = vrot.lane.b32.xlu0 %v2671_v32, %s6992_s12 }
 0x38c   : > { %2751 = vrot.lane.b32.xlu1 %v2670_v33, %s6992_s12  ;;  %2757 = vrot.lane.b32.xlu0 %v2673_v34, %s6992_s12  ;;  %v2626_v33 = vld [vmem:[#allocation2 + $0x52] sm:$0xff] }
 0x390   : > { %2755 = vrot.lane.b32.xlu1 %v2672_v35, %s6992_s12  ;;  %2761 = vrot.lane.b32.xlu0 %v2675_v36, %s6992_s12  ;;  %v2629_v36 = vld [vmem:[#allocation2 + $0x7a] sm:$0xff] }
 0x394   : > { %2759 = vrot.lane.b32.xlu1 %v2674_v37, %s6992_s12  ;;  %2765 = vrot.lane.b32.xlu0 %v2677_v38, %s6992_s12 }
 0x396   : > { %v2493_v41 = vpop.permute.xlu0 %2492 }
 0x397   : > { %2589 = vst.msk [vmem:[#allocation5] sm:$0xff] %vm2588_vm7, %v2493_v41 }
 0x398   : > { %2763 = vrot.lane.b32.xlu1 %v2676_v39, %s6992_s12  ;;  %2769 = vrot.lane.b32.xlu0 %v2679_v40, %s6992_s12  ;;  %v2628_v39 = vld [vmem:[#allocation2 + $0x6a] sm:$0xff] }
 0x39a   : > { %v2497_v44 = vpop.permute.xlu0 %2496 }
 0x39b   : > { %2591 = vst.msk [vmem:[#allocation5 + $0x10] sm:$0xff] %vm2588_vm7, %v2497_v44 }
 0x39c   : > { %2767 = vrot.lane.b32.xlu1 %v2678_v42, %s6992_s12  ;;  %2773 = vrot.lane.b32.xlu0 %v2681_v43, %s6992_s12  ;;  %v2631_v42 = vld [vmem:[#allocation2 + $0x92] sm:$0xff] }
 0x39e   : > { %v2495_v46 = vpop.permute.xlu1 %2494  ;;  %v2501_v48 = vpop.permute.xlu0 %2500 }
 0x39f   : > { %2590 = vst.msk [vmem:[#allocation5 + $0x8] sm:$0xff] %vm2588_vm7, %v2495_v46  ;;  %2593 = vst.msk [vmem:[#allocation5 + $0x20] sm:$0xff] %vm2588_vm7, %v2501_v48  ;;  %v2633_v48 = vld [vmem:[#allocation2 + $0xaa] sm:$0xff] }
 0x3a0   : > { %2771 = vrot.lane.b32.xlu1 %v2680_v45, %s6992_s12  ;;  %2777 = vrot.lane.b32.xlu0 %v2683_v47, %s6992_s12  ;;  %v2630_v45 = vld [vmem:[#allocation2 + $0x82] sm:$0xff] }
 0x3a2   : > { %v2499_v50 = vpop.permute.xlu1 %2498  ;;  %v2505_v51 = vpop.permute.xlu0 %2504 }
 0x3a3   : > { %2592 = vst.msk [vmem:[#allocation5 + $0x18] sm:$0xff] %vm2588_vm7, %v2499_v50  ;;  %2595 = vst.msk [vmem:[#allocation5 + $0x30] sm:$0xff] %vm2588_vm7, %v2505_v51  ;;  %v2632_v51 = vld [vmem:[#allocation2 + $0x9a] sm:$0xff] }
 0x3a4   : > { %2775 = vrot.lane.b32.xlu1 %v2682_v49, %s6992_s12 }
 0x3a6   : > { %v2503_v53 = vpop.permute.xlu1 %2502  ;;  %v2509_v54 = vpop.permute.xlu0 %2508 }
 0x3a7   : > { %2594 = vst.msk [vmem:[#allocation5 + $0x28] sm:$0xff] %vm2588_vm7, %v2503_v53  ;;  %2597 = vst.msk [vmem:[#allocation5 + $0x40] sm:$0xff] %vm2588_vm7, %v2509_v54  ;;  %v2635_v54 = vld [vmem:[#allocation2 + $0xc2] sm:$0xff] }
 0x3a8   : > { %2779 = vrot.lane.b32.xlu1 %v2684_v52, %s6992_s12 }
 0x3aa   : > { %v2507_v55 = vpop.permute.xlu1 %2506  ;;  %v2513_v56 = vpop.permute.xlu0 %2512 }
 0x3ab   : > { %2596 = vst.msk [vmem:[#allocation5 + $0x38] sm:$0xff] %vm2588_vm7, %v2507_v55  ;;  %2599 = vst.msk [vmem:[#allocation5 + $0x50] sm:$0xff] %vm2588_vm7, %v2513_v56 }
 0x3ae   : > { %v2511_v57 = vpop.permute.xlu1 %2510  ;;  %v2517_v58 = vpop.permute.xlu0 %2516 }
 0x3af   : > { %2598 = vst.msk [vmem:[#allocation5 + $0x48] sm:$0xff] %vm2588_vm7, %v2511_v57  ;;  %2601 = vst.msk [vmem:[#allocation5 + $0x60] sm:$0xff] %vm2588_vm7, %v2517_v58  ;;  %v2634_v57 = vld [vmem:[#allocation2 + $0xb2] sm:$0xff] }
 0x3b2   : > { %v2515_v59 = vpop.permute.xlu1 %2514  ;;  %v2521_v60 = vpop.permute.xlu0 %2520 }
 0x3b3   : > { %2600 = vst.msk [vmem:[#allocation5 + $0x58] sm:$0xff] %vm2588_vm7, %v2515_v59  ;;  %2603 = vst.msk [vmem:[#allocation5 + $0x70] sm:$0xff] %vm2588_vm7, %v2521_v60  ;;  %v2637_v60 = vld [vmem:[#allocation2 + $0xda] sm:$0xff] }
 0x3b6   : > { %v2519_v61 = vpop.permute.xlu1 %2518  ;;  %v2525_v62 = vpop.permute.xlu0 %2524 }
 0x3b7   : > { %2602 = vst.msk [vmem:[#allocation5 + $0x68] sm:$0xff] %vm2588_vm7, %v2519_v61  ;;  %2605 = vst.msk [vmem:[#allocation5 + $0x80] sm:$0xff] %vm2588_vm7, %v2525_v62 }
 0x3ba   : > { %v2523_v63 = vpop.permute.xlu1 %2522  ;;  %v2529_v1 = vpop.permute.xlu0 %2528 }
 0x3bb   : > { %2604 = vst.msk [vmem:[#allocation5 + $0x78] sm:$0xff] %vm2588_vm7, %v2523_v63  ;;  %2607 = vst.msk [vmem:[#allocation5 + $0x90] sm:$0xff] %vm2588_vm7, %v2529_v1  ;;  %v2636_v63 = vld [vmem:[#allocation2 + $0xca] sm:$0xff] }
 0x3be   : > { %v2527_v2 = vpop.permute.xlu1 %2526  ;;  %v2533_v3 = vpop.permute.xlu0 %2532 }
 0x3bf   : > { %2606 = vst.msk [vmem:[#allocation5 + $0x88] sm:$0xff] %vm2588_vm7, %v2527_v2  ;;  %2609 = vst.msk [vmem:[#allocation5 + $0xa0] sm:$0xff] %vm2588_vm7, %v2533_v3  ;;  %v2639_v3 = vld [vmem:[#allocation2 + $0xf2] sm:$0xff] }
 0x3c2   : > { %v2531_v4 = vpop.permute.xlu1 %2530  ;;  %v2537_v5 = vpop.permute.xlu0 %2536 }
 0x3c3   : > { %2608 = vst.msk [vmem:[#allocation5 + $0x98] sm:$0xff] %vm2588_vm7, %v2531_v4  ;;  %2611 = vst.msk [vmem:[#allocation5 + $0xb0] sm:$0xff] %vm2588_vm7, %v2537_v5 }
 0x3c6   : > { %v2535_v6 = vpop.permute.xlu1 %2534  ;;  %v2541_v7 = vpop.permute.xlu0 %2540 }
 0x3c7   : > { %2610 = vst.msk [vmem:[#allocation5 + $0xa8] sm:$0xff] %vm2588_vm7, %v2535_v6  ;;  %2613 = vst.msk [vmem:[#allocation5 + $0xc0] sm:$0xff] %vm2588_vm7, %v2541_v7  ;;  %v2638_v6 = vld [vmem:[#allocation2 + $0xe2] sm:$0xff] }
 0x3ca   : > { %v2539_v8 = vpop.permute.xlu1 %2538  ;;  %v2545_v9 = vpop.permute.xlu0 %2544 }
 0x3cb   : > { %2612 = vst.msk [vmem:[#allocation5 + $0xb8] sm:$0xff] %vm2588_vm7, %v2539_v8  ;;  %2615 = vst.msk [vmem:[#allocation5 + $0xd0] sm:$0xff] %vm2588_vm7, %v2545_v9  ;;  %v2641_v9 = vld [vmem:[#allocation2 + $0x10a] sm:$0xff] }
 0x3ce   : > { %v2543_v10 = vpop.permute.xlu1 %2542  ;;  %v2549_v11 = vpop.permute.xlu0 %2548 }
 0x3cf   : > { %2614 = vst.msk [vmem:[#allocation5 + $0xc8] sm:$0xff] %vm2588_vm7, %v2543_v10  ;;  %2617 = vst.msk [vmem:[#allocation5 + $0xe0] sm:$0xff] %vm2588_vm7, %v2549_v11 }
 0x3d2   : > { %v2547_v12 = vpop.permute.xlu1 %2546  ;;  %v2553_v13 = vpop.permute.xlu0 %2552 }
 0x3d3   : > { %2616 = vst.msk [vmem:[#allocation5 + $0xd8] sm:$0xff] %vm2588_vm7, %v2547_v12  ;;  %2619 = vst.msk [vmem:[#allocation5 + $0xf0] sm:$0xff] %vm2588_vm7, %v2553_v13  ;;  %v2640_v12 = vld [vmem:[#allocation2 + $0xfa] sm:$0xff] }
 0x3d6   : > { %v2551_v14 = vpop.permute.xlu1 %2550  ;;  %v2718_v16 = vpop.permute.xlu0 %2717 }
 0x3d7   : > { %2618 = vst.msk [vmem:[#allocation5 + $0xe8] sm:$0xff] %vm2588_vm7, %v2551_v14  ;;  %v2813_v17 = vsel %vm327_vm0, %v2621_v15, %v2718_v16  ;;  %v2643_v15 = vld [vmem:[#allocation2 + $0x122] sm:$0xff] }
 0x3d8   : > { %2877 = vrot.lane.b32.xlu0 %v2813_v17, %s6997_s21 }
 0x3da   : > { %v2555_v18 = vpop.permute.xlu1 %2554  ;;  %v2722_v20 = vpop.permute.xlu0 %2721 }
 0x3db   : > { %2620 = vst.msk [vmem:[#allocation5 + $0xf8] sm:$0xff] %vm2588_vm7, %v2555_v18  ;;  %v2815_v22 = vsel %vm327_vm0, %v2623_v19, %v2722_v20  ;;  %v2642_v18 = vld [vmem:[#allocation2 + $0x112] sm:$0xff] }
 0x3dc   : > { %2881 = vrot.lane.b32.xlu0 %v2815_v22, %s6997_s21 }
 0x3de   : > { %v2720_v23 = vpop.permute.xlu1 %2719  ;;  %v2726_v26 = vpop.permute.xlu0 %2725 }
 0x3df   : > { %v2814_v25 = vsel %vm327_vm0, %v2622_v21, %v2720_v23  ;;  %v2817_v28 = vsel %vm327_vm0, %v2625_v24, %v2726_v26  ;;  %v2645_v21 = vld [vmem:[#allocation2 + $0x13a] sm:$0xff]  ;;  %v2644_v24 = vld [vmem:[#allocation2 + $0x12a] sm:$0xff] }
 0x3e0   : > { %2879 = vrot.lane.b32.xlu1 %v2814_v25, %s6997_s21  ;;  %2885 = vrot.lane.b32.xlu0 %v2817_v28, %s6997_s21 }
 0x3e2   : > { %v2724_v29 = vpop.permute.xlu1 %2723  ;;  %v2730_v32 = vpop.permute.xlu0 %2729 }
 0x3e3   : > { %v2816_v31 = vsel %vm327_vm0, %v2624_v27, %v2724_v29  ;;  %v2819_v34 = vsel %vm327_vm0, %v2627_v30, %v2730_v32  ;;  %v2647_v27 = vld [vmem:[#allocation2 + $0x152] sm:$0xff]  ;;  %v2646_v30 = vld [vmem:[#allocation2 + $0x142] sm:$0xff] }
 0x3e4   : > { %2883 = vrot.lane.b32.xlu1 %v2816_v31, %s6997_s21  ;;  %2889 = vrot.lane.b32.xlu0 %v2819_v34, %s6997_s21 }
 0x3e6   : > { %v2728_v35 = vpop.permute.xlu1 %2727  ;;  %v2734_v38 = vpop.permute.xlu0 %2733 }
 0x3e7   : > { %v2818_v37 = vsel %vm327_vm0, %v2626_v33, %v2728_v35  ;;  %v2821_v40 = vsel %vm327_vm0, %v2629_v36, %v2734_v38  ;;  %v2649_v33 = vld [vmem:[#allocation2 + $0x16a] sm:$0xff]  ;;  %v2648_v36 = vld [vmem:[#allocation2 + $0x15a] sm:$0xff] }
 0x3e8   : > { %2887 = vrot.lane.b32.xlu1 %v2818_v37, %s6997_s21  ;;  %2893 = vrot.lane.b32.xlu0 %v2821_v40, %s6997_s21 }
 0x3ea   : > { %v2732_v41 = vpop.permute.xlu1 %2731  ;;  %v2738_v44 = vpop.permute.xlu0 %2737 }
 0x3eb   : > { %v2820_v43 = vsel %vm327_vm0, %v2628_v39, %v2732_v41  ;;  %v2823_v46 = vsel %vm327_vm0, %v2631_v42, %v2738_v44  ;;  %v2651_v39 = vld [vmem:[#allocation2 + $0x182] sm:$0xff]  ;;  %v2650_v42 = vld [vmem:[#allocation2 + $0x172] sm:$0xff] }
 0x3ec   : > { %2891 = vrot.lane.b32.xlu1 %v2820_v43, %s6997_s21  ;;  %2897 = vrot.lane.b32.xlu0 %v2823_v46, %s6997_s21  ;;  %v3040_v46 = vld [vmem:[#allocation3 + $0x30] sm:$0xff] }
 0x3ee   : > { %v2736_v47 = vpop.permute.xlu1 %2735  ;;  %v2742_v50 = vpop.permute.xlu0 %2741 }
 0x3ef   : > { %v2822_v49 = vsel %vm327_vm0, %v2630_v45, %v2736_v47  ;;  %v2825_v52 = vsel %vm327_vm0, %v2633_v48, %v2742_v50  ;;  %v2652_v47 = vld [vmem:[#allocation2 + $0x18a] sm:$0xff]  ;;  %v3042_v50 = vld [vmem:[#allocation3 + $0x48] sm:$0xff] }
 0x3f0   : > { %2895 = vrot.lane.b32.xlu1 %v2822_v49, %s6997_s21  ;;  %2901 = vrot.lane.b32.xlu0 %v2825_v52, %s6997_s21  ;;  %v3044_v52 = vld [vmem:[#allocation3 + $0x60] sm:$0xff] }
 0x3f2   : > { %v2740_v53 = vpop.permute.xlu1 %2739  ;;  %v2746_v56 = vpop.permute.xlu0 %2745 }
 0x3f3   : > { %v2824_v55 = vsel %vm327_vm0, %v2632_v51, %v2740_v53  ;;  %v2827_v58 = vsel %vm327_vm0, %v2635_v54, %v2746_v56  ;;  %v3041_v51 = vld [vmem:[#allocation3 + $0x38] sm:$0xff]  ;;  %v3043_v53 = vld [vmem:[#allocation3 + $0x50] sm:$0xff] }
 0x3f4   : > { %2899 = vrot.lane.b32.xlu1 %v2824_v55, %s6997_s21  ;;  %2905 = vrot.lane.b32.xlu0 %v2827_v58, %s6997_s21  ;;  %v3046_v54 = vld [vmem:[#allocation3 + $0x78] sm:$0xff]  ;;  %v3045_v55 = vld [vmem:[#allocation3 + $0x68] sm:$0xff]  ;;  %v3048_v56 = vld [vmem:[#allocation3 + $0x90] sm:$0xff] }
 0x3f5   : > { %v3050_v58 = vld [vmem:[#allocation3 + $0xa8] sm:$0xff] }
 0x3f6   : > { %v2744_v59 = vpop.permute.xlu1 %2743  ;;  %v2750_v62 = vpop.permute.xlu0 %2749 }
 0x3f7   : > { %v2826_v61 = vsel %vm327_vm0, %v2634_v57, %v2744_v59  ;;  %v2829_v1 = vsel %vm327_vm0, %v2637_v60, %v2750_v62  ;;  %v3047_v57 = vld [vmem:[#allocation3 + $0x80] sm:$0xff]  ;;  %v3049_v59 = vld [vmem:[#allocation3 + $0x98] sm:$0xff] }
 0x3f8   : > { %2903 = vrot.lane.b32.xlu1 %v2826_v61, %s6997_s21  ;;  %2909 = vrot.lane.b32.xlu0 %v2829_v1, %s6997_s21  ;;  %v3052_v60 = vld [vmem:[#allocation3 + $0xc0] sm:$0xff]  ;;  %v3051_v61 = vld [vmem:[#allocation3 + $0xb0] sm:$0xff]  ;;  %v3054_v62 = vld [vmem:[#allocation3 + $0xd8] sm:$0xff] }
 0x3f9   : > { %v3056_v1 = vld [vmem:[#allocation3 + $0xf0] sm:$0xff] }
 0x3fa   : > { %v2748_v2 = vpop.permute.xlu1 %2747  ;;  %v2754_v5 = vpop.permute.xlu0 %2753 }
 0x3fb   : > { %v2828_v4 = vsel %vm327_vm0, %v2636_v63, %v2748_v2  ;;  %v2831_v7 = vsel %vm327_vm0, %v2639_v3, %v2754_v5  ;;  %v3053_v63 = vld [vmem:[#allocation3 + $0xc8] sm:$0xff]  ;;  %v3055_v2 = vld [vmem:[#allocation3 + $0xe0] sm:$0xff] }
 0x3fc   : > { %2907 = vrot.lane.b32.xlu1 %v2828_v4, %s6997_s21  ;;  %2913 = vrot.lane.b32.xlu0 %v2831_v7, %s6997_s21  ;;  %v3058_v3 = vld [vmem:[#allocation3 + $0x108] sm:$0xff]  ;;  %v3057_v4 = vld [vmem:[#allocation3 + $0xf8] sm:$0xff]  ;;  %v3060_v5 = vld [vmem:[#allocation3 + $0x120] sm:$0xff] }
 0x3fd   : > { %v3062_v7 = vld [vmem:[#allocation3 + $0x138] sm:$0xff] }
 0x3fe   : > { %v2752_v8 = vpop.permute.xlu1 %2751  ;;  %v2758_v11 = vpop.permute.xlu0 %2757 }
 0x3ff   : > { %v2830_v10 = vsel %vm327_vm0, %v2638_v6, %v2752_v8  ;;  %v2833_v13 = vsel %vm327_vm0, %v2641_v9, %v2758_v11  ;;  %v3059_v6 = vld [vmem:[#allocation3 + $0x110] sm:$0xff]  ;;  %v3061_v8 = vld [vmem:[#allocation3 + $0x128] sm:$0xff] }
 0x400   : > { %2911 = vrot.lane.b32.xlu1 %v2830_v10, %s6997_s21  ;;  %2917 = vrot.lane.b32.xlu0 %v2833_v13, %s6997_s21  ;;  %v3064_v9 = vld [vmem:[#allocation3 + $0x150] sm:$0xff]  ;;  %v3063_v10 = vld [vmem:[#allocation3 + $0x140] sm:$0xff]  ;;  %v3066_v11 = vld [vmem:[#allocation3 + $0x168] sm:$0xff] }
 0x401   : > { %v3065_v13 = vld [vmem:[#allocation3 + $0x158] sm:$0xff] }
 0x402   : > { %v2756_v14 = vpop.permute.xlu1 %2755  ;;  %v2762_v17 = vpop.permute.xlu0 %2761 }
 0x403   : > { %v2832_v16 = vsel %vm327_vm0, %v2640_v12, %v2756_v14  ;;  %v2835_v19 = vsel %vm327_vm0, %v2643_v15, %v2762_v17  ;;  %v3068_v14 = vld [vmem:[#allocation3 + $0x180] sm:$0xff] }
 0x404   : > { %2915 = vrot.lane.b32.xlu1 %v2832_v16, %s6997_s21  ;;  %2921 = vrot.lane.b32.xlu0 %v2835_v19, %s6997_s21  ;;  %v3067_v16 = vld [vmem:[#allocation3 + $0x170] sm:$0xff] }
 0x406   : > { %v2760_v20 = vpop.permute.xlu1 %2759  ;;  %v2766_v23 = vpop.permute.xlu0 %2765 }
 0x407   : > { %v2834_v22 = vsel %vm327_vm0, %v2642_v18, %v2760_v20  ;;  %v2837_v25 = vsel %vm327_vm0, %v2645_v21, %v2766_v23  ;;  %v3070_v18 = vld [vmem:[#allocation3 + $0x198] sm:$0xff]  ;;  %v3069_v20 = vld [vmem:[#allocation3 + $0x188] sm:$0xff]  ;;  %v3071_v23 = vld [vmem:[#allocation3 + $0x1a0] sm:$0xff] }
 0x408   : > { %2919 = vrot.lane.b32.xlu1 %v2834_v22, %s6997_s21  ;;  %2925 = vrot.lane.b32.xlu0 %v2837_v25, %s6997_s21 }
 0x40a   : > { %v2764_v26 = vpop.permute.xlu1 %2763  ;;  %v2770_v29 = vpop.permute.xlu0 %2769 }
 0x40b   : > { %v2836_v28 = vsel %vm327_vm0, %v2644_v24, %v2764_v26  ;;  %v2839_v31 = vsel %vm327_vm0, %v2647_v27, %v2770_v29 }
 0x40c   : > { %2923 = vrot.lane.b32.xlu1 %v2836_v28, %s6997_s21  ;;  %2929 = vrot.lane.b32.xlu0 %v2839_v31, %s6997_s21 }
 0x40e   : > { %v2768_v32 = vpop.permute.xlu1 %2767  ;;  %v2774_v35 = vpop.permute.xlu0 %2773 }
 0x40f   : > { %v2838_v34 = vsel %vm327_vm0, %v2646_v30, %v2768_v32  ;;  %v2841_v37 = vsel %vm327_vm0, %v2649_v33, %v2774_v35 }
 0x410   : > { %2927 = vrot.lane.b32.xlu1 %v2838_v34, %s6997_s21  ;;  %2933 = vrot.lane.b32.xlu0 %v2841_v37, %s6997_s21 }
 0x412   : > { %v2772_v38 = vpop.permute.xlu1 %2771  ;;  %v2778_v41 = vpop.permute.xlu0 %2777 }
 0x413   : > { %v2840_v40 = vsel %vm327_vm0, %v2648_v36, %v2772_v38  ;;  %v2843_v43 = vsel %vm327_vm0, %v2651_v39, %v2778_v41 }
 0x414   : > { %2931 = vrot.lane.b32.xlu1 %v2840_v40, %s6997_s21  ;;  %2937 = vrot.lane.b32.xlu0 %v2843_v43, %s6997_s21 }
 0x416   : > { %v2776_v44 = vpop.permute.xlu1 %2775 }
 0x417   : > { %v2842_v45 = vsel %vm327_vm0, %v2650_v42, %v2776_v44 }
 0x418   : > { %2935 = vrot.lane.b32.xlu1 %v2842_v45, %s6997_s21  ;;  %3104 = vrot.lane.b32.xlu0 %v3040_v46, %s6992_s12 }
 0x41a   : > { %v2780_v48 = vpop.permute.xlu1 %2779 }
 0x41b   : > { %v2844_v49 = vsel %vm327_vm0, %v2652_v47, %v2780_v48 }
 0x41c   : > { %2939 = vrot.lane.b32.xlu1 %v2844_v49, %s6997_s21  ;;  %3108 = vrot.lane.b32.xlu0 %v3042_v50, %s6992_s12  ;;  %v3007_v49 = vld [vmem:[#allocation2 + $0x30] sm:$0xff] }
 0x420   : > { %3106 = vrot.lane.b32.xlu1 %v3041_v51, %s6992_s12  ;;  %3112 = vrot.lane.b32.xlu0 %v3044_v52, %s6992_s12 }
 0x424   : > { %3110 = vrot.lane.b32.xlu1 %v3043_v53, %s6992_s12  ;;  %3116 = vrot.lane.b32.xlu0 %v3046_v54, %s6992_s12  ;;  %v3009_v53 = vld [vmem:[#allocation2 + $0x48] sm:$0xff] }
 0x428   : > { %3114 = vrot.lane.b32.xlu1 %v3045_v55, %s6992_s12  ;;  %3120 = vrot.lane.b32.xlu0 %v3048_v56, %s6992_s12  ;;  %v3008_v55 = vld [vmem:[#allocation2 + $0x38] sm:$0xff] }
 0x42c   : > { %3118 = vrot.lane.b32.xlu1 %v3047_v57, %s6992_s12  ;;  %3124 = vrot.lane.b32.xlu0 %v3050_v58, %s6992_s12  ;;  %v3011_v58 = vld [vmem:[#allocation2 + $0x60] sm:$0xff] }
 0x430   : > { %3122 = vrot.lane.b32.xlu1 %v3049_v59, %s6992_s12  ;;  %3128 = vrot.lane.b32.xlu0 %v3052_v60, %s6992_s12 }
 0x434   : > { %3126 = vrot.lane.b32.xlu1 %v3051_v61, %s6992_s12  ;;  %3132 = vrot.lane.b32.xlu0 %v3054_v62, %s6992_s12  ;;  %v3010_v61 = vld [vmem:[#allocation2 + $0x50] sm:$0xff] }
 0x438   : > { %3130 = vrot.lane.b32.xlu1 %v3053_v63, %s6992_s12  ;;  %3136 = vrot.lane.b32.xlu0 %v3056_v1, %s6992_s12  ;;  %v3013_v1 = vld [vmem:[#allocation2 + $0x78] sm:$0xff] }
 0x43c   : > { %3134 = vrot.lane.b32.xlu1 %v3055_v2, %s6992_s12  ;;  %3140 = vrot.lane.b32.xlu0 %v3058_v3, %s6992_s12 }
 0x440   : > { %3138 = vrot.lane.b32.xlu1 %v3057_v4, %s6992_s12  ;;  %3144 = vrot.lane.b32.xlu0 %v3060_v5, %s6992_s12  ;;  %v3012_v4 = vld [vmem:[#allocation2 + $0x68] sm:$0xff] }
 0x444   : > { %3142 = vrot.lane.b32.xlu1 %v3059_v6, %s6992_s12  ;;  %3148 = vrot.lane.b32.xlu0 %v3062_v7, %s6992_s12  ;;  %v3015_v7 = vld [vmem:[#allocation2 + $0x90] sm:$0xff] }
 0x448   : > { %3146 = vrot.lane.b32.xlu1 %v3061_v8, %s6992_s12  ;;  %3152 = vrot.lane.b32.xlu0 %v3064_v9, %s6992_s12 }
 0x44a   : > { %v2878_v12 = vpop.permute.xlu0 %2877 }
 0x44b   : > { %2974 = vst.msk [vmem:[#allocation5] sm:$0xff] %vm2973_vm8, %v2878_v12 }
 0x44c   : > { %3150 = vrot.lane.b32.xlu1 %v3063_v10, %s6992_s12  ;;  %3156 = vrot.lane.b32.xlu0 %v3066_v11, %s6992_s12  ;;  %v3014_v10 = vld [vmem:[#allocation2 + $0x80] sm:$0xff] }
 0x44e   : > { %v2882_v15 = vpop.permute.xlu0 %2881 }
 0x44f   : > { %2976 = vst.msk [vmem:[#allocation5 + $0x10] sm:$0xff] %vm2973_vm8, %v2882_v15 }
 0x450   : > { %3154 = vrot.lane.b32.xlu1 %v3065_v13, %s6992_s12  ;;  %3160 = vrot.lane.b32.xlu0 %v3068_v14, %s6992_s12  ;;  %v3017_v13 = vld [vmem:[#allocation2 + $0xa8] sm:$0xff] }
 0x452   : > { %v2880_v17 = vpop.permute.xlu1 %2879  ;;  %v2886_v19 = vpop.permute.xlu0 %2885 }
 0x453   : > { %2975 = vst.msk [vmem:[#allocation5 + $0x8] sm:$0xff] %vm2973_vm8, %v2880_v17  ;;  %2978 = vst.msk [vmem:[#allocation5 + $0x20] sm:$0xff] %vm2973_vm8, %v2886_v19  ;;  %v3019_v19 = vld [vmem:[#allocation2 + $0xc0] sm:$0xff] }
 0x454   : > { %3158 = vrot.lane.b32.xlu1 %v3067_v16, %s6992_s12  ;;  %3164 = vrot.lane.b32.xlu0 %v3070_v18, %s6992_s12  ;;  %v3016_v16 = vld [vmem:[#allocation2 + $0x98] sm:$0xff] }
 0x456   : > { %v2884_v21 = vpop.permute.xlu1 %2883  ;;  %v2890_v22 = vpop.permute.xlu0 %2889 }
 0x457   : > { %2977 = vst.msk [vmem:[#allocation5 + $0x18] sm:$0xff] %vm2973_vm8, %v2884_v21  ;;  %2980 = vst.msk [vmem:[#allocation5 + $0x30] sm:$0xff] %vm2973_vm8, %v2890_v22  ;;  %v3018_v22 = vld [vmem:[#allocation2 + $0xb0] sm:$0xff] }
 0x458   : > { %3162 = vrot.lane.b32.xlu1 %v3069_v20, %s6992_s12 }
 0x45a   : > { %v2888_v24 = vpop.permute.xlu1 %2887  ;;  %v2894_v25 = vpop.permute.xlu0 %2893 }
 0x45b   : > { %2979 = vst.msk [vmem:[#allocation5 + $0x28] sm:$0xff] %vm2973_vm8, %v2888_v24  ;;  %2982 = vst.msk [vmem:[#allocation5 + $0x40] sm:$0xff] %vm2973_vm8, %v2894_v25  ;;  %v3021_v25 = vld [vmem:[#allocation2 + $0xd8] sm:$0xff] }
 0x45c   : > { %3166 = vrot.lane.b32.xlu1 %v3071_v23, %s6992_s12 }
 0x45e   : > { %v2892_v26 = vpop.permute.xlu1 %2891  ;;  %v2898_v27 = vpop.permute.xlu0 %2897 }
 0x45f   : > { %2981 = vst.msk [vmem:[#allocation5 + $0x38] sm:$0xff] %vm2973_vm8, %v2892_v26  ;;  %2984 = vst.msk [vmem:[#allocation5 + $0x50] sm:$0xff] %vm2973_vm8, %v2898_v27 }
 0x462   : > { %v2896_v28 = vpop.permute.xlu1 %2895  ;;  %v2902_v29 = vpop.permute.xlu0 %2901 }
 0x463   : > { %2983 = vst.msk [vmem:[#allocation5 + $0x48] sm:$0xff] %vm2973_vm8, %v2896_v28  ;;  %2986 = vst.msk [vmem:[#allocation5 + $0x60] sm:$0xff] %vm2973_vm8, %v2902_v29  ;;  %v3020_v28 = vld [vmem:[#allocation2 + $0xc8] sm:$0xff] }
 0x466   : > { %v2900_v30 = vpop.permute.xlu1 %2899  ;;  %v2906_v31 = vpop.permute.xlu0 %2905 }
 0x467   : > { %2985 = vst.msk [vmem:[#allocation5 + $0x58] sm:$0xff] %vm2973_vm8, %v2900_v30  ;;  %2988 = vst.msk [vmem:[#allocation5 + $0x70] sm:$0xff] %vm2973_vm8, %v2906_v31  ;;  %v3023_v31 = vld [vmem:[#allocation2 + $0xf0] sm:$0xff] }
 0x46a   : > { %v2904_v32 = vpop.permute.xlu1 %2903  ;;  %v2910_v33 = vpop.permute.xlu0 %2909 }
 0x46b   : > { %2987 = vst.msk [vmem:[#allocation5 + $0x68] sm:$0xff] %vm2973_vm8, %v2904_v32  ;;  %2990 = vst.msk [vmem:[#allocation5 + $0x80] sm:$0xff] %vm2973_vm8, %v2910_v33 }
 0x46e   : > { %v2908_v34 = vpop.permute.xlu1 %2907  ;;  %v2914_v35 = vpop.permute.xlu0 %2913 }
 0x46f   : > { %2989 = vst.msk [vmem:[#allocation5 + $0x78] sm:$0xff] %vm2973_vm8, %v2908_v34  ;;  %2992 = vst.msk [vmem:[#allocation5 + $0x90] sm:$0xff] %vm2973_vm8, %v2914_v35  ;;  %v3022_v34 = vld [vmem:[#allocation2 + $0xe0] sm:$0xff] }
 0x472   : > { %v2912_v36 = vpop.permute.xlu1 %2911  ;;  %v2918_v37 = vpop.permute.xlu0 %2917 }
 0x473   : > { %2991 = vst.msk [vmem:[#allocation5 + $0x88] sm:$0xff] %vm2973_vm8, %v2912_v36  ;;  %2994 = vst.msk [vmem:[#allocation5 + $0xa0] sm:$0xff] %vm2973_vm8, %v2918_v37  ;;  %v3025_v37 = vld [vmem:[#allocation2 + $0x108] sm:$0xff] }
 0x476   : > { %v2916_v38 = vpop.permute.xlu1 %2915  ;;  %v2922_v39 = vpop.permute.xlu0 %2921 }
 0x477   : > { %2993 = vst.msk [vmem:[#allocation5 + $0x98] sm:$0xff] %vm2973_vm8, %v2916_v38  ;;  %2996 = vst.msk [vmem:[#allocation5 + $0xb0] sm:$0xff] %vm2973_vm8, %v2922_v39 }
 0x47a   : > { %v2920_v40 = vpop.permute.xlu1 %2919  ;;  %v2926_v41 = vpop.permute.xlu0 %2925 }
 0x47b   : > { %2995 = vst.msk [vmem:[#allocation5 + $0xa8] sm:$0xff] %vm2973_vm8, %v2920_v40  ;;  %2998 = vst.msk [vmem:[#allocation5 + $0xc0] sm:$0xff] %vm2973_vm8, %v2926_v41  ;;  %v3024_v40 = vld [vmem:[#allocation2 + $0xf8] sm:$0xff] }
 0x47e   : > { %v2924_v42 = vpop.permute.xlu1 %2923  ;;  %v2930_v43 = vpop.permute.xlu0 %2929 }
 0x47f   : > { %2997 = vst.msk [vmem:[#allocation5 + $0xb8] sm:$0xff] %vm2973_vm8, %v2924_v42  ;;  %3000 = vst.msk [vmem:[#allocation5 + $0xd0] sm:$0xff] %vm2973_vm8, %v2930_v43  ;;  %v3027_v43 = vld [vmem:[#allocation2 + $0x120] sm:$0xff] }
 0x482   : > { %v2928_v44 = vpop.permute.xlu1 %2927  ;;  %v2934_v45 = vpop.permute.xlu0 %2933 }
 0x483   : > { %2999 = vst.msk [vmem:[#allocation5 + $0xc8] sm:$0xff] %vm2973_vm8, %v2928_v44  ;;  %3002 = vst.msk [vmem:[#allocation5 + $0xe0] sm:$0xff] %vm2973_vm8, %v2934_v45 }
 0x486   : > { %v2932_v46 = vpop.permute.xlu1 %2931  ;;  %v2938_v47 = vpop.permute.xlu0 %2937 }
 0x487   : > { %3001 = vst.msk [vmem:[#allocation5 + $0xd8] sm:$0xff] %vm2973_vm8, %v2932_v46  ;;  %3004 = vst.msk [vmem:[#allocation5 + $0xf0] sm:$0xff] %vm2973_vm8, %v2938_v47  ;;  %v3026_v46 = vld [vmem:[#allocation2 + $0x110] sm:$0xff] }
 0x48a   : > { %v2936_v48 = vpop.permute.xlu1 %2935  ;;  %v3105_v50 = vpop.permute.xlu0 %3104 }
 0x48b   : > { %3003 = vst.msk [vmem:[#allocation5 + $0xe8] sm:$0xff] %vm2973_vm8, %v2936_v48  ;;  %v3200_v51 = vsel %vm327_vm0, %v3007_v49, %v3105_v50  ;;  %v3029_v49 = vld [vmem:[#allocation2 + $0x138] sm:$0xff] }
 0x48c   : > { %3264 = vrot.lane.b32.xlu0 %v3200_v51, %s6998_s22 }
 0x48e   : > { %v2940_v52 = vpop.permute.xlu1 %2939  ;;  %v3109_v54 = vpop.permute.xlu0 %3108 }
 0x48f   : > { %3005 = vst.msk [vmem:[#allocation5 + $0xf8] sm:$0xff] %vm2973_vm8, %v2940_v52  ;;  %v3202_v56 = vsel %vm327_vm0, %v3009_v53, %v3109_v54  ;;  %v3028_v52 = vld [vmem:[#allocation2 + $0x128] sm:$0xff] }
 0x490   : > { %3268 = vrot.lane.b32.xlu0 %v3202_v56, %s6998_s22 }
 0x492   : > { %v3107_v57 = vpop.permute.xlu1 %3106  ;;  %v3113_v60 = vpop.permute.xlu0 %3112 }
 0x493   : > { %v3201_v59 = vsel %vm327_vm0, %v3008_v55, %v3107_v57  ;;  %v3204_v62 = vsel %vm327_vm0, %v3011_v58, %v3113_v60  ;;  %v3031_v55 = vld [vmem:[#allocation2 + $0x150] sm:$0xff]  ;;  %v3030_v58 = vld [vmem:[#allocation2 + $0x140] sm:$0xff] }
 0x494   : > { %3266 = vrot.lane.b32.xlu1 %v3201_v59, %s6998_s22  ;;  %3272 = vrot.lane.b32.xlu0 %v3204_v62, %s6998_s22 }
 0x496   : > { %v3111_v63 = vpop.permute.xlu1 %3110  ;;  %v3117_v3 = vpop.permute.xlu0 %3116 }
 0x497   : > { %v3203_v2 = vsel %vm327_vm0, %v3010_v61, %v3111_v63  ;;  %v3206_v5 = vsel %vm327_vm0, %v3013_v1, %v3117_v3  ;;  %v3033_v61 = vld [vmem:[#allocation2 + $0x168] sm:$0xff]  ;;  %v3032_v1 = vld [vmem:[#allocation2 + $0x158] sm:$0xff] }
 0x498   : > { %3270 = vrot.lane.b32.xlu1 %v3203_v2, %s6998_s22  ;;  %3276 = vrot.lane.b32.xlu0 %v3206_v5, %s6998_s22 }
 0x49a   : > { %v3115_v6 = vpop.permute.xlu1 %3114  ;;  %v3121_v9 = vpop.permute.xlu0 %3120 }
 0x49b   : > { %v3205_v8 = vsel %vm327_vm0, %v3012_v4, %v3115_v6  ;;  %v3208_v11 = vsel %vm327_vm0, %v3015_v7, %v3121_v9  ;;  %v3035_v4 = vld [vmem:[#allocation2 + $0x180] sm:$0xff]  ;;  %v3034_v7 = vld [vmem:[#allocation2 + $0x170] sm:$0xff] }
 0x49c   : > { %3274 = vrot.lane.b32.xlu1 %v3205_v8, %s6998_s22  ;;  %3280 = vrot.lane.b32.xlu0 %v3208_v11, %s6998_s22 }
 0x49e   : > { %v3119_v12 = vpop.permute.xlu1 %3118  ;;  %v3125_v15 = vpop.permute.xlu0 %3124 }
 0x49f   : > { %v3207_v14 = vsel %vm327_vm0, %v3014_v10, %v3119_v12  ;;  %v3210_v17 = vsel %vm327_vm0, %v3017_v13, %v3125_v15  ;;  %v3037_v10 = vld [vmem:[#allocation2 + $0x198] sm:$0xff]  ;;  %v3036_v13 = vld [vmem:[#allocation2 + $0x188] sm:$0xff] }
 0x4a0   : > { %3278 = vrot.lane.b32.xlu1 %v3207_v14, %s6998_s22  ;;  %3284 = vrot.lane.b32.xlu0 %v3210_v17, %s6998_s22  ;;  %v3425_v17 = vld [vmem:[#allocation3 + $0x31] sm:$0xff] }
 0x4a2   : > { %v3123_v18 = vpop.permute.xlu1 %3122  ;;  %v3129_v21 = vpop.permute.xlu0 %3128 }
 0x4a3   : > { %v3209_v20 = vsel %vm327_vm0, %v3016_v16, %v3123_v18  ;;  %v3212_v23 = vsel %vm327_vm0, %v3019_v19, %v3129_v21  ;;  %v3038_v18 = vld [vmem:[#allocation2 + $0x1a0] sm:$0xff] }
 0x4a4   : > { %3282 = vrot.lane.b32.xlu1 %v3209_v20, %s6998_s22  ;;  %3288 = vrot.lane.b32.xlu0 %v3212_v23, %s6998_s22  ;;  %v3427_v21 = vld [vmem:[#allocation3 + $0x49] sm:$0xff]  ;;  %v3429_v23 = vld [vmem:[#allocation3 + $0x61] sm:$0xff] }
 0x4a6   : > { %v3127_v24 = vpop.permute.xlu1 %3126  ;;  %v3133_v27 = vpop.permute.xlu0 %3132 }
 0x4a7   : > { %v3211_v26 = vsel %vm327_vm0, %v3018_v22, %v3127_v24  ;;  %v3214_v29 = vsel %vm327_vm0, %v3021_v25, %v3133_v27  ;;  %v3426_v22 = vld [vmem:[#allocation3 + $0x39] sm:$0xff]  ;;  %v3428_v24 = vld [vmem:[#allocation3 + $0x51] sm:$0xff] }
 0x4a8   : > { %3286 = vrot.lane.b32.xlu1 %v3211_v26, %s6998_s22  ;;  %3292 = vrot.lane.b32.xlu0 %v3214_v29, %s6998_s22  ;;  %v3431_v25 = vld [vmem:[#allocation3 + $0x79] sm:$0xff]  ;;  %v3430_v26 = vld [vmem:[#allocation3 + $0x69] sm:$0xff]  ;;  %v3433_v27 = vld [vmem:[#allocation3 + $0x91] sm:$0xff] }
 0x4a9   : > { %v3435_v29 = vld [vmem:[#allocation3 + $0xa9] sm:$0xff] }
 0x4aa   : > { %v3131_v30 = vpop.permute.xlu1 %3130  ;;  %v3137_v33 = vpop.permute.xlu0 %3136 }
 0x4ab   : > { %v3213_v32 = vsel %vm327_vm0, %v3020_v28, %v3131_v30  ;;  %v3216_v35 = vsel %vm327_vm0, %v3023_v31, %v3137_v33  ;;  %v3432_v28 = vld [vmem:[#allocation3 + $0x81] sm:$0xff]  ;;  %v3434_v30 = vld [vmem:[#allocation3 + $0x99] sm:$0xff] }
 0x4ac   : > { %3290 = vrot.lane.b32.xlu1 %v3213_v32, %s6998_s22  ;;  %3296 = vrot.lane.b32.xlu0 %v3216_v35, %s6998_s22  ;;  %v3437_v31 = vld [vmem:[#allocation3 + $0xc1] sm:$0xff]  ;;  %v3436_v32 = vld [vmem:[#allocation3 + $0xb1] sm:$0xff]  ;;  %v3439_v33 = vld [vmem:[#allocation3 + $0xd9] sm:$0xff] }
 0x4ad   : > { %v3441_v35 = vld [vmem:[#allocation3 + $0xf1] sm:$0xff] }
 0x4ae   : > { %v3135_v36 = vpop.permute.xlu1 %3134  ;;  %v3141_v39 = vpop.permute.xlu0 %3140 }
 0x4af   : > { %v3215_v38 = vsel %vm327_vm0, %v3022_v34, %v3135_v36  ;;  %v3218_v41 = vsel %vm327_vm0, %v3025_v37, %v3141_v39  ;;  %v3438_v34 = vld [vmem:[#allocation3 + $0xc9] sm:$0xff]  ;;  %v3440_v36 = vld [vmem:[#allocation3 + $0xe1] sm:$0xff] }
 0x4b0   : > { %3294 = vrot.lane.b32.xlu1 %v3215_v38, %s6998_s22  ;;  %3300 = vrot.lane.b32.xlu0 %v3218_v41, %s6998_s22  ;;  %v3443_v37 = vld [vmem:[#allocation3 + $0x109] sm:$0xff]  ;;  %v3442_v38 = vld [vmem:[#allocation3 + $0xf9] sm:$0xff]  ;;  %v3445_v39 = vld [vmem:[#allocation3 + $0x121] sm:$0xff] }
 0x4b1   : > { %v3447_v41 = vld [vmem:[#allocation3 + $0x139] sm:$0xff] }
 0x4b2   : > { %v3139_v42 = vpop.permute.xlu1 %3138  ;;  %v3145_v45 = vpop.permute.xlu0 %3144 }
 0x4b3   : > { %v3217_v44 = vsel %vm327_vm0, %v3024_v40, %v3139_v42  ;;  %v3220_v47 = vsel %vm327_vm0, %v3027_v43, %v3145_v45  ;;  %v3444_v40 = vld [vmem:[#allocation3 + $0x111] sm:$0xff]  ;;  %v3446_v42 = vld [vmem:[#allocation3 + $0x129] sm:$0xff] }
 0x4b4   : > { %3298 = vrot.lane.b32.xlu1 %v3217_v44, %s6998_s22  ;;  %3304 = vrot.lane.b32.xlu0 %v3220_v47, %s6998_s22  ;;  %v3449_v43 = vld [vmem:[#allocation3 + $0x151] sm:$0xff]  ;;  %v3448_v44 = vld [vmem:[#allocation3 + $0x141] sm:$0xff]  ;;  %v3451_v45 = vld [vmem:[#allocation3 + $0x169] sm:$0xff] }
 0x4b5   : > { %v3450_v47 = vld [vmem:[#allocation3 + $0x159] sm:$0xff] }
 0x4b6   : > { %v3143_v48 = vpop.permute.xlu1 %3142  ;;  %v3149_v51 = vpop.permute.xlu0 %3148 }
 0x4b7   : > { %v3219_v50 = vsel %vm327_vm0, %v3026_v46, %v3143_v48  ;;  %v3222_v53 = vsel %vm327_vm0, %v3029_v49, %v3149_v51  ;;  %v3453_v48 = vld [vmem:[#allocation3 + $0x181] sm:$0xff] }
 0x4b8   : > { %3302 = vrot.lane.b32.xlu1 %v3219_v50, %s6998_s22  ;;  %3308 = vrot.lane.b32.xlu0 %v3222_v53, %s6998_s22  ;;  %v3452_v50 = vld [vmem:[#allocation3 + $0x171] sm:$0xff] }
 0x4ba   : > { %v3147_v54 = vpop.permute.xlu1 %3146  ;;  %v3153_v57 = vpop.permute.xlu0 %3152 }
 0x4bb   : > { %v3221_v56 = vsel %vm327_vm0, %v3028_v52, %v3147_v54  ;;  %v3224_v59 = vsel %vm327_vm0, %v3031_v55, %v3153_v57  ;;  %v3455_v52 = vld [vmem:[#allocation3 + $0x199] sm:$0xff]  ;;  %v3454_v54 = vld [vmem:[#allocation3 + $0x189] sm:$0xff]  ;;  %v3456_v57 = vld [vmem:[#allocation3 + $0x1a1] sm:$0xff] }
 0x4bc   : > { %3306 = vrot.lane.b32.xlu1 %v3221_v56, %s6998_s22  ;;  %3312 = vrot.lane.b32.xlu0 %v3224_v59, %s6998_s22 }
 0x4be   : > { %v3151_v60 = vpop.permute.xlu1 %3150  ;;  %v3157_v63 = vpop.permute.xlu0 %3156 }
 0x4bf   : > { %v3223_v62 = vsel %vm327_vm0, %v3030_v58, %v3151_v60  ;;  %v3226_v2 = vsel %vm327_vm0, %v3033_v61, %v3157_v63 }
 0x4c0   : > { %3310 = vrot.lane.b32.xlu1 %v3223_v62, %s6998_s22  ;;  %3316 = vrot.lane.b32.xlu0 %v3226_v2, %s6998_s22 }
 0x4c2   : > { %v3155_v3 = vpop.permute.xlu1 %3154  ;;  %v3161_v6 = vpop.permute.xlu0 %3160 }
 0x4c3   : > { %v3225_v5 = vsel %vm327_vm0, %v3032_v1, %v3155_v3  ;;  %v3228_v8 = vsel %vm327_vm0, %v3035_v4, %v3161_v6 }
 0x4c4   : > { %3314 = vrot.lane.b32.xlu1 %v3225_v5, %s6998_s22  ;;  %3320 = vrot.lane.b32.xlu0 %v3228_v8, %s6998_s22 }
 0x4c6   : > { %v3159_v9 = vpop.permute.xlu1 %3158  ;;  %v3165_v12 = vpop.permute.xlu0 %3164 }
 0x4c7   : > { %v3227_v11 = vsel %vm327_vm0, %v3034_v7, %v3159_v9  ;;  %v3230_v14 = vsel %vm327_vm0, %v3037_v10, %v3165_v12 }
 0x4c8   : > { %3318 = vrot.lane.b32.xlu1 %v3227_v11, %s6998_s22  ;;  %3324 = vrot.lane.b32.xlu0 %v3230_v14, %s6998_s22 }
 0x4ca   : > { %v3163_v15 = vpop.permute.xlu1 %3162 }
 0x4cb   : > { %v3229_v16 = vsel %vm327_vm0, %v3036_v13, %v3163_v15 }
 0x4cc   : > { %3322 = vrot.lane.b32.xlu1 %v3229_v16, %s6998_s22  ;;  %3489 = vrot.lane.b32.xlu0 %v3425_v17, %s6992_s12 }
 0x4ce   : > { %v3167_v19 = vpop.permute.xlu1 %3166 }
 0x4cf   : > { %v3231_v20 = vsel %vm327_vm0, %v3038_v18, %v3167_v19 }
 0x4d0   : > { %3326 = vrot.lane.b32.xlu1 %v3231_v20, %s6998_s22  ;;  %3493 = vrot.lane.b32.xlu0 %v3427_v21, %s6992_s12  ;;  %v3393_v20 = vld [vmem:[#allocation2 + $0x31] sm:$0xff] }
 0x4d4   : > { %3491 = vrot.lane.b32.xlu1 %v3426_v22, %s6992_s12  ;;  %3497 = vrot.lane.b32.xlu0 %v3429_v23, %s6992_s12 }
 0x4d8   : > { %3495 = vrot.lane.b32.xlu1 %v3428_v24, %s6992_s12  ;;  %3501 = vrot.lane.b32.xlu0 %v3431_v25, %s6992_s12  ;;  %v3395_v24 = vld [vmem:[#allocation2 + $0x49] sm:$0xff] }
 0x4dc   : > { %3499 = vrot.lane.b32.xlu1 %v3430_v26, %s6992_s12  ;;  %3505 = vrot.lane.b32.xlu0 %v3433_v27, %s6992_s12  ;;  %v3394_v26 = vld [vmem:[#allocation2 + $0x39] sm:$0xff] }
 0x4e0   : > { %3503 = vrot.lane.b32.xlu1 %v3432_v28, %s6992_s12  ;;  %3509 = vrot.lane.b32.xlu0 %v3435_v29, %s6992_s12  ;;  %v3397_v29 = vld [vmem:[#allocation2 + $0x61] sm:$0xff] }
 0x4e4   : > { %3507 = vrot.lane.b32.xlu1 %v3434_v30, %s6992_s12  ;;  %3513 = vrot.lane.b32.xlu0 %v3437_v31, %s6992_s12 }
 0x4e8   : > { %3511 = vrot.lane.b32.xlu1 %v3436_v32, %s6992_s12  ;;  %3517 = vrot.lane.b32.xlu0 %v3439_v33, %s6992_s12  ;;  %v3396_v32 = vld [vmem:[#allocation2 + $0x51] sm:$0xff] }
 0x4ec   : > { %3515 = vrot.lane.b32.xlu1 %v3438_v34, %s6992_s12  ;;  %3521 = vrot.lane.b32.xlu0 %v3441_v35, %s6992_s12  ;;  %v3399_v35 = vld [vmem:[#allocation2 + $0x79] sm:$0xff] }
 0x4f0   : > { %3519 = vrot.lane.b32.xlu1 %v3440_v36, %s6992_s12  ;;  %3525 = vrot.lane.b32.xlu0 %v3443_v37, %s6992_s12 }
 0x4f4   : > { %3523 = vrot.lane.b32.xlu1 %v3442_v38, %s6992_s12  ;;  %3529 = vrot.lane.b32.xlu0 %v3445_v39, %s6992_s12  ;;  %v3398_v38 = vld [vmem:[#allocation2 + $0x69] sm:$0xff] }
 0x4f8   : > { %3527 = vrot.lane.b32.xlu1 %v3444_v40, %s6992_s12  ;;  %3533 = vrot.lane.b32.xlu0 %v3447_v41, %s6992_s12  ;;  %v3401_v41 = vld [vmem:[#allocation2 + $0x91] sm:$0xff] }
 0x4fc   : > { %3531 = vrot.lane.b32.xlu1 %v3446_v42, %s6992_s12  ;;  %3537 = vrot.lane.b32.xlu0 %v3449_v43, %s6992_s12 }
 0x4fe   : > { %v3265_v46 = vpop.permute.xlu0 %3264 }
 0x4ff   : > { %3361 = vst.msk [vmem:[#allocation5] sm:$0xff] %vm3360_vm9, %v3265_v46 }
 0x500   : > { %3535 = vrot.lane.b32.xlu1 %v3448_v44, %s6992_s12  ;;  %3541 = vrot.lane.b32.xlu0 %v3451_v45, %s6992_s12  ;;  %v3400_v44 = vld [vmem:[#allocation2 + $0x81] sm:$0xff] }
 0x502   : > { %v3269_v49 = vpop.permute.xlu0 %3268 }
 0x503   : > { %3363 = vst.msk [vmem:[#allocation5 + $0x10] sm:$0xff] %vm3360_vm9, %v3269_v49 }
 0x504   : > { %3539 = vrot.lane.b32.xlu1 %v3450_v47, %s6992_s12  ;;  %3545 = vrot.lane.b32.xlu0 %v3453_v48, %s6992_s12  ;;  %v3403_v47 = vld [vmem:[#allocation2 + $0xa9] sm:$0xff] }
 0x506   : > { %v3267_v51 = vpop.permute.xlu1 %3266  ;;  %v3273_v53 = vpop.permute.xlu0 %3272 }
 0x507   : > { %3362 = vst.msk [vmem:[#allocation5 + $0x8] sm:$0xff] %vm3360_vm9, %v3267_v51  ;;  %3365 = vst.msk [vmem:[#allocation5 + $0x20] sm:$0xff] %vm3360_vm9, %v3273_v53 }
 0x508   : > { %3543 = vrot.lane.b32.xlu1 %v3452_v50, %s6992_s12  ;;  %3549 = vrot.lane.b32.xlu0 %v3455_v52, %s6992_s12  ;;  %v3402_v50 = vld [vmem:[#allocation2 + $0x99] sm:$0xff] }
 0x50a   : > { %v3271_v55 = vpop.permute.xlu1 %3270  ;;  %v3277_v56 = vpop.permute.xlu0 %3276 }
 0x50b   : > { %3364 = vst.msk [vmem:[#allocation5 + $0x18] sm:$0xff] %vm3360_vm9, %v3271_v55  ;;  %3367 = vst.msk [vmem:[#allocation5 + $0x30] sm:$0xff] %vm3360_vm9, %v3277_v56  ;;  %v3404_v55 = vld [vmem:[#allocation2 + $0xb1] sm:$0xff] }
 0x50c   : > { %3547 = vrot.lane.b32.xlu1 %v3454_v54, %s6992_s12  ;;  %v3810_v54 = vld [vmem:[#allocation3 + $0x32] sm:$0xff] }
 0x50e   : > { %v3275_v58 = vpop.permute.xlu1 %3274  ;;  %v3281_v59 = vpop.permute.xlu0 %3280 }
 0x50f   : > { %3366 = vst.msk [vmem:[#allocation5 + $0x28] sm:$0xff] %vm3360_vm9, %v3275_v58  ;;  %3369 = vst.msk [vmem:[#allocation5 + $0x40] sm:$0xff] %vm3360_vm9, %v3281_v59  ;;  %v3812_v58 = vld [vmem:[#allocation3 + $0x4a] sm:$0xff]  ;;  %v3811_v59 = vld [vmem:[#allocation3 + $0x3a] sm:$0xff] }
 0x510   : > { %3551 = vrot.lane.b32.xlu1 %v3456_v57, %s6992_s12 }
 0x512   : > { %v3279_v60 = vpop.permute.xlu1 %3278  ;;  %v3285_v61 = vpop.permute.xlu0 %3284 }
 0x513   : > { %3368 = vst.msk [vmem:[#allocation5 + $0x38] sm:$0xff] %vm3360_vm9, %v3279_v60  ;;  %3371 = vst.msk [vmem:[#allocation5 + $0x50] sm:$0xff] %vm3360_vm9, %v3285_v61  ;;  %v3814_v60 = vld [vmem:[#allocation3 + $0x62] sm:$0xff]  ;;  %v3813_v61 = vld [vmem:[#allocation3 + $0x52] sm:$0xff] }
 0x516   : > { %v3283_v62 = vpop.permute.xlu1 %3282  ;;  %v3289_v63 = vpop.permute.xlu0 %3288 }
 0x517   : > { %3370 = vst.msk [vmem:[#allocation5 + $0x48] sm:$0xff] %vm3360_vm9, %v3283_v62  ;;  %3373 = vst.msk [vmem:[#allocation5 + $0x60] sm:$0xff] %vm3360_vm9, %v3289_v63  ;;  %v3816_v62 = vld [vmem:[#allocation3 + $0x7a] sm:$0xff]  ;;  %v3815_v63 = vld [vmem:[#allocation3 + $0x6a] sm:$0xff] }
 0x51a   : > { %v3287_v1 = vpop.permute.xlu1 %3286  ;;  %v3293_v2 = vpop.permute.xlu0 %3292 }
 0x51b   : > { %3372 = vst.msk [vmem:[#allocation5 + $0x58] sm:$0xff] %vm3360_vm9, %v3287_v1  ;;  %3375 = vst.msk [vmem:[#allocation5 + $0x70] sm:$0xff] %vm3360_vm9, %v3293_v2  ;;  %v3818_v1 = vld [vmem:[#allocation3 + $0x92] sm:$0xff]  ;;  %v3817_v2 = vld [vmem:[#allocation3 + $0x82] sm:$0xff] }
 0x51e   : > { %v3291_v3 = vpop.permute.xlu1 %3290  ;;  %v3297_v4 = vpop.permute.xlu0 %3296 }
 0x51f   : > { %3374 = vst.msk [vmem:[#allocation5 + $0x68] sm:$0xff] %vm3360_vm9, %v3291_v3  ;;  %3377 = vst.msk [vmem:[#allocation5 + $0x80] sm:$0xff] %vm3360_vm9, %v3297_v4  ;;  %v3820_v3 = vld [vmem:[#allocation3 + $0xaa] sm:$0xff]  ;;  %v3819_v4 = vld [vmem:[#allocation3 + $0x9a] sm:$0xff] }
 0x522   : > { %v3295_v5 = vpop.permute.xlu1 %3294  ;;  %v3301_v6 = vpop.permute.xlu0 %3300 }
 0x523   : > { %3376 = vst.msk [vmem:[#allocation5 + $0x78] sm:$0xff] %vm3360_vm9, %v3295_v5  ;;  %3379 = vst.msk [vmem:[#allocation5 + $0x90] sm:$0xff] %vm3360_vm9, %v3301_v6  ;;  %v3822_v5 = vld [vmem:[#allocation3 + $0xc2] sm:$0xff]  ;;  %v3821_v6 = vld [vmem:[#allocation3 + $0xb2] sm:$0xff] }
 0x526   : > { %v3299_v7 = vpop.permute.xlu1 %3298  ;;  %v3305_v8 = vpop.permute.xlu0 %3304 }
 0x527   : > { %3378 = vst.msk [vmem:[#allocation5 + $0x88] sm:$0xff] %vm3360_vm9, %v3299_v7  ;;  %3381 = vst.msk [vmem:[#allocation5 + $0xa0] sm:$0xff] %vm3360_vm9, %v3305_v8  ;;  %v3824_v7 = vld [vmem:[#allocation3 + $0xda] sm:$0xff]  ;;  %v3823_v8 = vld [vmem:[#allocation3 + $0xca] sm:$0xff] }
 0x52a   : > { %v3303_v9 = vpop.permute.xlu1 %3302  ;;  %v3309_v10 = vpop.permute.xlu0 %3308 }
 0x52b   : > { %3380 = vst.msk [vmem:[#allocation5 + $0x98] sm:$0xff] %vm3360_vm9, %v3303_v9  ;;  %3383 = vst.msk [vmem:[#allocation5 + $0xb0] sm:$0xff] %vm3360_vm9, %v3309_v10  ;;  %v3826_v9 = vld [vmem:[#allocation3 + $0xf2] sm:$0xff] }
 0x52e   : > { %v3307_v11 = vpop.permute.xlu1 %3306  ;;  %v3313_v12 = vpop.permute.xlu0 %3312 }
 0x52f   : > { %3382 = vst.msk [vmem:[#allocation5 + $0xa8] sm:$0xff] %vm3360_vm9, %v3307_v11  ;;  %3385 = vst.msk [vmem:[#allocation5 + $0xc0] sm:$0xff] %vm3360_vm9, %v3313_v12  ;;  %v3825_v11 = vld [vmem:[#allocation3 + $0xe2] sm:$0xff]  ;;  %v3828_v12 = vld [vmem:[#allocation3 + $0x10a] sm:$0xff] }
 0x532   : > { %v3311_v13 = vpop.permute.xlu1 %3310  ;;  %v3317_v14 = vpop.permute.xlu0 %3316 }
 0x533   : > { %3384 = vst.msk [vmem:[#allocation5 + $0xb8] sm:$0xff] %vm3360_vm9, %v3311_v13  ;;  %3387 = vst.msk [vmem:[#allocation5 + $0xd0] sm:$0xff] %vm3360_vm9, %v3317_v14  ;;  %v3827_v13 = vld [vmem:[#allocation3 + $0xfa] sm:$0xff] }
 0x536   : > { %v3315_v15 = vpop.permute.xlu1 %3314  ;;  %v3321_v16 = vpop.permute.xlu0 %3320 }
 0x537   : > { %3386 = vst.msk [vmem:[#allocation5 + $0xc8] sm:$0xff] %vm3360_vm9, %v3315_v15  ;;  %3389 = vst.msk [vmem:[#allocation5 + $0xe0] sm:$0xff] %vm3360_vm9, %v3321_v16  ;;  %v3830_v16 = vld [vmem:[#allocation3 + $0x122] sm:$0xff] }
 0x53a   : > { %v3319_v17 = vpop.permute.xlu1 %3318  ;;  %v3325_v18 = vpop.permute.xlu0 %3324 }
 0x53b   : > { %3388 = vst.msk [vmem:[#allocation5 + $0xd8] sm:$0xff] %vm3360_vm9, %v3319_v17  ;;  %3391 = vst.msk [vmem:[#allocation5 + $0xf0] sm:$0xff] %vm3360_vm9, %v3325_v18  ;;  %v3829_v17 = vld [vmem:[#allocation3 + $0x112] sm:$0xff]  ;;  %v3832_v18 = vld [vmem:[#allocation3 + $0x13a] sm:$0xff] }
 0x53e   : > { %v3323_v19 = vpop.permute.xlu1 %3322  ;;  %v3490_v21 = vpop.permute.xlu0 %3489 }
 0x53f   : > { %3390 = vst.msk [vmem:[#allocation5 + $0xe8] sm:$0xff] %vm3360_vm9, %v3323_v19  ;;  %v3585_v22 = vsel %vm327_vm0, %v3393_v20, %v3490_v21  ;;  %v3831_v21 = vld [vmem:[#allocation3 + $0x12a] sm:$0xff] }
 0x540   : > { %3649 = vrot.lane.b32.xlu0 %v3585_v22, %s6999_s23  ;;  %v3834_v22 = vld [vmem:[#allocation3 + $0x152] sm:$0xff] }
 0x542   : > { %v3327_v23 = vpop.permute.xlu1 %3326  ;;  %v3494_v25 = vpop.permute.xlu0 %3493 }
 0x543   : > { %3392 = vst.msk [vmem:[#allocation5 + $0xf8] sm:$0xff] %vm3360_vm9, %v3327_v23  ;;  %v3587_v27 = vsel %vm327_vm0, %v3395_v24, %v3494_v25  ;;  %v3833_v23 = vld [vmem:[#allocation3 + $0x142] sm:$0xff] }
 0x544   : > { %3653 = vrot.lane.b32.xlu0 %v3587_v27, %s6999_s23  ;;  %v3835_v27 = vld [vmem:[#allocation3 + $0x15a] sm:$0xff] }
 0x546   : > { %v3492_v28 = vpop.permute.xlu1 %3491  ;;  %v3498_v31 = vpop.permute.xlu0 %3497 }
 0x547   : > { %v3586_v30 = vsel %vm327_vm0, %v3394_v26, %v3492_v28  ;;  %v3589_v33 = vsel %vm327_vm0, %v3397_v29, %v3498_v31  ;;  %v3836_v26 = vld [vmem:[#allocation3 + $0x16a] sm:$0xff]  ;;  %v3838_v28 = vld [vmem:[#allocation3 + $0x182] sm:$0xff]  ;;  %v3837_v31 = vld [vmem:[#allocation3 + $0x172] sm:$0xff] }
 0x548   : > { %3651 = vrot.lane.b32.xlu1 %v3586_v30, %s6999_s23  ;;  %3657 = vrot.lane.b32.xlu0 %v3589_v33, %s6999_s23  ;;  %v3839_v33 = vld [vmem:[#allocation3 + $0x18a] sm:$0xff] }
 0x54a   : > { %v3496_v34 = vpop.permute.xlu1 %3495  ;;  %v3502_v37 = vpop.permute.xlu0 %3501 }
 0x54b   : > { %v3588_v36 = vsel %vm327_vm0, %v3396_v32, %v3496_v34  ;;  %v3591_v39 = vsel %vm327_vm0, %v3399_v35, %v3502_v37  ;;  %v3840_v32 = vld [vmem:[#allocation3 + $0x19a] sm:$0xff] }
 0x54c   : > { %3655 = vrot.lane.b32.xlu1 %v3588_v36, %s6999_s23  ;;  %3661 = vrot.lane.b32.xlu0 %v3591_v39, %s6999_s23  ;;  %v3841_v36 = vld [vmem:[#allocation3 + $0x1a2] sm:$0xff] }
 0x54e   : > { %v3500_v40 = vpop.permute.xlu1 %3499  ;;  %v3506_v43 = vpop.permute.xlu0 %3505 }
 0x54f   : > { %v3590_v42 = vsel %vm327_vm0, %v3398_v38, %v3500_v40  ;;  %v3593_v45 = vsel %vm327_vm0, %v3401_v41, %v3506_v43 }
 0x550   : > { %3659 = vrot.lane.b32.xlu1 %v3590_v42, %s6999_s23  ;;  %3665 = vrot.lane.b32.xlu0 %v3593_v45, %s6999_s23 }
 0x552   : > { %v3504_v46 = vpop.permute.xlu1 %3503  ;;  %v3510_v49 = vpop.permute.xlu0 %3509 }
 0x553   : > { %v3592_v48 = vsel %vm327_vm0, %v3400_v44, %v3504_v46  ;;  %v3595_v51 = vsel %vm327_vm0, %v3403_v47, %v3510_v49 }
 0x554   : > { %3663 = vrot.lane.b32.xlu1 %v3592_v48, %s6999_s23  ;;  %3669 = vrot.lane.b32.xlu0 %v3595_v51, %s6999_s23  ;;  %v6973_v51 = vld [vmem:[%s10026_s2 + $0x20] ss:$0 sps:$4 sm:$0xff]  }
 0x555   : > { %6953 = vmatprep.subr.msk.bf16.mxu0 %vm4296_vm11, %v6973_v51 }
 0x556   : > { %v3508_v52 = vpop.permute.xlu1 %3507  ;;  %v8633_v10 = vpop.permute.xlu0 %3513 }
 0x557   : > { %v3594_v53 = vsel %vm327_vm0, %v3402_v50, %v3508_v52 }
 0x558   : > { %3667 = vrot.lane.b32.xlu1 %v3594_v53, %s6999_s23  ;;  %3874 = vrot.lane.b32.xlu0 %v3810_v54, %s6992_s12  ;;  %v4298_v53 = vsel %vm4296_vm11, %v6973_v51, 0 }
 0x559   : > { %6870 = vmatpush3.bf16.msra.mxu0 %v4298_v53 }
 0x55a   : > { %v3512_v56 = vpop.permute.xlu1 %3511  ;;  %v8638_v14 = vpop.permute.xlu0 %3517 }
 0x55b   : > { %v3596_v57 = vsel %vm327_vm0, %v3404_v55, %v3512_v56  ;;  %v6974_v55 = vld [vmem:[%s10026_s2 + $0x18] sm:$0xff]  }
 0x55c   : > { %3671 = vrot.lane.b32.xlu1 %v3596_v57, %s6999_s23  ;;  %3878 = vrot.lane.b32.xlu0 %v3812_v58, %s6992_s12  ;;  %v6975_v58 = vld [vmem:[%s10026_s2 + $0x10] sm:$0xff]  }
 0x55d   : > { %6871 = vmatprep.subr.bf16.mxu0 %v6974_v55 }
 0x55e   : > { %v8640_v15 = vpop.permute.xlu1 %3515  ;;  %v8645_v19 = vpop.permute.xlu0 %3521  ;;  %6872 = vmatpush3.bf16.msra.mxu0 %v6974_v55  ;;  %v3789_v55 = vld [vmem:[#allocation2 + $0xb2] sm:$0xff] }
 0x55f   : > { %6873 = vmatprep.subr.bf16.mxu0 %v6975_v58 }
 0x560   : > { %3876 = vrot.lane.b32.xlu1 %v3811_v59, %s6992_s12  ;;  %3882 = vrot.lane.b32.xlu0 %v3814_v60, %s6992_s12 }
 0x562   : > { %v8647_v20 = vpop.permute.xlu1 %3519  ;;  %v8651_v24 = vpop.permute.xlu0 %3525  ;;  %6874 = vmatpush3.bf16.msra.mxu0 %v6975_v58 }
 0x564   : > { %3880 = vrot.lane.b32.xlu1 %v3813_v61, %s6992_s12  ;;  %3886 = vrot.lane.b32.xlu0 %v3816_v62, %s6992_s12  ;;  %v3778_v61 = vld [vmem:[#allocation2 + $0x32] sm:$0xff]  ;;  %v6976_v62 = vld [vmem:[%s10026_s2 + $0x8] sm:$0xff]  }
 0x565   : > { %6875 = vmatprep.subr.bf16.mxu0 %v6976_v62 }
 0x566   : > { %v8653_v25 = vpop.permute.xlu1 %3523  ;;  %v8658_v29 = vpop.permute.xlu0 %3529  ;;  %6876 = vmatpush3.bf16.msra.mxu0 %v6976_v62  ;;  %v3790_v62 = vld [vmem:[#allocation2 + $0xc2] sm:$0xff] }
 0x568   : > { %3884 = vrot.lane.b32.xlu1 %v3815_v63, %s6992_s12  ;;  %3890 = vrot.lane.b32.xlu0 %v3818_v1, %s6992_s12 }
 0x56a   : > { %v8660_v30 = vpop.permute.xlu1 %3527  ;;  %v8665_v34 = vpop.permute.xlu0 %3533 }
 0x56c   : > { %3888 = vrot.lane.b32.xlu1 %v3817_v2, %s6992_s12  ;;  %3894 = vrot.lane.b32.xlu0 %v3820_v3, %s6992_s12  ;;  %v3780_v3 = vld [vmem:[#allocation2 + $0x4a] sm:$0xff] }
 0x56e   : > { %v8667_v35 = vpop.permute.xlu1 %3531  ;;  %v8671_v37 = vpop.permute.xlu0 %3537 }
 0x570   : > { %3892 = vrot.lane.b32.xlu1 %v3819_v4, %s6992_s12  ;;  %3898 = vrot.lane.b32.xlu0 %v3822_v5, %s6992_s12  ;;  %v6977_v4 = vld [vmem:[%s10026_s2] sm:$0xff]  }
 0x571   : > { %6877 = vmatprep.subr.bf16.mxu0 %v6977_v4 }
 0x572   : > { %v8673_v38 = vpop.permute.xlu1 %3535  ;;  %v8676_v39 = vpop.permute.xlu0 %3541  ;;  %6878 = vmatpush3.bf16.msra.mxu0 %v6977_v4 }
 0x574   : > { %3896 = vrot.lane.b32.xlu1 %v3821_v6, %s6992_s12  ;;  %3902 = vrot.lane.b32.xlu0 %v3824_v7, %s6992_s12  ;;  %v3779_v6 = vld [vmem:[#allocation2 + $0x3a] sm:$0xff] }
 0x576   : > { %v8678_v40 = vpop.permute.xlu1 %3539  ;;  %v8680_v41 = vpop.permute.xlu0 %3545 }
 0x578   : > { %3900 = vrot.lane.b32.xlu1 %v3823_v8, %s6992_s12  ;;  %3906 = vrot.lane.b32.xlu0 %v3826_v9, %s6992_s12  ;;  %v3782_v9 = vld [vmem:[#allocation2 + $0x62] sm:$0xff] }
 0x57a   : > { %v8682_v42 = vpop.permute.xlu1 %3543  ;;  %v8684_v43 = vpop.permute.xlu0 %3549 }
 0x57c   : > { %3904 = vrot.lane.b32.xlu1 %v3825_v11, %s6992_s12  ;;  %3910 = vrot.lane.b32.xlu0 %v3828_v12, %s6992_s12 }
 0x57e   : > { %v8686_v44 = vpop.permute.xlu1 %3547 }
 0x580   : > { %3908 = vrot.lane.b32.xlu1 %v3827_v13, %s6992_s12  ;;  %3914 = vrot.lane.b32.xlu0 %v3830_v16, %s6992_s12  ;;  %v3781_v13 = vld [vmem:[#allocation2 + $0x52] sm:$0xff] }
 0x582   : > { %v8688_v46 = vpop.permute.xlu1 %3551 }
 0x584   : > { %3912 = vrot.lane.b32.xlu1 %v3829_v17, %s6992_s12  ;;  %3918 = vrot.lane.b32.xlu0 %v3832_v18, %s6992_s12  ;;  %v3784_v18 = vld [vmem:[#allocation2 + $0x7a] sm:$0xff] }
 0x588   : > { %3916 = vrot.lane.b32.xlu1 %v3831_v21, %s6992_s12  ;;  %3922 = vrot.lane.b32.xlu0 %v3834_v22, %s6992_s12 }
 0x58c   : > { %3920 = vrot.lane.b32.xlu1 %v3833_v23, %s6992_s12  ;;  %3926 = vrot.lane.b32.xlu0 %v3836_v26, %s6992_s12  ;;  %v3783_v23 = vld [vmem:[#allocation2 + $0x6a] sm:$0xff] }
 0x590   : > { %3924 = vrot.lane.b32.xlu1 %v3835_v27, %s6992_s12  ;;  %3930 = vrot.lane.b32.xlu0 %v3838_v28, %s6992_s12  ;;  %v3786_v28 = vld [vmem:[#allocation2 + $0x92] sm:$0xff] }
 0x594   : > { %3928 = vrot.lane.b32.xlu1 %v3837_v31, %s6992_s12  ;;  %3934 = vrot.lane.b32.xlu0 %v3840_v32, %s6992_s12 }
 0x598   : > { %3932 = vrot.lane.b32.xlu1 %v3839_v33, %s6992_s12  ;;  %v3785_v33 = vld [vmem:[#allocation2 + $0x82] sm:$0xff] }
 0x59c   : > { %3936 = vrot.lane.b32.xlu1 %v3841_v36, %s6992_s12 }
 0x5b2   : > { %v3650_v45 = vpop.permute.xlu0 %3649 }
 0x5b3   : > { %3746 = vst.msk [vmem:[#allocation5] sm:$0xff] %vm3745_vm10, %v3650_v45 }
 0x5b6   : > { %v3654_v47 = vpop.permute.xlu0 %3653 }
 0x5b7   : > { %3748 = vst.msk [vmem:[#allocation5 + $0x10] sm:$0xff] %vm3745_vm10, %v3654_v47  ;;  %v3788_v47 = vld [vmem:[#allocation2 + $0xaa] sm:$0xff] }
 0x5ba   : > { %v3652_v48 = vpop.permute.xlu1 %3651  ;;  %v3658_v49 = vpop.permute.xlu0 %3657 }
 0x5bb   : > { %3747 = vst.msk [vmem:[#allocation5 + $0x8] sm:$0xff] %vm3745_vm10, %v3652_v48  ;;  %3750 = vst.msk [vmem:[#allocation5 + $0x20] sm:$0xff] %vm3745_vm10, %v3658_v49 }
 0x5be   : > { %v3656_v50 = vpop.permute.xlu1 %3655  ;;  %v3662_v52 = vpop.permute.xlu0 %3661 }
 0x5bf   : > { %3749 = vst.msk [vmem:[#allocation5 + $0x18] sm:$0xff] %vm3745_vm10, %v3656_v50  ;;  %3752 = vst.msk [vmem:[#allocation5 + $0x30] sm:$0xff] %vm3745_vm10, %v3662_v52  ;;  %v3787_v50 = vld [vmem:[#allocation2 + $0x9a] sm:$0xff] }
 0x5c0   : > { %v3405_v52 = vld [vmem:[#allocation2 + $0xc1] sm:$0xff] }
 0x5c2   : > { %v3660_v54 = vpop.permute.xlu1 %3659  ;;  %v3666_v56 = vpop.permute.xlu0 %3665 }
 0x5c3   : > { %3751 = vst.msk [vmem:[#allocation5 + $0x28] sm:$0xff] %vm3745_vm10, %v3660_v54  ;;  %3754 = vst.msk [vmem:[#allocation5 + $0x40] sm:$0xff] %vm3745_vm10, %v3666_v56  ;;  %v3597_v56 = vsel %vm327_vm0, %v3405_v52, %v8633_v10 }
 0x5c6   : > { %v3664_v57 = vpop.permute.xlu1 %3663  ;;  %v3670_v59 = vpop.permute.xlu0 %3669 }
 0x5c7   : > { %3753 = vst.msk [vmem:[#allocation5 + $0x38] sm:$0xff] %vm3745_vm10, %v3664_v57  ;;  %3756 = vst.msk [vmem:[#allocation5 + $0x50] sm:$0xff] %vm3745_vm10, %v3670_v59  ;;  %v3407_v57 = vld [vmem:[#allocation2 + $0xd9] sm:$0xff] }
 0x5ca   : > { %v3668_v60 = vpop.permute.xlu1 %3667  ;;  %v3875_v63 = vpop.permute.xlu0 %3874 }
 0x5cb   : > { %3755 = vst.msk [vmem:[#allocation5 + $0x48] sm:$0xff] %vm3745_vm10, %v3668_v60  ;;  %v3970_v1 = vsel %vm327_vm0, %v3778_v61, %v3875_v63  ;;  %v3406_v61 = vld [vmem:[#allocation2 + $0xc9] sm:$0xff]  ;;  %v3599_v63 = vsel %vm327_vm0, %v3407_v57, %v8638_v14 }
 0x5cc   : > { %4034 = vrot.lane.b32.xlu0 %v3970_v1, %s7000_s13  ;;  %v3598_v1 = vsel %vm327_vm0, %v3406_v61, %v8640_v15  ;;  %v3801_v61 = vld [vmem:[#allocation2 + $0x142] sm:$0xff] }
 0x5ce   : > { %v3672_v2 = vpop.permute.xlu1 %3671  ;;  %v3879_v5 = vpop.permute.xlu0 %3878 }
 0x5cf   : > { %3757 = vst.msk [vmem:[#allocation5 + $0x58] sm:$0xff] %vm3745_vm10, %v3672_v2  ;;  %v3972_v7 = vsel %vm327_vm0, %v3780_v3, %v3879_v5  ;;  %v3408_v2 = vld [vmem:[#allocation2 + $0xe1] sm:$0xff] }
 0x5d0   : > { %4038 = vrot.lane.b32.xlu0 %v3972_v7, %s7000_s13  ;;  %v3792_v3 = vld [vmem:[#allocation2 + $0xda] sm:$0xff]  ;;  %v3600_v7 = vsel %vm327_vm0, %v3408_v2, %v8647_v20 }
 0x5d1   : > { %v3418_v2 = vld [vmem:[#allocation2 + $0x159] sm:$0xff] }
 0x5d2   : > { %v3877_v8 = vpop.permute.xlu1 %3876  ;;  %v3883_v12 = vpop.permute.xlu0 %3882 }
 0x5d3   : > { %v3971_v11 = vsel %vm327_vm0, %v3779_v6, %v3877_v8  ;;  %v3974_v16 = vsel %vm327_vm0, %v3782_v9, %v3883_v12  ;;  %v3791_v6 = vld [vmem:[#allocation2 + $0xca] sm:$0xff]  ;;  %v3793_v9 = vld [vmem:[#allocation2 + $0xe2] sm:$0xff] }
 0x5d4   : > { %4036 = vrot.lane.b32.xlu1 %v3971_v11, %s7000_s13  ;;  %4042 = vrot.lane.b32.xlu0 %v3974_v16, %s7000_s13  ;;  %v3409_v8 = vld [vmem:[#allocation2 + $0xf1] sm:$0xff]  ;;  %v3411_v16 = vld [vmem:[#allocation2 + $0x109] sm:$0xff] }
 0x5d5   : > { %v3601_v12 = vsel %vm327_vm0, %v3409_v8, %v8645_v19  ;;  %v3803_v8 = vld [vmem:[#allocation2 + $0x15a] sm:$0xff] }
 0x5d6   : > { %v3881_v17 = vpop.permute.xlu1 %3880  ;;  %v3887_v22 = vpop.permute.xlu0 %3886 }
 0x5d7   : > { %v3973_v21 = vsel %vm327_vm0, %v3781_v13, %v3881_v17  ;;  %v3976_v26 = vsel %vm327_vm0, %v3784_v18, %v3887_v22  ;;  %v3410_v17 = vld [vmem:[#allocation2 + $0xf9] sm:$0xff] }
 0x5d8   : > { %4040 = vrot.lane.b32.xlu1 %v3973_v21, %s7000_s13  ;;  %4046 = vrot.lane.b32.xlu0 %v3976_v26, %s7000_s13  ;;  %v3794_v18 = vld [vmem:[#allocation2 + $0xf2] sm:$0xff]  ;;  %v3603_v21 = vsel %vm327_vm0, %v3411_v16, %v8651_v24  ;;  %v3602_v22 = vsel %vm327_vm0, %v3410_v17, %v8653_v25  ;;  %v3796_v26 = vld [vmem:[#allocation2 + $0x10a] sm:$0xff] }
 0x5d9   : > { %v3423_v17 = vld [vmem:[#allocation2 + $0x199] sm:$0xff] }
 0x5da   : > { %v3885_v27 = vpop.permute.xlu1 %3884  ;;  %v3891_v32 = vpop.permute.xlu0 %3890 }
 0x5db   : > { %v3975_v31 = vsel %vm327_vm0, %v3783_v23, %v3885_v27  ;;  %v3978_v36 = vsel %vm327_vm0, %v3786_v28, %v3891_v32  ;;  %v3412_v23 = vld [vmem:[#allocation2 + $0x111] sm:$0xff] }
 0x5dc   : > { %4044 = vrot.lane.b32.xlu1 %v3975_v31, %s7000_s13  ;;  %4050 = vrot.lane.b32.xlu0 %v3978_v36, %s7000_s13  ;;  %v3795_v31 = vld [vmem:[#allocation2 + $0xfa] sm:$0xff]  ;;  %v3604_v32 = vsel %vm327_vm0, %v3412_v23, %v8660_v30  ;;  %v3797_v36 = vld [vmem:[#allocation2 + $0x112] sm:$0xff] }
 0x5dd   : > { %v3424_v23 = vld [vmem:[#allocation2 + $0x1a1] sm:$0xff] }
 0x5de   : > { %v3889_v45 = vpop.permute.xlu1 %3888  ;;  %v3895_v49 = vpop.permute.xlu0 %3894 }
 0x5df   : > { %v3977_v48 = vsel %vm327_vm0, %v3785_v33, %v3889_v45  ;;  %v3980_v51 = vsel %vm327_vm0, %v3788_v47, %v3895_v49  ;;  %v3413_v33 = vld [vmem:[#allocation2 + $0x121] sm:$0xff]  ;;  %v3415_v49 = vld [vmem:[#allocation2 + $0x139] sm:$0xff] }
 0x5e0   : > { %4048 = vrot.lane.b32.xlu1 %v3977_v48, %s7000_s13  ;;  %4054 = vrot.lane.b32.xlu0 %v3980_v51, %s7000_s13  ;;  %v3605_v47 = vsel %vm327_vm0, %v3413_v33, %v8658_v29  ;;  %v3798_v51 = vld [vmem:[#allocation2 + $0x122] sm:$0xff]  ;;  %v3607_v52 = vsel %vm327_vm0, %v3415_v49, %v8665_v34 }
 0x5e2   : > { %v3893_v53 = vpop.permute.xlu1 %3892  ;;  %v3899_v59 = vpop.permute.xlu0 %3898 }
 0x5e3   : > { %v3979_v54 = vsel %vm327_vm0, %v3787_v50, %v3893_v53  ;;  %v3982_v10 = vsel %vm327_vm0, %v3790_v62, %v3899_v59  ;;  %v3414_v50 = vld [vmem:[#allocation2 + $0x129] sm:$0xff] }
 0x5e4   : > { %4052 = vrot.lane.b32.xlu1 %v3979_v54, %s7000_s13  ;;  %3673 = vrot.lane.b32.xlu0 %v3597_v56, %s6999_s23  ;;  %v3606_v53 = vsel %vm327_vm0, %v3414_v50, %v8667_v35  ;;  %v3416_v54 = vld [vmem:[#allocation2 + $0x141] sm:$0xff] }
 0x5e5   : > { %v3608_v59 = vsel %vm327_vm0, %v3416_v54, %v8673_v38 }
 0x5e6   : > { %v3897_v58 = vpop.permute.xlu1 %3896  ;;  %v3903_v4 = vpop.permute.xlu0 %3902 }
 0x5e7   : > { %v3981_v60 = vsel %vm327_vm0, %v3789_v55, %v3897_v58  ;;  %v3984_v14 = vsel %vm327_vm0, %v3792_v3, %v3903_v4  ;;  %v3800_v55 = vld [vmem:[#allocation2 + $0x13a] sm:$0xff]  ;;  %v3799_v58 = vld [vmem:[#allocation2 + $0x12a] sm:$0xff]  ;;  %v3802_v3 = vld [vmem:[#allocation2 + $0x152] sm:$0xff] }
 0x5e8   : > { %4056 = vrot.lane.b32.xlu1 %v3981_v60, %s7000_s13  ;;  %3677 = vrot.lane.b32.xlu0 %v3599_v63, %s6999_s23  ;;  %v3417_v60 = vld [vmem:[#allocation2 + $0x151] sm:$0xff] }
 0x5e9   : > { %v3609_v63 = vsel %vm327_vm0, %v3417_v60, %v8671_v37 }
 0x5ea   : > { %v3901_v5 = vpop.permute.xlu1 %3900  ;;  %v3907_v20 = vpop.permute.xlu0 %3906 }
 0x5eb   : > { %v3983_v15 = vsel %vm327_vm0, %v3791_v6, %v3901_v5  ;;  %v3986_v19 = vsel %vm327_vm0, %v3794_v18, %v3907_v20  ;;  %v3610_v5 = vsel %vm327_vm0, %v3418_v2, %v8678_v40  ;;  %v3420_v6 = vld [vmem:[#allocation2 + $0x171] sm:$0xff]  ;;  %v3422_v18 = vld [vmem:[#allocation2 + $0x189] sm:$0xff] }
 0x5ec   : > { %3675 = vrot.lane.b32.xlu1 %v3598_v1, %s6999_s23  ;;  %4058 = vrot.lane.b32.xlu0 %v3982_v10, %s7000_s13  ;;  %v3419_v10 = vld [vmem:[#allocation2 + $0x169] sm:$0xff] }
 0x5ed   : > { %v3611_v4 = vsel %vm327_vm0, %v3419_v10, %v8676_v39 }
 0x5ee   : > { %v3905_v11 = vpop.permute.xlu1 %3904  ;;  %v3911_v27 = vpop.permute.xlu0 %3910 }
 0x5ef   : > { %v3985_v13 = vsel %vm327_vm0, %v3793_v9, %v3905_v11  ;;  %v3988_v24 = vsel %vm327_vm0, %v3796_v26, %v3911_v27  ;;  %v3612_v9 = vsel %vm327_vm0, %v3420_v6, %v8682_v42  ;;  %v3421_v11 = vld [vmem:[#allocation2 + $0x181] sm:$0xff] }
 0x5f0   : > { %3679 = vrot.lane.b32.xlu1 %v3600_v7, %s6999_s23  ;;  %4062 = vrot.lane.b32.xlu0 %v3984_v14, %s7000_s13  ;;  %v3804_v7 = vld [vmem:[#allocation2 + $0x16a] sm:$0xff]  ;;  %v3613_v16 = vsel %vm327_vm0, %v3421_v11, %v8680_v41  ;;  %v3808_v27 = vld [vmem:[#allocation2 + $0x19a] sm:$0xff] }
 0x5f2   : > { %v3909_v28 = vpop.permute.xlu1 %3908  ;;  %v3915_v30 = vpop.permute.xlu0 %3914 }
 0x5f3   : > { %v3987_v25 = vsel %vm327_vm0, %v3795_v31, %v3909_v28  ;;  %v3990_v29 = vsel %vm327_vm0, %v3798_v51, %v3915_v30  ;;  %v3807_v31 = vld [vmem:[#allocation2 + $0x18a] sm:$0xff] }
 0x5f4   : > { %4060 = vrot.lane.b32.xlu1 %v3983_v15, %s7000_s13  ;;  %3681 = vrot.lane.b32.xlu0 %v3601_v12, %s6999_s23  ;;  %v3805_v12 = vld [vmem:[#allocation2 + $0x172] sm:$0xff] }
 0x5f6   : > { %v3913_v45 = vpop.permute.xlu1 %3912  ;;  %v3919_v56 = vpop.permute.xlu0 %3918 }
 0x5f7   : > { %v3989_v48 = vsel %vm327_vm0, %v3797_v36, %v3913_v45  ;;  %v3992_v34 = vsel %vm327_vm0, %v3800_v55, %v3919_v56 }
 0x5f8   : > { %4064 = vrot.lane.b32.xlu1 %v3985_v13, %s7000_s13  ;;  %3685 = vrot.lane.b32.xlu0 %v3603_v21, %s6999_s23  ;;  %v3806_v21 = vld [vmem:[#allocation2 + $0x182] sm:$0xff] }
 0x5fa   : > { %v3917_v57 = vpop.permute.xlu1 %3916  ;;  %v3923_v38 = vpop.permute.xlu0 %3922 }
 0x5fb   : > { %v3991_v35 = vsel %vm327_vm0, %v3799_v58, %v3917_v57  ;;  %v3994_v37 = vsel %vm327_vm0, %v3802_v3, %v3923_v38 }
 0x5fc   : > { %3683 = vrot.lane.b32.xlu1 %v3602_v22, %s6999_s23  ;;  %4066 = vrot.lane.b32.xlu0 %v3986_v19, %s7000_s13  ;;  %v3615_v22 = vsel %vm327_vm0, %v3423_v17, %v8684_v43  ;;  %v3614_v19 = vsel %vm327_vm0, %v3422_v18, %v8686_v44 }
 0x5fe   : > { %v3921_v62 = vpop.permute.xlu1 %3920  ;;  %v3927_v14 = vpop.permute.xlu0 %3926 }
 0x5ff   : > { %v3993_v1 = vsel %vm327_vm0, %v3801_v61, %v3921_v62  ;;  %v3996_v39 = vsel %vm327_vm0, %v3804_v7, %v3927_v14 }
 0x600   : > { %3687 = vrot.lane.b32.xlu1 %v3604_v32, %s6999_s23  ;;  %4070 = vrot.lane.b32.xlu0 %v3988_v24, %s7000_s13  ;;  %v3616_v32 = vsel %vm327_vm0, %v3424_v23, %v8688_v46  ;;  %v3809_v24 = vld [vmem:[#allocation2 + $0x1a2] sm:$0xff] }
 0x602   : > { %v3925_v15 = vpop.permute.xlu1 %3924  ;;  %v3931_v42 = vpop.permute.xlu0 %3930 }
 0x603   : > { %v3995_v40 = vsel %vm327_vm0, %v3803_v8, %v3925_v15  ;;  %v3998_v41 = vsel %vm327_vm0, %v3806_v21, %v3931_v42 }
 0x604   : > { %4068 = vrot.lane.b32.xlu1 %v3987_v25, %s7000_s13  ;;  %3689 = vrot.lane.b32.xlu0 %v3605_v47, %s6999_s23 }
 0x606   : > { %v3929_v13 = vpop.permute.xlu1 %3928  ;;  %v3935_v28 = vpop.permute.xlu0 %3934 }
 0x607   : > { %v3997_v20 = vsel %vm327_vm0, %v3805_v12, %v3929_v13  ;;  %v4000_v43 = vsel %vm327_vm0, %v3808_v27, %v3935_v28 }
 0x608   : > { %4072 = vrot.lane.b32.xlu1 %v3989_v48, %s7000_s13  ;;  %3693 = vrot.lane.b32.xlu0 %v3607_v52, %s6999_s23 }
 0x60a   : > { %v3933_v26 = vpop.permute.xlu1 %3932 }
 0x60b   : > { %v3999_v44 = vsel %vm327_vm0, %v3807_v31, %v3933_v26 }
 0x60c   : > { %3691 = vrot.lane.b32.xlu1 %v3606_v53, %s6999_s23  ;;  %4074 = vrot.lane.b32.xlu0 %v3990_v29, %s7000_s13 }
 0x60e   : > { %v3937_v25 = vpop.permute.xlu1 %3936 }
 0x60f   : > { %v4001_v33 = vsel %vm327_vm0, %v3809_v24, %v3937_v25 }
 0x610   : > { %3695 = vrot.lane.b32.xlu1 %v3608_v59, %s6999_s23  ;;  %4078 = vrot.lane.b32.xlu0 %v3992_v34, %s7000_s13 }
 0x614   : > { %4076 = vrot.lane.b32.xlu1 %v3991_v35, %s7000_s13  ;;  %3697 = vrot.lane.b32.xlu0 %v3609_v63, %s6999_s23 }
 0x618   : > { %4080 = vrot.lane.b32.xlu1 %v3993_v1, %s7000_s13  ;;  %3701 = vrot.lane.b32.xlu0 %v3611_v4, %s6999_s23 }
 0x61c   : > { %3699 = vrot.lane.b32.xlu1 %v3610_v5, %s6999_s23  ;;  %4082 = vrot.lane.b32.xlu0 %v3994_v37, %s7000_s13 }
 0x620   : > { %3703 = vrot.lane.b32.xlu1 %v3612_v9, %s6999_s23  ;;  %4086 = vrot.lane.b32.xlu0 %v3996_v39, %s7000_s13 }
 0x624   : > { %4084 = vrot.lane.b32.xlu1 %v3995_v40, %s7000_s13  ;;  %3705 = vrot.lane.b32.xlu0 %v3613_v16, %s6999_s23 }
 0x628   : > { %4088 = vrot.lane.b32.xlu1 %v3997_v20, %s7000_s13  ;;  %3709 = vrot.lane.b32.xlu0 %v3615_v22, %s6999_s23 }
 0x62c   : > { %3707 = vrot.lane.b32.xlu1 %v3614_v19, %s6999_s23  ;;  %4090 = vrot.lane.b32.xlu0 %v3998_v41, %s7000_s13 }
 0x630   : > { %3711 = vrot.lane.b32.xlu1 %v3616_v32, %s6999_s23  ;;  %4094 = vrot.lane.b32.xlu0 %v4000_v43, %s7000_s13 }
 0x634   : > { %4092 = vrot.lane.b32.xlu1 %v3999_v44, %s7000_s13 }
 0x638   : > { %4096 = vrot.lane.b32.xlu1 %v4001_v33, %s7000_s13 }
 0x63c   : > { %4789 = vrot.lane.b32.xlu1 %v4724_v0, %s6993_s17 }
 0x63e   : > { %v4035_v36 = vpop.permute.xlu0 %4034 }
 0x63f   : > { %4131 = vst.msk [vmem:[#allocation5] sm:$0xff] %vm4130_vm12, %v4035_v36 }
 0x642   : > { %v4039_v46 = vpop.permute.xlu0 %4038 }
 0x643   : > { %4133 = vst.msk [vmem:[#allocation5 + $0x10] sm:$0xff] %vm4130_vm12, %v4039_v46 }
 0x646   : > { %v4037_v45 = vpop.permute.xlu1 %4036  ;;  %v4043_v47 = vpop.permute.xlu0 %4042  ;;  %v4163_v30 = vld [vmem:[#allocation5] sm:$0xff] }
 0x647   : > { %4132 = vst.msk [vmem:[#allocation5 + $0x8] sm:$0xff] %vm4130_vm12, %v4037_v45  ;;  %4135 = vst.msk [vmem:[#allocation5 + $0x20] sm:$0xff] %vm4130_vm12, %v4043_v47 }
 0x64a   : > { %v4041_v48 = vpop.permute.xlu1 %4040  ;;  %v4047_v49 = vpop.permute.xlu0 %4046  ;;  %v4165_v29 = vld [vmem:[#allocation5 + $0x10] sm:$0xff] }
 0x64b   : > { %4134 = vst.msk [vmem:[#allocation5 + $0x18] sm:$0xff] %vm4130_vm12, %v4041_v48  ;;  %4137 = vst.msk [vmem:[#allocation5 + $0x30] sm:$0xff] %vm4130_vm12, %v4047_v49 }
 0x64e   : > { %v4045_v50 = vpop.permute.xlu1 %4044  ;;  %v4164_v51 = vld [vmem:[#allocation5 + $0x8] sm:$0xff]  ;;  %v4051_v53 = vpop.permute.xlu0 %4050  ;;  %v4167_v58 = vld [vmem:[#allocation5 + $0x20] sm:$0xff] }
 0x64f   : > { %4136 = vst.msk [vmem:[#allocation5 + $0x28] sm:$0xff] %vm4130_vm12, %v4045_v50  ;;  %v4195_v52 = vpack.c.bf16 %v4164_v51, %v4163_v30  ;;  %4139 = vst.msk [vmem:[#allocation5 + $0x40] sm:$0xff] %vm4130_vm12, %v4051_v53 }
 0x651   : > { %6879 = vmatprep.mubr.msk.bf16.mxu0 %vm4247_vm13, %v4195_v52 }
 0x652   : > { %v4049_v54 = vpop.permute.xlu1 %4048  ;;  %v4166_v55 = vld [vmem:[#allocation5 + $0x18] sm:$0xff]  ;;  %v4055_v57 = vpop.permute.xlu0 %4054  ;;  %v4169_v61 = vld [vmem:[#allocation5 + $0x30] sm:$0xff] }
 0x653   : > { %4138 = vst.msk [vmem:[#allocation5 + $0x38] sm:$0xff] %vm4130_vm12, %v4049_v54  ;;  %v4196_v56 = vpack.c.bf16 %v4166_v55, %v4165_v29  ;;  %4141 = vst.msk [vmem:[#allocation5 + $0x50] sm:$0xff] %vm4130_vm12, %v4055_v57 }
 0x655   : > { %6880 = vmatmul.mubr.msk.bf16.vlgmr.msra.gmra.mxu0 %vm4247_vm13, %v4196_v56 }
 0x656   : > { %v4053_v59 = vpop.permute.xlu1 %4052  ;;  %v4168_v34 = vld [vmem:[#allocation5 + $0x28] sm:$0xff]  ;;  %v3674_v60 = vpop.permute.xlu0 %3673  ;;  %v4171_v38 = vld [vmem:[#allocation5 + $0x40] sm:$0xff] }
 0x657   : > { %4140 = vst.msk [vmem:[#allocation5 + $0x48] sm:$0xff] %vm4130_vm12, %v4053_v59  ;;  %v4197_v35 = vpack.c.bf16 %v4168_v34, %v4167_v58 }
 0x658   : > { %3758 = vst.msk [vmem:[#allocation5 + $0x60] sm:$0xff] %vm3745_vm10, %v3674_v60 }
 0x659   : > { %6883 = vmatprep.mubr.msk.bf16.mxu0 %vm4247_vm13, %v4197_v35 }
 0x65a   : > { %v4057_v62 = vpop.permute.xlu1 %4056  ;;  %v4170_v63 = vld [vmem:[#allocation5 + $0x38] sm:$0xff]  ;;  %v3678_v10 = vpop.permute.xlu0 %3677  ;;  %v4173_v37 = vld [vmem:[#allocation5 + $0x50] sm:$0xff] }
 0x65b   : > { %4142 = vst.msk [vmem:[#allocation5 + $0x58] sm:$0xff] %vm4130_vm12, %v4057_v62  ;;  %v4198_v1 = vpack.c.bf16 %v4170_v63, %v4169_v61 }
 0x65c   : > { %3760 = vst.msk [vmem:[#allocation5 + $0x70] sm:$0xff] %vm3745_vm10, %v3678_v10  ;;  %v4723_v10 = vld [vmem:[#allocation4 + $0x1] sm:$0xff] }
 0x65d   : > { %6884 = vmatmul.mubr.msk.bf16.gmra.mxu0 %vm4247_vm13, %v4198_v1  ;;  %4787 = vrot.lane.b32.xlu0 %v4723_v10, %s6993_s17 }
 0x65e   : > { %v3676_v2 = vpop.permute.xlu1 %3675  ;;  %v4172_v3 = vld [vmem:[#allocation5 + $0x48] sm:$0xff]  ;;  %v4059_v5 = vpop.permute.xlu0 %4058 }
 0x65f   : > { %3759 = vst.msk [vmem:[#allocation5 + $0x68] sm:$0xff] %vm3745_vm10, %v3676_v2  ;;  %v4199_v4 = vpack.c.bf16 %v4172_v3, %v4171_v38 }
 0x660   : > { %4143 = vst.msk [vmem:[#allocation5 + $0x60] sm:$0xff] %vm4130_vm12, %v4059_v5 }
 0x661   : > { %6887 = vmatprep.mubr.msk.bf16.mxu0 %vm4247_vm13, %v4199_v4 }
 0x662   : > { %v3680_v6 = vpop.permute.xlu1 %3679  ;;  %v4174_v7 = vld [vmem:[#allocation5 + $0x58] sm:$0xff]  ;;  %v4063_v15 = vpop.permute.xlu0 %4062 }
 0x663   : > { %3761 = vst.msk [vmem:[#allocation5 + $0x78] sm:$0xff] %vm3745_vm10, %v3680_v6  ;;  %v4200_v14 = vpack.c.bf16 %v4174_v7, %v4173_v37 }
 0x664   : > { %4145 = vst.msk [vmem:[#allocation5 + $0x70] sm:$0xff] %vm4130_vm12, %v4063_v15 }
 0x665   : > { %6888 = vmatmul.mubr.msk.bf16.gmra.mxu0 %vm4247_vm13, %v4200_v14 }
 0x666   : > { %v4061_v8 = vpop.permute.xlu1 %4060  ;;  %v3682_v9 = vpop.permute.xlu0 %3681 }
 0x667   : > { %4144 = vst.msk [vmem:[#allocation5 + $0x68] sm:$0xff] %vm4130_vm12, %v4061_v8  ;;  %v4175_v11 = vld [vmem:[#allocation5 + $0x60] sm:$0xff] }
 0x668   : > { %3762 = vst.msk [vmem:[#allocation5 + $0x80] sm:$0xff] %vm3745_vm10, %v3682_v9 }
 0x66a   : > { %v4065_v39 = vpop.permute.xlu1 %4064  ;;  %v3686_v40 = vpop.permute.xlu0 %3685 }
 0x66b   : > { %4146 = vst.msk [vmem:[#allocation5 + $0x78] sm:$0xff] %vm4130_vm12, %v4065_v39  ;;  %v4177_v17 = vld [vmem:[#allocation5 + $0x70] sm:$0xff] }
 0x66c   : > { %3764 = vst.msk [vmem:[#allocation5 + $0x90] sm:$0xff] %vm3745_vm10, %v3686_v40  ;;  %v4659_v39 = vld [vmem:[#allocation4] sm:$0xff] }
 0x66d   : > { %v8952_v40 = vld [vmem:[%s10028_s4] ss:$0 sm:$0xff]  ;;  %4691 = vst.msk [vmem:[#allocation6] sm:$0xff] %vm1048_vm2, %v4659_v39 }
 0x66e   : > { %v3684_v12 = vpop.permute.xlu1 %3683  ;;  %v4176_v13 = vld [vmem:[#allocation5 + $0x68] sm:$0xff]  ;;  %v4067_v20 = vpop.permute.xlu0 %4066 }
 0x66f   : > { %3763 = vst.msk [vmem:[#allocation5 + $0x88] sm:$0xff] %vm3745_vm10, %v3684_v12  ;;  %v4201_v16 = vpack.c.bf16 %v4176_v13, %v4175_v11  ;;  %v8958_v13 = vld [vmem:[%s10029_s5] ss:$0 sm:$0xff] }
 0x670   : > { %4147 = vst.msk [vmem:[#allocation5 + $0x80] sm:$0xff] %vm4130_vm12, %v4067_v20  ;;  %v4660_v20 = vld [vmem:[#allocation4 + $0x8] sm:$0xff] }
 0x671   : > { %6891 = vmatprep.mubr.msk.bf16.mxu0 %vm4247_vm13, %v4201_v16  ;;  %4692 = vst.msk [vmem:[#allocation6 + $0x8] sm:$0xff] %vm1048_vm2, %v4660_v20 }
 0x672   : > { %v3688_v42 = vpop.permute.xlu1 %3687  ;;  %v4178_v18 = vld [vmem:[#allocation5 + $0x78] sm:$0xff]  ;;  %v4071_v22 = vpop.permute.xlu0 %4070 }
 0x673   : > { %3765 = vst.msk [vmem:[#allocation5 + $0x98] sm:$0xff] %vm3745_vm10, %v3688_v42  ;;  %v4202_v21 = vpack.c.bf16 %v4178_v18, %v4177_v17 }
 0x674   : > { %4149 = vst.msk [vmem:[#allocation5 + $0x90] sm:$0xff] %vm4130_vm12, %v4071_v22 }
 0x675   : > { %6892 = vmatmul.mubr.msk.bf16.gmra.mxu0 %vm4247_vm13, %v4202_v21 }
 0x676   : > { %v4069_v19 = vpop.permute.xlu1 %4068  ;;  %v3690_v41 = vpop.permute.xlu0 %3689 }
 0x677   : > { %4148 = vst.msk [vmem:[#allocation5 + $0x88] sm:$0xff] %vm4130_vm12, %v4069_v19  ;;  %v4179_v27 = vld [vmem:[#allocation5 + $0x80] sm:$0xff] }
 0x678   : > { %3766 = vst.msk [vmem:[#allocation5 + $0xa0] sm:$0xff] %vm3745_vm10, %v3690_v41 }
 0x67a   : > { %v4073_v23 = vpop.permute.xlu1 %4072  ;;  %v3694_v26 = vpop.permute.xlu0 %3693 }
 0x67b   : > { %4150 = vst.msk [vmem:[#allocation5 + $0x98] sm:$0xff] %vm4130_vm12, %v4073_v23  ;;  %v4181_v44 = vld [vmem:[#allocation5 + $0x90] sm:$0xff] }
 0x67c   : > { %3768 = vst.msk [vmem:[#allocation5 + $0xb0] sm:$0xff] %vm3745_vm10, %v3694_v26 }
 0x67e   : > { %v3692_v28 = vpop.permute.xlu1 %3691  ;;  %v4180_v31 = vld [vmem:[#allocation5 + $0x88] sm:$0xff]  ;;  %v4075_v43 = vpop.permute.xlu0 %4074 }
 0x67f   : > { %3767 = vst.msk [vmem:[#allocation5 + $0xa8] sm:$0xff] %vm3745_vm10, %v3692_v28  ;;  %v4203_v32 = vpack.c.bf16 %v4180_v31, %v4179_v27 }
 0x680   : > { %4151 = vst.msk [vmem:[#allocation5 + $0xa0] sm:$0xff] %vm4130_vm12, %v4075_v43 }
 0x681   : > { %6895 = vmatprep.mubr.msk.bf16.mxu0 %vm4247_vm13, %v4203_v32 }
 0x682   : > { %v3696_v24 = vpop.permute.xlu1 %3695  ;;  %v4182_v25 = vld [vmem:[#allocation5 + $0x98] sm:$0xff]  ;;  %v4079_v36 = vpop.permute.xlu0 %4078 }
 0x683   : > { %3769 = vst.msk [vmem:[#allocation5 + $0xb8] sm:$0xff] %vm3745_vm10, %v3696_v24  ;;  %v4204_v33 = vpack.c.bf16 %v4182_v25, %v4181_v44 }
 0x684   : > { %4153 = vst.msk [vmem:[#allocation5 + $0xb0] sm:$0xff] %vm4130_vm12, %v4079_v36 }
 0x685   : > { %6896 = vmatmul.mubr.msk.bf16.gmra.mxu0 %vm4247_vm13, %v4204_v33 }
 0x686   : > { %v4077_v46 = vpop.permute.xlu1 %4076  ;;  %v3698_v45 = vpop.permute.xlu0 %3697 }
 0x687   : > { %4152 = vst.msk [vmem:[#allocation5 + $0xa8] sm:$0xff] %vm4130_vm12, %v4077_v46  ;;  %v4183_v49 = vld [vmem:[#allocation5 + $0xa0] sm:$0xff] }
 0x688   : > { %3770 = vst.msk [vmem:[#allocation5 + $0xc0] sm:$0xff] %vm3745_vm10, %v3698_v45 }
 0x68a   : > { %v4081_v47 = vpop.permute.xlu1 %4080  ;;  %v3702_v48 = vpop.permute.xlu0 %3701 }
 0x68b   : > { %4154 = vst.msk [vmem:[#allocation5 + $0xb8] sm:$0xff] %vm4130_vm12, %v4081_v47  ;;  %v4185_v53 = vld [vmem:[#allocation5 + $0xb0] sm:$0xff] }
 0x68c   : > { %3772 = vst.msk [vmem:[#allocation5 + $0xd0] sm:$0xff] %vm3745_vm10, %v3702_v48 }
 0x68e   : > { %v3700_v30 = vpop.permute.xlu1 %3699  ;;  %v4184_v50 = vld [vmem:[#allocation5 + $0xa8] sm:$0xff]  ;;  %v4083_v52 = vpop.permute.xlu0 %4082 }
 0x68f   : > { %3771 = vst.msk [vmem:[#allocation5 + $0xc8] sm:$0xff] %vm3745_vm10, %v3700_v30  ;;  %v4205_v51 = vpack.c.bf16 %v4184_v50, %v4183_v49 }
 0x690   : > { %4155 = vst.msk [vmem:[#allocation5 + $0xc0] sm:$0xff] %vm4130_vm12, %v4083_v52 }
 0x691   : > { %6899 = vmatprep.mubr.msk.bf16.mxu0 %vm4247_vm13, %v4205_v51 }
 0x692   : > { %v3704_v29 = vpop.permute.xlu1 %3703  ;;  %v4186_v54 = vld [vmem:[#allocation5 + $0xb8] sm:$0xff]  ;;  %v4087_v56 = vpop.permute.xlu0 %4086 }
 0x693   : > { %3773 = vst.msk [vmem:[#allocation5 + $0xd8] sm:$0xff] %vm3745_vm10, %v3704_v29  ;;  %v4206_v55 = vpack.c.bf16 %v4186_v54, %v4185_v53 }
 0x694   : > { %4157 = vst.msk [vmem:[#allocation5 + $0xd0] sm:$0xff] %vm4130_vm12, %v4087_v56 }
 0x695   : > { %6900 = vmatmul.mubr.msk.bf16.gmra.mxu0 %vm4247_vm13, %v4206_v55 }
 0x696   : > { %v4085_v57 = vpop.permute.xlu1 %4084  ;;  %v3706_v58 = vpop.permute.xlu0 %3705 }
 0x697   : > { %4156 = vst.msk [vmem:[#allocation5 + $0xc8] sm:$0xff] %vm4130_vm12, %v4085_v57  ;;  %v4187_v35 = vld [vmem:[#allocation5 + $0xc0] sm:$0xff] }
 0x698   : > { %3774 = vst.msk [vmem:[#allocation5 + $0xe0] sm:$0xff] %vm3745_vm10, %v3706_v58 }
 0x69a   : > { %v4089_v59 = vpop.permute.xlu1 %4088  ;;  %v3710_v34 = vpop.permute.xlu0 %3709 }
 0x69b   : > { %4158 = vst.msk [vmem:[#allocation5 + $0xd8] sm:$0xff] %vm4130_vm12, %v4089_v59  ;;  %v4189_v63 = vld [vmem:[#allocation5 + $0xd0] sm:$0xff] }
 0x69c   : > { %3776 = vst.msk [vmem:[#allocation5 + $0xf0] sm:$0xff] %vm3745_vm10, %v3710_v34 }
 0x69e   : > { %v3708_v60 = vpop.permute.xlu1 %3707  ;;  %v4188_v61 = vld [vmem:[#allocation5 + $0xc8] sm:$0xff]  ;;  %v4091_v1 = vpop.permute.xlu0 %4090 }
 0x69f   : > { %3775 = vst.msk [vmem:[#allocation5 + $0xe8] sm:$0xff] %vm3745_vm10, %v3708_v60  ;;  %v4207_v62 = vpack.c.bf16 %v4188_v61, %v4187_v35 }
 0x6a0   : > { %4159 = vst.msk [vmem:[#allocation5 + $0xe0] sm:$0xff] %vm4130_vm12, %v4091_v1 }
 0x6a1   : > { %6903 = vmatprep.mubr.msk.bf16.mxu0 %vm4247_vm13, %v4207_v62 }
 0x6a2   : > { %v3712_v38 = vpop.permute.xlu1 %3711  ;;  %v4190_v2 = vld [vmem:[#allocation5 + $0xd8] sm:$0xff]  ;;  %v4095_v4 = vpop.permute.xlu0 %4094 }
 0x6a3   : > { %3777 = vst.msk [vmem:[#allocation5 + $0xf8] sm:$0xff] %vm3745_vm10, %v3712_v38  ;;  %v4208_v3 = vpack.c.bf16 %v4190_v2, %v4189_v63 }
 0x6a4   : > { %4161 = vst.msk [vmem:[#allocation5 + $0xf0] sm:$0xff] %vm4130_vm12, %v4095_v4 }
 0x6a5   : > { %6904 = vmatmul.mubr.msk.bf16.gmra.mxu0 %vm4247_vm13, %v4208_v3 }
 0x6a6   : > { %v4093_v5 = vpop.permute.xlu1 %4092 }
 0x6a7   : > { %4160 = vst.msk [vmem:[#allocation5 + $0xe8] sm:$0xff] %vm4130_vm12, %v4093_v5  ;;  %v4191_v6 = vld [vmem:[#allocation5 + $0xe0] sm:$0xff] }
 0x6aa   : > { %v4097_v37 = vpop.permute.xlu1 %4096 }
 0x6ab   : > { %4162 = vst.msk [vmem:[#allocation5 + $0xf8] sm:$0xff] %vm4130_vm12, %v4097_v37  ;;  %v4193_v15 = vld [vmem:[#allocation5 + $0xf0] sm:$0xff] }
 0x6ae   : > { %v4192_v7 = vld [vmem:[#allocation5 + $0xe8] sm:$0xff]  ;;  %v4790_v21 = vpop.permute.xlu1 %4789 }
 0x6af   : > { %v4209_v14 = vpack.c.bf16 %v4192_v7, %v4191_v6  ;;  %4884 = vst.msk [vmem:[#allocation6 + $0x8] sm:$0xff] %vm1433_vm4, %v4790_v21 }
 0x6b1   : > { %6907 = vmatprep.mubr.msk.bf16.mxu0 %vm4247_vm13, %v4209_v14 }
 0x6b2   : > { %v4194_v8 = vld [vmem:[#allocation5 + $0xf8] sm:$0xff] }
 0x6b3   : > { %v4210_v9 = vpack.c.bf16 %v4194_v8, %v4193_v15 }
 0x6b5   : > { %6908 = vmatmul.mubr.msk.bf16.gmra.mxu0 %vm4247_vm13, %v4210_v9 }
 0x6cf   : > { %v4788_v11 = vpop.permute.xlu0 %4787 }
 0x6d0   : > { %4883 = vst.msk [vmem:[#allocation6] sm:$0xff] %vm1433_vm4, %v4788_v11 }
 0x715   : > { %v6881_v12 = vpop.f32.mrf.mxu0 }
 0x716   : > { %v4470_v16 = vmul.f32 %v6881_v12, %v8952_v40 }
 0x717   : > { %v4334_v17 = vpop.f32.mrf.mxu0 }
 0x718   : > { %v4509_v42 = vadd.f32 %v8958_v13, %v4470_v16  ;;  %v4468_v18 = vmul.f32 %v8952_v40, %v4334_v17 }
 0x719   : > { %v6882_v22 = vpop.f32.mrf.mxu0 }
 0x71a   : > { %v4541_v19 = vmax.f32 %v4509_v42, 0.0  ;;  %v4507_v41 = vadd.f32 %v8958_v13, %v4468_v18  ;;  %v4471_v23 = vmul.f32 %v6882_v22, %v8952_v40 }
 0x71b   : > { %v4337_v26 = vpop.f32.mrf.mxu0 }
 0x71c   : > { %4629 = vst.msk [vmem:[#allocation4 + $0x31] sm:$0xff] %vm1048_vm2, %v4541_v19  ;;  %v4539_v27 = vmax.f32 %v4507_v41, 0.0  ;;  %v4510_v28 = vadd.f32 %v8958_v13, %v4471_v23  ;;  %v4469_v31 = vmul.f32 %v8952_v40, %v4337_v26 }
 0x71d   : > { %v6885_v32 = vpop.f32.mrf.mxu0 }
 0x71e   : > { %4627 = vst.msk [vmem:[#allocation4 + $0x19] sm:$0xff] %vm1048_vm2, %v4539_v27  ;;  %v4542_v43 = vmax.f32 %v4510_v28, 0.0  ;;  %v4508_v44 = vadd.f32 %v8958_v13, %v4469_v31  ;;  %v4474_v24 = vmul.f32 %v6885_v32, %v8952_v40 }
 0x71f   : > { %v4350_v25 = vpop.f32.mrf.mxu0 }
 0x720   : > { %4630 = vst.msk [vmem:[#allocation4 + $0x39] sm:$0xff] %vm1048_vm2, %v4542_v43  ;;  %v4540_v33 = vmax.f32 %v4508_v44, 0.0  ;;  %v4513_v36 = vadd.f32 %v8958_v13, %v4474_v24  ;;  %v4472_v46 = vmul.f32 %v8952_v40, %v4350_v25 }
 0x721   : > { %v6886_v45 = vpop.f32.mrf.mxu0 }
 0x722   : > { %4628 = vst.msk [vmem:[#allocation4 + $0x21] sm:$0xff] %vm1048_vm2, %v4540_v33  ;;  %v4545_v47 = vmax.f32 %v4513_v36, 0.0  ;;  %v4511_v48 = vadd.f32 %v8958_v13, %v4472_v46  ;;  %v4475_v49 = vmul.f32 %v6886_v45, %v8952_v40 }
 0x723   : > { %v4353_v30 = vpop.f32.mrf.mxu0  ;;  %v8980_v50 = vld [vmem:[#allocation4 + $0x30] sm:$0xff] }
 0x724   : > { %4633 = vst.msk [vmem:[#allocation4 + $0x61] sm:$0xff] %vm1048_vm2, %v4545_v47  ;;  %v4543_v51 = vmax.f32 %v4511_v48, 0.0  ;;  %v4514_v52 = vadd.f32 %v8958_v13, %v4475_v49  ;;  %v4473_v53 = vmul.f32 %v8952_v40, %v4353_v30  ;;  %4695 = vst.msk [vmem:[#allocation6 + $0x20] sm:$0xff] %vm1048_vm2, %v8980_v50  ;;  %v9003_v63 = vld [vmem:[#allocation4 + $0x31] sm:$0xff] }
 0x725   : > { %v6889_v29 = vpop.f32.mrf.mxu0  ;;  %v8987_v54 = vld [vmem:[#allocation4 + $0x19] sm:$0xff] }
 0x726   : > { %v8989_v55 = vld [vmem:[#allocation4 + $0x18] sm:$0xff]  ;;  %4631 = vst.msk [vmem:[#allocation4 + $0x49] sm:$0xff] %vm1048_vm2, %v4543_v51  ;;  %v4546_v56 = vmax.f32 %v4514_v52, 0.0  ;;  %v4512_v57 = vadd.f32 %v8958_v13, %v4473_v53  ;;  %v4478_v58 = vmul.f32 %v6889_v29, %v8952_v40  ;;  %4791 = vrot.lane.b32.xlu0 %v8987_v54, %s6993_s17 }
 0x727   : > { %4693 = vst.msk [vmem:[#allocation6 + $0x10] sm:$0xff] %vm1048_vm2, %v8989_v55  ;;  %v4366_v59 = vpop.f32.mrf.mxu0  ;;  %v9001_v61 = vld [vmem:[#allocation4 + $0x38] sm:$0xff] }
 0x728   : > { %4634 = vst.msk [vmem:[#allocation4 + $0x69] sm:$0xff] %vm1048_vm2, %v4546_v56  ;;  %v4544_v34 = vmax.f32 %v4512_v57, 0.0  ;;  %v4517_v35 = vadd.f32 %v8958_v13, %v4478_v58  ;;  %v4476_v60 = vmul.f32 %v8952_v40, %v4366_v59  ;;  %4696 = vst.msk [vmem:[#allocation6 + $0x28] sm:$0xff] %vm1048_vm2, %v9001_v61  ;;  %v9027_v7 = vld [vmem:[#allocation4 + $0x39] sm:$0xff] }
 0x729   : > { %v6890_v62 = vpop.f32.mrf.mxu0  ;;  %v9005_v1 = vld [vmem:[#allocation4 + $0x21] sm:$0xff] }
 0x72a   : > { %4632 = vst.msk [vmem:[#allocation4 + $0x51] sm:$0xff] %vm1048_vm2, %v4544_v34  ;;  %v4549_v10 = vmax.f32 %v4517_v35, 0.0  ;;  %v4515_v38 = vadd.f32 %v8958_v13, %v4476_v60  ;;  %v4479_v2 = vmul.f32 %v6890_v62, %v8952_v40  ;;  %4795 = vrot.lane.b32.xlu0 %v9003_v63, %s6993_s17  ;;  %4793 = vrot.lane.b32.xlu1 %v9005_v1, %s6993_s17  ;;  %v9016_v3 = vld [vmem:[#allocation4 + $0x20] sm:$0xff] }
 0x72b   : > { %v4369_v4 = vpop.f32.mrf.mxu0  ;;  %4694 = vst.msk [vmem:[#allocation6 + $0x18] sm:$0xff] %vm1048_vm2, %v9016_v3  ;;  %v9020_v0 = vld [vmem:[#allocation4 + $0x60] sm:$0xff] }
 0x72c   : > { %4637 = vst.msk [vmem:[#allocation4 + $0x91] sm:$0xff] %vm1048_vm2, %v4549_v10  ;;  %v4547_v5 = vmax.f32 %v4515_v38, 0.0  ;;  %v4518_v37 = vadd.f32 %v8958_v13, %v4479_v2  ;;  %v4477_v6 = vmul.f32 %v8952_v40, %v4369_v4  ;;  %4699 = vst.msk [vmem:[#allocation6 + $0x40] sm:$0xff] %vm1048_vm2, %v9020_v0  ;;  %v9044_v12 = vld [vmem:[#allocation4 + $0x61] sm:$0xff] }
 0x72d   : > { %v9029_v14 = vld [vmem:[#allocation4 + $0x49] sm:$0xff] }
 0x72e   : > { %v9031_v15 = vld [vmem:[#allocation4 + $0x48] sm:$0xff]  ;;  %4635 = vst.msk [vmem:[#allocation4 + $0x79] sm:$0xff] %vm1048_vm2, %v4547_v5  ;;  %v4550_v8 = vmax.f32 %v4518_v37, 0.0  ;;  %v4516_v9 = vadd.f32 %v8958_v13, %v4477_v6  ;;  %4797 = vrot.lane.b32.xlu1 %v9027_v7, %s6993_s17  ;;  %4799 = vrot.lane.b32.xlu0 %v9029_v14, %s6993_s17 }
 0x72f   : > { %4697 = vst.msk [vmem:[#allocation6 + $0x30] sm:$0xff] %vm1048_vm2, %v9031_v15  ;;  %v9042_v11 = vld [vmem:[#allocation4 + $0x68] sm:$0xff] }
 0x730   : > { %4638 = vst.msk [vmem:[#allocation4 + $0x99] sm:$0xff] %vm1048_vm2, %v4550_v8  ;;  %v4548_v39 = vmax.f32 %v4516_v9, 0.0  ;;  %4700 = vst.msk [vmem:[#allocation6 + $0x48] sm:$0xff] %vm1048_vm2, %v9042_v11  ;;  %v9063_v18 = vld [vmem:[#allocation4 + $0x69] sm:$0xff] }
 0x731   : > { %v9046_v16 = vld [vmem:[#allocation4 + $0x51] sm:$0xff] }
 0x732   : > { %4636 = vst.msk [vmem:[#allocation4 + $0x81] sm:$0xff] %vm1048_vm2, %v4548_v39  ;;  %4803 = vrot.lane.b32.xlu0 %v9044_v12, %s6993_s17  ;;  %4801 = vrot.lane.b32.xlu1 %v9046_v16, %s6993_s17  ;;  %v9055_v20 = vld [vmem:[#allocation4 + $0x50] sm:$0xff] }
 0x733   : > { %4698 = vst.msk [vmem:[#allocation6 + $0x38] sm:$0xff] %vm1048_vm2, %v9055_v20  ;;  %v9059_v17 = vld [vmem:[#allocation4 + $0x90] sm:$0xff] }
 0x734   : > { %4703 = vst.msk [vmem:[#allocation6 + $0x60] sm:$0xff] %vm1048_vm2, %v9059_v17  ;;  %v4735_v31 = vld [vmem:[#allocation4 + $0x91] sm:$0xff] }
 0x735   : > { %v6893_v42 = vpop.f32.mrf.mxu0  ;;  %v4733_v21 = vld [vmem:[#allocation4 + $0x79] sm:$0xff] }
 0x736   : > { %v9065_v22 = vld [vmem:[#allocation4 + $0x78] sm:$0xff]  ;;  %v4482_v19 = vmul.f32 %v6893_v42, %v8952_v40  ;;  %4805 = vrot.lane.b32.xlu1 %v9063_v18, %s6993_s17  ;;  %4807 = vrot.lane.b32.xlu0 %v4733_v21, %s6993_s17 }
 0x737   : > { %4701 = vst.msk [vmem:[#allocation6 + $0x50] sm:$0xff] %vm1048_vm2, %v9065_v22  ;;  %v4382_v41 = vpop.f32.mrf.mxu0  ;;  %v9075_v27 = vld [vmem:[#allocation4 + $0x98] sm:$0xff] }
 0x738   : > { %v4521_v23 = vadd.f32 %v8958_v13, %v4482_v19  ;;  %v4480_v26 = vmul.f32 %v8952_v40, %v4382_v41  ;;  %4704 = vst.msk [vmem:[#allocation6 + $0x68] sm:$0xff] %vm1048_vm2, %v9075_v27  ;;  %v4736_v47 = vld [vmem:[#allocation4 + $0x99] sm:$0xff] }
 0x739   : > { %v6894_v28 = vpop.f32.mrf.mxu0  ;;  %v9077_v32 = vld [vmem:[#allocation4 + $0x81] sm:$0xff] }
 0x73a   : > { %v4553_v43 = vmax.f32 %v4521_v23, 0.0  ;;  %v4519_v44 = vadd.f32 %v8958_v13, %v4480_v26  ;;  %v4483_v24 = vmul.f32 %v6894_v28, %v8952_v40  ;;  %4811 = vrot.lane.b32.xlu0 %v4735_v31, %s6993_s17  ;;  %4809 = vrot.lane.b32.xlu1 %v9077_v32, %s6993_s17  ;;  %v9086_v25 = vld [vmem:[#allocation4 + $0x80] sm:$0xff] }
 0x73b   : > { %v4385_v33 = vpop.f32.mrf.mxu0  ;;  %4702 = vst.msk [vmem:[#allocation6 + $0x58] sm:$0xff] %vm1048_vm2, %v9086_v25 }
 0x73c   : > { %4641 = vst.msk [vmem:[#allocation4 + $0xc1] sm:$0xff] %vm1048_vm2, %v4553_v43  ;;  %v4551_v36 = vmax.f32 %v4519_v44, 0.0  ;;  %v4522_v46 = vadd.f32 %v8958_v13, %v4483_v24  ;;  %v4481_v45 = vmul.f32 %v8952_v40, %v4385_v33 }
 0x73e   : > { %4639 = vst.msk [vmem:[#allocation4 + $0xa9] sm:$0xff] %vm1048_vm2, %v4551_v36  ;;  %v4554_v48 = vmax.f32 %v4522_v46, 0.0  ;;  %v4520_v49 = vadd.f32 %v8958_v13, %v4481_v45  ;;  %4813 = vrot.lane.b32.xlu1 %v4736_v47, %s6993_s17 }
 0x740   : > { %4642 = vst.msk [vmem:[#allocation4 + $0xc9] sm:$0xff] %vm1048_vm2, %v4554_v48  ;;  %v4552_v30 = vmax.f32 %v4520_v49, 0.0 }
 0x742   : > { %4640 = vst.msk [vmem:[#allocation4 + $0xb1] sm:$0xff] %vm1048_vm2, %v4552_v30 }
 0x743   : > { %v9098_v51 = vld [vmem:[#allocation4 + $0xc0] sm:$0xff] }
 0x744   : > { %4707 = vst.msk [vmem:[#allocation6 + $0x80] sm:$0xff] %vm1048_vm2, %v9098_v51  ;;  %v4739_v60 = vld [vmem:[#allocation4 + $0xc1] sm:$0xff] }
 0x745   : > { %v6897_v52 = vpop.f32.mrf.mxu0  ;;  %v4737_v53 = vld [vmem:[#allocation4 + $0xa9] sm:$0xff] }
 0x746   : > { %v9102_v29 = vld [vmem:[#allocation4 + $0xa8] sm:$0xff]  ;;  %v4486_v56 = vmul.f32 %v6897_v52, %v8952_v40  ;;  %4815 = vrot.lane.b32.xlu0 %v4737_v53, %s6993_s17 }
 0x747   : > { %4705 = vst.msk [vmem:[#allocation6 + $0x70] sm:$0xff] %vm1048_vm2, %v9102_v29  ;;  %v4398_v57 = vpop.f32.mrf.mxu0  ;;  %v9110_v34 = vld [vmem:[#allocation4 + $0xc8] sm:$0xff] }
 0x748   : > { %v4525_v58 = vadd.f32 %v8958_v13, %v4486_v56  ;;  %v4484_v59 = vmul.f32 %v8952_v40, %v4398_v57  ;;  %4708 = vst.msk [vmem:[#allocation6 + $0x88] sm:$0xff] %vm1048_vm2, %v9110_v34  ;;  %v4740_v9 = vld [vmem:[#allocation4 + $0xc9] sm:$0xff] }
 0x749   : > { %v6898_v35 = vpop.f32.mrf.mxu0  ;;  %v4738_v62 = vld [vmem:[#allocation4 + $0xb1] sm:$0xff] }
 0x74a   : > { %v4557_v10 = vmax.f32 %v4525_v58, 0.0  ;;  %v4523_v38 = vadd.f32 %v8958_v13, %v4484_v59  ;;  %v4487_v2 = vmul.f32 %v6898_v35, %v8952_v40  ;;  %4819 = vrot.lane.b32.xlu0 %v4739_v60, %s6993_s17  ;;  %4817 = vrot.lane.b32.xlu1 %v4738_v62, %s6993_s17  ;;  %v9118_v4 = vld [vmem:[#allocation4 + $0xb0] sm:$0xff] }
 0x74b   : > { %v4401_v5 = vpop.f32.mrf.mxu0  ;;  %4706 = vst.msk [vmem:[#allocation6 + $0x78] sm:$0xff] %vm1048_vm2, %v9118_v4 }
 0x74c   : > { %4645 = vst.msk [vmem:[#allocation4 + $0xf1] sm:$0xff] %vm1048_vm2, %v4557_v10  ;;  %v4555_v37 = vmax.f32 %v4523_v38, 0.0  ;;  %v4526_v6 = vadd.f32 %v8958_v13, %v4487_v2  ;;  %v4485_v8 = vmul.f32 %v8952_v40, %v4401_v5 }
 0x74e   : > { %4643 = vst.msk [vmem:[#allocation4 + $0xd9] sm:$0xff] %vm1048_vm2, %v4555_v37  ;;  %v4558_v39 = vmax.f32 %v4526_v6, 0.0  ;;  %v4524_v42 = vadd.f32 %v8958_v13, %v4485_v8  ;;  %4821 = vrot.lane.b32.xlu1 %v4740_v9, %s6993_s17 }
 0x750   : > { %4646 = vst.msk [vmem:[#allocation4 + $0xf9] sm:$0xff] %vm1048_vm2, %v4558_v39  ;;  %v4556_v21 = vmax.f32 %v4524_v42, 0.0 }
 0x752   : > { %4644 = vst.msk [vmem:[#allocation4 + $0xe1] sm:$0xff] %vm1048_vm2, %v4556_v21 }
 0x753   : > { %v9130_v19 = vld [vmem:[#allocation4 + $0xf0] sm:$0xff] }
 0x754   : > { %4711 = vst.msk [vmem:[#allocation6 + $0xa0] sm:$0xff] %vm1048_vm2, %v9130_v19  ;;  %v4743_v36 = vld [vmem:[#allocation4 + $0xf1] sm:$0xff] }
 0x755   : > { %v6901_v41 = vpop.f32.mrf.mxu0  ;;  %v4741_v23 = vld [vmem:[#allocation4 + $0xd9] sm:$0xff] }
 0x756   : > { %v9134_v26 = vld [vmem:[#allocation4 + $0xd8] sm:$0xff]  ;;  %v4490_v28 = vmul.f32 %v6901_v41, %v8952_v40  ;;  %4823 = vrot.lane.b32.xlu0 %v4741_v23, %s6993_s17 }
 0x757   : > { %4709 = vst.msk [vmem:[#allocation6 + $0x90] sm:$0xff] %vm1048_vm2, %v9134_v26  ;;  %v4414_v31 = vpop.f32.mrf.mxu0  ;;  %v9142_v24 = vld [vmem:[#allocation4 + $0xf8] sm:$0xff] }
 0x758   : > { %v4529_v43 = vadd.f32 %v8958_v13, %v4490_v28  ;;  %v4488_v44 = vmul.f32 %v8952_v40, %v4414_v31  ;;  %4712 = vst.msk [vmem:[#allocation6 + $0xa8] sm:$0xff] %vm1048_vm2, %v9142_v24  ;;  %v4744_v57 = vld [vmem:[#allocation4 + $0xf9] sm:$0xff] }
 0x759   : > { %v6902_v33 = vpop.f32.mrf.mxu0  ;;  %v4742_v46 = vld [vmem:[#allocation4 + $0xe1] sm:$0xff] }
 0x75a   : > { %v4561_v45 = vmax.f32 %v4529_v43, 0.0  ;;  %v4527_v47 = vadd.f32 %v8958_v13, %v4488_v44  ;;  %v4491_v48 = vmul.f32 %v6902_v33, %v8952_v40  ;;  %4827 = vrot.lane.b32.xlu0 %v4743_v36, %s6993_s17  ;;  %4825 = vrot.lane.b32.xlu1 %v4742_v46, %s6993_s17  ;;  %v9150_v49 = vld [vmem:[#allocation4 + $0xe0] sm:$0xff] }
 0x75b   : > { %v4417_v30 = vpop.f32.mrf.mxu0  ;;  %4710 = vst.msk [vmem:[#allocation6 + $0x98] sm:$0xff] %vm1048_vm2, %v9150_v49 }
 0x75c   : > { %4649 = vst.msk [vmem:[#allocation4 + $0x121] sm:$0xff] %vm1048_vm2, %v4561_v45  ;;  %v4559_v52 = vmax.f32 %v4527_v47, 0.0  ;;  %v4530_v53 = vadd.f32 %v8958_v13, %v4491_v48  ;;  %v4489_v56 = vmul.f32 %v8952_v40, %v4417_v30 }
 0x75e   : > { %4647 = vst.msk [vmem:[#allocation4 + $0x109] sm:$0xff] %vm1048_vm2, %v4559_v52  ;;  %v4562_v58 = vmax.f32 %v4530_v53, 0.0  ;;  %v4528_v59 = vadd.f32 %v8958_v13, %v4489_v56  ;;  %4829 = vrot.lane.b32.xlu1 %v4744_v57, %s6993_s17 }
 0x760   : > { %4650 = vst.msk [vmem:[#allocation4 + $0x129] sm:$0xff] %vm1048_vm2, %v4562_v58  ;;  %v4560_v35 = vmax.f32 %v4528_v59, 0.0 }
 0x762   : > { %4648 = vst.msk [vmem:[#allocation4 + $0x111] sm:$0xff] %vm1048_vm2, %v4560_v35 }
 0x763   : > { %v9162_v60 = vld [vmem:[#allocation4 + $0x120] sm:$0xff] }
 0x764   : > { %4715 = vst.msk [vmem:[#allocation6 + $0xc0] sm:$0xff] %vm1048_vm2, %v9162_v60  ;;  %v4747_v39 = vld [vmem:[#allocation4 + $0x121] sm:$0xff] }
 0x765   : > { %v6905_v62 = vpop.f32.mrf.mxu0  ;;  %v4745_v10 = vld [vmem:[#allocation4 + $0x109] sm:$0xff] }
 0x766   : > { %v9166_v38 = vld [vmem:[#allocation4 + $0x108] sm:$0xff]  ;;  %v4494_v2 = vmul.f32 %v6905_v62, %v8952_v40  ;;  %4831 = vrot.lane.b32.xlu0 %v4745_v10, %s6993_s17 }
 0x767   : > { %4713 = vst.msk [vmem:[#allocation6 + $0xb0] sm:$0xff] %vm1048_vm2, %v9166_v38  ;;  %v4430_v5 = vpop.f32.mrf.mxu0  ;;  %v9174_v8 = vld [vmem:[#allocation4 + $0x128] sm:$0xff] }
 0x768   : > { %v4533_v37 = vadd.f32 %v8958_v13, %v4494_v2  ;;  %v4492_v6 = vmul.f32 %v8952_v40, %v4430_v5  ;;  %4716 = vst.msk [vmem:[#allocation6 + $0xc8] sm:$0xff] %vm1048_vm2, %v9174_v8  ;;  %v4748_v36 = vld [vmem:[#allocation4 + $0x129] sm:$0xff] }
 0x769   : > { %v6906_v9 = vpop.f32.mrf.mxu0  ;;  %v4746_v42 = vld [vmem:[#allocation4 + $0x111] sm:$0xff] }
 0x76a   : > { %v4565_v21 = vmax.f32 %v4533_v37, 0.0  ;;  %v4531_v41 = vadd.f32 %v8958_v13, %v4492_v6  ;;  %v4495_v23 = vmul.f32 %v6906_v9, %v8952_v40  ;;  %4835 = vrot.lane.b32.xlu0 %v4747_v39, %s6993_s17  ;;  %4833 = vrot.lane.b32.xlu1 %v4746_v42, %s6993_s17  ;;  %v9182_v28 = vld [vmem:[#allocation4 + $0x110] sm:$0xff] }
 0x76b   : > { %v4433_v31 = vpop.f32.mrf.mxu0  ;;  %4714 = vst.msk [vmem:[#allocation6 + $0xb8] sm:$0xff] %vm1048_vm2, %v9182_v28 }
 0x76c   : > { %4653 = vst.msk [vmem:[#allocation4 + $0x151] sm:$0xff] %vm1048_vm2, %v4565_v21  ;;  %v4563_v43 = vmax.f32 %v4531_v41, 0.0  ;;  %v4534_v44 = vadd.f32 %v8958_v13, %v4495_v23  ;;  %v4493_v33 = vmul.f32 %v8952_v40, %v4433_v31 }
 0x76e   : > { %4651 = vst.msk [vmem:[#allocation4 + $0x139] sm:$0xff] %vm1048_vm2, %v4563_v43  ;;  %v4566_v46 = vmax.f32 %v4534_v44, 0.0  ;;  %v4532_v45 = vadd.f32 %v8958_v13, %v4493_v33  ;;  %4837 = vrot.lane.b32.xlu1 %v4748_v36, %s6993_s17 }
 0x770   : > { %4654 = vst.msk [vmem:[#allocation4 + $0x159] sm:$0xff] %vm1048_vm2, %v4566_v46  ;;  %v4564_v47 = vmax.f32 %v4532_v45, 0.0  ;;  %v4916_v45 = vld [vmem:[#allocation4 + $0xa] sm:$0xff] }
 0x772   : > { %4652 = vst.msk [vmem:[#allocation4 + $0x141] sm:$0xff] %vm1048_vm2, %v4564_v47  ;;  %v9222_v47 = vld [vmem:[#allocation4 + $0x1a] sm:$0xff] }
 0x773   : > { %v4687_v48 = vld [vmem:[#allocation4 + $0x150] sm:$0xff] }
 0x774   : > { %4719 = vst.msk [vmem:[#allocation6 + $0xe0] sm:$0xff] %vm1048_vm2, %v4687_v48  ;;  %v4751_v10 = vld [vmem:[#allocation4 + $0x151] sm:$0xff] }
 0x775   : > { %v6909_v30 = vpop.f32.mrf.mxu0  ;;  %v4749_v52 = vld [vmem:[#allocation4 + $0x139] sm:$0xff] }
 0x776   : > { %v9195_v53 = vld [vmem:[#allocation4 + $0x138] sm:$0xff]  ;;  %v4498_v56 = vmul.f32 %v6909_v30, %v8952_v40  ;;  %4839 = vrot.lane.b32.xlu0 %v4749_v52, %s6993_s17  ;;  %v9229_v30 = vld [vmem:[#allocation4 + $0x22] sm:$0xff]  ;;  %v9235_v52 = vld [vmem:[#allocation4 + $0x4a] sm:$0xff] }
 0x777   : > { %4717 = vst.msk [vmem:[#allocation6 + $0xd0] sm:$0xff] %vm1048_vm2, %v9195_v53  ;;  %v4446_v57 = vpop.f32.mrf.mxu0  ;;  %v4688_v35 = vld [vmem:[#allocation4 + $0x158] sm:$0xff] }
 0x778   : > { %v4537_v58 = vadd.f32 %v8958_v13, %v4498_v56  ;;  %v4496_v59 = vmul.f32 %v8952_v40, %v4446_v57  ;;  %4720 = vst.msk [vmem:[#allocation6 + $0xe8] sm:$0xff] %vm1048_vm2, %v4688_v35  ;;  %v4752_v23 = vld [vmem:[#allocation4 + $0x159] sm:$0xff] }
 0x779   : > { %v6910_v62 = vpop.f32.mrf.mxu0  ;;  %v4750_v2 = vld [vmem:[#allocation4 + $0x141] sm:$0xff]  ;;  %v9227_v48 = vld [vmem:[#allocation4 + $0x32] sm:$0xff] }
 0x77a   : > { %v4569_v5 = vmax.f32 %v4537_v58, 0.0  ;;  %v4535_v37 = vadd.f32 %v8958_v13, %v4496_v59  ;;  %v4499_v6 = vmul.f32 %v6910_v62, %v8952_v40  ;;  %4843 = vrot.lane.b32.xlu0 %v4751_v10, %s6993_s17  ;;  %4841 = vrot.lane.b32.xlu1 %v4750_v2, %s6993_s17  ;;  %v4686_v9 = vld [vmem:[#allocation4 + $0x140] sm:$0xff]  ;;  %v9246_v59 = vld [vmem:[#allocation4 + $0x52] sm:$0xff]  ;;  %v9256_v2 = vld [vmem:[#allocation4 + $0x6a] sm:$0xff] }
 0x77b   : > { %v4449_v39 = vpop.f32.mrf.mxu0  ;;  %4718 = vst.msk [vmem:[#allocation6 + $0xd8] sm:$0xff] %vm1048_vm2, %v4686_v9  ;;  %v9237_v56 = vld [vmem:[#allocation4 + $0x3a] sm:$0xff]  ;;  %v9244_v58 = vld [vmem:[#allocation4 + $0x62] sm:$0xff] }
 0x77c   : > { %4657 = vst.msk [vmem:[#allocation4 + $0x181] sm:$0xff] %vm1048_vm2, %v4569_v5  ;;  %v4567_v42 = vmax.f32 %v4535_v37, 0.0  ;;  %v4538_v21 = vadd.f32 %v8958_v13, %v4499_v6  ;;  %v4497_v41 = vmul.f32 %v8952_v40, %v4449_v39  ;;  %v4915_v40 = vld [vmem:[#allocation4 + $0x2] sm:$0xff]  ;;  %v9254_v10 = vld [vmem:[#allocation4 + $0x7a] sm:$0xff]  ;;  %v9264_v6 = vld [vmem:[#allocation4 + $0x92] sm:$0xff] }
 0x77d   : > { %v9266_v9 = vld [vmem:[#allocation4 + $0x82] sm:$0xff] }
 0x77e   : > { %4655 = vst.msk [vmem:[#allocation4 + $0x169] sm:$0xff] %vm1048_vm2, %v4567_v42  ;;  %v4570_v31 = vmax.f32 %v4538_v21, 0.0  ;;  %v4536_v43 = vadd.f32 %v8958_v13, %v4497_v41  ;;  %4845 = vrot.lane.b32.xlu1 %v4752_v23, %s6993_s17  ;;  %v9274_v21 = vld [vmem:[#allocation4 + $0xaa] sm:$0xff]  ;;  %v9276_v41 = vld [vmem:[#allocation4 + $0x9a] sm:$0xff] }
 0x780   : > { %4658 = vst.msk [vmem:[#allocation4 + $0x189] sm:$0xff] %vm1048_vm2, %v4570_v31  ;;  %v4568_v44 = vmax.f32 %v4536_v43, 0.0  ;;  %v9284_v43 = vld [vmem:[#allocation4 + $0xc2] sm:$0xff] }
 0x782   : > { %4656 = vst.msk [vmem:[#allocation4 + $0x171] sm:$0xff] %vm1048_vm2, %v4568_v44  ;;  %v9286_v44 = vld [vmem:[#allocation4 + $0xb2] sm:$0xff] }
 0x785   : > { %v4753_v33 = vld [vmem:[#allocation4 + $0x169] sm:$0xff] }
 0x786   : > { %v4689_v36 = vld [vmem:[#allocation4 + $0x168] sm:$0xff]  ;;  %4847 = vrot.lane.b32.xlu0 %v4753_v33, %s6993_s17 }
 0x787   : > { %4721 = vst.msk [vmem:[#allocation6 + $0xf0] sm:$0xff] %vm1048_vm2, %v4689_v36 }
 0x789   : > { %v4754_v46 = vld [vmem:[#allocation4 + $0x171] sm:$0xff] }
 0x78a   : > { %4979 = vrot.lane.b32.xlu0 %v4915_v40, %s6994_s18  ;;  %4849 = vrot.lane.b32.xlu1 %v4754_v46, %s6993_s17  ;;  %v4690_v13 = vld [vmem:[#allocation4 + $0x170] sm:$0xff]  ;;  %v9294_v40 = vld [vmem:[#allocation4 + $0xda] sm:$0xff] }
 0x78b   : > { %4722 = vst.msk [vmem:[#allocation6 + $0xf8] sm:$0xff] %vm1048_vm2, %v4690_v13  ;;  %v9296_v46 = vld [vmem:[#allocation4 + $0xca] sm:$0xff] }
 0x78e   : > { %4983 = vrot.lane.b32.xlu0 %v9222_v47, %s6994_s18  ;;  %4981 = vrot.lane.b32.xlu1 %v4916_v45, %s6994_s18  ;;  %v4935_v45 = vld [vmem:[#allocation4 + $0xf2] sm:$0xff] }
 0x792   : > { %4987 = vrot.lane.b32.xlu0 %v9227_v48, %s6994_s18  ;;  %4985 = vrot.lane.b32.xlu1 %v9229_v30, %s6994_s18 }
 0x796   : > { %4991 = vrot.lane.b32.xlu0 %v9235_v52, %s6994_s18  ;;  %4989 = vrot.lane.b32.xlu1 %v9237_v56, %s6994_s18 }
 0x798   : > { %v4792_v57 = vpop.permute.xlu0 %4791 }
 0x799   : > { %4885 = vst.msk [vmem:[#allocation6 + $0x10] sm:$0xff] %vm1433_vm4, %v4792_v57  ;;  %v9303_v57 = vld [vmem:[#allocation4 + $0xe2] sm:$0xff] }
 0x79a   : > { %4995 = vrot.lane.b32.xlu0 %v9244_v58, %s6994_s18  ;;  %4993 = vrot.lane.b32.xlu1 %v9246_v59, %s6994_s18 }
 0x79c   : > { %v4796_v35 = vpop.permute.xlu0 %4795  ;;  %v4794_v62 = vpop.permute.xlu1 %4793 }
 0x79d   : > { %4887 = vst.msk [vmem:[#allocation6 + $0x20] sm:$0xff] %vm1433_vm4, %v4796_v35  ;;  %4886 = vst.msk [vmem:[#allocation6 + $0x18] sm:$0xff] %vm1433_vm4, %v4794_v62  ;;  %v4937_v35 = vld [vmem:[#allocation4 + $0x10a] sm:$0xff]  ;;  %v4936_v62 = vld [vmem:[#allocation4 + $0xfa] sm:$0xff] }
 0x79e   : > { %4999 = vrot.lane.b32.xlu0 %v9254_v10, %s6994_s18  ;;  %4997 = vrot.lane.b32.xlu1 %v9256_v2, %s6994_s18 }
 0x7a0   : > { %v4798_v5 = vpop.permute.xlu1 %4797  ;;  %v4800_v37 = vpop.permute.xlu0 %4799 }
 0x7a1   : > { %4888 = vst.msk [vmem:[#allocation6 + $0x28] sm:$0xff] %vm1433_vm4, %v4798_v5  ;;  %4889 = vst.msk [vmem:[#allocation6 + $0x30] sm:$0xff] %vm1433_vm4, %v4800_v37  ;;  %v4939_v37 = vld [vmem:[#allocation4 + $0x122] sm:$0xff] }
 0x7a2   : > { %5003 = vrot.lane.b32.xlu0 %v9264_v6, %s6994_s18  ;;  %5001 = vrot.lane.b32.xlu1 %v9266_v9, %s6994_s18 }
 0x7a4   : > { %v4804_v39 = vpop.permute.xlu0 %4803  ;;  %v4802_v42 = vpop.permute.xlu1 %4801 }
 0x7a5   : > { %4891 = vst.msk [vmem:[#allocation6 + $0x40] sm:$0xff] %vm1433_vm4, %v4804_v39  ;;  %4890 = vst.msk [vmem:[#allocation6 + $0x38] sm:$0xff] %vm1433_vm4, %v4802_v42  ;;  %v4938_v39 = vld [vmem:[#allocation4 + $0x112] sm:$0xff] }
 0x7a6   : > { %5007 = vrot.lane.b32.xlu0 %v9274_v21, %s6994_s18  ;;  %5005 = vrot.lane.b32.xlu1 %v9276_v41, %s6994_s18 }
 0x7a8   : > { %v4806_v23 = vpop.permute.xlu1 %4805  ;;  %v4808_v31 = vpop.permute.xlu0 %4807 }
 0x7a9   : > { %4892 = vst.msk [vmem:[#allocation6 + $0x48] sm:$0xff] %vm1433_vm4, %v4806_v23  ;;  %4893 = vst.msk [vmem:[#allocation6 + $0x50] sm:$0xff] %vm1433_vm4, %v4808_v31  ;;  %v4941_v31 = vld [vmem:[#allocation4 + $0x13a] sm:$0xff] }
 0x7aa   : > { %5011 = vrot.lane.b32.xlu0 %v9284_v43, %s6994_s18  ;;  %5009 = vrot.lane.b32.xlu1 %v9286_v44, %s6994_s18 }
 0x7ac   : > { %v4812_v33 = vpop.permute.xlu0 %4811  ;;  %v4810_v36 = vpop.permute.xlu1 %4809 }
 0x7ad   : > { %4895 = vst.msk [vmem:[#allocation6 + $0x60] sm:$0xff] %vm1433_vm4, %v4812_v33  ;;  %4894 = vst.msk [vmem:[#allocation6 + $0x58] sm:$0xff] %vm1433_vm4, %v4810_v36  ;;  %v4940_v33 = vld [vmem:[#allocation4 + $0x12a] sm:$0xff] }
 0x7ae   : > { %5015 = vrot.lane.b32.xlu0 %v9294_v40, %s6994_s18  ;;  %5013 = vrot.lane.b32.xlu1 %v9296_v46, %s6994_s18 }
 0x7b0   : > { %v4814_v13 = vpop.permute.xlu1 %4813 }
 0x7b1   : > { %4896 = vst.msk [vmem:[#allocation6 + $0x68] sm:$0xff] %vm1433_vm4, %v4814_v13  ;;  %v4943_v13 = vld [vmem:[#allocation4 + $0x152] sm:$0xff] }
 0x7b2   : > { %5019 = vrot.lane.b32.xlu0 %v4935_v45, %s6994_s18  ;;  %5017 = vrot.lane.b32.xlu1 %v9303_v57, %s6994_s18  ;;  %v4942_v45 = vld [vmem:[#allocation4 + $0x142] sm:$0xff] }
 0x7b6   : > { %5023 = vrot.lane.b32.xlu0 %v4937_v35, %s6994_s18  ;;  %5021 = vrot.lane.b32.xlu1 %v4936_v62, %s6994_s18  ;;  %v4945_v35 = vld [vmem:[#allocation4 + $0x16a] sm:$0xff]  ;;  %v4944_v62 = vld [vmem:[#allocation4 + $0x15a] sm:$0xff] }
 0x7b8   : > { %v4816_v5 = vpop.permute.xlu0 %4815 }
 0x7b9   : > { %4897 = vst.msk [vmem:[#allocation6 + $0x70] sm:$0xff] %vm1433_vm4, %v4816_v5 }
 0x7ba   : > { %5027 = vrot.lane.b32.xlu0 %v4939_v37, %s6994_s18  ;;  %5025 = vrot.lane.b32.xlu1 %v4938_v39, %s6994_s18  ;;  %v4946_v37 = vld [vmem:[#allocation4 + $0x172] sm:$0xff] }
 0x7bc   : > { %v4820_v42 = vpop.permute.xlu0 %4819  ;;  %v4818_v23 = vpop.permute.xlu1 %4817 }
 0x7bd   : > { %4899 = vst.msk [vmem:[#allocation6 + $0x80] sm:$0xff] %vm1433_vm4, %v4820_v42  ;;  %4898 = vst.msk [vmem:[#allocation6 + $0x78] sm:$0xff] %vm1433_vm4, %v4818_v23 }
 0x7be   : > { %5031 = vrot.lane.b32.xlu0 %v4941_v31, %s6994_s18  ;;  %5029 = vrot.lane.b32.xlu1 %v4940_v33, %s6994_s18 }
 0x7c0   : > { %v4822_v36 = vpop.permute.xlu1 %4821 }
 0x7c1   : > { %4900 = vst.msk [vmem:[#allocation6 + $0x88] sm:$0xff] %vm1433_vm4, %v4822_v36 }
 0x7c2   : > { %5035 = vrot.lane.b32.xlu0 %v4943_v13, %s6994_s18  ;;  %5033 = vrot.lane.b32.xlu1 %v4942_v45, %s6994_s18 }
 0x7c6   : > { %5039 = vrot.lane.b32.xlu0 %v4945_v35, %s6994_s18  ;;  %5037 = vrot.lane.b32.xlu1 %v4944_v62, %s6994_s18 }
 0x7c8   : > { %v4824_v5 = vpop.permute.xlu0 %4823 }
 0x7c9   : > { %4901 = vst.msk [vmem:[#allocation6 + $0x90] sm:$0xff] %vm1433_vm4, %v4824_v5 }
 0x7ca   : > { %5171 = vrot.lane.b32.xlu0 %v8989_v55, %s6995_s19  ;;  %5041 = vrot.lane.b32.xlu1 %v4946_v37, %s6994_s18 }
 0x7cc   : > { %v4828_v39 = vpop.permute.xlu0 %4827  ;;  %v4826_v42 = vpop.permute.xlu1 %4825 }
 0x7cd   : > { %4903 = vst.msk [vmem:[#allocation6 + $0xa0] sm:$0xff] %vm1433_vm4, %v4828_v39  ;;  %4902 = vst.msk [vmem:[#allocation6 + $0x98] sm:$0xff] %vm1433_vm4, %v4826_v42  ;;  %v6978_v42 = vld [vmem:[%s10027_s3 + $0x20] ss:$0 sps:$4 sm:$0xff]  }
 0x7ce   : > { %5175 = vrot.lane.b32.xlu0 %v8980_v50, %s6995_s19  ;;  %5173 = vrot.lane.b32.xlu1 %v9016_v3, %s6995_s19 }
 0x7cf   : > { %6954 = vmatprep.subr.msk.bf16.mxu1 %vm4296_vm11, %v6978_v42 }
 0x7d0   : > { %v4830_v23 = vpop.permute.xlu1 %4829 }
 0x7d1   : > { %4904 = vst.msk [vmem:[#allocation6 + $0xa8] sm:$0xff] %vm1433_vm4, %v4830_v23 }
 0x7d2   : > { %5179 = vrot.lane.b32.xlu0 %v9031_v15, %s6995_s19  ;;  %5177 = vrot.lane.b32.xlu1 %v9001_v61, %s6995_s19 }
 0x7d6   : > { %5183 = vrot.lane.b32.xlu0 %v9020_v0, %s6995_s19  ;;  %5181 = vrot.lane.b32.xlu1 %v9055_v20, %s6995_s19 }
 0x7d8   : > { %v4832_v55 = vpop.permute.xlu0 %4831 }
 0x7d9   : > { %4905 = vst.msk [vmem:[#allocation6 + $0xb0] sm:$0xff] %vm1433_vm4, %v4832_v55  ;;  %v6979_v55 = vld [vmem:[%s10027_s3 + $0x18] sm:$0xff]  }
 0x7da   : > { %5187 = vrot.lane.b32.xlu0 %v9065_v22, %s6995_s19  ;;  %5185 = vrot.lane.b32.xlu1 %v9042_v11, %s6995_s19 }
 0x7dc   : > { %v4836_v3 = vpop.permute.xlu0 %4835  ;;  %v4834_v31 = vpop.permute.xlu1 %4833 }
 0x7dd   : > { %4907 = vst.msk [vmem:[#allocation6 + $0xc0] sm:$0xff] %vm1433_vm4, %v4836_v3  ;;  %4906 = vst.msk [vmem:[#allocation6 + $0xb8] sm:$0xff] %vm1433_vm4, %v4834_v31 }
 0x7de   : > { %5191 = vrot.lane.b32.xlu0 %v9059_v17, %s6995_s19  ;;  %5189 = vrot.lane.b32.xlu1 %v9086_v25, %s6995_s19 }
 0x7e0   : > { %v4838_v33 = vpop.permute.xlu1 %4837 }
 0x7e1   : > { %4908 = vst.msk [vmem:[#allocation6 + $0xc8] sm:$0xff] %vm1433_vm4, %v4838_v33 }
 0x7e2   : > { %5195 = vrot.lane.b32.xlu0 %v9102_v29, %s6995_s19  ;;  %5193 = vrot.lane.b32.xlu1 %v9075_v27, %s6995_s19 }
 0x7e6   : > { %5199 = vrot.lane.b32.xlu0 %v9098_v51, %s6995_s19  ;;  %5197 = vrot.lane.b32.xlu1 %v9118_v4, %s6995_s19 }
 0x7e8   : > { %v4840_v36 = vpop.permute.xlu0 %4839 }
 0x7e9   : > { %4909 = vst.msk [vmem:[#allocation6 + $0xd0] sm:$0xff] %vm1433_vm4, %v4840_v36 }
 0x7ea   : > { %5203 = vrot.lane.b32.xlu0 %v9134_v26, %s6995_s19  ;;  %5201 = vrot.lane.b32.xlu1 %v9110_v34, %s6995_s19 }
 0x7ec   : > { %v4844_v13 = vpop.permute.xlu0 %4843  ;;  %v4842_v45 = vpop.permute.xlu1 %4841 }
 0x7ed   : > { %4911 = vst.msk [vmem:[#allocation6 + $0xe0] sm:$0xff] %vm1433_vm4, %v4844_v13  ;;  %4910 = vst.msk [vmem:[#allocation6 + $0xd8] sm:$0xff] %vm1433_vm4, %v4842_v45 }
 0x7ee   : > { %5207 = vrot.lane.b32.xlu0 %v9130_v19, %s6995_s19  ;;  %5205 = vrot.lane.b32.xlu1 %v9150_v49, %s6995_s19 }
 0x7f0   : > { %v4846_v35 = vpop.permute.xlu1 %4845 }
 0x7f1   : > { %4912 = vst.msk [vmem:[#allocation6 + $0xe8] sm:$0xff] %vm1433_vm4, %v4846_v35 }
 0x7f2   : > { %5211 = vrot.lane.b32.xlu0 %v9166_v38, %s6995_s19  ;;  %5209 = vrot.lane.b32.xlu1 %v9142_v24, %s6995_s19 }
 0x7f6   : > { %5215 = vrot.lane.b32.xlu0 %v9162_v60, %s6995_s19  ;;  %5213 = vrot.lane.b32.xlu1 %v9182_v28, %s6995_s19 }
 0x7f8   : > { %v4848_v62 = vpop.permute.xlu0 %4847 }
 0x7f9   : > { %4913 = vst.msk [vmem:[#allocation6 + $0xf0] sm:$0xff] %vm1433_vm4, %v4848_v62 }
 0x7fa   : > { %5219 = vrot.lane.b32.xlu0 %v9195_v53, %s6995_s19  ;;  %5217 = vrot.lane.b32.xlu1 %v9174_v8, %s6995_s19 }
 0x7fc   : > { %v4980_v5 = vpop.permute.xlu0 %4979  ;;  %v4850_v37 = vpop.permute.xlu1 %4849 }
 0x7fd   : > { %5075 = vst.msk [vmem:[#allocation6] sm:$0xff] %vm1818_vm5, %v4980_v5 }
 0x7fe   : > { %4914 = vst.msk [vmem:[#allocation6 + $0xf8] sm:$0xff] %vm1433_vm4, %v4850_v37  ;;  %5365 = vrot.lane.b32.xlu0 %v9005_v1, %s6996_s20  ;;  %5363 = vrot.lane.b32.xlu1 %v8987_v54, %s6996_s20 }
 0x800   : > { %v4984_v60 = vpop.permute.xlu0 %4983  ;;  %v4982_v39 = vpop.permute.xlu1 %4981 }
 0x801   : > { %5077 = vst.msk [vmem:[#allocation6 + $0x10] sm:$0xff] %vm1818_vm5, %v4984_v60  ;;  %5076 = vst.msk [vmem:[#allocation6 + $0x8] sm:$0xff] %vm1818_vm5, %v4982_v39 }
 0x802   : > { %5369 = vrot.lane.b32.xlu0 %v9027_v7, %s6996_s20  ;;  %5367 = vrot.lane.b32.xlu1 %v9003_v63, %s6996_s20 }
 0x804   : > { %v4988_v8 = vpop.permute.xlu0 %4987  ;;  %v4986_v53 = vpop.permute.xlu1 %4985 }
 0x805   : > { %5079 = vst.msk [vmem:[#allocation6 + $0x20] sm:$0xff] %vm1818_vm5, %v4988_v8  ;;  %5078 = vst.msk [vmem:[#allocation6 + $0x18] sm:$0xff] %vm1818_vm5, %v4986_v53 }
 0x806   : > { %5557 = vrot.lane.b32.xlu0 %v9229_v30, %s6997_s21  ;;  %5555 = vrot.lane.b32.xlu1 %v9222_v47, %s6997_s21  ;;  %v6393_v47 = vsel %vm4296_vm11, %v6978_v42, 0 }
 0x807   : > { %6912 = vmatpush3.bf16.msra.mxu1 %v6393_v47 }
 0x808   : > { %v4992_v54 = vpop.permute.xlu0 %4991  ;;  %v4990_v1 = vpop.permute.xlu1 %4989  ;;  %6913 = vmatprep.subr.bf16.mxu1 %v6979_v55 }
 0x809   : > { %5081 = vst.msk [vmem:[#allocation6 + $0x30] sm:$0xff] %vm1818_vm5, %v4992_v54  ;;  %5080 = vst.msk [vmem:[#allocation6 + $0x28] sm:$0xff] %vm1818_vm5, %v4990_v1 }
 0x80a   : > { %5561 = vrot.lane.b32.xlu0 %v9237_v56, %s6997_s21  ;;  %5559 = vrot.lane.b32.xlu1 %v9227_v48, %s6997_s21 }
 0x80b   : > { %6914 = vmatpush3.bf16.msra.mxu1 %v6979_v55  ;;  %v5310_v55 = vld [vmem:[#allocation4 + $0x99] sm:$0xff] }
 0x80c   : > { %v4996_v30 = vpop.permute.xlu0 %4995  ;;  %v4994_v23 = vpop.permute.xlu1 %4993 }
 0x80d   : > { %5083 = vst.msk [vmem:[#allocation6 + $0x40] sm:$0xff] %vm1818_vm5, %v4996_v30  ;;  %5082 = vst.msk [vmem:[#allocation6 + $0x38] sm:$0xff] %vm1818_vm5, %v4994_v23 }
 0x80e   : > { %5750 = vrot.lane.b32.xlu0 %v9001_v61, %s6998_s22  ;;  %5748 = vrot.lane.b32.xlu1 %v8980_v50, %s6998_s22  ;;  %v6980_v50 = vld [vmem:[%s10027_s3 + $0x10] sm:$0xff]  }
 0x80f   : > { %6915 = vmatprep.subr.bf16.mxu1 %v6980_v50 }
 0x810   : > { %v5000_v3 = vpop.permute.xlu0 %4999  ;;  %v4998_v31 = vpop.permute.xlu1 %4997  ;;  %6916 = vmatpush3.bf16.msra.mxu1 %v6980_v50 }
 0x811   : > { %5085 = vst.msk [vmem:[#allocation6 + $0x50] sm:$0xff] %vm1818_vm5, %v5000_v3  ;;  %5084 = vst.msk [vmem:[#allocation6 + $0x48] sm:$0xff] %vm1818_vm5, %v4998_v31  ;;  %v5309_v3 = vld [vmem:[#allocation4 + $0x91] sm:$0xff] }
 0x812   : > { %5754 = vrot.lane.b32.xlu0 %v9055_v20, %s6998_s22  ;;  %5752 = vrot.lane.b32.xlu1 %v9031_v15, %s6998_s22  ;;  %v6981_v15 = vld [vmem:[%s10027_s3 + $0x8] sm:$0xff]  }
 0x813   : > { %6917 = vmatprep.subr.bf16.mxu1 %v6981_v15 }
 0x814   : > { %v5004_v61 = vpop.permute.xlu0 %5003  ;;  %v5002_v33 = vpop.permute.xlu1 %5001  ;;  %6918 = vmatpush3.bf16.msra.mxu1 %v6981_v15 }
 0x815   : > { %5087 = vst.msk [vmem:[#allocation6 + $0x60] sm:$0xff] %vm1818_vm5, %v5004_v61  ;;  %5086 = vst.msk [vmem:[#allocation6 + $0x58] sm:$0xff] %vm1818_vm5, %v5002_v33 }
 0x816   : > { %5942 = vrot.lane.b32.xlu0 %v9027_v7, %s6999_s23  ;;  %5940 = vrot.lane.b32.xlu1 %v9003_v63, %s6999_s23  ;;  %v6982_v63 = vld [vmem:[%s10027_s3] sm:$0xff]  }
 0x817   : > { %6919 = vmatprep.subr.bf16.mxu1 %v6982_v63 }
 0x818   : > { %v5008_v20 = vpop.permute.xlu0 %5007  ;;  %v5006_v36 = vpop.permute.xlu1 %5005  ;;  %6920 = vmatpush3.bf16.msra.mxu1 %v6982_v63 }
 0x819   : > { %5089 = vst.msk [vmem:[#allocation6 + $0x70] sm:$0xff] %vm1818_vm5, %v5008_v20  ;;  %5088 = vst.msk [vmem:[#allocation6 + $0x68] sm:$0xff] %vm1818_vm5, %v5006_v36 }
 0x81a   : > { %5946 = vrot.lane.b32.xlu0 %v9046_v16, %s6999_s23  ;;  %5944 = vrot.lane.b32.xlu1 %v9029_v14, %s6999_s23 }
 0x81c   : > { %v5012_v7 = vpop.permute.xlu0 %5011  ;;  %v5010_v13 = vpop.permute.xlu1 %5009 }
 0x81d   : > { %5091 = vst.msk [vmem:[#allocation6 + $0x80] sm:$0xff] %vm1818_vm5, %v5012_v7  ;;  %5090 = vst.msk [vmem:[#allocation6 + $0x78] sm:$0xff] %vm1818_vm5, %v5010_v13  ;;  %v5886_v7 = vld [vmem:[#allocation4 + $0xa9] sm:$0xff] }
 0x81e   : > { %6134 = vrot.lane.b32.xlu0 %v9237_v56, %s7000_s13  ;;  %6132 = vrot.lane.b32.xlu1 %v9227_v48, %s7000_s13 }
 0x820   : > { %v5016_v45 = vpop.permute.xlu0 %5015  ;;  %v5014_v35 = vpop.permute.xlu1 %5013 }
 0x821   : > { %5093 = vst.msk [vmem:[#allocation6 + $0x90] sm:$0xff] %vm1818_vm5, %v5016_v45  ;;  %5092 = vst.msk [vmem:[#allocation6 + $0x88] sm:$0xff] %vm1818_vm5, %v5014_v35 }
 0x822   : > { %6138 = vrot.lane.b32.xlu0 %v9246_v59, %s7000_s13  ;;  %6136 = vrot.lane.b32.xlu1 %v9235_v52, %s7000_s13 }
 0x824   : > { %v5020_v62 = vpop.permute.xlu0 %5019  ;;  %v5018_v5 = vpop.permute.xlu1 %5017 }
 0x825   : > { %5095 = vst.msk [vmem:[#allocation6 + $0xa0] sm:$0xff] %vm1818_vm5, %v5020_v62  ;;  %5094 = vst.msk [vmem:[#allocation6 + $0x98] sm:$0xff] %vm1818_vm5, %v5018_v5 }
 0x826   : > { %5373 = vrot.lane.b32.xlu0 %v9046_v16, %s6996_s20  ;;  %5371 = vrot.lane.b32.xlu1 %v9029_v14, %s6996_s20 }
 0x828   : > { %v5024_v48 = vpop.permute.xlu0 %5023  ;;  %v5022_v56 = vpop.permute.xlu1 %5021 }
 0x829   : > { %5097 = vst.msk [vmem:[#allocation6 + $0xb0] sm:$0xff] %vm1818_vm5, %v5024_v48  ;;  %5096 = vst.msk [vmem:[#allocation6 + $0xa8] sm:$0xff] %vm1818_vm5, %v5022_v56  ;;  %v5314_v48 = vld [vmem:[#allocation4 + $0xc9] sm:$0xff]  ;;  %v5313_v56 = vld [vmem:[#allocation4 + $0xc1] sm:$0xff] }
 0x82a   : > { %5377 = vrot.lane.b32.xlu0 %v9063_v18, %s6996_s20  ;;  %5375 = vrot.lane.b32.xlu1 %v9044_v12, %s6996_s20 }
 0x82c   : > { %v5028_v37 = vpop.permute.xlu0 %5027  ;;  %v5026_v60 = vpop.permute.xlu1 %5025 }
 0x82d   : > { %5099 = vst.msk [vmem:[#allocation6 + $0xc0] sm:$0xff] %vm1818_vm5, %v5028_v37  ;;  %5098 = vst.msk [vmem:[#allocation6 + $0xb8] sm:$0xff] %vm1818_vm5, %v5026_v60 }
 0x82e   : > { %5565 = vrot.lane.b32.xlu0 %v9246_v59, %s6997_s21  ;;  %5563 = vrot.lane.b32.xlu1 %v9235_v52, %s6997_s21 }
 0x830   : > { %v5032_v14 = vpop.permute.xlu0 %5031  ;;  %v5030_v16 = vpop.permute.xlu1 %5029 }
 0x831   : > { %5101 = vst.msk [vmem:[#allocation6 + $0xd0] sm:$0xff] %vm1818_vm5, %v5032_v14  ;;  %5100 = vst.msk [vmem:[#allocation6 + $0xc8] sm:$0xff] %vm1818_vm5, %v5030_v16 }
 0x832   : > { %5569 = vrot.lane.b32.xlu0 %v9256_v2, %s6997_s21  ;;  %5567 = vrot.lane.b32.xlu1 %v9244_v58, %s6997_s21 }
 0x834   : > { %v5036_v12 = vpop.permute.xlu0 %5035  ;;  %v5034_v18 = vpop.permute.xlu1 %5033 }
 0x835   : > { %5103 = vst.msk [vmem:[#allocation6 + $0xe0] sm:$0xff] %vm1818_vm5, %v5036_v12  ;;  %5102 = vst.msk [vmem:[#allocation6 + $0xd8] sm:$0xff] %vm1818_vm5, %v5034_v18 }
 0x836   : > { %5758 = vrot.lane.b32.xlu0 %v9042_v11, %s6998_s22  ;;  %5756 = vrot.lane.b32.xlu1 %v9020_v0, %s6998_s22  ;;  %v5881_v11 = vld [vmem:[#allocation4 + $0x69] sm:$0xff]  ;;  %v5880_v0 = vld [vmem:[#allocation4 + $0x61] sm:$0xff] }
 0x838   : > { %v5040_v52 = vpop.permute.xlu0 %5039  ;;  %v5038_v59 = vpop.permute.xlu1 %5037 }
 0x839   : > { %5105 = vst.msk [vmem:[#allocation6 + $0xf0] sm:$0xff] %vm1818_vm5, %v5040_v52  ;;  %5104 = vst.msk [vmem:[#allocation6 + $0xe8] sm:$0xff] %vm1818_vm5, %v5038_v59 }
 0x83a   : > { %5762 = vrot.lane.b32.xlu0 %v9086_v25, %s6998_s22  ;;  %5760 = vrot.lane.b32.xlu1 %v9065_v22, %s6998_s22  ;;  %v5882_v25 = vld [vmem:[#allocation4 + $0x79] sm:$0xff] }
 0x83c   : > { %v5172_v39 = vpop.permute.xlu0 %5171  ;;  %v5042_v8 = vpop.permute.xlu1 %5041 }
 0x83d   : > { %5267 = vst.msk [vmem:[#allocation6] sm:$0xff] %vm2203_vm6, %v5172_v39  ;;  %v5890_v39 = vld [vmem:[#allocation4 + $0xd9] sm:$0xff] }
 0x83e   : > { %5106 = vst.msk [vmem:[#allocation6 + $0xf8] sm:$0xff] %vm1818_vm5, %v5042_v8  ;;  %5950 = vrot.lane.b32.xlu0 %v5881_v11, %s6999_s23  ;;  %5948 = vrot.lane.b32.xlu1 %v5880_v0, %s6999_s23 }
 0x840   : > { %v5176_v53 = vpop.permute.xlu0 %5175  ;;  %v5174_v54 = vpop.permute.xlu1 %5173 }
 0x841   : > { %5269 = vst.msk [vmem:[#allocation6 + $0x10] sm:$0xff] %vm2203_vm6, %v5176_v53  ;;  %5268 = vst.msk [vmem:[#allocation6 + $0x8] sm:$0xff] %vm2203_vm6, %v5174_v54 }
 0x842   : > { %5954 = vrot.lane.b32.xlu0 %v9077_v32, %s6999_s23  ;;  %5952 = vrot.lane.b32.xlu1 %v5882_v25, %s6999_s23 }
 0x844   : > { %v5180_v22 = vpop.permute.xlu0 %5179  ;;  %v5178_v1 = vpop.permute.xlu1 %5177 }
 0x845   : > { %5271 = vst.msk [vmem:[#allocation6 + $0x20] sm:$0xff] %vm2203_vm6, %v5180_v22  ;;  %5270 = vst.msk [vmem:[#allocation6 + $0x18] sm:$0xff] %vm2203_vm6, %v5178_v1 }
 0x846   : > { %6142 = vrot.lane.b32.xlu0 %v9256_v2, %s7000_s13  ;;  %6140 = vrot.lane.b32.xlu1 %v9244_v58, %s7000_s13  ;;  %v5308_v2 = vld [vmem:[#allocation4 + $0x81] sm:$0xff] }
 0x848   : > { %v5184_v42 = vpop.permute.xlu0 %5183  ;;  %v5182_v30 = vpop.permute.xlu1 %5181 }
 0x849   : > { %5273 = vst.msk [vmem:[#allocation6 + $0x30] sm:$0xff] %vm2203_vm6, %v5184_v42  ;;  %5272 = vst.msk [vmem:[#allocation6 + $0x28] sm:$0xff] %vm2203_vm6, %v5182_v30 }
 0x84a   : > { %6146 = vrot.lane.b32.xlu0 %v9266_v9, %s7000_s13  ;;  %6144 = vrot.lane.b32.xlu1 %v9254_v10, %s7000_s13 }
 0x84c   : > { %v5188_v32 = vpop.permute.xlu0 %5187  ;;  %v5186_v23 = vpop.permute.xlu1 %5185 }
 0x84d   : > { %5275 = vst.msk [vmem:[#allocation6 + $0x40] sm:$0xff] %vm2203_vm6, %v5188_v32  ;;  %5274 = vst.msk [vmem:[#allocation6 + $0x38] sm:$0xff] %vm2203_vm6, %v5186_v23  ;;  %v5317_v32 = vld [vmem:[#allocation4 + $0xf1] sm:$0xff] }
 0x84e   : > { %5381 = vrot.lane.b32.xlu0 %v5308_v2, %s6996_s20  ;;  %5379 = vrot.lane.b32.xlu1 %v5882_v25, %s6996_s20 }
 0x850   : > { %v5192_v58 = vpop.permute.xlu0 %5191  ;;  %v5190_v47 = vpop.permute.xlu1 %5189 }
 0x851   : > { %5277 = vst.msk [vmem:[#allocation6 + $0x50] sm:$0xff] %vm2203_vm6, %v5192_v58  ;;  %5276 = vst.msk [vmem:[#allocation6 + $0x48] sm:$0xff] %vm2203_vm6, %v5190_v47  ;;  %v5508_v58 = vld [vmem:[#allocation4 + $0xe2] sm:$0xff]  ;;  %v5507_v47 = vld [vmem:[#allocation4 + $0xda] sm:$0xff] }
 0x852   : > { %5385 = vrot.lane.b32.xlu0 %v5310_v55, %s6996_s20  ;;  %5383 = vrot.lane.b32.xlu1 %v5309_v3, %s6996_s20 }
 0x854   : > { %v5196_v31 = vpop.permute.xlu0 %5195  ;;  %v5194_v50 = vpop.permute.xlu1 %5193 }
 0x855   : > { %5279 = vst.msk [vmem:[#allocation6 + $0x60] sm:$0xff] %vm2203_vm6, %v5196_v31  ;;  %5278 = vst.msk [vmem:[#allocation6 + $0x58] sm:$0xff] %vm2203_vm6, %v5194_v50  ;;  %v5510_v31 = vld [vmem:[#allocation4 + $0xfa] sm:$0xff]  ;;  %v5509_v50 = vld [vmem:[#allocation4 + $0xf2] sm:$0xff] }
 0x856   : > { %5573 = vrot.lane.b32.xlu0 %v9266_v9, %s6997_s21  ;;  %5571 = vrot.lane.b32.xlu1 %v9254_v10, %s6997_s21 }
 0x858   : > { %v5200_v61 = vpop.permute.xlu0 %5199  ;;  %v5198_v33 = vpop.permute.xlu1 %5197 }
 0x859   : > { %5281 = vst.msk [vmem:[#allocation6 + $0x70] sm:$0xff] %vm2203_vm6, %v5200_v61  ;;  %5280 = vst.msk [vmem:[#allocation6 + $0x68] sm:$0xff] %vm2203_vm6, %v5198_v33 }
 0x85a   : > { %5577 = vrot.lane.b32.xlu0 %v9276_v41, %s6997_s21  ;;  %5575 = vrot.lane.b32.xlu1 %v9264_v6, %s6997_s21 }
 0x85c   : > { %v5204_v15 = vpop.permute.xlu0 %5203  ;;  %v5202_v20 = vpop.permute.xlu1 %5201 }
 0x85d   : > { %5283 = vst.msk [vmem:[#allocation6 + $0x80] sm:$0xff] %vm2203_vm6, %v5204_v15  ;;  %5282 = vst.msk [vmem:[#allocation6 + $0x78] sm:$0xff] %vm2203_vm6, %v5202_v20 }
 0x85e   : > { %5766 = vrot.lane.b32.xlu0 %v9075_v27, %s6998_s22  ;;  %5764 = vrot.lane.b32.xlu1 %v9059_v17, %s6998_s22 }
 0x860   : > { %v5208_v10 = vpop.permute.xlu0 %5207  ;;  %v5206_v9 = vpop.permute.xlu1 %5205 }
 0x861   : > { %5285 = vst.msk [vmem:[#allocation6 + $0x90] sm:$0xff] %vm2203_vm6, %v5208_v10  ;;  %5284 = vst.msk [vmem:[#allocation6 + $0x88] sm:$0xff] %vm2203_vm6, %v5206_v9 }
 0x862   : > { %5770 = vrot.lane.b32.xlu0 %v9118_v4, %s6998_s22  ;;  %5768 = vrot.lane.b32.xlu1 %v9102_v29, %s6998_s22  ;;  %v5887_v4 = vld [vmem:[#allocation4 + $0xb1] sm:$0xff] }
 0x864   : > { %v5212_v36 = vpop.permute.xlu0 %5211  ;;  %v5210_v63 = vpop.permute.xlu1 %5209 }
 0x865   : > { %5287 = vst.msk [vmem:[#allocation6 + $0xa0] sm:$0xff] %vm2203_vm6, %v5212_v36  ;;  %5286 = vst.msk [vmem:[#allocation6 + $0x98] sm:$0xff] %vm2203_vm6, %v5210_v63  ;;  %v5894_v36 = vld [vmem:[#allocation4 + $0x109] sm:$0xff] }
 0x866   : > { %5958 = vrot.lane.b32.xlu0 %v5310_v55, %s6999_s23  ;;  %5956 = vrot.lane.b32.xlu1 %v5309_v3, %s6999_s23 }
 0x868   : > { %v5216_v17 = vpop.permute.xlu0 %5215  ;;  %v5214_v27 = vpop.permute.xlu1 %5213 }
 0x869   : > { %5289 = vst.msk [vmem:[#allocation6 + $0xb0] sm:$0xff] %vm2203_vm6, %v5216_v17  ;;  %5288 = vst.msk [vmem:[#allocation6 + $0xa8] sm:$0xff] %vm2203_vm6, %v5214_v27 }
 0x86a   : > { %5962 = vrot.lane.b32.xlu0 %v5887_v4, %s6999_s23  ;;  %5960 = vrot.lane.b32.xlu1 %v5886_v7, %s6999_s23 }
 0x86c   : > { %v5220_v29 = vpop.permute.xlu0 %5219  ;;  %v5218_v13 = vpop.permute.xlu1 %5217 }
 0x86d   : > { %5291 = vst.msk [vmem:[#allocation6 + $0xc0] sm:$0xff] %vm2203_vm6, %v5220_v29  ;;  %5290 = vst.msk [vmem:[#allocation6 + $0xb8] sm:$0xff] %vm2203_vm6, %v5218_v13  ;;  %v6087_v29 = vld [vmem:[#allocation4 + $0x112] sm:$0xff]  ;;  %v6086_v13 = vld [vmem:[#allocation4 + $0x10a] sm:$0xff] }
 0x86e   : > { %6150 = vrot.lane.b32.xlu0 %v9276_v41, %s7000_s13  ;;  %6148 = vrot.lane.b32.xlu1 %v9264_v6, %s7000_s13 }
 0x870   : > { %v5366_v45 = vpop.permute.xlu0 %5365  ;;  %v5364_v35 = vpop.permute.xlu1 %5363 }
 0x871   : > { %5460 = vst.msk [vmem:[#allocation6 + $0x8] sm:$0xff] %vm2588_vm7, %v5366_v45  ;;  %5459 = vst.msk [vmem:[#allocation6] sm:$0xff] %vm2588_vm7, %v5364_v35 }
 0x872   : > { %6154 = vrot.lane.b32.xlu0 %v9286_v44, %s7000_s13  ;;  %6152 = vrot.lane.b32.xlu1 %v9274_v21, %s7000_s13 }
 0x874   : > { %v5370_v62 = vpop.permute.xlu0 %5369  ;;  %v5368_v5 = vpop.permute.xlu1 %5367 }
 0x875   : > { %5462 = vst.msk [vmem:[#allocation6 + $0x18] sm:$0xff] %vm2588_vm7, %v5370_v62  ;;  %5461 = vst.msk [vmem:[#allocation6 + $0x10] sm:$0xff] %vm2588_vm7, %v5368_v5 }
 0x876   : > { %5389 = vrot.lane.b32.xlu0 %v5887_v4, %s6996_s20  ;;  %5387 = vrot.lane.b32.xlu1 %v5886_v7, %s6996_s20 }
 0x878   : > { %v5558_v6 = vpop.permute.xlu0 %5557  ;;  %v5556_v41 = vpop.permute.xlu1 %5555 }
 0x879   : > { %5652 = vst.msk [vmem:[#allocation6 + $0x8] sm:$0xff] %vm2973_vm8, %v5558_v6  ;;  %5651 = vst.msk [vmem:[#allocation6] sm:$0xff] %vm2973_vm8, %v5556_v41 }
 0x87a   : > { %5393 = vrot.lane.b32.xlu0 %v5314_v48, %s6996_s20  ;;  %5391 = vrot.lane.b32.xlu1 %v5313_v56, %s6996_s20 }
 0x87c   : > { %v5562_v37 = vpop.permute.xlu0 %5561  ;;  %v5560_v60 = vpop.permute.xlu1 %5559 }
 0x87d   : > { %5654 = vst.msk [vmem:[#allocation6 + $0x18] sm:$0xff] %vm2973_vm8, %v5562_v37  ;;  %5653 = vst.msk [vmem:[#allocation6 + $0x10] sm:$0xff] %vm2973_vm8, %v5560_v60  ;;  %v5322_v37 = vld [vmem:[#allocation4 + $0x129] sm:$0xff]  ;;  %v5321_v60 = vld [vmem:[#allocation4 + $0x121] sm:$0xff] }
 0x87e   : > { %5581 = vrot.lane.b32.xlu0 %v9286_v44, %s6997_s21  ;;  %5579 = vrot.lane.b32.xlu1 %v9274_v21, %s6997_s21 }
 0x880   : > { %v5751_v14 = vpop.permute.xlu0 %5750  ;;  %v5749_v16 = vpop.permute.xlu1 %5748 }
 0x881   : > { %5845 = vst.msk [vmem:[#allocation6 + $0x8] sm:$0xff] %vm3360_vm9, %v5751_v14  ;;  %5844 = vst.msk [vmem:[#allocation6] sm:$0xff] %vm3360_vm9, %v5749_v16 }
 0x882   : > { %5585 = vrot.lane.b32.xlu0 %v9296_v46, %s6997_s21  ;;  %5583 = vrot.lane.b32.xlu1 %v9284_v43, %s6997_s21 }
 0x884   : > { %v5755_v12 = vpop.permute.xlu0 %5754  ;;  %v5753_v18 = vpop.permute.xlu1 %5752 }
 0x885   : > { %5847 = vst.msk [vmem:[#allocation6 + $0x18] sm:$0xff] %vm3360_vm9, %v5755_v12  ;;  %5846 = vst.msk [vmem:[#allocation6 + $0x10] sm:$0xff] %vm3360_vm9, %v5753_v18 }
 0x886   : > { %5774 = vrot.lane.b32.xlu0 %v9110_v34, %s6998_s22  ;;  %5772 = vrot.lane.b32.xlu1 %v9098_v51, %s6998_s22 }
 0x888   : > { %v5943_v21 = vpop.permute.xlu0 %5942  ;;  %v5941_v44 = vpop.permute.xlu1 %5940 }
 0x889   : > { %6037 = vst.msk [vmem:[#allocation6 + $0x8] sm:$0xff] %vm3745_vm10, %v5943_v21  ;;  %6036 = vst.msk [vmem:[#allocation6] sm:$0xff] %vm3745_vm10, %v5941_v44  ;;  %v5514_v21 = vld [vmem:[#allocation4 + $0x12a] sm:$0xff]  ;;  %v5513_v44 = vld [vmem:[#allocation4 + $0x122] sm:$0xff] }
 0x88a   : > { %5778 = vrot.lane.b32.xlu0 %v9150_v49, %s6998_s22  ;;  %5776 = vrot.lane.b32.xlu1 %v9134_v26, %s6998_s22  ;;  %v5891_v49 = vld [vmem:[#allocation4 + $0xe1] sm:$0xff] }
 0x88c   : > { %v5947_v52 = vpop.permute.xlu0 %5946  ;;  %v5945_v59 = vpop.permute.xlu1 %5944 }
 0x88d   : > { %6039 = vst.msk [vmem:[#allocation6 + $0x18] sm:$0xff] %vm3745_vm10, %v5947_v52  ;;  %6038 = vst.msk [vmem:[#allocation6 + $0x10] sm:$0xff] %vm3745_vm10, %v5945_v59 }
 0x88e   : > { %5966 = vrot.lane.b32.xlu0 %v5314_v48, %s6999_s23  ;;  %5964 = vrot.lane.b32.xlu1 %v5313_v56, %s6999_s23 }
 0x890   : > { %v6135_v51 = vpop.permute.xlu0 %6134  ;;  %v6133_v34 = vpop.permute.xlu1 %6132 }
 0x891   : > { %6229 = vst.msk [vmem:[#allocation6 + $0x8] sm:$0xff] %vm4130_vm12, %v6135_v51  ;;  %6228 = vst.msk [vmem:[#allocation6] sm:$0xff] %vm4130_vm12, %v6133_v34  ;;  %v5705_v51 = vld [vmem:[#allocation4 + $0x128] sm:$0xff]  ;;  %v5704_v34 = vld [vmem:[#allocation4 + $0x120] sm:$0xff] }
 0x892   : > { %5970 = vrot.lane.b32.xlu0 %v5891_v49, %s6999_s23  ;;  %5968 = vrot.lane.b32.xlu1 %v5890_v39, %s6999_s23 }
 0x894   : > { %v6139_v26 = vpop.permute.xlu0 %6138  ;;  %v6137_v8 = vpop.permute.xlu1 %6136 }
 0x895   : > { %6231 = vst.msk [vmem:[#allocation6 + $0x18] sm:$0xff] %vm4130_vm12, %v6139_v26  ;;  %6230 = vst.msk [vmem:[#allocation6 + $0x10] sm:$0xff] %vm4130_vm12, %v6137_v8  ;;  %v5707_v26 = vld [vmem:[#allocation4 + $0x140] sm:$0xff]  ;;  %v5706_v8 = vld [vmem:[#allocation4 + $0x138] sm:$0xff] }
 0x896   : > { %6158 = vrot.lane.b32.xlu0 %v9296_v46, %s7000_s13  ;;  %6156 = vrot.lane.b32.xlu1 %v9284_v43, %s7000_s13 }
 0x898   : > { %v5374_v11 = vpop.permute.xlu0 %5373  ;;  %v5372_v0 = vpop.permute.xlu1 %5371  ;;  %v6260_v53 = vld [vmem:[#allocation6] sm:$0xff]  ;;  %v6261_v54 = vld [vmem:[#allocation6 + $0x8] sm:$0xff] }
 0x899   : > { %5464 = vst.msk [vmem:[#allocation6 + $0x28] sm:$0xff] %vm2588_vm7, %v5374_v11  ;;  %5463 = vst.msk [vmem:[#allocation6 + $0x20] sm:$0xff] %vm2588_vm7, %v5372_v0  ;;  %v6292_v25 = vpack.c.bf16 %v6261_v54, %v6260_v53 }
 0x89a   : > { %6162 = vrot.lane.b32.xlu0 %v9303_v57, %s7000_s13  ;;  %6160 = vrot.lane.b32.xlu1 %v9294_v40, %s7000_s13  ;;  %v5318_v40 = vld [vmem:[#allocation4 + $0xf9] sm:$0xff] }
 0x89b   : > { %6921 = vmatprep.mubr.msk.bf16.mxu1 %vm4247_vm13, %v6292_v25  ;;  %v5899_v25 = vld [vmem:[#allocation4 + $0x141] sm:$0xff] }
 0x89c   : > { %v5378_v46 = vpop.permute.xlu0 %5377  ;;  %v5376_v22 = vpop.permute.xlu1 %5375  ;;  %v6262_v43 = vld [vmem:[#allocation6 + $0x10] sm:$0xff]  ;;  %v6263_v1 = vld [vmem:[#allocation6 + $0x18] sm:$0xff] }
 0x89d   : > { %5466 = vst.msk [vmem:[#allocation6 + $0x38] sm:$0xff] %vm2588_vm7, %v5378_v46  ;;  %5465 = vst.msk [vmem:[#allocation6 + $0x30] sm:$0xff] %vm2588_vm7, %v5376_v22  ;;  %v6293_v42 = vpack.c.bf16 %v6263_v1, %v6262_v43  ;;  %v5898_v46 = vld [vmem:[#allocation4 + $0x139] sm:$0xff] }
 0x89e   : > { %5397 = vrot.lane.b32.xlu0 %v5891_v49, %s6996_s20  ;;  %5395 = vrot.lane.b32.xlu1 %v5890_v39, %s6996_s20 }
 0x89f   : > { %6922 = vmatmul.mubr.msk.bf16.vlgmr.msra.gmra.mxu1 %vm4247_vm13, %v6293_v42 }
 0x8a0   : > { %v5566_v57 = vpop.permute.xlu0 %5565  ;;  %v5564_v30 = vpop.permute.xlu1 %5563 }
 0x8a1   : > { %5656 = vst.msk [vmem:[#allocation6 + $0x28] sm:$0xff] %vm2973_vm8, %v5566_v57  ;;  %5655 = vst.msk [vmem:[#allocation6 + $0x20] sm:$0xff] %vm2973_vm8, %v5564_v30 }
 0x8a2   : > { %5401 = vrot.lane.b32.xlu0 %v5318_v40, %s6996_s20  ;;  %5399 = vrot.lane.b32.xlu1 %v5317_v32, %s6996_s20 }
 0x8a4   : > { %v5570_v23 = vpop.permute.xlu0 %5569  ;;  %v5568_v2 = vpop.permute.xlu1 %5567 }
 0x8a5   : > { %5658 = vst.msk [vmem:[#allocation6 + $0x38] sm:$0xff] %vm2973_vm8, %v5570_v23  ;;  %5657 = vst.msk [vmem:[#allocation6 + $0x30] sm:$0xff] %vm2973_vm8, %v5568_v2 }
 0x8a6   : > { %5589 = vrot.lane.b32.xlu0 %v5508_v58, %s6997_s21  ;;  %5587 = vrot.lane.b32.xlu1 %v5507_v47, %s6997_s21 }
 0x8a8   : > { %v5759_v55 = vpop.permute.xlu0 %5758  ;;  %v5757_v3 = vpop.permute.xlu1 %5756 }
 0x8a9   : > { %5849 = vst.msk [vmem:[#allocation6 + $0x28] sm:$0xff] %vm3360_vm9, %v5759_v55  ;;  %5848 = vst.msk [vmem:[#allocation6 + $0x20] sm:$0xff] %vm3360_vm9, %v5757_v3  ;;  %v5133_v3 = vld [vmem:[#allocation4 + $0x150] sm:$0xff] }
 0x8aa   : > { %5593 = vrot.lane.b32.xlu0 %v5510_v31, %s6997_s21  ;;  %5591 = vrot.lane.b32.xlu1 %v5509_v50, %s6997_s21 }
 0x8ac   : > { %v5763_v61 = vpop.permute.xlu0 %5762  ;;  %v5761_v33 = vpop.permute.xlu1 %5760 }
 0x8ad   : > { %5851 = vst.msk [vmem:[#allocation6 + $0x38] sm:$0xff] %vm3360_vm9, %v5763_v61  ;;  %5850 = vst.msk [vmem:[#allocation6 + $0x30] sm:$0xff] %vm3360_vm9, %v5761_v33  ;;  %v5134_v33 = vld [vmem:[#allocation4 + $0x158] sm:$0xff] }
 0x8ae   : > { %5782 = vrot.lane.b32.xlu0 %v9142_v24, %s6998_s22  ;;  %5780 = vrot.lane.b32.xlu1 %v9130_v19, %s6998_s22 }
 0x8b0   : > { %v5951_v15 = vpop.permute.xlu0 %5950  ;;  %v5949_v20 = vpop.permute.xlu1 %5948 }
 0x8b1   : > { %6041 = vst.msk [vmem:[#allocation6 + $0x28] sm:$0xff] %vm3745_vm10, %v5951_v15  ;;  %6040 = vst.msk [vmem:[#allocation6 + $0x20] sm:$0xff] %vm3745_vm10, %v5949_v20 }
 0x8b2   : > { %5786 = vrot.lane.b32.xlu0 %v9182_v28, %s6998_s22  ;;  %5784 = vrot.lane.b32.xlu1 %v9166_v38, %s6998_s22  ;;  %v5895_v28 = vld [vmem:[#allocation4 + $0x111] sm:$0xff] }
 0x8b4   : > { %v5955_v10 = vpop.permute.xlu0 %5954  ;;  %v5953_v9 = vpop.permute.xlu1 %5952 }
 0x8b5   : > { %6043 = vst.msk [vmem:[#allocation6 + $0x38] sm:$0xff] %vm3745_vm10, %v5955_v10  ;;  %6042 = vst.msk [vmem:[#allocation6 + $0x30] sm:$0xff] %vm3745_vm10, %v5953_v9  ;;  %v5325_v10 = vld [vmem:[#allocation4 + $0x151] sm:$0xff] }
 0x8b6   : > { %5974 = vrot.lane.b32.xlu0 %v5318_v40, %s6999_s23  ;;  %5972 = vrot.lane.b32.xlu1 %v5317_v32, %s6999_s23  ;;  %v6091_v40 = vld [vmem:[#allocation4 + $0x142] sm:$0xff]  ;;  %v6090_v32 = vld [vmem:[#allocation4 + $0x13a] sm:$0xff] }
 0x8b8   : > { %v6143_v19 = vpop.permute.xlu0 %6142  ;;  %v6141_v24 = vpop.permute.xlu1 %6140 }
 0x8b9   : > { %6233 = vst.msk [vmem:[#allocation6 + $0x28] sm:$0xff] %vm4130_vm12, %v6143_v19  ;;  %6232 = vst.msk [vmem:[#allocation6 + $0x20] sm:$0xff] %vm4130_vm12, %v6141_v24  ;;  %v5326_v24 = vld [vmem:[#allocation4 + $0x159] sm:$0xff] }
 0x8ba   : > { %5978 = vrot.lane.b32.xlu0 %v5895_v28, %s6999_s23  ;;  %5976 = vrot.lane.b32.xlu1 %v5894_v36, %s6999_s23 }
 0x8bc   : > { %v6147_v38 = vpop.permute.xlu0 %6146  ;;  %v6145_v63 = vpop.permute.xlu1 %6144 }
 0x8bd   : > { %6235 = vst.msk [vmem:[#allocation6 + $0x38] sm:$0xff] %vm4130_vm12, %v6147_v38  ;;  %6234 = vst.msk [vmem:[#allocation6 + $0x30] sm:$0xff] %vm4130_vm12, %v6145_v63  ;;  %v5517_v38 = vld [vmem:[#allocation4 + $0x152] sm:$0xff] }
 0x8be   : > { %6166 = vrot.lane.b32.xlu0 %v5510_v31, %s7000_s13  ;;  %6164 = vrot.lane.b32.xlu1 %v5509_v50, %s7000_s13 }
 0x8c0   : > { %v5382_v17 = vpop.permute.xlu0 %5381  ;;  %v5380_v27 = vpop.permute.xlu1 %5379  ;;  %v6264_v4 = vld [vmem:[#allocation6 + $0x20] sm:$0xff]  ;;  %v6265_v7 = vld [vmem:[#allocation6 + $0x28] sm:$0xff] }
 0x8c1   : > { %5468 = vst.msk [vmem:[#allocation6 + $0x48] sm:$0xff] %vm2588_vm7, %v5382_v17  ;;  %5467 = vst.msk [vmem:[#allocation6 + $0x40] sm:$0xff] %vm2588_vm7, %v5380_v27  ;;  %v6294_v45 = vpack.c.bf16 %v6265_v7, %v6264_v4  ;;  %v5518_v27 = vld [vmem:[#allocation4 + $0x15a] sm:$0xff] }
 0x8c2   : > { %6170 = vrot.lane.b32.xlu0 %v6087_v29, %s7000_s13  ;;  %6168 = vrot.lane.b32.xlu1 %v6086_v13, %s7000_s13 }
 0x8c3   : > { %6925 = vmatprep.mubr.msk.bf16.mxu1 %vm4247_vm13, %v6294_v45 }
 0x8c4   : > { %v5386_v35 = vpop.permute.xlu0 %5385  ;;  %v5384_v62 = vpop.permute.xlu1 %5383  ;;  %v6266_v5 = vld [vmem:[#allocation6 + $0x30] sm:$0xff]  ;;  %v6267_v6 = vld [vmem:[#allocation6 + $0x38] sm:$0xff] }
 0x8c5   : > { %5470 = vst.msk [vmem:[#allocation6 + $0x58] sm:$0xff] %vm2588_vm7, %v5386_v35  ;;  %5469 = vst.msk [vmem:[#allocation6 + $0x50] sm:$0xff] %vm2588_vm7, %v5384_v62  ;;  %v6295_v41 = vpack.c.bf16 %v6267_v6, %v6266_v5  ;;  %v5711_v35 = vld [vmem:[#allocation4 + $0x170] sm:$0xff] }
 0x8c6   : > { %5405 = vrot.lane.b32.xlu0 %v5895_v28, %s6996_s20  ;;  %5403 = vrot.lane.b32.xlu1 %v5894_v36, %s6996_s20  ;;  %v5902_v6 = vld [vmem:[#allocation4 + $0x169] sm:$0xff] }
 0x8c7   : > { %6926 = vmatmul.mubr.msk.bf16.gmra.mxu1 %vm4247_vm13, %v6295_v41 }
 0x8c8   : > { %v5574_v48 = vpop.permute.xlu0 %5573  ;;  %v5572_v56 = vpop.permute.xlu1 %5571 }
 0x8c9   : > { %5660 = vst.msk [vmem:[#allocation6 + $0x48] sm:$0xff] %vm2973_vm8, %v5574_v48  ;;  %5659 = vst.msk [vmem:[#allocation6 + $0x40] sm:$0xff] %vm2973_vm8, %v5572_v56 }
 0x8ca   : > { %5409 = vrot.lane.b32.xlu0 %v5322_v37, %s6996_s20  ;;  %5407 = vrot.lane.b32.xlu1 %v5321_v60, %s6996_s20 }
 0x8cc   : > { %v5578_v14 = vpop.permute.xlu0 %5577  ;;  %v5576_v16 = vpop.permute.xlu1 %5575 }
 0x8cd   : > { %5662 = vst.msk [vmem:[#allocation6 + $0x58] sm:$0xff] %vm2973_vm8, %v5578_v14  ;;  %5661 = vst.msk [vmem:[#allocation6 + $0x50] sm:$0xff] %vm2973_vm8, %v5576_v16 }
 0x8ce   : > { %5597 = vrot.lane.b32.xlu0 %v6087_v29, %s6997_s21  ;;  %5595 = vrot.lane.b32.xlu1 %v6086_v13, %s6997_s21  ;;  %v5710_v29 = vld [vmem:[#allocation4 + $0x168] sm:$0xff] }
 0x8d0   : > { %v5767_v12 = vpop.permute.xlu0 %5766  ;;  %v5765_v18 = vpop.permute.xlu1 %5764 }
 0x8d1   : > { %5853 = vst.msk [vmem:[#allocation6 + $0x48] sm:$0xff] %vm3360_vm9, %v5767_v12  ;;  %5852 = vst.msk [vmem:[#allocation6 + $0x40] sm:$0xff] %vm3360_vm9, %v5765_v18 }
 0x8d2   : > { %5601 = vrot.lane.b32.xlu0 %v5514_v21, %s6997_s21  ;;  %5599 = vrot.lane.b32.xlu1 %v5513_v44, %s6997_s21 }
 0x8d4   : > { %v5771_v52 = vpop.permute.xlu0 %5770  ;;  %v5769_v59 = vpop.permute.xlu1 %5768 }
 0x8d5   : > { %5855 = vst.msk [vmem:[#allocation6 + $0x58] sm:$0xff] %vm3360_vm9, %v5771_v52  ;;  %5854 = vst.msk [vmem:[#allocation6 + $0x50] sm:$0xff] %vm3360_vm9, %v5769_v59 }
 0x8d6   : > { %5790 = vrot.lane.b32.xlu0 %v5705_v51, %s6998_s22  ;;  %5788 = vrot.lane.b32.xlu1 %v5704_v34, %s6998_s22  ;;  %v6095_v34 = vld [vmem:[#allocation4 + $0x172] sm:$0xff] }
 0x8d8   : > { %v5959_v49 = vpop.permute.xlu0 %5958  ;;  %v5957_v39 = vpop.permute.xlu1 %5956 }
 0x8d9   : > { %6045 = vst.msk [vmem:[#allocation6 + $0x48] sm:$0xff] %vm3745_vm10, %v5959_v49  ;;  %6044 = vst.msk [vmem:[#allocation6 + $0x40] sm:$0xff] %vm3745_vm10, %v5957_v39 }
 0x8da   : > { %5794 = vrot.lane.b32.xlu0 %v5707_v26, %s6998_s22  ;;  %5792 = vrot.lane.b32.xlu1 %v5706_v8, %s6998_s22 }
 0x8dc   : > { %v5963_v11 = vpop.permute.xlu0 %5962  ;;  %v5961_v0 = vpop.permute.xlu1 %5960 }
 0x8dd   : > { %6047 = vst.msk [vmem:[#allocation6 + $0x58] sm:$0xff] %vm3745_vm10, %v5963_v11  ;;  %6046 = vst.msk [vmem:[#allocation6 + $0x50] sm:$0xff] %vm3745_vm10, %v5961_v0  ;;  %v5138_v0 = vld [vmem:[#allocation4 + $0x188] sm:$0xff] }
 0x8de   : > { %5982 = vrot.lane.b32.xlu0 %v5322_v37, %s6999_s23  ;;  %5980 = vrot.lane.b32.xlu1 %v5321_v60, %s6999_s23  ;;  %v5903_v60 = vld [vmem:[#allocation4 + $0x171] sm:$0xff] }
 0x8e0   : > { %v6151_v53 = vpop.permute.xlu0 %6150  ;;  %v6149_v54 = vpop.permute.xlu1 %6148 }
 0x8e1   : > { %6237 = vst.msk [vmem:[#allocation6 + $0x48] sm:$0xff] %vm4130_vm12, %v6151_v53  ;;  %6236 = vst.msk [vmem:[#allocation6 + $0x40] sm:$0xff] %vm4130_vm12, %v6149_v54 }
 0x8e2   : > { %5986 = vrot.lane.b32.xlu0 %v5899_v25, %s6999_s23  ;;  %5984 = vrot.lane.b32.xlu1 %v5898_v46, %s6999_s23 }
 0x8e4   : > { %v6155_v22 = vpop.permute.xlu0 %6154  ;;  %v6153_v43 = vpop.permute.xlu1 %6152 }
 0x8e5   : > { %6239 = vst.msk [vmem:[#allocation6 + $0x58] sm:$0xff] %vm4130_vm12, %v6155_v22  ;;  %6238 = vst.msk [vmem:[#allocation6 + $0x50] sm:$0xff] %vm4130_vm12, %v6153_v43  ;;  %v5330_v43 = vld [vmem:[#allocation4 + $0x189] sm:$0xff] }
 0x8e6   : > { %6174 = vrot.lane.b32.xlu0 %v5514_v21, %s7000_s13  ;;  %6172 = vrot.lane.b32.xlu1 %v5513_v44, %s7000_s13  ;;  %v6094_v44 = vld [vmem:[#allocation4 + $0x16a] sm:$0xff] }
 0x8e8   : > { %v5390_v1 = vpop.permute.xlu0 %5389  ;;  %v5388_v42 = vpop.permute.xlu1 %5387  ;;  %v6268_v57 = vld [vmem:[#allocation6 + $0x40] sm:$0xff]  ;;  %v6269_v30 = vld [vmem:[#allocation6 + $0x48] sm:$0xff] }
 0x8e9   : > { %5472 = vst.msk [vmem:[#allocation6 + $0x68] sm:$0xff] %vm2588_vm7, %v5390_v1  ;;  %5471 = vst.msk [vmem:[#allocation6 + $0x60] sm:$0xff] %vm2588_vm7, %v5388_v42  ;;  %v6296_v23 = vpack.c.bf16 %v6269_v30, %v6268_v57  ;;  %v5521_v57 = vld [vmem:[#allocation4 + $0x182] sm:$0xff] }
 0x8ea   : > { %6178 = vrot.lane.b32.xlu0 %v6091_v40, %s7000_s13  ;;  %6176 = vrot.lane.b32.xlu1 %v6090_v32, %s7000_s13 }
 0x8eb   : > { %6929 = vmatprep.mubr.msk.bf16.mxu1 %vm4247_vm13, %v6296_v23  ;;  %v5714_v23 = vld [vmem:[#allocation4 + $0x198] sm:$0xff] }
 0x8ec   : > { %v5394_v2 = vpop.permute.xlu0 %5393  ;;  %v5392_v58 = vpop.permute.xlu1 %5391  ;;  %v6270_v47 = vld [vmem:[#allocation6 + $0x50] sm:$0xff]  ;;  %v6271_v55 = vld [vmem:[#allocation6 + $0x58] sm:$0xff] }
 0x8ed   : > { %5474 = vst.msk [vmem:[#allocation6 + $0x78] sm:$0xff] %vm2588_vm7, %v5394_v2  ;;  %5473 = vst.msk [vmem:[#allocation6 + $0x70] sm:$0xff] %vm2588_vm7, %v5392_v58  ;;  %v6297_v31 = vpack.c.bf16 %v6271_v55, %v6270_v47  ;;  %v5715_v47 = vld [vmem:[#allocation4 + $0x1a0] sm:$0xff] }
 0x8ee   : > { %5223 = vrot.lane.b32.xlu0 %v5133_v3, %s6995_s19  ;;  %5221 = vrot.lane.b32.xlu1 %v5707_v26, %s6995_s19  ;;  %v5137_v26 = vld [vmem:[#allocation4 + $0x180] sm:$0xff] }
 0x8ef   : > { %6930 = vmatmul.mubr.msk.bf16.gmra.mxu1 %vm4247_vm13, %v6297_v31 }
 0x8f0   : > { %v5582_v50 = vpop.permute.xlu0 %5581  ;;  %v5580_v61 = vpop.permute.xlu1 %5579 }
 0x8f1   : > { %5664 = vst.msk [vmem:[#allocation6 + $0x68] sm:$0xff] %vm2973_vm8, %v5582_v50  ;;  %5663 = vst.msk [vmem:[#allocation6 + $0x60] sm:$0xff] %vm2973_vm8, %v5580_v61 }
 0x8f2   : > { %5411 = vrot.lane.b32.xlu0 %v5898_v46, %s6996_s20  ;;  %5225 = vrot.lane.b32.xlu1 %v5134_v33, %s6995_s19 }
 0x8f4   : > { %v5586_v15 = vpop.permute.xlu0 %5585  ;;  %v5584_v20 = vpop.permute.xlu1 %5583 }
 0x8f5   : > { %5666 = vst.msk [vmem:[#allocation6 + $0x78] sm:$0xff] %vm2973_vm8, %v5586_v15  ;;  %5665 = vst.msk [vmem:[#allocation6 + $0x70] sm:$0xff] %vm2973_vm8, %v5584_v20 }
 0x8f6   : > { %5415 = vrot.lane.b32.xlu0 %v5325_v10, %s6996_s20  ;;  %5413 = vrot.lane.b32.xlu1 %v5899_v25, %s6996_s20  ;;  %v5329_v25 = vld [vmem:[#allocation4 + $0x181] sm:$0xff] }
 0x8f8   : > { %v5775_v9 = vpop.permute.xlu0 %5774  ;;  %v5773_v19 = vpop.permute.xlu1 %5772 }
 0x8f9   : > { %5857 = vst.msk [vmem:[#allocation6 + $0x68] sm:$0xff] %vm3360_vm9, %v5775_v9  ;;  %5856 = vst.msk [vmem:[#allocation6 + $0x60] sm:$0xff] %vm3360_vm9, %v5773_v19 }
 0x8fa   : > { %5603 = vrot.lane.b32.xlu0 %v6090_v32, %s6997_s21  ;;  %5417 = vrot.lane.b32.xlu1 %v5326_v24, %s6996_s20  ;;  %v5522_v32 = vld [vmem:[#allocation4 + $0x18a] sm:$0xff] }
 0x8fc   : > { %v5779_v28 = vpop.permute.xlu0 %5778  ;;  %v5777_v36 = vpop.permute.xlu1 %5776 }
 0x8fd   : > { %5859 = vst.msk [vmem:[#allocation6 + $0x78] sm:$0xff] %vm3360_vm9, %v5779_v28  ;;  %5858 = vst.msk [vmem:[#allocation6 + $0x70] sm:$0xff] %vm3360_vm9, %v5777_v36 }
 0x8fe   : > { %5607 = vrot.lane.b32.xlu0 %v5517_v38, %s6997_s21  ;;  %5605 = vrot.lane.b32.xlu1 %v6091_v40, %s6997_s21 }
 0x900   : > { %v5967_v63 = vpop.permute.xlu0 %5966  ;;  %v5965_v17 = vpop.permute.xlu1 %5964 }
 0x901   : > { %6049 = vst.msk [vmem:[#allocation6 + $0x68] sm:$0xff] %vm3745_vm10, %v5967_v63  ;;  %6048 = vst.msk [vmem:[#allocation6 + $0x60] sm:$0xff] %vm3745_vm10, %v5965_v17 }
 0x902   : > { %5796 = vrot.lane.b32.xlu0 %v5133_v3, %s6998_s22  ;;  %5609 = vrot.lane.b32.xlu1 %v5518_v27, %s6997_s21 }
 0x904   : > { %v5971_v4 = vpop.permute.xlu0 %5970  ;;  %v5969_v7 = vpop.permute.xlu1 %5968 }
 0x905   : > { %6051 = vst.msk [vmem:[#allocation6 + $0x78] sm:$0xff] %vm3745_vm10, %v5971_v4  ;;  %6050 = vst.msk [vmem:[#allocation6 + $0x70] sm:$0xff] %vm3745_vm10, %v5969_v7 }
 0x906   : > { %5800 = vrot.lane.b32.xlu0 %v5710_v29, %s6998_s22  ;;  %5798 = vrot.lane.b32.xlu1 %v5134_v33, %s6998_s22  ;;  %v5906_v33 = vld [vmem:[#allocation4 + $0x199] sm:$0xff] }
 0x908   : > { %v6159_v13 = vpop.permute.xlu0 %6158  ;;  %v6157_v45 = vpop.permute.xlu1 %6156 }
 0x909   : > { %6241 = vst.msk [vmem:[#allocation6 + $0x68] sm:$0xff] %vm4130_vm12, %v6159_v13  ;;  %6240 = vst.msk [vmem:[#allocation6 + $0x60] sm:$0xff] %vm4130_vm12, %v6157_v45 }
 0x90a   : > { %5988 = vrot.lane.b32.xlu0 %v5325_v10, %s6999_s23  ;;  %5802 = vrot.lane.b32.xlu1 %v5711_v35, %s6998_s22 }
 0x90c   : > { %v6163_v62 = vpop.permute.xlu0 %6162  ;;  %v6161_v5 = vpop.permute.xlu1 %6160 }
 0x90d   : > { %6243 = vst.msk [vmem:[#allocation6 + $0x78] sm:$0xff] %vm4130_vm12, %v6163_v62  ;;  %6242 = vst.msk [vmem:[#allocation6 + $0x70] sm:$0xff] %vm4130_vm12, %v6161_v5 }
 0x90e   : > { %5992 = vrot.lane.b32.xlu0 %v5902_v6, %s6999_s23  ;;  %5990 = vrot.lane.b32.xlu1 %v5326_v24, %s6999_s23  ;;  %v5907_v24 = vld [vmem:[#allocation4 + $0x1a1] sm:$0xff] }
 0x910   : > { %v5398_v41 = vpop.permute.xlu0 %5397  ;;  %v5396_v48 = vpop.permute.xlu1 %5395  ;;  %v6272_v56 = vld [vmem:[#allocation6 + $0x60] sm:$0xff]  ;;  %v6273_v37 = vld [vmem:[#allocation6 + $0x68] sm:$0xff] }
 0x911   : > { %5476 = vst.msk [vmem:[#allocation6 + $0x88] sm:$0xff] %vm2588_vm7, %v5398_v41  ;;  %5475 = vst.msk [vmem:[#allocation6 + $0x80] sm:$0xff] %vm2588_vm7, %v5396_v48  ;;  %v6298_v14 = vpack.c.bf16 %v6273_v37, %v6272_v56  ;;  %v9826_v37 = vld [vmem:[%s10030_s6] ss:$0 sm:$0xff] }
 0x912   : > { %6180 = vrot.lane.b32.xlu0 %v5517_v38, %s7000_s13  ;;  %5994 = vrot.lane.b32.xlu1 %v5903_v60, %s6999_s23  ;;  %v6098_v38 = vld [vmem:[#allocation4 + $0x19a] sm:$0xff] }
 0x913   : > { %6933 = vmatprep.mubr.msk.bf16.mxu1 %vm4247_vm13, %v6298_v14  ;;  %v9831_v14 = vld [vmem:[%s10031_s7] ss:$0 sm:$0xff] }
 0x914   : > { %v5402_v16 = vpop.permute.xlu0 %5401  ;;  %v5400_v12 = vpop.permute.xlu1 %5399  ;;  %v6274_v18 = vld [vmem:[#allocation6 + $0x70] sm:$0xff]  ;;  %v6275_v21 = vld [vmem:[#allocation6 + $0x78] sm:$0xff] }
 0x915   : > { %5478 = vst.msk [vmem:[#allocation6 + $0x98] sm:$0xff] %vm2588_vm7, %v5402_v16  ;;  %5477 = vst.msk [vmem:[#allocation6 + $0x90] sm:$0xff] %vm2588_vm7, %v5400_v12  ;;  %v6299_v52 = vpack.c.bf16 %v6275_v21, %v6274_v18 }
 0x916   : > { %6184 = vrot.lane.b32.xlu0 %v6094_v44, %s7000_s13  ;;  %6182 = vrot.lane.b32.xlu1 %v5518_v27, %s7000_s13  ;;  %v6099_v27 = vld [vmem:[#allocation4 + $0x1a2] sm:$0xff] }
 0x917   : > { %6934 = vmatmul.mubr.msk.bf16.gmra.mxu1 %vm4247_vm13, %v6299_v52 }
 0x918   : > { %v5590_v59 = vpop.permute.xlu0 %5589  ;;  %v5588_v51 = vpop.permute.xlu1 %5587 }
 0x919   : > { %5668 = vst.msk [vmem:[#allocation6 + $0x88] sm:$0xff] %vm2973_vm8, %v5590_v59  ;;  %5667 = vst.msk [vmem:[#allocation6 + $0x80] sm:$0xff] %vm2973_vm8, %v5588_v51 }
 0x91a   : > { %5227 = vrot.lane.b32.xlu0 %v5710_v29, %s6995_s19  ;;  %6186 = vrot.lane.b32.xlu1 %v6095_v34, %s7000_s13 }
 0x91c   : > { %v5594_v49 = vpop.permute.xlu0 %5593  ;;  %v5592_v39 = vpop.permute.xlu1 %5591 }
 0x91d   : > { %5670 = vst.msk [vmem:[#allocation6 + $0x98] sm:$0xff] %vm2973_vm8, %v5594_v49  ;;  %5669 = vst.msk [vmem:[#allocation6 + $0x90] sm:$0xff] %vm2973_vm8, %v5592_v39 }
 0x91e   : > { %5231 = vrot.lane.b32.xlu0 %v5137_v26, %s6995_s19  ;;  %5229 = vrot.lane.b32.xlu1 %v5711_v35, %s6995_s19 }
 0x920   : > { %v5783_v8 = vpop.permute.xlu0 %5782  ;;  %v5781_v11 = vpop.permute.xlu1 %5780 }
 0x921   : > { %5861 = vst.msk [vmem:[#allocation6 + $0x88] sm:$0xff] %vm3360_vm9, %v5783_v8  ;;  %5860 = vst.msk [vmem:[#allocation6 + $0x80] sm:$0xff] %vm3360_vm9, %v5781_v11 }
 0x922   : > { %5419 = vrot.lane.b32.xlu0 %v5902_v6, %s6996_s20  ;;  %5233 = vrot.lane.b32.xlu1 %v5138_v0, %s6995_s19 }
 0x924   : > { %v5787_v53 = vpop.permute.xlu0 %5786  ;;  %v5785_v54 = vpop.permute.xlu1 %5784 }
 0x925   : > { %5863 = vst.msk [vmem:[#allocation6 + $0x98] sm:$0xff] %vm3360_vm9, %v5787_v53  ;;  %5862 = vst.msk [vmem:[#allocation6 + $0x90] sm:$0xff] %vm3360_vm9, %v5785_v54 }
 0x926   : > { %5423 = vrot.lane.b32.xlu0 %v5329_v25, %s6996_s20  ;;  %5421 = vrot.lane.b32.xlu1 %v5903_v60, %s6996_s20 }
 0x928   : > { %v5975_v46 = vpop.permute.xlu0 %5974  ;;  %v5973_v22 = vpop.permute.xlu1 %5972 }
 0x929   : > { %6053 = vst.msk [vmem:[#allocation6 + $0x88] sm:$0xff] %vm3745_vm10, %v5975_v46  ;;  %6052 = vst.msk [vmem:[#allocation6 + $0x80] sm:$0xff] %vm3745_vm10, %v5973_v22 }
 0x92a   : > { %5611 = vrot.lane.b32.xlu0 %v6094_v44, %s6997_s21  ;;  %5425 = vrot.lane.b32.xlu1 %v5330_v43, %s6996_s20 }
 0x92c   : > { %v5979_v1 = vpop.permute.xlu0 %5978  ;;  %v5977_v42 = vpop.permute.xlu1 %5976 }
 0x92d   : > { %6055 = vst.msk [vmem:[#allocation6 + $0x98] sm:$0xff] %vm3745_vm10, %v5979_v1  ;;  %6054 = vst.msk [vmem:[#allocation6 + $0x90] sm:$0xff] %vm3745_vm10, %v5977_v42 }
 0x92e   : > { %5615 = vrot.lane.b32.xlu0 %v5521_v57, %s6997_s21  ;;  %5613 = vrot.lane.b32.xlu1 %v6095_v34, %s6997_s21 }
 0x930   : > { %v6167_v30 = vpop.permute.xlu0 %6166  ;;  %v6165_v40 = vpop.permute.xlu1 %6164 }
 0x931   : > { %6245 = vst.msk [vmem:[#allocation6 + $0x88] sm:$0xff] %vm4130_vm12, %v6167_v30  ;;  %6244 = vst.msk [vmem:[#allocation6 + $0x80] sm:$0xff] %vm4130_vm12, %v6165_v40 }
 0x932   : > { %5804 = vrot.lane.b32.xlu0 %v5137_v26, %s6998_s22  ;;  %5617 = vrot.lane.b32.xlu1 %v5522_v32, %s6997_s21 }
 0x934   : > { %v6171_v2 = vpop.permute.xlu0 %6170  ;;  %v6169_v58 = vpop.permute.xlu1 %6168 }
 0x935   : > { %6247 = vst.msk [vmem:[#allocation6 + $0x98] sm:$0xff] %vm4130_vm12, %v6171_v2  ;;  %6246 = vst.msk [vmem:[#allocation6 + $0x90] sm:$0xff] %vm4130_vm12, %v6169_v58 }
 0x936   : > { %5808 = vrot.lane.b32.xlu0 %v5714_v23, %s6998_s22  ;;  %5806 = vrot.lane.b32.xlu1 %v5138_v0, %s6998_s22 }
 0x938   : > { %v5406_v55 = vpop.permute.xlu0 %5405  ;;  %v5404_v3 = vpop.permute.xlu1 %5403  ;;  %v6276_v31 = vld [vmem:[#allocation6 + $0x80] sm:$0xff]  ;;  %v6277_v50 = vld [vmem:[#allocation6 + $0x88] sm:$0xff] }
 0x939   : > { %5480 = vst.msk [vmem:[#allocation6 + $0xa8] sm:$0xff] %vm2588_vm7, %v5406_v55  ;;  %5479 = vst.msk [vmem:[#allocation6 + $0xa0] sm:$0xff] %vm2588_vm7, %v5404_v3  ;;  %v6300_v61 = vpack.c.bf16 %v6277_v50, %v6276_v31 }
 0x93a   : > { %5996 = vrot.lane.b32.xlu0 %v5329_v25, %s6999_s23  ;;  %5810 = vrot.lane.b32.xlu1 %v5715_v47, %s6998_s22 }
 0x93b   : > { %6937 = vmatprep.mubr.msk.bf16.mxu1 %vm4247_vm13, %v6300_v61 }
 0x93c   : > { %v5410_v15 = vpop.permute.xlu0 %5409  ;;  %v5408_v20 = vpop.permute.xlu1 %5407  ;;  %v6278_v10 = vld [vmem:[#allocation6 + $0x90] sm:$0xff]  ;;  %v6279_v9 = vld [vmem:[#allocation6 + $0x98] sm:$0xff] }
 0x93d   : > { %5482 = vst.msk [vmem:[#allocation6 + $0xb8] sm:$0xff] %vm2588_vm7, %v5410_v15  ;;  %5481 = vst.msk [vmem:[#allocation6 + $0xb0] sm:$0xff] %vm2588_vm7, %v5408_v20  ;;  %v6301_v19 = vpack.c.bf16 %v6279_v9, %v6278_v10 }
 0x93e   : > { %6000 = vrot.lane.b32.xlu0 %v5906_v33, %s6999_s23  ;;  %5998 = vrot.lane.b32.xlu1 %v5330_v43, %s6999_s23 }
 0x93f   : > { %6938 = vmatmul.mubr.msk.bf16.gmra.mxu1 %vm4247_vm13, %v6301_v19 }
 0x940   : > { %v5598_v28 = vpop.permute.xlu0 %5597  ;;  %v5596_v36 = vpop.permute.xlu1 %5595 }
 0x941   : > { %5672 = vst.msk [vmem:[#allocation6 + $0xa8] sm:$0xff] %vm2973_vm8, %v5598_v28  ;;  %5671 = vst.msk [vmem:[#allocation6 + $0xa0] sm:$0xff] %vm2973_vm8, %v5596_v36 }
 0x942   : > { %6188 = vrot.lane.b32.xlu0 %v5521_v57, %s7000_s13  ;;  %6002 = vrot.lane.b32.xlu1 %v5907_v24, %s6999_s23 }
 0x944   : > { %v5602_v63 = vpop.permute.xlu0 %5601  ;;  %v5600_v17 = vpop.permute.xlu1 %5599 }
 0x945   : > { %5674 = vst.msk [vmem:[#allocation6 + $0xb8] sm:$0xff] %vm2973_vm8, %v5602_v63  ;;  %5673 = vst.msk [vmem:[#allocation6 + $0xb0] sm:$0xff] %vm2973_vm8, %v5600_v17 }
 0x946   : > { %6190 = vrot.lane.b32.xlu1 %v5522_v32, %s7000_s13  ;;  %6192 = vrot.lane.b32.xlu0 %v6098_v38, %s7000_s13 }
 0x948   : > { %v5791_v4 = vpop.permute.xlu0 %5790  ;;  %v5789_v7 = vpop.permute.xlu1 %5788 }
 0x949   : > { %5865 = vst.msk [vmem:[#allocation6 + $0xa8] sm:$0xff] %vm3360_vm9, %v5791_v4  ;;  %5864 = vst.msk [vmem:[#allocation6 + $0xa0] sm:$0xff] %vm3360_vm9, %v5789_v7 }
 0x94a   : > { %6194 = vrot.lane.b32.xlu1 %v6099_v27, %s7000_s13 }
 0x94c   : > { %v5795_v29 = vpop.permute.xlu0 %5794  ;;  %v5793_v13 = vpop.permute.xlu1 %5792 }
 0x94d   : > { %5867 = vst.msk [vmem:[#allocation6 + $0xb8] sm:$0xff] %vm3360_vm9, %v5795_v29  ;;  %5866 = vst.msk [vmem:[#allocation6 + $0xb0] sm:$0xff] %vm3360_vm9, %v5793_v13 }
 0x950   : > { %v5983_v45 = vpop.permute.xlu0 %5982  ;;  %v5981_v35 = vpop.permute.xlu1 %5980 }
 0x951   : > { %6057 = vst.msk [vmem:[#allocation6 + $0xa8] sm:$0xff] %vm3745_vm10, %v5983_v45  ;;  %6056 = vst.msk [vmem:[#allocation6 + $0xa0] sm:$0xff] %vm3745_vm10, %v5981_v35 }
 0x954   : > { %v5987_v62 = vpop.permute.xlu0 %5986  ;;  %v5985_v5 = vpop.permute.xlu1 %5984 }
 0x955   : > { %6059 = vst.msk [vmem:[#allocation6 + $0xb8] sm:$0xff] %vm3745_vm10, %v5987_v62  ;;  %6058 = vst.msk [vmem:[#allocation6 + $0xb0] sm:$0xff] %vm3745_vm10, %v5985_v5 }
 0x958   : > { %v6175_v6 = vpop.permute.xlu0 %6174  ;;  %v6173_v41 = vpop.permute.xlu1 %6172 }
 0x959   : > { %6249 = vst.msk [vmem:[#allocation6 + $0xa8] sm:$0xff] %vm4130_vm12, %v6175_v6  ;;  %6248 = vst.msk [vmem:[#allocation6 + $0xa0] sm:$0xff] %vm4130_vm12, %v6173_v41 }
 0x95c   : > { %v6179_v48 = vpop.permute.xlu0 %6178  ;;  %v6177_v56 = vpop.permute.xlu1 %6176 }
 0x95d   : > { %6251 = vst.msk [vmem:[#allocation6 + $0xb8] sm:$0xff] %vm4130_vm12, %v6179_v48  ;;  %6250 = vst.msk [vmem:[#allocation6 + $0xb0] sm:$0xff] %vm4130_vm12, %v6177_v56 }
 0x95f   : > { %v6923_v60 = vpop.f32.mrf.mxu1 }
 0x960   : > { %v6565_v16 = vmul.f32 %v6923_v60, %v9826_v37  ;;  %v5224_v12 = vpop.permute.xlu0 %5223  ;;  %v5222_v18 = vpop.permute.xlu1 %5221  ;;  %v6280_v21 = vld [vmem:[#allocation6 + $0xa0] sm:$0xff]  ;;  %v6281_v44 = vld [vmem:[#allocation6 + $0xa8] sm:$0xff] }
 0x961   : > { %5293 = vst.msk [vmem:[#allocation6 + $0xd0] sm:$0xff] %vm2203_vm6, %v5224_v12  ;;  %5292 = vst.msk [vmem:[#allocation6 + $0xc8] sm:$0xff] %vm2203_vm6, %v5222_v18  ;;  %v6429_v52 = vpop.f32.mrf.mxu1  ;;  %v6302_v59 = vpack.c.bf16 %v6281_v44, %v6280_v21 }
 0x962   : > { %v6604_v51 = vadd.f32 %v9831_v14, %v6565_v16  ;;  %v6563_v34 = vmul.f32 %v9826_v37, %v6429_v52 }
 0x963   : > { %v6924_v49 = vpop.f32.mrf.mxu1  ;;  %6941 = vmatprep.mubr.msk.bf16.mxu1 %vm4247_vm13, %v6302_v59 }
 0x964   : > { %v6636_v39 = vmax.f32 %v6604_v51, 0.0  ;;  %v6602_v26 = vadd.f32 %v9831_v14, %v6563_v34  ;;  %v6566_v8 = vmul.f32 %v6924_v49, %v9826_v37  ;;  %v5412_v11 = vpop.permute.xlu0 %5411  ;;  %v5226_v0 = vpop.permute.xlu1 %5225  ;;  %v6282_v53 = vld [vmem:[#allocation6 + $0xb0] sm:$0xff]  ;;  %v6283_v54 = vld [vmem:[#allocation6 + $0xb8] sm:$0xff] }
 0x965   : > { %5483 = vst.msk [vmem:[#allocation6 + $0xc0] sm:$0xff] %vm2588_vm7, %v5412_v11  ;;  %v6432_v25 = vpop.f32.mrf.mxu1  ;;  %v6303_v46 = vpack.c.bf16 %v6283_v54, %v6282_v53 }
 0x966   : > { %5294 = vst.msk [vmem:[#allocation6 + $0xd8] sm:$0xff] %vm2203_vm6, %v5226_v0  ;;  %v6634_v22 = vmax.f32 %v6602_v26, 0.0  ;;  %v6605_v43 = vadd.f32 %v9831_v14, %v6566_v8  ;;  %v6564_v1 = vmul.f32 %v9826_v37, %v6432_v25 }
 0x967   : > { %6668 = vst.msk [vmem:[%s9843_s24 + $0x10] sm:$0xff] %vm1048_vm2, %v6636_v39  ;;  %6942 = vmatmul.mubr.msk.bf16.gmra.mxu1 %vm4247_vm13, %v6303_v46 }
 0x968   : > { %6666 = vst.msk [vmem:[%s9843_s24] sm:$0xff] %vm1048_vm2, %v6634_v22  ;;  %v6637_v42 = vmax.f32 %v6605_v43, 0.0  ;;  %v6603_v57 = vadd.f32 %v9831_v14, %v6564_v1  ;;  %v5416_v30 = vpop.permute.xlu0 %5415  ;;  %v5414_v40 = vpop.permute.xlu1 %5413 }
 0x969   : > { %5485 = vst.msk [vmem:[#allocation6 + $0xd0] sm:$0xff] %vm2588_vm7, %v5416_v30  ;;  %5484 = vst.msk [vmem:[#allocation6 + $0xc8] sm:$0xff] %vm2588_vm7, %v5414_v40 }
 0x96a   : > { %6669 = vst.msk [vmem:[%s9843_s24 + $0x18] sm:$0xff] %vm1048_vm2, %v6637_v42  ;;  %v6635_v32 = vmax.f32 %v6603_v57, 0.0 }
 0x96c   : > { %6667 = vst.msk [vmem:[%s9843_s24 + $0x8] sm:$0xff] %vm1048_vm2, %v6635_v32  ;;  %v5604_v23 = vpop.permute.xlu0 %5603  ;;  %v5418_v2 = vpop.permute.xlu1 %5417 }
 0x96d   : > { %5675 = vst.msk [vmem:[#allocation6 + $0xc0] sm:$0xff] %vm2973_vm8, %v5604_v23 }
 0x96e   : > { %5486 = vst.msk [vmem:[#allocation6 + $0xd8] sm:$0xff] %vm2588_vm7, %v5418_v2 }
 0x970   : > { %v5608_v58 = vpop.permute.xlu0 %5607  ;;  %v5606_v47 = vpop.permute.xlu1 %5605 }
 0x971   : > { %5677 = vst.msk [vmem:[#allocation6 + $0xd0] sm:$0xff] %vm2973_vm8, %v5608_v58  ;;  %5676 = vst.msk [vmem:[#allocation6 + $0xc8] sm:$0xff] %vm2973_vm8, %v5606_v47 }
 0x974   : > { %v5797_v55 = vpop.permute.xlu0 %5796  ;;  %v5610_v3 = vpop.permute.xlu1 %5609 }
 0x975   : > { %5868 = vst.msk [vmem:[#allocation6 + $0xc0] sm:$0xff] %vm3360_vm9, %v5797_v55 }
 0x976   : > { %5678 = vst.msk [vmem:[#allocation6 + $0xd8] sm:$0xff] %vm2973_vm8, %v5610_v3 }
 0x978   : > { %v5801_v31 = vpop.permute.xlu0 %5800  ;;  %v5799_v50 = vpop.permute.xlu1 %5798 }
 0x979   : > { %5870 = vst.msk [vmem:[#allocation6 + $0xd0] sm:$0xff] %vm3360_vm9, %v5801_v31  ;;  %5869 = vst.msk [vmem:[#allocation6 + $0xc8] sm:$0xff] %vm3360_vm9, %v5799_v50 }
 0x97c   : > { %v5989_v61 = vpop.permute.xlu0 %5988  ;;  %v5803_v33 = vpop.permute.xlu1 %5802 }
 0x97d   : > { %6060 = vst.msk [vmem:[#allocation6 + $0xc0] sm:$0xff] %vm3745_vm10, %v5989_v61 }
 0x97e   : > { %5871 = vst.msk [vmem:[#allocation6 + $0xd8] sm:$0xff] %vm3360_vm9, %v5803_v33 }
 0x980   : > { %v5993_v15 = vpop.permute.xlu0 %5992  ;;  %v5991_v20 = vpop.permute.xlu1 %5990 }
 0x981   : > { %6062 = vst.msk [vmem:[#allocation6 + $0xd0] sm:$0xff] %vm3745_vm10, %v5993_v15  ;;  %6061 = vst.msk [vmem:[#allocation6 + $0xc8] sm:$0xff] %vm3745_vm10, %v5991_v20 }
 0x984   : > { %v6181_v10 = vpop.permute.xlu0 %6180  ;;  %v5995_v9 = vpop.permute.xlu1 %5994 }
 0x985   : > { %6252 = vst.msk [vmem:[#allocation6 + $0xc0] sm:$0xff] %vm4130_vm12, %v6181_v10 }
 0x986   : > { %6063 = vst.msk [vmem:[#allocation6 + $0xd8] sm:$0xff] %vm3745_vm10, %v5995_v9 }
 0x987   : > { %v6927_v19 = vpop.f32.mrf.mxu1 }
 0x988   : > { %v6569_v24 = vmul.f32 %v6927_v19, %v9826_v37  ;;  %v6185_v28 = vpop.permute.xlu0 %6184  ;;  %v6183_v36 = vpop.permute.xlu1 %6182 }
 0x989   : > { %6254 = vst.msk [vmem:[#allocation6 + $0xd0] sm:$0xff] %vm4130_vm12, %v6185_v28  ;;  %6253 = vst.msk [vmem:[#allocation6 + $0xc8] sm:$0xff] %vm4130_vm12, %v6183_v36  ;;  %v6445_v38 = vpop.f32.mrf.mxu1 }
 0x98a   : > { %v6608_v63 = vadd.f32 %v9831_v14, %v6569_v24  ;;  %v6567_v17 = vmul.f32 %v9826_v37, %v6445_v38 }
 0x98b   : > { %v6928_v27 = vpop.f32.mrf.mxu1 }
 0x98c   : > { %v6640_v4 = vmax.f32 %v6608_v63, 0.0  ;;  %v6606_v7 = vadd.f32 %v9831_v14, %v6567_v17  ;;  %v6570_v29 = vmul.f32 %v6928_v27, %v9826_v37  ;;  %v5228_v13 = vpop.permute.xlu0 %5227  ;;  %v6187_v45 = vpop.permute.xlu1 %6186  ;;  %v6284_v16 = vld [vmem:[#allocation6 + $0xc0] sm:$0xff] }
 0x98d   : > { %5295 = vst.msk [vmem:[#allocation6 + $0xe0] sm:$0xff] %vm2203_vm6, %v5228_v13  ;;  %v6448_v35 = vpop.f32.mrf.mxu1 }
 0x98e   : > { %6255 = vst.msk [vmem:[#allocation6 + $0xd8] sm:$0xff] %vm4130_vm12, %v6187_v45  ;;  %v6638_v62 = vmax.f32 %v6606_v7, 0.0  ;;  %v6609_v5 = vadd.f32 %v9831_v14, %v6570_v29  ;;  %v6568_v6 = vmul.f32 %v9826_v37, %v6448_v35 }
 0x98f   : > { %6672 = vst.msk [vmem:[%s9843_s24 + $0x30] sm:$0xff] %vm1048_vm2, %v6640_v4 }
 0x990   : > { %6670 = vst.msk [vmem:[%s9843_s24 + $0x20] sm:$0xff] %vm1048_vm2, %v6638_v62  ;;  %v6641_v41 = vmax.f32 %v6609_v5, 0.0  ;;  %v6607_v48 = vadd.f32 %v9831_v14, %v6568_v6  ;;  %v5232_v56 = vpop.permute.xlu0 %5231  ;;  %v5230_v60 = vpop.permute.xlu1 %5229  ;;  %v6285_v12 = vld [vmem:[#allocation6 + $0xc8] sm:$0xff]  ;;  %v6286_v59 = vld [vmem:[#allocation6 + $0xd0] sm:$0xff] }
 0x991   : > { %5297 = vst.msk [vmem:[#allocation6 + $0xf0] sm:$0xff] %vm2203_vm6, %v5232_v56  ;;  %5296 = vst.msk [vmem:[#allocation6 + $0xe8] sm:$0xff] %vm2203_vm6, %v5230_v60  ;;  %v6304_v18 = vpack.c.bf16 %v6285_v12, %v6284_v16 }
 0x992   : > { %6673 = vst.msk [vmem:[%s9843_s24 + $0x38] sm:$0xff] %vm1048_vm2, %v6641_v41  ;;  %v6639_v21 = vmax.f32 %v6607_v48, 0.0 }
 0x993   : > { %6945 = vmatprep.mubr.msk.bf16.mxu1 %vm4247_vm13, %v6304_v18 }
 0x994   : > { %6671 = vst.msk [vmem:[%s9843_s24 + $0x28] sm:$0xff] %vm1048_vm2, %v6639_v21  ;;  %v5420_v44 = vpop.permute.xlu0 %5419  ;;  %v5234_v52 = vpop.permute.xlu1 %5233 }
 0x995   : > { %v6287_v51 = vld [vmem:[#allocation6 + $0xd8] sm:$0xff]  ;;  %5487 = vst.msk [vmem:[#allocation6 + $0xe0] sm:$0xff] %vm2588_vm7, %v5420_v44 }
 0x996   : > { %5298 = vst.msk [vmem:[#allocation6 + $0xf8] sm:$0xff] %vm2203_vm6, %v5234_v52  ;;  %v6305_v34 = vpack.c.bf16 %v6287_v51, %v6286_v59 }
 0x998   : > { %6946 = vmatmul.mubr.msk.bf16.gmra.mxu1 %vm4247_vm13, %v6305_v34  ;;  %v5424_v49 = vpop.permute.xlu0 %5423  ;;  %v5422_v39 = vpop.permute.xlu1 %5421 }
 0x999   : > { %5489 = vst.msk [vmem:[#allocation6 + $0xf0] sm:$0xff] %vm2588_vm7, %v5424_v49  ;;  %5488 = vst.msk [vmem:[#allocation6 + $0xe8] sm:$0xff] %vm2588_vm7, %v5422_v39 }
 0x99c   : > { %v5612_v26 = vpop.permute.xlu0 %5611  ;;  %v5426_v8 = vpop.permute.xlu1 %5425 }
 0x99d   : > { %5679 = vst.msk [vmem:[#allocation6 + $0xe0] sm:$0xff] %vm2973_vm8, %v5612_v26 }
 0x99e   : > { %5490 = vst.msk [vmem:[#allocation6 + $0xf8] sm:$0xff] %vm2588_vm7, %v5426_v8 }
 0x9a0   : > { %v5616_v11 = vpop.permute.xlu0 %5615  ;;  %v5614_v0 = vpop.permute.xlu1 %5613 }
 0x9a1   : > { %5681 = vst.msk [vmem:[#allocation6 + $0xf0] sm:$0xff] %vm2973_vm8, %v5616_v11  ;;  %5680 = vst.msk [vmem:[#allocation6 + $0xe8] sm:$0xff] %vm2973_vm8, %v5614_v0 }
 0x9a4   : > { %v5805_v53 = vpop.permute.xlu0 %5804  ;;  %v5618_v54 = vpop.permute.xlu1 %5617 }
 0x9a5   : > { %5872 = vst.msk [vmem:[#allocation6 + $0xe0] sm:$0xff] %vm3360_vm9, %v5805_v53 }
 0x9a6   : > { %5682 = vst.msk [vmem:[#allocation6 + $0xf8] sm:$0xff] %vm2973_vm8, %v5618_v54 }
 0x9a8   : > { %v5809_v25 = vpop.permute.xlu0 %5808  ;;  %v5807_v46 = vpop.permute.xlu1 %5806 }
 0x9a9   : > { %5874 = vst.msk [vmem:[#allocation6 + $0xf0] sm:$0xff] %vm3360_vm9, %v5809_v25  ;;  %5873 = vst.msk [vmem:[#allocation6 + $0xe8] sm:$0xff] %vm3360_vm9, %v5807_v46 }
 0x9ac   : > { %v5997_v22 = vpop.permute.xlu0 %5996  ;;  %v5811_v43 = vpop.permute.xlu1 %5810 }
 0x9ad   : > { %6064 = vst.msk [vmem:[#allocation6 + $0xe0] sm:$0xff] %vm3745_vm10, %v5997_v22 }
 0x9ae   : > { %5875 = vst.msk [vmem:[#allocation6 + $0xf8] sm:$0xff] %vm3360_vm9, %v5811_v43 }
 0x9af   : > { %v6931_v1 = vpop.f32.mrf.mxu1 }
 0x9b0   : > { %v6573_v42 = vmul.f32 %v6931_v1, %v9826_v37  ;;  %v6001_v57 = vpop.permute.xlu0 %6000  ;;  %v5999_v30 = vpop.permute.xlu1 %5998 }
 0x9b1   : > { %6066 = vst.msk [vmem:[#allocation6 + $0xf0] sm:$0xff] %vm3745_vm10, %v6001_v57  ;;  %6065 = vst.msk [vmem:[#allocation6 + $0xe8] sm:$0xff] %vm3745_vm10, %v5999_v30  ;;  %v6461_v40 = vpop.f32.mrf.mxu1 }
 0x9b2   : > { %v6612_v32 = vadd.f32 %v9831_v14, %v6573_v42  ;;  %v6571_v23 = vmul.f32 %v9826_v37, %v6461_v40 }
 0x9b3   : > { %v6932_v2 = vpop.f32.mrf.mxu1 }
 0x9b4   : > { %v6644_v58 = vmax.f32 %v6612_v32, 0.0  ;;  %v6610_v47 = vadd.f32 %v9831_v14, %v6571_v23  ;;  %v6574_v55 = vmul.f32 %v6932_v2, %v9826_v37  ;;  %v6189_v3 = vpop.permute.xlu0 %6188  ;;  %v6003_v31 = vpop.permute.xlu1 %6002 }
 0x9b5   : > { %6256 = vst.msk [vmem:[#allocation6 + $0xe0] sm:$0xff] %vm4130_vm12, %v6189_v3  ;;  %v6464_v50 = vpop.f32.mrf.mxu1 }
 0x9b6   : > { %6067 = vst.msk [vmem:[#allocation6 + $0xf8] sm:$0xff] %vm3745_vm10, %v6003_v31  ;;  %v6642_v61 = vmax.f32 %v6610_v47, 0.0  ;;  %v6613_v33 = vadd.f32 %v9831_v14, %v6574_v55  ;;  %v6572_v15 = vmul.f32 %v9826_v37, %v6464_v50 }
 0x9b7   : > { %6676 = vst.msk [vmem:[%s9843_s24 + $0x50] sm:$0xff] %vm1048_vm2, %v6644_v58 }
 0x9b8   : > { %6674 = vst.msk [vmem:[%s9843_s24 + $0x40] sm:$0xff] %vm1048_vm2, %v6642_v61  ;;  %v6645_v20 = vmax.f32 %v6613_v33, 0.0  ;;  %v6611_v10 = vadd.f32 %v9831_v14, %v6572_v15  ;;  %v6191_v9 = vpop.permute.xlu1 %6190  ;;  %v6193_v19 = vpop.permute.xlu0 %6192 }
 0x9b9   : > { %6257 = vst.msk [vmem:[#allocation6 + $0xe8] sm:$0xff] %vm4130_vm12, %v6191_v9  ;;  %6258 = vst.msk [vmem:[#allocation6 + $0xf0] sm:$0xff] %vm4130_vm12, %v6193_v19 }
 0x9ba   : > { %6677 = vst.msk [vmem:[%s9843_s24 + $0x58] sm:$0xff] %vm1048_vm2, %v6645_v20  ;;  %v6643_v24 = vmax.f32 %v6611_v10, 0.0 }
 0x9bc   : > { %6675 = vst.msk [vmem:[%s9843_s24 + $0x48] sm:$0xff] %vm1048_vm2, %v6643_v24  ;;  %v6195_v28 = vpop.permute.xlu1 %6194  ;;  %v6288_v36 = vld [vmem:[#allocation6 + $0xe0] sm:$0xff] }
 0x9bd   : > { %6259 = vst.msk [vmem:[#allocation6 + $0xf8] sm:$0xff] %vm4130_vm12, %v6195_v28 }
 0x9c0   : > { %v6289_v38 = vld [vmem:[#allocation6 + $0xe8] sm:$0xff]  ;;  %v6290_v17 = vld [vmem:[#allocation6 + $0xf0] sm:$0xff] }
 0x9c1   : > { %v6306_v63 = vpack.c.bf16 %v6289_v38, %v6288_v36 }
 0x9c3   : > { %6949 = vmatprep.mubr.msk.bf16.mxu1 %vm4247_vm13, %v6306_v63 }
 0x9c4   : > { %v6291_v27 = vld [vmem:[#allocation6 + $0xf8] sm:$0xff] }
 0x9c5   : > { %v6307_v4 = vpack.c.bf16 %v6291_v27, %v6290_v17 }
 0x9c7   : > { %6950 = vmatmul.mubr.msk.bf16.gmra.mxu1 %vm4247_vm13, %v6307_v4 }
 0x9d7   : > { %v6935_v7 = vpop.f32.mrf.mxu1 }
 0x9d8   : > { %v6577_v29 = vmul.f32 %v6935_v7, %v9826_v37 }
 0x9d9   : > { %v6477_v13 = vpop.f32.mrf.mxu1 }
 0x9da   : > { %v6616_v45 = vadd.f32 %v9831_v14, %v6577_v29  ;;  %v6575_v35 = vmul.f32 %v9826_v37, %v6477_v13 }
 0x9db   : > { %v6936_v62 = vpop.f32.mrf.mxu1 }
 0x9dc   : > { %v6648_v5 = vmax.f32 %v6616_v45, 0.0  ;;  %v6614_v6 = vadd.f32 %v9831_v14, %v6575_v35  ;;  %v6578_v41 = vmul.f32 %v6936_v62, %v9826_v37 }
 0x9dd   : > { %v6480_v48 = vpop.f32.mrf.mxu1 }
 0x9de   : > { %6680 = vst.msk [vmem:[%s9843_s24 + $0x70] sm:$0xff] %vm1048_vm2, %v6648_v5  ;;  %v6646_v56 = vmax.f32 %v6614_v6, 0.0  ;;  %v6617_v60 = vadd.f32 %v9831_v14, %v6578_v41  ;;  %v6576_v16 = vmul.f32 %v9826_v37, %v6480_v48 }
 0x9e0   : > { %6678 = vst.msk [vmem:[%s9843_s24 + $0x60] sm:$0xff] %vm1048_vm2, %v6646_v56  ;;  %v6649_v12 = vmax.f32 %v6617_v60, 0.0  ;;  %v6615_v18 = vadd.f32 %v9831_v14, %v6576_v16 }
 0x9e2   : > { %6681 = vst.msk [vmem:[%s9843_s24 + $0x78] sm:$0xff] %vm1048_vm2, %v6649_v12  ;;  %v6647_v21 = vmax.f32 %v6615_v18, 0.0 }
 0x9e4   : > { %6679 = vst.msk [vmem:[%s9843_s24 + $0x68] sm:$0xff] %vm1048_vm2, %v6647_v21 }
 0x9ff   : > { %v6939_v44 = vpop.f32.mrf.mxu1 }
 0xa00   : > { %v6581_v52 = vmul.f32 %v6939_v44, %v9826_v37 }
 0xa01   : > { %v6493_v59 = vpop.f32.mrf.mxu1 }
 0xa02   : > { %v6620_v51 = vadd.f32 %v9831_v14, %v6581_v52  ;;  %v6579_v34 = vmul.f32 %v9826_v37, %v6493_v59 }
 0xa03   : > { %v6940_v49 = vpop.f32.mrf.mxu1 }
 0xa04   : > { %v6652_v39 = vmax.f32 %v6620_v51, 0.0  ;;  %v6618_v26 = vadd.f32 %v9831_v14, %v6579_v34  ;;  %v6582_v8 = vmul.f32 %v6940_v49, %v9826_v37 }
 0xa05   : > { %v6496_v11 = vpop.f32.mrf.mxu1 }
 0xa06   : > { %6684 = vst.msk [vmem:[%s9843_s24 + $0x90] sm:$0xff] %vm1048_vm2, %v6652_v39  ;;  %v6650_v0 = vmax.f32 %v6618_v26, 0.0  ;;  %v6621_v53 = vadd.f32 %v9831_v14, %v6582_v8  ;;  %v6580_v54 = vmul.f32 %v9826_v37, %v6496_v11 }
 0xa08   : > { %6682 = vst.msk [vmem:[%s9843_s24 + $0x80] sm:$0xff] %vm1048_vm2, %v6650_v0  ;;  %v6653_v25 = vmax.f32 %v6621_v53, 0.0  ;;  %v6619_v46 = vadd.f32 %v9831_v14, %v6580_v54 }
 0xa0a   : > { %6685 = vst.msk [vmem:[%s9843_s24 + $0x98] sm:$0xff] %vm1048_vm2, %v6653_v25  ;;  %v6651_v22 = vmax.f32 %v6619_v46, 0.0 }
 0xa0c   : > { %6683 = vst.msk [vmem:[%s9843_s24 + $0x88] sm:$0xff] %vm1048_vm2, %v6651_v22 }
 0xa27   : > { %v6943_v43 = vpop.f32.mrf.mxu1 }
 0xa28   : > { %v6585_v1 = vmul.f32 %v6943_v43, %v9826_v37 }
 0xa29   : > { %v6509_v42 = vpop.f32.mrf.mxu1 }
 0xa2a   : > { %v6624_v57 = vadd.f32 %v9831_v14, %v6585_v1  ;;  %v6583_v30 = vmul.f32 %v9826_v37, %v6509_v42 }
 0xa2b   : > { %v6944_v40 = vpop.f32.mrf.mxu1 }
 0xa2c   : > { %v6656_v32 = vmax.f32 %v6624_v57, 0.0  ;;  %v6622_v23 = vadd.f32 %v9831_v14, %v6583_v30  ;;  %v6586_v2 = vmul.f32 %v6944_v40, %v9826_v37 }
 0xa2d   : > { %v6512_v58 = vpop.f32.mrf.mxu1 }
 0xa2e   : > { %6688 = vst.msk [vmem:[%s9843_s24 + $0xb0] sm:$0xff] %vm1048_vm2, %v6656_v32  ;;  %v6654_v47 = vmax.f32 %v6622_v23, 0.0  ;;  %v6625_v55 = vadd.f32 %v9831_v14, %v6586_v2  ;;  %v6584_v3 = vmul.f32 %v9826_v37, %v6512_v58 }
 0xa30   : > { %6686 = vst.msk [vmem:[%s9843_s24 + $0xa0] sm:$0xff] %vm1048_vm2, %v6654_v47  ;;  %v6657_v31 = vmax.f32 %v6625_v55, 0.0  ;;  %v6623_v50 = vadd.f32 %v9831_v14, %v6584_v3 }
 0xa32   : > { %6689 = vst.msk [vmem:[%s9843_s24 + $0xb8] sm:$0xff] %vm1048_vm2, %v6657_v31  ;;  %v6655_v61 = vmax.f32 %v6623_v50, 0.0 }
 0xa34   : > { %6687 = vst.msk [vmem:[%s9843_s24 + $0xa8] sm:$0xff] %vm1048_vm2, %v6655_v61 }
 0xa58   : > { %v6947_v33 = vpop.f32.mrf.mxu1 }
 0xa59   : > { %v6589_v15 = vmul.f32 %v6947_v33, %v9826_v37 }
 0xa5a   : > { %v6525_v20 = vpop.f32.mrf.mxu1 }
 0xa5b   : > { %v6628_v10 = vadd.f32 %v9831_v14, %v6589_v15  ;;  %v6587_v9 = vmul.f32 %v9826_v37, %v6525_v20 }
 0xa5c   : > { %v6948_v19 = vpop.f32.mrf.mxu1 }
 0xa5d   : > { %v6660_v24 = vmax.f32 %v6628_v10, 0.0  ;;  %v6626_v28 = vadd.f32 %v9831_v14, %v6587_v9  ;;  %v6590_v36 = vmul.f32 %v6948_v19, %v9826_v37 }
 0xa5e   : > { %v6528_v38 = vpop.f32.mrf.mxu1 }
 0xa5f   : > { %6692 = vst.msk [vmem:[%s9843_s24 + $0xd0] sm:$0xff] %vm1048_vm2, %v6660_v24  ;;  %v6658_v63 = vmax.f32 %v6626_v28, 0.0  ;;  %v6629_v17 = vadd.f32 %v9831_v14, %v6590_v36  ;;  %v6588_v27 = vmul.f32 %v9826_v37, %v6528_v38 }
 0xa61   : > { %6690 = vst.msk [vmem:[%s9843_s24 + $0xc0] sm:$0xff] %vm1048_vm2, %v6658_v63  ;;  %v6661_v4 = vmax.f32 %v6629_v17, 0.0  ;;  %v6627_v7 = vadd.f32 %v9831_v14, %v6588_v27 }
 0xa63   : > { %6693 = vst.msk [vmem:[%s9843_s24 + $0xd8] sm:$0xff] %vm1048_vm2, %v6661_v4  ;;  %v6659_v29 = vmax.f32 %v6627_v7, 0.0 }
 0xa65   : > { %6691 = vst.msk [vmem:[%s9843_s24 + $0xc8] sm:$0xff] %vm1048_vm2, %v6659_v29 }
 0xa87   : > { %v6951_v13 = vpop.f32.mrf.mxu1 }
 0xa88   : > { %v6593_v45 = vmul.f32 %v6951_v13, %v9826_v37 }
 0xa89   : > { %v6541_v35 = vpop.f32.mrf.mxu1 }
 0xa8a   : > { %v6632_v62 = vadd.f32 %v9831_v14, %v6593_v45  ;;  %v6591_v5 = vmul.f32 %v9826_v37, %v6541_v35 }
 0xa8b   : > { %v6952_v6 = vpop.f32.mrf.mxu1 }
 0xa8c   : > { %v6664_v41 = vmax.f32 %v6632_v62, 0.0  ;;  %v6630_v48 = vadd.f32 %v9831_v14, %v6591_v5  ;;  %v6594_v56 = vmul.f32 %v6952_v6, %v9826_v37 }
 0xa8d   : > { %v6544_v60 = vpop.f32.mrf.mxu1 }
 0xa8e   : > { %6696 = vst.msk [vmem:[%s9843_s24 + $0xf0] sm:$0xff] %vm1048_vm2, %v6664_v41  ;;  %v6662_v16 = vmax.f32 %v6630_v48, 0.0  ;;  %v6633_v12 = vadd.f32 %v9831_v14, %v6594_v56  ;;  %v6592_v18 = vmul.f32 %v9826_v37, %v6544_v60 }
 0xa90   : > { %6694 = vst.msk [vmem:[%s9843_s24 + $0xe0] sm:$0xff] %vm1048_vm2, %v6662_v16  ;;  %v6665_v21 = vmax.f32 %v6633_v12, 0.0  ;;  %v6631_v44 = vadd.f32 %v9831_v14, %v6592_v18 }
 0xa92   : > { %6697 = vst.msk [vmem:[%s9843_s24 + $0xf8] sm:$0xff] %vm1048_vm2, %v6665_v21  ;;  %v6663_v52 = vmax.f32 %v6631_v44, 0.0 }
 0xa94   : > { %6695 = vst.msk [vmem:[%s9843_s24 + $0xe8] sm:$0xff] %vm1048_vm2, %v6663_v52 }
 0xa95 PF: > { %s18_s27 = sadd.s32 1, %s6989_s27  }
 0xa96   : > { %p15_p4 = scmp.ge.s32.totalorder %s18_s27, 4  }
 0xa98   :  { %17 = sbr.rel (!%p15_p4) target bundleno = 1 (0x1), region = 91 }

</bundles_post_ra>
